<compile_context>
chip_gen: v5e
topology: v5e:2x2
jax: 0.10.0
libtpu: 0.0.40
codegen_flags: <defaults>
</compile_context>

<pallas_src>
import numpy as np

import jax
import jax.numpy as jnp
from jax import lax
from jax.experimental import pallas as pl
from jax.experimental.pallas import tpu as pltpu


_K = 4  # conv kernel size (4x4 everywhere in this model)


# ---------------------------------------------------------------------------
# One-time packing: each conv / conv-transpose layer -> dense (F_in, F_out)
# matrix (its exact linear operator) + flattened bias.
# ---------------------------------------------------------------------------
def _dense_layer_matrix(w, b, h_in, w_in, transpose):
    w = np.asarray(w, np.float32)
    b = np.asarray(b, np.float32)
    if transpose:                     # ConvTranspose2d weight: (C_in, C_out, 4, 4)
        c_in, c_out = w.shape[0], w.shape[1]
        h_out, w_out = 2 * h_in, 2 * w_in
    else:                             # Conv2d weight: (C_out, C_in, 4, 4)
        c_out, c_in = w.shape[0], w.shape[1]
        h_out, w_out = h_in // 2, w_in // 2
    m_in, m_out = h_in * w_in, h_out * w_out

    T = np.zeros((c_in * m_in, c_out * m_out), np.float32)
    ci_idx = np.arange(c_in)
    co_idx = np.arange(c_out)
    for kh in range(_K):
        for kw in range(_K):
            # (c_in, c_out) weight slice for this tap
            wt = w[:, :, kh, kw] if transpose else w[:, :, kh, kw].T
            for y in range(h_out):
                for x in range(w_out):
                    if transpose:
                        ry, cx = y + 1 - kh, x + 1 - kw
                        if (ry % 2) or (cx % 2):
                            continue
                        r, c = ry // 2, cx // 2
                    else:
                        r, c = 2 * y + kh - 1, 2 * x + kw - 1
                    if not (0 <= r < h_in and 0 <= c < w_in):
                        continue
                    q = r * w_in + c
                    p = y * w_out + x
                    T[np.ix_(ci_idx * m_in + q, co_idx * m_out + p)] += wt

    b_flat = np.repeat(b, m_out)[None, :]        # (1, C_out*m_out), f32
    meta = {"c_out": c_out, "h_out": h_out, "w_out": w_out}
    return (jnp.asarray(T, jnp.bfloat16), jnp.asarray(b_flat, jnp.float32)), meta


def pack_params(params, img_hw=16):
    layer_defs = [("w1", "b1", False), ("w2", "b2", False),
                  ("w3", "b3", True), ("w4", "b4", True)]
    packed, metas = [], []
    h = w = img_hw
    for wk, bk, tr in layer_defs:
        arrs, meta = _dense_layer_matrix(params[wk], params[bk], h, w, tr)
        packed.extend(arrs)
        metas.append(meta)
        h, w = meta["h_out"], meta["w_out"]
    return packed, metas


# ---------------------------------------------------------------------------
# PyTorch-style parameter init (layouts match nn.Conv2d / nn.ConvTranspose2d)
# ---------------------------------------------------------------------------
def init_params(key):
    def u(k, shape, fan_in):
        bound = 1.0 / np.sqrt(fan_in)
        return jax.random.uniform(k, shape, jnp.float32, -bound, bound)

    ks = jax.random.split(key, 8)
    return {
        "w1": u(ks[0], (16, 3, 4, 4), 3 * 16),   "b1": u(ks[1], (16,), 3 * 16),
        "w2": u(ks[2], (32, 16, 4, 4), 16 * 16), "b2": u(ks[3], (32,), 16 * 16),
        # ConvTranspose2d weight layout: (C_in, C_out, kH, kW)
        "w3": u(ks[4], (32, 16, 4, 4), 16 * 16), "b3": u(ks[5], (16,), 16 * 16),
        "w4": u(ks[6], (16, 3, 4, 4), 3 * 16),   "b4": u(ks[7], (3,), 3 * 16),
    }


# ---------------------------------------------------------------------------
# Fused Pallas kernel: 4 GEMMs + bias/ReLU/sigmoid, B_tile images per step
# ---------------------------------------------------------------------------
def _fused_ae_kernel(x_ref, t1, b1, t2, b2, t3, b3, t4, b4, z_ref, out_ref):
    def dense(a, t_r, b_r):
        return jnp.dot(a, t_r[...], preferred_element_type=jnp.float32) + b_r[...]

    act = x_ref[0]                                                  # (B, 768) bf16
    h = jnp.maximum(dense(act, t1, b1), 0.0)                        # (B, 1024) f32
    h = jnp.maximum(dense(h.astype(jnp.bfloat16), t2, b2), 0.0)     # (B, 512)  f32
    z_ref[0] = h                                                    # bottleneck z
    h = jnp.maximum(dense(h.astype(jnp.bfloat16), t3, b3), 0.0)     # (B, 1024) f32
    h = dense(h.astype(jnp.bfloat16), t4, b4)                       # (B, 768)  f32
    out_ref[0] = 1.0 / (1.0 + jnp.exp(-h))                          # exact sigmoid


def make_forward(metas):
    z_meta, out_meta = metas[1], metas[3]
    z_feat = z_meta["c_out"] * z_meta["h_out"] * z_meta["w_out"]
    out_feat = out_meta["c_out"] * out_meta["h_out"] * out_meta["w_out"]

    @jax.jit
    def forward(packed, x_nchw):
        n, c, h, w = x_nchw.shape
        f_in = c * h * w

        # Batch tiling: >=2 grid steps whenever n >= 2 (both v7x TensorCores
        # stay busy); capped so per-step activations stay in a few vregs.
        b_tile = 1 if n < 2 else min(16, -(-n // 2))
        n_steps = -(-n // b_tile)
        n_pad = n_steps * b_tile

        x_flat = x_nchw.reshape(n, f_in).astype(jnp.bfloat16)
        if n_pad != n:
            x_flat = jnp.pad(x_flat, ((0, n_pad - n), (0, 0)))
        x_tiles = x_flat.reshape(n_steps, b_tile, f_in)

        in_specs = [pl.BlockSpec((1, b_tile, f_in), lambda i: (i, 0, 0))]
        for p in packed:                         # weights / biases: resident in VMEM
            in_specs.append(pl.BlockSpec(p.shape, lambda i: (0, 0)))

        z_t, out_t = pl.pallas_call(
            _fused_ae_kernel,
            out_shape=(jax.ShapeDtypeStruct((n_steps, b_tile, z_feat), jnp.float32),
                       jax.ShapeDtypeStruct((n_steps, b_tile, out_feat), jnp.float32)),
            grid=(n_steps,),
            in_specs=in_specs,
            out_specs=(pl.BlockSpec((1, b_tile, z_feat), lambda i: (i, 0, 0)),
                       pl.BlockSpec((1, b_tile, out_feat), lambda i: (i, 0, 0))),
            compiler_params=pltpu.CompilerParams(
                dimension_semantics=("parallel",),
                vmem_limit_bytes=32 * 1024 * 1024),
        )(x_tiles, *packed)

        z = z_t.reshape(n_pad, z_feat)[:n].reshape(
            n, z_meta["c_out"], z_meta["h_out"], z_meta["w_out"])
        out = out_t.reshape(n_pad, out_feat)[:n].reshape(
            n, out_meta["c_out"], out_meta["h_out"], out_meta["w_out"])
        return z, out

    return forward


# ---------------------------------------------------------------------------
# Pure-JAX reference (lax conv), using the same bf16 operand rounding
# ---------------------------------------------------------------------------
def reference_forward(params, x):
    dn = ("NCHW", "OIHW", "NCHW")
    bf = lambda a: jnp.asarray(a, jnp.float32).astype(jnp.bfloat16).astype(jnp.float32)

    def conv(a, w, b):
        y = lax.conv_general_dilated(bf(a), bf(w), (2, 2), [(1, 1), (1, 1)],
                                     dimension_numbers=dn)
        return y + jnp.asarray(b, jnp.float32).reshape(1, -1, 1, 1)

    def convT(a, w, b):
        w_f = jnp.transpose(jnp.asarray(w, jnp.float32), (1, 0, 2, 3))[:, :, ::-1, ::-1]
        y = lax.conv_general_dilated(bf(a), bf(w_f), (1, 1), [(2, 2), (2, 2)],
                                     lhs_dilation=(2, 2), dimension_numbers=dn)
        return y + jnp.asarray(b, jnp.float32).reshape(1, -1, 1, 1)

    h = jax.nn.relu(conv(x, params["w1"], params["b1"]))
    z = jax.nn.relu(conv(h, params["w2"], params["b2"]))
    h = jax.nn.relu(convT(z, params["w3"], params["b3"]))
    out = jax.nn.sigmoid(convT(h, params["w4"], params["b4"]))
    return z, out


if __name__ == "__main__":
    key = jax.random.PRNGKey(0)
    pkey, xkey = jax.random.split(key)

    params = init_params(pkey)
    packed, metas = pack_params(params, img_hw=16)
    forward = make_forward(metas)

    # small CIFAR-like input: batch=2, 3 channels, 16x16 spatial (NCHW)
    x = jax.random.uniform(xkey, (2, 3, 16, 16), jnp.float32)

    z, out = forward(packed, x)
    jax.block_until_ready((z, out))

    assert z.shape == (2, 32, 4, 4), z.shape
    assert out.shape == (2, 3, 16, 16), out.shape
    assert bool(jnp.all(out >= 0.0) & jnp.all(out <= 1.0))
    assert bool(jnp.all(z >= 0.0))

    # numeric check vs. a lax.conv reference with identical bf16 rounding
    z_ref, out_ref = reference_forward(params, x)
    assert float(jnp.max(jnp.abs(z - z_ref))) < 2e-2, float(jnp.max(jnp.abs(z - z_ref)))
    assert float(jnp.max(jnp.abs(out - out_ref))) < 2e-2, float(jnp.max(jnp.abs(out - out_ref)))

    print("KERNEL_OK")
</pallas_src>

<mosaic_0001>
module attributes {stable_mosaic.version = 11 : i64} {
  func.func @_fused_ae_kernel(%arg0: i32, %arg1: memref<1x1x768xbf16, #tpu.memory_space<vmem>>, %arg2: memref<768x1024xbf16, #tpu.memory_space<vmem>>, %arg3: memref<1x1024xf32, #tpu.memory_space<vmem>>, %arg4: memref<1024x512xbf16, #tpu.memory_space<vmem>>, %arg5: memref<1x512xf32, #tpu.memory_space<vmem>>, %arg6: memref<512x1024xbf16, #tpu.memory_space<vmem>>, %arg7: memref<1x1024xf32, #tpu.memory_space<vmem>>, %arg8: memref<1024x768xbf16, #tpu.memory_space<vmem>>, %arg9: memref<1x768xf32, #tpu.memory_space<vmem>>, %arg10: memref<1x1x512xf32, #tpu.memory_space<vmem>>, %arg11: memref<1x1x768xf32, #tpu.memory_space<vmem>>) attributes {dimension_semantics = [#tpu.dimension_semantics<parallel>], iteration_bounds = array<i64: 2>, scalar_prefetch = 0 : i64, scratch_operands = 0 : i64, tpu.core_type = #tpu.core_type<tc>, window_params = [{transform_indices = @transform_0, window_bounds = array<i64: 1, 1, 768>}, {pipeline_mode = #tpu.pipeline_mode<synchronous>, transform_indices = @transform_1, window_bounds = array<i64: 768, 1024>}, {pipeline_mode = #tpu.pipeline_mode<synchronous>, transform_indices = @transform_2, window_bounds = array<i64: 1, 1024>}, {pipeline_mode = #tpu.pipeline_mode<synchronous>, transform_indices = @transform_3, window_bounds = array<i64: 1024, 512>}, {pipeline_mode = #tpu.pipeline_mode<synchronous>, transform_indices = @transform_4, window_bounds = array<i64: 1, 512>}, {pipeline_mode = #tpu.pipeline_mode<synchronous>, transform_indices = @transform_5, window_bounds = array<i64: 512, 1024>}, {pipeline_mode = #tpu.pipeline_mode<synchronous>, transform_indices = @transform_6, window_bounds = array<i64: 1, 1024>}, {pipeline_mode = #tpu.pipeline_mode<synchronous>, transform_indices = @transform_7, window_bounds = array<i64: 1024, 768>}, {pipeline_mode = #tpu.pipeline_mode<synchronous>, transform_indices = @transform_8, window_bounds = array<i64: 1, 768>}, {transform_indices = @transform_9, window_bounds = array<i64: 1, 1, 512>}, {transform_indices = @transform_10, window_bounds = array<i64: 1, 1, 768>}]} {
    %c0 = arith.constant 0 : index
    %c0_0 = arith.constant 0 : index
    %c0_1 = arith.constant 0 : index
    %0 = vector.load %arg1[%c0, %c0_0, %c0_1] : memref<1x1x768xbf16, #tpu.memory_space<vmem>>, vector<1x1x768xbf16>
    %1 = vector.shape_cast %0 : vector<1x1x768xbf16> to vector<1x768xbf16>
    %c0_2 = arith.constant 0 : index
    %c0_3 = arith.constant 0 : index
    %2 = vector.load %arg2[%c0_2, %c0_3] : memref<768x1024xbf16, #tpu.memory_space<vmem>>, vector<768x1024xbf16>
    %cst = arith.constant dense<0.000000e+00> : vector<1x1024xf32>
    %3 = tpu.matmul %1, %2, %cst {dimension_numbers = #tpu.dot_dimension_numbers<[1], [0], [0], [1], [0, 0, 1, 1], [], []>} : vector<1x768xbf16>, vector<768x1024xbf16>, vector<1x1024xf32> -> vector<1x1024xf32>
    %c0_4 = arith.constant 0 : index
    %c0_5 = arith.constant 0 : index
    %4 = vector.load %arg3[%c0_4, %c0_5] : memref<1x1024xf32, #tpu.memory_space<vmem>>, vector<1x1024xf32>
    %5 = arith.addf %3, %4 : vector<1x1024xf32>
    %cst_6 = arith.constant 0.000000e+00 : f32
    %6 = vector.broadcast %cst_6 : f32 to vector<1x1024xf32>
    %7 = arith.maximumf %5, %6 : vector<1x1024xf32>
    %8 = arith.truncf %7 : vector<1x1024xf32> to vector<1x1024xbf16>
    %c0_7 = arith.constant 0 : index
    %c0_8 = arith.constant 0 : index
    %9 = vector.load %arg4[%c0_7, %c0_8] : memref<1024x512xbf16, #tpu.memory_space<vmem>>, vector<1024x512xbf16>
    %cst_9 = arith.constant dense<0.000000e+00> : vector<1x512xf32>
    %10 = tpu.matmul %8, %9, %cst_9 {dimension_numbers = #tpu.dot_dimension_numbers<[1], [0], [0], [1], [0, 0, 1, 1], [], []>} : vector<1x1024xbf16>, vector<1024x512xbf16>, vector<1x512xf32> -> vector<1x512xf32>
    %c0_10 = arith.constant 0 : index
    %c0_11 = arith.constant 0 : index
    %11 = vector.load %arg5[%c0_10, %c0_11] : memref<1x512xf32, #tpu.memory_space<vmem>>, vector<1x512xf32>
    %12 = arith.addf %10, %11 : vector<1x512xf32>
    %cst_12 = arith.constant 0.000000e+00 : f32
    %13 = vector.broadcast %cst_12 : f32 to vector<1x512xf32>
    %14 = arith.maximumf %12, %13 : vector<1x512xf32>
    %c0_13 = arith.constant 0 : index
    %c0_14 = arith.constant 0 : index
    %c0_15 = arith.constant 0 : index
    %15 = vector.load %arg10[%c0_13, %c0_14, %c0_15] : memref<1x1x512xf32, #tpu.memory_space<vmem>>, vector<1x1x512xf32>
    %16 = vector.shape_cast %15 : vector<1x1x512xf32> to vector<1x512xf32>
    %17 = vector.shape_cast %14 : vector<1x512xf32> to vector<1x1x512xf32>
    tpu.vector_store %arg10[%c0_13, %c0_14, %c0_15], %17 {strides = array<i32>} : memref<1x1x512xf32, #tpu.memory_space<vmem>>, vector<1x1x512xf32>,
    %18 = arith.truncf %14 : vector<1x512xf32> to vector<1x512xbf16>
    %c0_16 = arith.constant 0 : index
    %c0_17 = arith.constant 0 : index
    %19 = vector.load %arg6[%c0_16, %c0_17] : memref<512x1024xbf16, #tpu.memory_space<vmem>>, vector<512x1024xbf16>
    %cst_18 = arith.constant dense<0.000000e+00> : vector<1x1024xf32>
    %20 = tpu.matmul %18, %19, %cst_18 {dimension_numbers = #tpu.dot_dimension_numbers<[1], [0], [0], [1], [0, 0, 1, 1], [], []>} : vector<1x512xbf16>, vector<512x1024xbf16>, vector<1x1024xf32> -> vector<1x1024xf32>
    %c0_19 = arith.constant 0 : index
    %c0_20 = arith.constant 0 : index
    %21 = vector.load %arg7[%c0_19, %c0_20] : memref<1x1024xf32, #tpu.memory_space<vmem>>, vector<1x1024xf32>
    %22 = arith.addf %20, %21 : vector<1x1024xf32>
    %cst_21 = arith.constant 0.000000e+00 : f32
    %23 = vector.broadcast %cst_21 : f32 to vector<1x1024xf32>
    %24 = arith.maximumf %22, %23 : vector<1x1024xf32>
    %25 = arith.truncf %24 : vector<1x1024xf32> to vector<1x1024xbf16>
    %c0_22 = arith.constant 0 : index
    %c0_23 = arith.constant 0 : index
    %26 = vector.load %arg8[%c0_22, %c0_23] : memref<1024x768xbf16, #tpu.memory_space<vmem>>, vector<1024x768xbf16>
    %cst_24 = arith.constant dense<0.000000e+00> : vector<1x768xf32>
    %27 = tpu.matmul %25, %26, %cst_24 {dimension_numbers = #tpu.dot_dimension_numbers<[1], [0], [0], [1], [0, 0, 1, 1], [], []>} : vector<1x1024xbf16>, vector<1024x768xbf16>, vector<1x768xf32> -> vector<1x768xf32>
    %c0_25 = arith.constant 0 : index
    %c0_26 = arith.constant 0 : index
    %28 = vector.load %arg9[%c0_25, %c0_26] : memref<1x768xf32, #tpu.memory_space<vmem>>, vector<1x768xf32>
    %29 = arith.addf %27, %28 : vector<1x768xf32>
    %cst_27 = arith.constant 0.000000e+00 : f32
    %30 = vector.broadcast %cst_27 : f32 to vector<1x768xf32>
    %31 = arith.subf %30, %29 : vector<1x768xf32>
    %32 = math.exp %31 : vector<1x768xf32>
    %cst_28 = arith.constant 1.000000e+00 : f32
    %33 = vector.broadcast %cst_28 : f32 to vector<1x768xf32>
    %34 = arith.addf %33, %32 : vector<1x768xf32>
    %cst_29 = arith.constant 1.000000e+00 : f32
    %35 = vector.broadcast %cst_29 : f32 to vector<1x768xf32>
    %36 = arith.divf %35, %34 : vector<1x768xf32>
    %c0_30 = arith.constant 0 : index
    %c0_31 = arith.constant 0 : index
    %c0_32 = arith.constant 0 : index
    %37 = vector.load %arg11[%c0_30, %c0_31, %c0_32] : memref<1x1x768xf32, #tpu.memory_space<vmem>>, vector<1x1x768xf32>
    %38 = vector.shape_cast %37 : vector<1x1x768xf32> to vector<1x768xf32>
    %39 = vector.shape_cast %36 : vector<1x768xf32> to vector<1x1x768xf32>
    tpu.vector_store %arg11[%c0_30, %c0_31, %c0_32], %39 {strides = array<i32>} : memref<1x1x768xf32, #tpu.memory_space<vmem>>, vector<1x1x768xf32>,
    return
  }
  func.func @transform_0(%arg0: i32) -> (i32, i32, i32) {
    %c0_i32 = arith.constant 0 : i32
    %c0_i32_0 = arith.constant 0 : i32
    %c0_i32_1 = arith.constant 0 : i32
    return %arg0, %c0_i32, %c0_i32_0 : i32, i32, i32
  }
  func.func @transform_1(%arg0: i32) -> (i32, i32) {
    %c0_i32 = arith.constant 0 : i32
    %c0_i32_0 = arith.constant 0 : i32
    %c0_i32_1 = arith.constant 0 : i32
    return %c0_i32, %c0_i32_0 : i32, i32
  }
  func.func @transform_2(%arg0: i32) -> (i32, i32) {
    %c0_i32 = arith.constant 0 : i32
    %c0_i32_0 = arith.constant 0 : i32
    %c0_i32_1 = arith.constant 0 : i32
    return %c0_i32, %c0_i32_0 : i32, i32
  }
  func.func @transform_3(%arg0: i32) -> (i32, i32) {
    %c0_i32 = arith.constant 0 : i32
    %c0_i32_0 = arith.constant 0 : i32
    %c0_i32_1 = arith.constant 0 : i32
    return %c0_i32, %c0_i32_0 : i32, i32
  }
  func.func @transform_4(%arg0: i32) -> (i32, i32) {
    %c0_i32 = arith.constant 0 : i32
    %c0_i32_0 = arith.constant 0 : i32
    %c0_i32_1 = arith.constant 0 : i32
    return %c0_i32, %c0_i32_0 : i32, i32
  }
  func.func @transform_5(%arg0: i32) -> (i32, i32) {
    %c0_i32 = arith.constant 0 : i32
    %c0_i32_0 = arith.constant 0 : i32
    %c0_i32_1 = arith.constant 0 : i32
    return %c0_i32, %c0_i32_0 : i32, i32
  }
  func.func @transform_6(%arg0: i32) -> (i32, i32) {
    %c0_i32 = arith.constant 0 : i32
    %c0_i32_0 = arith.constant 0 : i32
    %c0_i32_1 = arith.constant 0 : i32
    return %c0_i32, %c0_i32_0 : i32, i32
  }
  func.func @transform_7(%arg0: i32) -> (i32, i32) {
    %c0_i32 = arith.constant 0 : i32
    %c0_i32_0 = arith.constant 0 : i32
    %c0_i32_1 = arith.constant 0 : i32
    return %c0_i32, %c0_i32_0 : i32, i32
  }
  func.func @transform_8(%arg0: i32) -> (i32, i32) {
    %c0_i32 = arith.constant 0 : i32
    %c0_i32_0 = arith.constant 0 : i32
    %c0_i32_1 = arith.constant 0 : i32
    return %c0_i32, %c0_i32_0 : i32, i32
  }
  func.func @transform_9(%arg0: i32) -> (i32, i32, i32) {
    %c0_i32 = arith.constant 0 : i32
    %c0_i32_0 = arith.constant 0 : i32
    %c0_i32_1 = arith.constant 0 : i32
    return %arg0, %c0_i32, %c0_i32_0 : i32, i32, i32
  }
  func.func @transform_10(%arg0: i32) -> (i32, i32, i32) {
    %c0_i32 = arith.constant 0 : i32
    %c0_i32_0 = arith.constant 0 : i32
    %c0_i32_1 = arith.constant 0 : i32
    return %arg0, %c0_i32, %c0_i32_0 : i32, i32, i32
  }
}

</mosaic_0001>

<bundles_post_ra>
// kernel: forward.1
= control target key start
LH: loop header
LB: loop body
LE: loop exit
PB: predicated region body
PF: predicated region fallthrough
CT: control target
= control target key end

     0   :  { %16 = vsyncpa [#allocation3], 0  ;;  %s18291_s0 = inlined_call_operand.vmem [shape: bf16[2,1,768], index: 0, kind: input, shape index: {}]   ;;  %s18292_s1 = inlined_call_operand.hbm [shape: bf16[768,1024], index: 1, kind: input, shape index: {}]   ;;  %s18293_s2 = inlined_call_operand.hbm [shape: f32[1,1024], index: 2, kind: input, shape index: {}]   ;;  %s18294_s3 = inlined_call_operand.hbm [shape: bf16[1024,512], index: 3, kind: input, shape index: {}]   ;;  %s18295_s4 = inlined_call_operand.hbm [shape: f32[1,512], index: 4, kind: input, shape index: {}]   ;;  %s18296_s5 = inlined_call_operand.hbm [shape: bf16[512,1024], index: 5, kind: input, shape index: {}]   ;;  %s18297_s6 = inlined_call_operand.hbm [shape: f32[1,1024], index: 6, kind: input, shape index: {}]   ;;  %s18298_s7 = inlined_call_operand.hbm [shape: bf16[1024,768], index: 7, kind: input, shape index: {}]   ;;  %s18299_s8 = inlined_call_operand.hbm [shape: f32[1,768], index: 8, kind: input, shape index: {}]   ;;  %s18300_s9 = inlined_call_operand.vmem [shape: f32[2,1,512], index: 9, kind: output, shape index: {0}]   ;;  %s18301_s10 = inlined_call_operand.vmem [shape: f32[2,1,768], index: 10, kind: output, shape index: {1}]  }
   0x1   :  { %17 = vsyncpa [#allocation5], 0 }
   0x2   :  { %18 = vsyncpa [#allocation8], 0 }
   0x3   :  { %19 = vsyncpa [#allocation11], 0 }
   0x4   :  { %20 = vsyncpa [#allocation14], 0  ;;  %s17584_s13 = smov 0  }
   0x5 LB: > { %s303_s16 = sshll.u32 %s18293_s2, 4  ;;  %s17593_s17 = sadd.s32 4294967295, %s17513_s13   ;;  %s17513_s13 = sphi %s17584_s13, %s26_s13   ;;  %s304_s16 = int_to_ptr.hbm [resolvable:$true] %s303_s16 }
   0x6   : > { %p10687_p0 = scmp.ge.s32.totalorder %s17513_s13, 1  ;;  %p277_p1 = scmp.lt.s32.totalorder %s17513_s13, 3 }
   0x7   : > { %p17167_p2 = scmp.eq.s32.totalorder %s17593_s17, 0  ;;  %s17515_s19 = smov [#allocation4]  }
   0x8   : > { %p17598_p3 = pnand %p10687_p0, %p277_p1  ;;  %s305_s20 = sshll.u32 %s17515_s19, 4  ;;  %s306_s20 = int_to_ptr.vmem [resolvable:$true] %s305_s20 }
   0x9   : > { %s329_s23 = sshll.u32 %s18295_s4, 4  ;;  %s355_s26 = sshll.u32 %s18297_s6, 4  ;;  %s330_s23 = int_to_ptr.hbm [resolvable:$true] %s329_s23  ;;  %s356_s26 = int_to_ptr.hbm [resolvable:$true] %s355_s26 }
   0xa   : > { %p17142_p4 = pneg %p17598_p3  ;;  %s17516_s28 = smov [#allocation7]  }
   0xb   : > { %s331_s29 = sshll.u32 %s17516_s28, 4  ;;  %s17517_s30 = smov [#allocation10]   ;;  %s332_s29 = int_to_ptr.vmem [resolvable:$true] %s331_s29 }
   0xc   : > { %p17612_p5 = pnand %p17167_p2, %p17142_p4  ;;  %s357_s11 = sshll.u32 %s17517_s30, 4  ;;  %s358_s11 = int_to_ptr.vmem [resolvable:$true] %s357_s11 }
   0xd   : > { %s288_s15 = sshll.u32 %s18292_s1, 4  ;;  %s17518_s19 = smov [#allocation2]   ;;  %s289_s15 = int_to_ptr.hbm [resolvable:$true] %s288_s15 }
   0xe   : > { %17148 = dma.hbm_to_vmem [thread:$0]  (!%p17612_p5), %s304_s16, 128, %s306_s20, [#allocation5]  }
   0xf   : > { %17154 = dma.hbm_to_vmem [thread:$0]  (!%p17612_p5), %s330_s23, 64, %s332_s29, [#allocation8]  }
  0x10   : > { %17160 = dma.hbm_to_vmem [thread:$0]  (!%p17612_p5), %s356_s26, 128, %s358_s11, [#allocation11]  }
  0x11   : > { %s290_s21 = sshll.u32 %s17518_s19, 4  ;;  %s314_s16 = sshll.u32 %s18294_s3, 4  ;;  %s291_s21 = int_to_ptr.vmem [resolvable:$true] %s290_s21  ;;  %s315_s16 = int_to_ptr.hbm [resolvable:$true] %s314_s16 }
  0x12   : > { %s17519_s20 = smov 512   ;;  %s17520_s23 = smov 32  }
  0x13   : > { %17145 = dma.hbm_to_vmem [thread:$0]  (!%p17612_p5), %s289_s15, 49152, %s291_s21, [#allocation3], %s17519_s20, %s17519_s20, %s17520_s23  }
  0x14   : > { %s17521_s25 = smov [#allocation6]   ;;  %s17522_s29 = smov 256  }
  0x15   : > { %s316_s28 = sshll.u32 %s17521_s25, 4  ;;  %s17523_s30 = smov 16   ;;  %s317_s28 = int_to_ptr.vmem [resolvable:$true] %s316_s28 }
  0x16   : > { %17151 = dma.hbm_to_vmem [thread:$0]  (!%p17612_p5), %s315_s16, 32768, %s317_s28, [#allocation5], %s17522_s29, %s17522_s29, %s17523_s30  }
  0x17   : > { %s340_s12 = sshll.u32 %s18296_s5, 4  ;;  %s17524_s14 = smov [#allocation9]   ;;  %s341_s12 = int_to_ptr.hbm [resolvable:$true] %s340_s12 }
  0x18   : > { %s342_s19 = sshll.u32 %s17524_s14, 4  ;;  %s366_s21 = sshll.u32 %s18298_s7, 4  ;;  %s343_s19 = int_to_ptr.vmem [resolvable:$true] %s342_s19  ;;  %s367_s21 = int_to_ptr.hbm [resolvable:$true] %s366_s21 }
  0x19   : > { %17157 = dma.hbm_to_vmem [thread:$0]  (!%p17612_p5), %s341_s12, 32768, %s343_s19, [#allocation8], %s17519_s20, %s17519_s20, %s17520_s23  }
  0x1a   : > { %s17525_s24 = smov [#allocation12]   ;;  %s17526_s16 = smov 384  }
  0x1b   : > { %s368_s25 = sshll.u32 %s17525_s24, 4  ;;  %s17527_s28 = smov 24   ;;  %s369_s25 = int_to_ptr.vmem [resolvable:$true] %s368_s25 }
  0x1c   : > { %17163 = dma.hbm_to_vmem [thread:$0]  (!%p17612_p5), %s367_s21, 49152, %s369_s25, [#allocation11], %s17526_s16, %s17526_s16, %s17527_s28  }
  0x1d   : > { %s381_s26 = sshll.u32 %s18299_s8, 4  ;;  %s17528_s11 = smov [#allocation13]   ;;  %s382_s26 = int_to_ptr.hbm [resolvable:$true] %s381_s26 }
  0x1e   : > { %s383_s14 = sshll.u32 %s17528_s11, 4  ;;  %403 = sbr.rel (%p17598_p3) target bundleno = 1738 (0x6ca), region = 56  ;;  %s384_s14 = int_to_ptr.vmem [resolvable:$true] %s383_s14 }
  0x1f   : > { %17166 = dma.hbm_to_vmem [thread:$0]  (!%p17612_p5), %s382_s26, 96, %s384_s14, [#allocation14]  }
  0x23   : > { %17492 = dma.done.wait (%p17167_p2), [#allocation3], 49152  }
  0x24   : > { %17494 = vsyncadd (%p17167_p2), [#allocation3], 4294918144 }
  0x25   : > { %17496 = dma.done.wait (%p17167_p2), [#allocation5], 32896  }
  0x26   : > { %17498 = vsyncadd (%p17167_p2), [#allocation5], 4294934400 }
  0x27   : > { %17500 = dma.done.wait (%p17167_p2), [#allocation8], 32832  }
  0x28   : > { %17502 = vsyncadd (%p17167_p2), [#allocation8], 4294934464 }
  0x29   : > { %17504 = dma.done.wait (%p17167_p2), [#allocation11], 49280  }
  0x2a   : > { %17506 = vsyncadd (%p17167_p2), [#allocation11], 4294918016 }
  0x2b   : > { %17508 = dma.done.wait (%p17167_p2), [#allocation14], 96  }
  0x2c   : > { %17510 = vsyncadd (%p17167_p2), [#allocation14], 4294967200  ;;  %v10933_v0 = vld [vmem:[#allocation2 + $0x1c0] sm:$0xf]  ;;  %p479_p6 = scmp.lt.s32.totalorder %s17593_s17, 1  ;;  %vm5441_vm0 = vcmask 1040384  }
  0x2d   : > { %v15889_v1 = vld [vmem:[#allocation2 + $0x1dc] sm:$0xf0]  ;;  %vm5443_vm1 = vcmask 1042434   ;;  %vm5445_vm2 = vcmask 1041408  }
  0x2e   : > { %v11189_v2 = vld [vmem:[#allocation2 + $0x3c0] sm:$0xf]  ;;  %v10934_v3 = vor.u32 %v15889_v1, %v10933_v0  ;;  %s18309_s17 = smov (!%p479_p6, %s17593_s17), 1 }
  0x2f   : > { %v15953_v4 = vld [vmem:[#allocation2 + $0x3dc] sm:$0xf0]  ;;  %s17109_s18 = smul.u32 6, %s18309_s17  ;;  %s10706_s12 = sshll.u32 %s18309_s17, 2 }
  0x30   : > { %v11445_v5 = vld [vmem:[#allocation2 + $0x5c0] sm:$0xf]  ;;  %v11190_v7 = vor.u32 %v15953_v4, %v11189_v2  ;;  %2828 = vmatpush.bf16.msra.mxu0 %v10934_v3  ;;  %s486_s15 = scalar_lea.vmem %s18300_s9, %s10706_s12 }
  0x31   : > { %v16017_v6 = vld [vmem:[#allocation2 + $0x5dc] sm:$0xf0]  ;;  %s482_s23 = scalar_lea.vmem %s18291_s0, %s17109_s18  ;;  %s490_s25 = scalar_lea.vmem %s18301_s10, %s17109_s18 }
  0x32   : > { %v11446_v8 = vor.u32 %v16017_v6, %v11445_v5  ;;  %v11701_v9 = vld [vmem:[#allocation2 + $0x7c0] sm:$0xf]  ;;  %2841 = vmatpush.bf16.msra.mxu1 %v11190_v7 }
  0x33   : > { %v16081_v10 = vld [vmem:[#allocation2 + $0x7dc] sm:$0xf0] }
  0x34   : > { %v10901_v11 = vld [vmem:[#allocation2 + $0x180] sm:$0xf]  ;;  %v11702_v12 = vor.u32 %v16081_v10, %v11701_v9  ;;  %2854 = vmatpush.bf16.msra.mxu2 %v11446_v8 }
  0x35   : > { %v15881_v13 = vld [vmem:[#allocation2 + $0x19c] sm:$0xf0] }
  0x36   : > { %v11157_v14 = vld [vmem:[#allocation2 + $0x380] sm:$0xf]  ;;  %v10902_v16 = vor.u32 %v15881_v13, %v10901_v11  ;;  %2867 = vmatpush.bf16.msra.mxu3 %v11702_v12 }
  0x37   : > { %v15945_v15 = vld [vmem:[#allocation2 + $0x39c] sm:$0xf0] }
  0x38   : > { %v11158_v17 = vor.u32 %v15945_v15, %v11157_v14  ;;  %v11413_v18 = vld [vmem:[#allocation2 + $0x580] sm:$0xf]  ;;  %2829 = vmatpush.bf16.msra.mxu0 %v10902_v16 }
  0x39   : > { %v16009_v19 = vld [vmem:[#allocation2 + $0x59c] sm:$0xf0] }
  0x3a   : > { %v11669_v20 = vld [vmem:[#allocation2 + $0x780] sm:$0xf]  ;;  %v11414_v21 = vor.u32 %v16009_v19, %v11413_v18  ;;  %2842 = vmatpush.bf16.msra.mxu1 %v11158_v17 }
  0x3b   : > { %v16073_v22 = vld [vmem:[#allocation2 + $0x79c] sm:$0xf0] }
  0x3c   : > { %v10869_v23 = vld [vmem:[#allocation2 + $0x140] sm:$0xf]  ;;  %v11670_v25 = vor.u32 %v16073_v22, %v11669_v20  ;;  %2855 = vmatpush.bf16.msra.mxu2 %v11414_v21 }
  0x3d   : > { %v15873_v24 = vld [vmem:[#allocation2 + $0x15c] sm:$0xf0] }
  0x3e   : > { %v11125_v26 = vld [vmem:[#allocation2 + $0x340] sm:$0xf]  ;;  %v10870_v29 = vor.u32 %v15873_v24, %v10869_v23  ;;  %2868 = vmatpush.bf16.msra.mxu3 %v11670_v25 }
  0x3f   : > { %v15937_v27 = vld [vmem:[#allocation2 + $0x35c] sm:$0xf0] }
  0x40   : > { %v11381_v28 = vld [vmem:[#allocation2 + $0x540] sm:$0xf]  ;;  %v11126_v33 = vor.u32 %v15937_v27, %v11125_v26  ;;  %2830 = vmatpush.bf16.msra.mxu0 %v10870_v29 }
  0x41   : > { %v16001_v30 = vld [vmem:[#allocation2 + $0x55c] sm:$0xf0] }
  0x42   : > { %v11637_v31 = vld [vmem:[#allocation2 + $0x740] sm:$0xf]  ;;  %v11382_v34 = vor.u32 %v16001_v30, %v11381_v28  ;;  %2843 = vmatpush.bf16.msra.mxu1 %v11126_v33  ;;  %v15885_v33 = vld [vmem:[#allocation2 + $0x1c4] sm:$0xf] }
  0x43   : > { %v16065_v32 = vld [vmem:[#allocation2 + $0x75c] sm:$0xf0] }
  0x44   : > { %v10837_v35 = vld [vmem:[#allocation2 + $0x100] sm:$0xf]  ;;  %v11638_v38 = vor.u32 %v16065_v32, %v11637_v31  ;;  %2856 = vmatpush.bf16.msra.mxu2 %v11382_v34  ;;  %v10935_v34 = vld [vmem:[#allocation2 + $0x1e0] sm:$0xf0] }
  0x45   : > { %v15865_v36 = vld [vmem:[#allocation2 + $0x11c] sm:$0xf0] }
  0x46   : > { %v11093_v37 = vld [vmem:[#allocation2 + $0x300] sm:$0xf]  ;;  %v10838_v44 = vor.u32 %v15865_v36, %v10837_v35  ;;  %2869 = vmatpush.bf16.msra.mxu3 %v11638_v38  ;;  %v11191_v38 = vld [vmem:[#allocation2 + $0x3e0] sm:$0xf0] }
  0x47   : > { %v15929_v39 = vld [vmem:[#allocation2 + $0x31c] sm:$0xf0] }
  0x48   : > { %v11349_v40 = vld [vmem:[#allocation2 + $0x500] sm:$0xf]  ;;  %v11094_v45 = vor.u32 %v15929_v39, %v11093_v37  ;;  %2831 = vmatpush.bf16.msra.mxu0 %v10838_v44  ;;  %v15949_v37 = vld [vmem:[#allocation2 + $0x3c4] sm:$0xf] }
  0x49   : > { %v15993_v41 = vld [vmem:[#allocation2 + $0x51c] sm:$0xf0] }
  0x4a   : > { %v11605_v42 = vld [vmem:[#allocation2 + $0x700] sm:$0xf]  ;;  %v11350_v46 = vor.u32 %v15993_v41, %v11349_v40  ;;  %2844 = vmatpush.bf16.msra.mxu1 %v11094_v45 }
  0x4b   : > { %v16057_v43 = vld [vmem:[#allocation2 + $0x71c] sm:$0xf0] }
  0x4c   : > { %v10805_v47 = vld [vmem:[#allocation2 + $0xc0] sm:$0xf]  ;;  %v11606_v50 = vor.u32 %v16057_v43, %v11605_v42  ;;  %2857 = vmatpush.bf16.msra.mxu2 %v11350_v46  ;;  %v10938_v42 = vor.u32 %v15885_v33, %v10935_v34  ;;  %v11194_v46 = vor.u32 %v15949_v37, %v11191_v38  ;;  %v15845_v37 = vld [vmem:[#allocation2 + $0x84] sm:$0xf] }
  0x4d   : > { %v15857_v48 = vld [vmem:[#allocation2 + $0xdc] sm:$0xf0]  ;;  %v10775_v38 = vld [vmem:[#allocation2 + $0xa0] sm:$0xf0] }
  0x4e   : > { %v11061_v49 = vld [vmem:[#allocation2 + $0x2c0] sm:$0xf]  ;;  %v10806_v56 = vor.u32 %v15857_v48, %v10805_v47  ;;  %2870 = vmatpush.bf16.msra.mxu3 %v11606_v50  ;;  %v15877_v48 = vld [vmem:[#allocation2 + $0x184] sm:$0xf] }
  0x4f   : > { %v15921_v51 = vld [vmem:[#allocation2 + $0x2dc] sm:$0xf0]  ;;  %v15941_v50 = vld [vmem:[#allocation2 + $0x384] sm:$0xf] }
  0x50   : > { %v11317_v52 = vld [vmem:[#allocation2 + $0x4c0] sm:$0xf]  ;;  %v11062_v57 = vor.u32 %v15921_v51, %v11061_v49  ;;  %2832 = vmatpush.bf16.msra.mxu0 %v10806_v56  ;;  %v10903_v49 = vld [vmem:[#allocation2 + $0x1a0] sm:$0xf0] }
  0x51   : > { %v15985_v53 = vld [vmem:[#allocation2 + $0x4dc] sm:$0xf0]  ;;  %v11159_v51 = vld [vmem:[#allocation2 + $0x3a0] sm:$0xf0] }
  0x52   : > { %v11573_v54 = vld [vmem:[#allocation2 + $0x6c0] sm:$0xf]  ;;  %v11318_v58 = vor.u32 %v15985_v53, %v11317_v52  ;;  %2845 = vmatpush.bf16.msra.mxu1 %v11062_v57 }
  0x53   : > { %v16049_v55 = vld [vmem:[#allocation2 + $0x6dc] sm:$0xf0] }
  0x54   : > { %v10773_v59 = vld [vmem:[#allocation2 + $0x80] sm:$0xf]  ;;  %v11574_v62 = vor.u32 %v16049_v55, %v11573_v54  ;;  %2858 = vmatpush.bf16.msra.mxu2 %v11318_v58  ;;  %v10906_v54 = vor.u32 %v15877_v48, %v10903_v49  ;;  %v11162_v58 = vor.u32 %v15941_v50, %v11159_v51  ;;  %v15837_v49 = vld [vmem:[#allocation2 + $0x44] sm:$0xf] }
  0x55   : > { %v15849_v60 = vld [vmem:[#allocation2 + $0x9c] sm:$0xf0]  ;;  %v10743_v50 = vld [vmem:[#allocation2 + $0x60] sm:$0xf0] }
  0x56   : > { %v11029_v61 = vld [vmem:[#allocation2 + $0x280] sm:$0xf]  ;;  %v10774_v4 = vor.u32 %v15849_v60, %v10773_v59  ;;  %2871 = vmatpush.bf16.msra.mxu3 %v11574_v62  ;;  %v15869_v60 = vld [vmem:[#allocation2 + $0x144] sm:$0xf] }
  0x57   : > { %v15913_v63 = vld [vmem:[#allocation2 + $0x29c] sm:$0xf0]  ;;  %v15933_v62 = vld [vmem:[#allocation2 + $0x344] sm:$0xf] }
  0x58   : > { %v11285_v0 = vld [vmem:[#allocation2 + $0x480] sm:$0xf]  ;;  %v11030_v5 = vor.u32 %v15913_v63, %v11029_v61  ;;  %2833 = vmatpush.bf16.msra.mxu0 %v10774_v4  ;;  %v10871_v61 = vld [vmem:[#allocation2 + $0x160] sm:$0xf0] }
  0x59   : > { %v15977_v1 = vld [vmem:[#allocation2 + $0x49c] sm:$0xf0]  ;;  %v11127_v63 = vld [vmem:[#allocation2 + $0x360] sm:$0xf0]  ;;  %v10874_v4 = vor.u32 %v15869_v60, %v10871_v61 }
  0x5a   : > { %v11541_v2 = vld [vmem:[#allocation2 + $0x680] sm:$0xf]  ;;  %v11286_v6 = vor.u32 %v15977_v1, %v11285_v0  ;;  %2846 = vmatpush.bf16.msra.mxu1 %v11030_v5  ;;  %v15901_v51 = vld [vmem:[#allocation2 + $0x244] sm:$0xf] }
  0x5b   : > { %v16041_v3 = vld [vmem:[#allocation2 + $0x69c] sm:$0xf0]  ;;  %v15829_v60 = vld [vmem:[#allocation2 + $0x4] sm:$0xf] }
  0x5c   : > { %v10741_v7 = vld [vmem:[#allocation2 + $0x40] sm:$0xf]  ;;  %v11542_v10 = vor.u32 %v16041_v3, %v11541_v2  ;;  %2859 = vmatpush.bf16.msra.mxu2 %v11286_v6  ;;  %v491_v2 = vld [vmem:[%s482_s23] sm:$0x3f] }
  0x5d   : > { %v15841_v8 = vld [vmem:[#allocation2 + $0x5c] sm:$0xf0]  ;;  %878 = vst [vmem:[#allocation1] ss:$9 sm:$0xff] %v491_v2  ;;  %v11447_v2 = vld [vmem:[#allocation2 + $0x5e0] sm:$0xf0] }
  0x5e   : > { %v10997_v9 = vld [vmem:[#allocation2 + $0x240] sm:$0xf]  ;;  %v10742_v16 = vor.u32 %v15841_v8, %v10741_v7  ;;  %2872 = vmatpush.bf16.msra.mxu3 %v11542_v10  ;;  %v11130_v7 = vor.u32 %v15933_v62, %v11127_v63  ;;  %v10839_v10 = vld [vmem:[#allocation2 + $0x120] sm:$0xf0] }
  0x5f   : > { %v15905_v11 = vld [vmem:[#allocation2 + $0x25c] sm:$0xf0]  ;;  %v10711_v62 = vld [vmem:[#allocation2 + $0x20] sm:$0xf0] }
  0x60   : > { %v11253_v12 = vld [vmem:[#allocation2 + $0x440] sm:$0xf]  ;;  %v10998_v19 = vor.u32 %v15905_v11, %v10997_v9  ;;  %2834 = vmatpush.bf16.msra.mxu0 %v10742_v16  ;;  %v15861_v9 = vld [vmem:[#allocation2 + $0x104] sm:$0xf] }
  0x61   : > { %v15969_v13 = vld [vmem:[#allocation2 + $0x45c] sm:$0xf0]  ;;  %v15925_v11 = vld [vmem:[#allocation2 + $0x304] sm:$0xf] }
  0x62   : > { %v11509_v14 = vld [vmem:[#allocation2 + $0x640] sm:$0xf]  ;;  %v11254_v20 = vor.u32 %v15969_v13, %v11253_v12  ;;  %2847 = vmatpush.bf16.msra.mxu1 %v10998_v19  ;;  %v11095_v12 = vld [vmem:[#allocation2 + $0x320] sm:$0xf0] }
  0x63   : > { %v16033_v15 = vld [vmem:[#allocation2 + $0x65c] sm:$0xf0]  ;;  %v11098_v19 = vor.u32 %v15925_v11, %v11095_v12  ;;  %v15893_v63 = vld [vmem:[#allocation2 + $0x204] sm:$0xf] }
  0x64   : > { %v10709_v17 = vld [vmem:[#allocation2] sm:$0xf]  ;;  %v11510_v24 = vor.u32 %v16033_v15, %v11509_v14  ;;  %2860 = vmatpush.bf16.msra.mxu2 %v11254_v20  ;;  %v10842_v15 = vor.u32 %v15861_v9, %v10839_v10  ;;  %v10714_v9 = vor.u32 %v15829_v60, %v10711_v62  ;;  %v16205_v10 = vld [vmem:[#allocation2 + $0xbc4] sm:$0xf] }
  0x65   : > { %v15833_v18 = vld [vmem:[#allocation2 + $0x1c] sm:$0xf0]  ;;  %v12215_v11 = vld [vmem:[#allocation2 + $0xbe0] sm:$0xf0] }
  0x66   : > { %v10965_v21 = vld [vmem:[#allocation2 + $0x200] sm:$0xf]  ;;  %v10710_v31 = vor.u32 %v15833_v18, %v10709_v17  ;;  %2873 = vmatpush.bf16.msra.mxu3 %v11510_v24  ;;  %v11063_v24 = vld [vmem:[#allocation2 + $0x2e0] sm:$0xf0] }
  0x67   : > { %v15897_v22 = vld [vmem:[#allocation2 + $0x21c] sm:$0xf0]  ;;  %v16045_v60 = vld [vmem:[#allocation2 + $0x6c4] sm:$0xf] }
  0x68   : > { %v11221_v23 = vld [vmem:[#allocation2 + $0x400] sm:$0xf]  ;;  %v10966_v35 = vor.u32 %v15897_v22, %v10965_v21  ;;  %2835 = vmatpush.bf16.msra.mxu0 %v10710_v31  ;;  %v15853_v21 = vld [vmem:[#allocation2 + $0xc4] sm:$0xf] }
  0x69   : > { %v15961_v25 = vld [vmem:[#allocation2 + $0x41c] sm:$0xf0]  ;;  %v10807_v22 = vld [vmem:[#allocation2 + $0xe0] sm:$0xf0] }
  0x6a   : > { %v11477_v26 = vld [vmem:[#allocation2 + $0x600] sm:$0xf]  ;;  %v11222_v36 = vor.u32 %v15961_v25, %v11221_v23  ;;  %2848 = vmatpush.bf16.msra.mxu1 %v10966_v35  ;;  %v15917_v23 = vld [vmem:[#allocation2 + $0x2c4] sm:$0xf]  ;;  %v10810_v31 = vor.u32 %v15853_v21, %v10807_v22 }
  0x6b   : > { %v16025_v27 = vld [vmem:[#allocation2 + $0x61c] sm:$0xf0]  ;;  %v11066_v35 = vor.u32 %v15917_v23, %v11063_v24  ;;  %v16133_v21 = vld [vmem:[#allocation2 + $0x984] sm:$0xf] }
  0x6c   : > { %v11957_v28 = vld [vmem:[#allocation2 + $0x9c0] sm:$0xf]  ;;  %v11478_v39 = vor.u32 %v16025_v27, %v11477_v26  ;;  %2861 = vmatpush.bf16.msra.mxu2 %v11222_v36  ;;  %v17681_v27 = vld [vmem:[#allocation1 + $0x12] sm:$0xff]  ;;  %v11927_v22 = vld [vmem:[#allocation2 + $0x9a0] sm:$0xf0] }
  0x6d   : > { %v16145_v29 = vld [vmem:[#allocation2 + $0x9dc] sm:$0xf0]  ;;  %v16197_v23 = vld [vmem:[#allocation2 + $0xb84] sm:$0xf] }
  0x6e   : > { %v12213_v30 = vld [vmem:[#allocation2 + $0xbc0] sm:$0xf]  ;;  %v11958_v40 = vor.u32 %v16145_v29, %v11957_v28  ;;  %2874 = vmatpush.bf16.msra.mxu3 %v11478_v39  ;;  %v17683_v28 = vld [vmem:[#allocation1] sm:$0xff]  ;;  %v15909_v39 = vld [vmem:[#allocation2 + $0x284] sm:$0xf] }
  0x6f   : > { %v16209_v32 = vld [vmem:[#allocation2 + $0xbdc] sm:$0xf0]  ;;  %v17685_v29 = vld [vmem:[#allocation1 + $0x1b] sm:$0xff]  ;;  %2862 = vmatmul.bf16.vlgmr.msra.gmra.mxu2 %v17681_v27  ;;  %2836 = vmatmul.bf16.vlgmr.msra.gmra.mxu0 %v17683_v28  ;;  %v12183_v24 = vld [vmem:[#allocation2 + $0xba0] sm:$0xf0] }
  0x70   : > { %v12214_v41 = vor.u32 %v16209_v32, %v12213_v30  ;;  %v11925_v43 = vld [vmem:[#allocation2 + $0x980] sm:$0xf]  ;;  %2880 = vmatpush.bf16.msrb.mxu0 %v11958_v40  ;;  %2906 = vmatpush.bf16.msrb.mxu2 %v10938_v42  ;;  %v11031_v40 = vld [vmem:[#allocation2 + $0x2a0] sm:$0xf0] }
  0x71   : > { %v16137_v44 = vld [vmem:[#allocation2 + $0x99c] sm:$0xf0]  ;;  %2875 = vmatmul.bf16.vlgmr.msra.gmra.mxu3 %v17685_v29  ;;  %v11575_v62 = vld [vmem:[#allocation2 + $0x6e0] sm:$0xf0] }
  0x72   : > { %v12181_v45 = vld [vmem:[#allocation2 + $0xb80] sm:$0xf]  ;;  %v11926_v52 = vor.u32 %v16137_v44, %v11925_v43  ;;  %2893 = vmatpush.bf16.msrb.mxu1 %v12214_v41  ;;  %2919 = vmatpush.bf16.msrb.mxu3 %v11194_v46  ;;  %v10778_v43 = vor.u32 %v15845_v37, %v10775_v38  ;;  %v12186_v37 = vor.u32 %v16197_v23, %v12183_v24  ;;  %v11639_v38 = vld [vmem:[#allocation2 + $0x760] sm:$0xf0] }
  0x73   : > { %v16201_v47 = vld [vmem:[#allocation2 + $0xb9c] sm:$0xf0]  ;;  %v16093_v23 = vld [vmem:[#allocation2 + $0x844] sm:$0xf] }
  0x74   : > { %v12182_v53 = vor.u32 %v16201_v47, %v12181_v45  ;;  %v11893_v55 = vld [vmem:[#allocation2 + $0x940] sm:$0xf]  ;;  %2881 = vmatpush.bf16.msrb.mxu0 %v11926_v52  ;;  %2907 = vmatpush.bf16.msrb.mxu2 %v10906_v54  ;;  %v11034_v47 = vor.u32 %v15909_v39, %v11031_v40  ;;  %v10999_v52 = vld [vmem:[#allocation2 + $0x260] sm:$0xf0] }
  0x75   : > { %v16129_v56 = vld [vmem:[#allocation2 + $0x95c] sm:$0xf0]  ;;  %v11002_v61 = vor.u32 %v15901_v51, %v10999_v52  ;;  %v16125_v39 = vld [vmem:[#allocation2 + $0x944] sm:$0xf] }
  0x76   : > { %v12149_v57 = vld [vmem:[#allocation2 + $0xb40] sm:$0xf]  ;;  %v11894_v0 = vor.u32 %v16129_v56, %v11893_v55  ;;  %2894 = vmatpush.bf16.msrb.mxu1 %v12182_v53  ;;  %2920 = vmatpush.bf16.msrb.mxu3 %v11162_v58  ;;  %v11895_v40 = vld [vmem:[#allocation2 + $0x960] sm:$0xf0] }
  0x77   : > { %v16193_v59 = vld [vmem:[#allocation2 + $0xb5c] sm:$0xf0]  ;;  %v16117_v51 = vld [vmem:[#allocation2 + $0x904] sm:$0xf] }
  0x78   : > { %v11861_v1 = vld [vmem:[#allocation2 + $0x900] sm:$0xf]  ;;  %v12150_v3 = vor.u32 %v16193_v59, %v12149_v57  ;;  %2882 = vmatpush.bf16.msrb.mxu0 %v11894_v0  ;;  %2908 = vmatpush.bf16.msrb.mxu2 %v10874_v4  ;;  %v10746_v57 = vor.u32 %v15837_v49, %v10743_v50  ;;  %v10967_v0 = vld [vmem:[#allocation2 + $0x220] sm:$0xf0] }
  0x79   : > { %v16121_v5 = vld [vmem:[#allocation2 + $0x91c] sm:$0xf0]  ;;  %v10970_v12 = vor.u32 %v15893_v63, %v10967_v0  ;;  %v11607_v50 = vld [vmem:[#allocation2 + $0x720] sm:$0xf0] }
  0x7a   : > { %v12117_v6 = vld [vmem:[#allocation2 + $0xb00] sm:$0xf]  ;;  %v11862_v13 = vor.u32 %v16121_v5, %v11861_v1  ;;  %2895 = vmatpush.bf16.msrb.mxu1 %v12150_v3  ;;  %2921 = vmatpush.bf16.msrb.mxu3 %v11130_v7  ;;  %v16013_v1 = vld [vmem:[#allocation2 + $0x5c4] sm:$0xf] }
  0x7b   : > { %v16185_v8 = vld [vmem:[#allocation2 + $0xb1c] sm:$0xf0]  ;;  %v16077_v3 = vld [vmem:[#allocation2 + $0x7c4] sm:$0xf] }
  0x7c   : > { %v12118_v14 = vor.u32 %v16185_v8, %v12117_v6  ;;  %v11829_v16 = vld [vmem:[#allocation2 + $0x8c0] sm:$0xf]  ;;  %2883 = vmatpush.bf16.msrb.mxu0 %v11862_v13  ;;  %2909 = vmatpush.bf16.msrb.mxu2 %v10842_v15  ;;  %v11703_v5 = vld [vmem:[#allocation2 + $0x7e0] sm:$0xf0]  ;;  %v11450_v13 = vor.u32 %v16013_v1, %v11447_v2 }
  0x7d   : > { %v16113_v17 = vld [vmem:[#allocation2 + $0x8dc] sm:$0xf0]  ;;  %v16141_v6 = vld [vmem:[#allocation2 + $0x9c4] sm:$0xf] }
  0x7e   : > { %v12085_v18 = vld [vmem:[#allocation2 + $0xac0] sm:$0xf]  ;;  %v11830_v26 = vor.u32 %v16113_v17, %v11829_v16  ;;  %2896 = vmatpush.bf16.msrb.mxu1 %v12118_v14  ;;  %2922 = vmatpush.bf16.msrb.mxu3 %v11098_v19  ;;  %v11959_v7 = vld [vmem:[#allocation2 + $0x9e0] sm:$0xf0]  ;;  %v11706_v14 = vor.u32 %v16077_v3, %v11703_v5  ;;  %v12218_v19 = vor.u32 %v16205_v10, %v12215_v11 }
  0x7f   : > { %v16177_v20 = vld [vmem:[#allocation2 + $0xadc] sm:$0xf0]  ;;  %v11962_v15 = vor.u32 %v16141_v6, %v11959_v7  ;;  %v16005_v16 = vld [vmem:[#allocation2 + $0x584] sm:$0xf] }
  0x80   : > { %v11797_v25 = vld [vmem:[#allocation2 + $0x880] sm:$0xf]  ;;  %v12086_v30 = vor.u32 %v16177_v20, %v12085_v18  ;;  %2884 = vmatpush.bf16.msrb.mxu0 %v11830_v26  ;;  %2910 = vmatpush.bf16.msrb.mxu2 %v10810_v31  ;;  %v11415_v17 = vld [vmem:[#allocation2 + $0x5a0] sm:$0xf0] }
  0x81   : > { %v16105_v32 = vld [vmem:[#allocation2 + $0x89c] sm:$0xf0]  ;;  %v16069_v18 = vld [vmem:[#allocation2 + $0x784] sm:$0xf]  ;;  %v11418_v26 = vor.u32 %v16005_v16, %v11415_v17 }
  0x82   : > { %v12053_v33 = vld [vmem:[#allocation2 + $0xa80] sm:$0xf]  ;;  %v11798_v41 = vor.u32 %v16105_v32, %v11797_v25  ;;  %2897 = vmatpush.bf16.msrb.mxu1 %v12086_v30  ;;  %2923 = vmatpush.bf16.msrb.mxu3 %v11066_v35  ;;  %v11671_v20 = vld [vmem:[#allocation2 + $0x7a0] sm:$0xf0]  ;;  %v11930_v32 = vor.u32 %v16133_v21, %v11927_v22 }
  0x83   : > { %v17687_v34 = vld [vmem:[#allocation1 + $0x9] sm:$0xff]  ;;  %v11674_v31 = vor.u32 %v16069_v18, %v11671_v20 }
  0x84   : > { %v16169_v36 = vld [vmem:[#allocation2 + $0xa9c] sm:$0xf0]  ;;  %2849 = vmatmul.bf16.vlgmr.msra.gmra.mxu1 %v17687_v34  ;;  %2885 = vmatpush.bf16.msrb.mxu0 %v11798_v41  ;;  %v17695_v30 = vld [vmem:[#allocation1 + $0x2d] sm:$0xff] }
  0x85   : > { %v12054_v42 = vor.u32 %v16169_v36, %v12053_v33  ;;  %v11765_v44 = vld [vmem:[#allocation2 + $0x840] sm:$0xf]  ;;  %2911 = vmatpush.bf16.msrb.mxu2 %v10778_v43  ;;  %v15997_v33 = vld [vmem:[#allocation2 + $0x544] sm:$0xf] }
  0x86   : > { %v16097_v45 = vld [vmem:[#allocation2 + $0x85c] sm:$0xf0]  ;;  %2924 = vmatpush.bf16.msrb.mxu3 %v11034_v47  ;;  %v11383_v35 = vld [vmem:[#allocation2 + $0x560] sm:$0xf0] }
  0x87   : > { %v12021_v46 = vld [vmem:[#allocation2 + $0xa40] sm:$0xf]  ;;  %v11766_v53 = vor.u32 %v16097_v45, %v11765_v44  ;;  %2898 = vmatpush.bf16.msrb.mxu1 %v12054_v42  ;;  %v16061_v36 = vld [vmem:[#allocation2 + $0x744] sm:$0xf]  ;;  %v11386_v43 = vor.u32 %v15997_v33, %v11383_v35  ;;  %v11898_v45 = vor.u32 %v16125_v39, %v11895_v40 }
  0x88   : > { %v16161_v48 = vld [vmem:[#allocation2 + $0xa5c] sm:$0xf0]  ;;  %v16189_v41 = vld [vmem:[#allocation2 + $0xb44] sm:$0xf]  ;;  %v11642_v44 = vor.u32 %v16061_v36, %v11639_v38 }
  0x89   : > { %v11733_v54 = vld [vmem:[#allocation2 + $0x800] sm:$0xf]  ;;  %v12022_v56 = vor.u32 %v16161_v48, %v12021_v46  ;;  %2886 = vmatpush.bf16.msrb.mxu0 %v11766_v53  ;;  %2912 = vmatpush.bf16.msrb.mxu2 %v10746_v57  ;;  %v12151_v42 = vld [vmem:[#allocation2 + $0xb60] sm:$0xf0] }
  0x8a   : > { %v16089_v55 = vld [vmem:[#allocation2 + $0x81c] sm:$0xf0]  ;;  %2925 = vmatpush.bf16.msrb.mxu3 %v11002_v61  ;;  %v15989_v46 = vld [vmem:[#allocation2 + $0x504] sm:$0xf]  ;;  %v12154_v49 = vor.u32 %v16189_v41, %v12151_v42 }
  0x8b   : > { %v11989_v58 = vld [vmem:[#allocation2 + $0xa00] sm:$0xf]  ;;  %v11734_v4 = vor.u32 %v16089_v55, %v11733_v54  ;;  %2899 = vmatpush.bf16.msrb.mxu1 %v12022_v56  ;;  %v11351_v47 = vld [vmem:[#allocation2 + $0x520] sm:$0xf0] }
  0x8c   : > { %v16153_v59 = vld [vmem:[#allocation2 + $0xa1c] sm:$0xf0]  ;;  %v16053_v48 = vld [vmem:[#allocation2 + $0x704] sm:$0xf]  ;;  %v11354_v55 = vor.u32 %v15989_v46, %v11351_v47  ;;  %v15890_v46 = vld [vmem:[#allocation2 + $0x1e4] sm:$0xf0] }
  0x8d   : > { %v11990_v8 = vor.u32 %v16153_v59, %v11989_v58  ;;  %2887 = vmatpush.bf16.msrb.mxu0 %v11734_v4  ;;  %2913 = vmatpush.bf16.msrb.mxu2 %v10714_v9  ;;  %v17693_v25 = vld [vmem:[#allocation1 + $0x24] sm:$0xff]  ;;  %v11863_v52 = vld [vmem:[#allocation2 + $0x920] sm:$0xf0]  ;;  %v11610_v56 = vor.u32 %v16053_v48, %v11607_v50  ;;  %v11578_v4 = vor.u32 %v16045_v60, %v11575_v62  ;;  %v11197_v47 = vld [vmem:[#allocation2 + $0x3c8] sm:$0xf] }
  0x8e   : > { %2926 = vmatpush.bf16.msrb.mxu3 %v10970_v12  ;;  %v16181_v53 = vld [vmem:[#allocation2 + $0xb04] sm:$0xf]  ;;  %v11866_v57 = vor.u32 %v16117_v51, %v11863_v52  ;;  %v11453_v50 = vld [vmem:[#allocation2 + $0x5c8] sm:$0xf] }
  0x8f   : > { %2900 = vmatpush.bf16.msrb.mxu1 %v11990_v8  ;;  %v12119_v54 = vld [vmem:[#allocation2 + $0xb20] sm:$0xf0]  ;;  %v16018_v51 = vld [vmem:[#allocation2 + $0x5e4] sm:$0xf0] }
  0x90   : > { %2888 = vmatmul.bf16.vlgmr.msrb.gmra.mxu0 %v17693_v25  ;;  %2914 = vmatmul.bf16.vlgmr.msrb.gmra.mxu2 %v17683_v28  ;;  %v15981_v58 = vld [vmem:[#allocation2 + $0x4c4] sm:$0xf]  ;;  %v12122_v61 = vor.u32 %v16181_v53, %v12119_v54  ;;  %v11709_v54 = vld [vmem:[#allocation2 + $0x7c8] sm:$0xf] }
  0x91   : > { %2932 = vmatpush.bf16.msra.mxu0 %v11450_v13  ;;  %2958 = vmatpush.bf16.msra.mxu2 %v11962_v15  ;;  %v11319_v59 = vld [vmem:[#allocation2 + $0x4e0] sm:$0xf0]  ;;  %v10909_v60 = vld [vmem:[#allocation2 + $0x188] sm:$0xf] }
  0x92   : > { %2971 = vmatpush.bf16.msra.mxu3 %v12218_v19  ;;  %v16109_v63 = vld [vmem:[#allocation2 + $0x8c4] sm:$0xf]  ;;  %v11322_v3 = vor.u32 %v15981_v58, %v11319_v59  ;;  %v11454_v59 = vor.u32 %v16018_v51, %v11453_v50  ;;  %v11165_v62 = vld [vmem:[#allocation2 + $0x388] sm:$0xf] }
  0x93   : > { %2945 = vmatpush.bf16.msra.mxu1 %v11706_v14  ;;  %2927 = vmatmul.bf16.vlgmr.msrb.gmra.mxu3 %v17687_v34  ;;  %v11831_v0 = vld [vmem:[#allocation2 + $0x8e0] sm:$0xf0]  ;;  %v10781_v50 = vld [vmem:[#allocation2 + $0x88] sm:$0xf] }
  0x94   : > { %2901 = vmatmul.bf16.vlgmr.msrb.gmra.mxu1 %v17695_v30  ;;  %v16173_v1 = vld [vmem:[#allocation2 + $0xac4] sm:$0xf]  ;;  %v11834_v5 = vor.u32 %v16109_v63, %v11831_v0  ;;  %v15946_v0 = vld [vmem:[#allocation2 + $0x3a4] sm:$0xf0] }
  0x95   : > { %2933 = vmatpush.bf16.msra.mxu0 %v11418_v26  ;;  %2959 = vmatpush.bf16.msra.mxu2 %v11930_v32  ;;  %v12087_v2 = vld [vmem:[#allocation2 + $0xae0] sm:$0xf0]  ;;  %v15850_v51 = vld [vmem:[#allocation2 + $0xa4] sm:$0xf0] }
  0x96   : > { %2972 = vmatpush.bf16.msra.mxu3 %v12186_v37  ;;  %v15973_v6 = vld [vmem:[#allocation2 + $0x484] sm:$0xf]  ;;  %v12090_v9 = vor.u32 %v16173_v1, %v12087_v2  ;;  %v11421_v1 = vld [vmem:[#allocation2 + $0x588] sm:$0xf] }
  0x97   : > { %2946 = vmatpush.bf16.msra.mxu1 %v11674_v31  ;;  %v11287_v7 = vld [vmem:[#allocation2 + $0x4a0] sm:$0xf0]  ;;  %v16010_v2 = vld [vmem:[#allocation2 + $0x5a4] sm:$0xf0] }
  0x98   : > { %v16037_v8 = vld [vmem:[#allocation2 + $0x684] sm:$0xf]  ;;  %v11290_v15 = vor.u32 %v15973_v6, %v11287_v7  ;;  %v11166_v6 = vor.u32 %v15946_v0, %v11165_v62  ;;  %v11422_v7 = vor.u32 %v16010_v2, %v11421_v1  ;;  %v10749_v62 = vld [vmem:[#allocation2 + $0x48] sm:$0xf] }
  0x99   : > { %2934 = vmatpush.bf16.msra.mxu0 %v11386_v43  ;;  %2960 = vmatpush.bf16.msra.mxu2 %v11898_v45  ;;  %v11543_v10 = vld [vmem:[#allocation2 + $0x6a0] sm:$0xf0]  ;;  %v10941_v45 = vld [vmem:[#allocation2 + $0x1c8] sm:$0xf] }
  0x9a   : > { %2973 = vmatpush.bf16.msra.mxu3 %v12154_v49  ;;  %v16101_v11 = vld [vmem:[#allocation2 + $0x884] sm:$0xf]  ;;  %v11546_v16 = vor.u32 %v16037_v8, %v11543_v10  ;;  %v15954_v49 = vld [vmem:[#allocation2 + $0x3e4] sm:$0xf0] }
  0x9b   : > { %2947 = vmatpush.bf16.msra.mxu1 %v11642_v44  ;;  %v11799_v12 = vld [vmem:[#allocation2 + $0x8a0] sm:$0xf0]  ;;  %v11198_v58 = vor.u32 %v15954_v49, %v11197_v47  ;;  %v10877_v8 = vld [vmem:[#allocation2 + $0x148] sm:$0xf] }
  0x9c   : > { %v16165_v13 = vld [vmem:[#allocation2 + $0xa84] sm:$0xf]  ;;  %v11802_v17 = vor.u32 %v16101_v11, %v11799_v12  ;;  %v11133_v10 = vld [vmem:[#allocation2 + $0x348] sm:$0xf] }
  0x9d   : > { %2935 = vmatpush.bf16.msra.mxu0 %v11354_v55  ;;  %2961 = vmatpush.bf16.msra.mxu2 %v11866_v57  ;;  %v12055_v14 = vld [vmem:[#allocation2 + $0xaa0] sm:$0xf0]  ;;  %v16082_v55 = vld [vmem:[#allocation2 + $0x7e4] sm:$0xf0]  ;;  %v10942_v57 = vor.u32 %v15890_v46, %v10941_v45 }
  0x9e   : > { %2974 = vmatpush.bf16.msra.mxu3 %v12122_v61  ;;  %v15965_v18 = vld [vmem:[#allocation2 + $0x444] sm:$0xf]  ;;  %v12058_v21 = vor.u32 %v16165_v13, %v12055_v14  ;;  %v15882_v61 = vld [vmem:[#allocation2 + $0x1a4] sm:$0xf0]  ;;  %v11710_v63 = vor.u32 %v16082_v55, %v11709_v54 }
  0x9f   : > { %2948 = vmatpush.bf16.msra.mxu1 %v11610_v56  ;;  %v11255_v19 = vld [vmem:[#allocation2 + $0x460] sm:$0xf0]  ;;  %v15938_v12 = vld [vmem:[#allocation2 + $0x364] sm:$0xf0] }
  0xa0   : > { %v16029_v20 = vld [vmem:[#allocation2 + $0x644] sm:$0xf]  ;;  %v11258_v32 = vor.u32 %v15965_v18, %v11255_v19  ;;  %v11389_v13 = vld [vmem:[#allocation2 + $0x548] sm:$0xf]  ;;  %v11134_v18 = vor.u32 %v15938_v12, %v11133_v10 }
  0xa1   : > { %2936 = vmatpush.bf16.msra.mxu0 %v11322_v3  ;;  %2962 = vmatpush.bf16.msra.mxu2 %v11834_v5  ;;  %v11511_v22 = vld [vmem:[#allocation2 + $0x660] sm:$0xf0]  ;;  %v11677_v3 = vld [vmem:[#allocation2 + $0x788] sm:$0xf]  ;;  %v10910_v5 = vor.u32 %v15882_v61, %v10909_v60 }
  0xa2   : > { %2975 = vmatpush.bf16.msra.mxu3 %v12090_v9  ;;  %v11767_v24 = vld [vmem:[#allocation2 + $0x860] sm:$0xf0]  ;;  %v11514_v36 = vor.u32 %v16029_v20, %v11511_v22  ;;  %v15874_v9 = vld [vmem:[#allocation2 + $0x164] sm:$0xf0] }
  0xa3   : > { %2949 = vmatpush.bf16.msra.mxu1 %v11578_v4  ;;  %v16157_v26 = vld [vmem:[#allocation2 + $0xa44] sm:$0xf]  ;;  %v11770_v37 = vor.u32 %v16093_v23, %v11767_v24  ;;  %v16074_v4 = vld [vmem:[#allocation2 + $0x7a4] sm:$0xf0] }
  0xa4   : > { %v12023_v31 = vld [vmem:[#allocation2 + $0xa60] sm:$0xf0]  ;;  %v11678_v11 = vor.u32 %v16074_v4, %v11677_v3  ;;  %v16002_v14 = vld [vmem:[#allocation2 + $0x564] sm:$0xf0] }
  0xa5   : > { %2937 = vmatpush.bf16.msra.mxu0 %v11290_v15  ;;  %v15957_v33 = vld [vmem:[#allocation2 + $0x404] sm:$0xf]  ;;  %2963 = vmatpush.bf16.msra.mxu2 %v11802_v17  ;;  %v12026_v41 = vor.u32 %v16157_v26, %v12023_v31  ;;  %v11645_v15 = vld [vmem:[#allocation2 + $0x748] sm:$0xf]  ;;  %v10878_v17 = vor.u32 %v15874_v9, %v10877_v8  ;;  %v11390_v19 = vor.u32 %v16002_v14, %v11389_v13 }
  0xa6   : > { %v11223_v35 = vld [vmem:[#allocation2 + $0x420] sm:$0xf0]  ;;  %2976 = vmatpush.bf16.msra.mxu3 %v12058_v21  ;;  %v10845_v20 = vld [vmem:[#allocation2 + $0x108] sm:$0xf] }
  0xa7   : > { %2950 = vmatpush.bf16.msra.mxu1 %v11546_v16  ;;  %v16021_v38 = vld [vmem:[#allocation2 + $0x604] sm:$0xf]  ;;  %v11226_v48 = vor.u32 %v15957_v33, %v11223_v35  ;;  %v16066_v16 = vld [vmem:[#allocation2 + $0x764] sm:$0xf0] }
  0xa8   : > { %v11479_v39 = vld [vmem:[#allocation2 + $0x620] sm:$0xf0]  ;;  %v15866_v21 = vld [vmem:[#allocation2 + $0x124] sm:$0xf0]  ;;  %v11646_v23 = vor.u32 %v16066_v16, %v11645_v15 }
  0xa9   : > { %v16085_v40 = vld [vmem:[#allocation2 + $0x804] sm:$0xf]  ;;  %2938 = vmatpush.bf16.msra.mxu0 %v11258_v32  ;;  %2964 = vmatpush.bf16.msra.mxu2 %v11770_v37  ;;  %v11482_v52 = vor.u32 %v16021_v38, %v11479_v39  ;;  %v11101_v22 = vld [vmem:[#allocation2 + $0x308] sm:$0xf]  ;;  %v10846_v35 = vor.u32 %v15866_v21, %v10845_v20 }
  0xaa   : > { %v11735_v42 = vld [vmem:[#allocation2 + $0x820] sm:$0xf0]  ;;  %2977 = vmatpush.bf16.msra.mxu3 %v12026_v41  ;;  %v15930_v24 = vld [vmem:[#allocation2 + $0x324] sm:$0xf0] }
  0xab   : > { %v16149_v43 = vld [vmem:[#allocation2 + $0xa04] sm:$0xf]  ;;  %2951 = vmatpush.bf16.msra.mxu1 %v11514_v36  ;;  %v11738_v53 = vor.u32 %v16085_v40, %v11735_v42  ;;  %v11357_v26 = vld [vmem:[#allocation2 + $0x508] sm:$0xf]  ;;  %v11102_v36 = vor.u32 %v15930_v24, %v11101_v22  ;;  %v15886_v24 = vld [vmem:[#allocation2 + $0x1cc] sm:$0xf] }
  0xac   : > { %v11991_v44 = vld [vmem:[#allocation2 + $0xa20] sm:$0xf0]  ;;  %v15994_v31 = vld [vmem:[#allocation2 + $0x524] sm:$0xf0] }
  0xad   : > { %v11994_v56 = vor.u32 %v16149_v43, %v11991_v44  ;;  %2939 = vmatpush.bf16.msra.mxu0 %v11226_v48  ;;  %2965 = vmatpush.bf16.msra.mxu2 %v11738_v53  ;;  %v11613_v32 = vld [vmem:[#allocation2 + $0x708] sm:$0xf]  ;;  %v11358_v37 = vor.u32 %v15994_v31, %v11357_v26  ;;  %v10943_v26 = vld [vmem:[#allocation2 + $0x1e8] sm:$0xf0] }
  0xae   : > { %v16058_v33 = vld [vmem:[#allocation2 + $0x724] sm:$0xf0] }
  0xaf   : > { %2952 = vmatpush.bf16.msra.mxu1 %v11482_v52  ;;  %2978 = vmatpush.bf16.msra.mxu3 %v11994_v56  ;;  %v10813_v38 = vld [vmem:[#allocation2 + $0xc8] sm:$0xf]  ;;  %v11614_v41 = vor.u32 %v16058_v33, %v11613_v32  ;;  %v15950_v33 = vld [vmem:[#allocation2 + $0x3cc] sm:$0xf] }
  0xb0   : > { %2966 = vmatmul.bf16.vlgmr.msra.gmra.mxu2 %v17693_v25  ;;  %2940 = vmatmul.bf16.vlgmr.msra.gmra.mxu0 %v17681_v27  ;;  %v15858_v39 = vld [vmem:[#allocation2 + $0xe4] sm:$0xf0] }
  0xb1   : > { %2984 = vmatpush.bf16.msrb.mxu0 %v10942_v57  ;;  %3010 = vmatpush.bf16.msrb.mxu2 %v11454_v59  ;;  %v11069_v40 = vld [vmem:[#allocation2 + $0x2c8] sm:$0xf]  ;;  %v10814_v47 = vor.u32 %v15858_v39, %v10813_v38  ;;  %v10782_v59 = vor.u32 %v15850_v51, %v10781_v50  ;;  %v10946_v39 = vor.u32 %v15886_v24, %v10943_v26 }
  0xb2   : > { %2979 = vmatmul.bf16.vlgmr.msra.gmra.mxu3 %v17695_v30  ;;  %2953 = vmatmul.bf16.vlgmr.msra.gmra.mxu1 %v17685_v29  ;;  %v15922_v42 = vld [vmem:[#allocation2 + $0x2e4] sm:$0xf0] }
  0xb3   : > { %2997 = vmatpush.bf16.msrb.mxu1 %v11198_v58  ;;  %3023 = vmatpush.bf16.msrb.mxu3 %v11710_v63  ;;  %v11325_v43 = vld [vmem:[#allocation2 + $0x4c8] sm:$0xf]  ;;  %v11070_v48 = vor.u32 %v15922_v42, %v11069_v40 }
  0xb4   : > { %v15986_v44 = vld [vmem:[#allocation2 + $0x4e4] sm:$0xf0] }
  0xb5   : > { %2985 = vmatpush.bf16.msrb.mxu0 %v10910_v5  ;;  %3011 = vmatpush.bf16.msrb.mxu2 %v11422_v7  ;;  %v11581_v45 = vld [vmem:[#allocation2 + $0x6c8] sm:$0xf]  ;;  %v11326_v49 = vor.u32 %v15986_v44, %v11325_v43 }
  0xb6   : > { %v16050_v46 = vld [vmem:[#allocation2 + $0x6e4] sm:$0xf0] }
  0xb7   : > { %2998 = vmatpush.bf16.msrb.mxu1 %v11166_v6  ;;  %3024 = vmatpush.bf16.msrb.mxu3 %v11678_v11  ;;  %v11037_v52 = vld [vmem:[#allocation2 + $0x288] sm:$0xf]  ;;  %v11582_v53 = vor.u32 %v16050_v46, %v11581_v45  ;;  %v15878_v45 = vld [vmem:[#allocation2 + $0x18c] sm:$0xf] }
  0xb8   : > { %v15914_v54 = vld [vmem:[#allocation2 + $0x2a4] sm:$0xf0]  ;;  %v10911_v46 = vld [vmem:[#allocation2 + $0x1a8] sm:$0xf0] }
  0xb9   : > { %2986 = vmatpush.bf16.msrb.mxu0 %v10878_v17  ;;  %3012 = vmatpush.bf16.msrb.mxu2 %v11390_v19  ;;  %v11293_v55 = vld [vmem:[#allocation2 + $0x488] sm:$0xf]  ;;  %v11038_v60 = vor.u32 %v15914_v54, %v11037_v52  ;;  %v10914_v51 = vor.u32 %v15878_v45, %v10911_v46  ;;  %v15838_v45 = vld [vmem:[#allocation2 + $0x4c] sm:$0xf] }
  0xba   : > { %v15978_v56 = vld [vmem:[#allocation2 + $0x4a4] sm:$0xf0]  ;;  %v10751_v46 = vld [vmem:[#allocation2 + $0x68] sm:$0xf0] }
  0xbb   : > { %2999 = vmatpush.bf16.msrb.mxu1 %v11134_v18  ;;  %3025 = vmatpush.bf16.msrb.mxu3 %v11646_v23  ;;  %v11549_v57 = vld [vmem:[#allocation2 + $0x688] sm:$0xf]  ;;  %v11294_v61 = vor.u32 %v15978_v56, %v11293_v55 }
  0xbc   : > { %v16042_v58 = vld [vmem:[#allocation2 + $0x6a4] sm:$0xf0] }
  0xbd   : > { %2987 = vmatpush.bf16.msrb.mxu0 %v10846_v35  ;;  %3013 = vmatpush.bf16.msrb.mxu2 %v11358_v37  ;;  %v15842_v63 = vld [vmem:[#allocation2 + $0x64] sm:$0xf0]  ;;  %v11550_v1 = vor.u32 %v16042_v58, %v11549_v57  ;;  %v11199_v35 = vld [vmem:[#allocation2 + $0x3e8] sm:$0xf0] }
  0xbe   : > { %v11005_v0 = vld [vmem:[#allocation2 + $0x248] sm:$0xf]  ;;  %v10750_v7 = vor.u32 %v15842_v63, %v10749_v62  ;;  %v11202_v43 = vor.u32 %v15950_v33, %v11199_v35  ;;  %v15870_v57 = vld [vmem:[#allocation2 + $0x14c] sm:$0xf] }
  0xbf   : > { %3000 = vmatpush.bf16.msrb.mxu1 %v11102_v36  ;;  %3026 = vmatpush.bf16.msrb.mxu3 %v11614_v41  ;;  %v15906_v2 = vld [vmem:[#allocation2 + $0x264] sm:$0xf0]  ;;  %v10879_v58 = vld [vmem:[#allocation2 + $0x168] sm:$0xf0] }
  0xc0   : > { %v11261_v3 = vld [vmem:[#allocation2 + $0x448] sm:$0xf]  ;;  %v11006_v10 = vor.u32 %v15906_v2, %v11005_v0  ;;  %v10882_v63 = vor.u32 %v15870_v57, %v10879_v58  ;;  %v10783_v33 = vld [vmem:[#allocation2 + $0xa8] sm:$0xf0] }
  0xc1   : > { %2988 = vmatpush.bf16.msrb.mxu0 %v10814_v47  ;;  %3014 = vmatpush.bf16.msrb.mxu2 %v11326_v49  ;;  %v15970_v4 = vld [vmem:[#allocation2 + $0x464] sm:$0xf0]  ;;  %v15942_v47 = vld [vmem:[#allocation2 + $0x38c] sm:$0xf] }
  0xc2   : > { %v11517_v5 = vld [vmem:[#allocation2 + $0x648] sm:$0xf]  ;;  %v11262_v11 = vor.u32 %v15970_v4, %v11261_v3  ;;  %v15862_v4 = vld [vmem:[#allocation2 + $0x10c] sm:$0xf] }
  0xc3   : > { %3001 = vmatpush.bf16.msrb.mxu1 %v11070_v48  ;;  %3027 = vmatpush.bf16.msrb.mxu3 %v11582_v53  ;;  %v16034_v6 = vld [vmem:[#allocation2 + $0x664] sm:$0xf0]  ;;  %v11167_v48 = vld [vmem:[#allocation2 + $0x3a8] sm:$0xf0] }
  0xc4   : > { %v10717_v8 = vld [vmem:[#allocation2 + $0x8] sm:$0xf]  ;;  %v11518_v15 = vor.u32 %v16034_v6, %v11517_v5  ;;  %v11170_v55 = vor.u32 %v15942_v47, %v11167_v48  ;;  %v10847_v5 = vld [vmem:[#allocation2 + $0x128] sm:$0xf0] }
  0xc5   : > { %2989 = vmatpush.bf16.msrb.mxu0 %v10782_v59  ;;  %v15834_v9 = vld [vmem:[#allocation2 + $0x24] sm:$0xf0]  ;;  %3015 = vmatpush.bf16.msrb.mxu2 %v11294_v61  ;;  %v15934_v59 = vld [vmem:[#allocation2 + $0x34c] sm:$0xf] }
  0xc6   : > { %v10973_v12 = vld [vmem:[#allocation2 + $0x208] sm:$0xf]  ;;  %v10718_v22 = vor.u32 %v15834_v9, %v10717_v8  ;;  %v15926_v6 = vld [vmem:[#allocation2 + $0x30c] sm:$0xf]  ;;  %v10850_v9 = vor.u32 %v15862_v4, %v10847_v5 }
  0xc7   : > { %3002 = vmatpush.bf16.msrb.mxu1 %v11038_v60  ;;  %v15898_v13 = vld [vmem:[#allocation2 + $0x224] sm:$0xf0]  ;;  %3028 = vmatpush.bf16.msrb.mxu3 %v11550_v1  ;;  %v11135_v60 = vld [vmem:[#allocation2 + $0x368] sm:$0xf0] }
  0xc8   : > { %v11229_v14 = vld [vmem:[#allocation2 + $0x408] sm:$0xf]  ;;  %v10974_v31 = vor.u32 %v15898_v13, %v10973_v12  ;;  %v11138_v3 = vor.u32 %v15934_v59, %v11135_v60  ;;  %v15910_v35 = vld [vmem:[#allocation2 + $0x28c] sm:$0xf] }
  0xc9   : > { %v15962_v16 = vld [vmem:[#allocation2 + $0x424] sm:$0xf0]  ;;  %2990 = vmatpush.bf16.msrb.mxu0 %v10750_v7  ;;  %3016 = vmatpush.bf16.msrb.mxu2 %v11262_v11  ;;  %v11103_v7 = vld [vmem:[#allocation2 + $0x328] sm:$0xf0] }
  0xca   : > { %v11485_v17 = vld [vmem:[#allocation2 + $0x608] sm:$0xf]  ;;  %v11230_v32 = vor.u32 %v15962_v16, %v11229_v14  ;;  %v11106_v13 = vor.u32 %v15926_v6, %v11103_v7  ;;  %v10815_v16 = vld [vmem:[#allocation2 + $0xe8] sm:$0xf0] }
  0xcb   : > { %v16026_v18 = vld [vmem:[#allocation2 + $0x624] sm:$0xf0]  ;;  %3003 = vmatpush.bf16.msrb.mxu1 %v11006_v10  ;;  %3029 = vmatpush.bf16.msrb.mxu3 %v11518_v15  ;;  %v15854_v15 = vld [vmem:[#allocation2 + $0xcc] sm:$0xf] }
  0xcc   : > { %v11965_v19 = vld [vmem:[#allocation2 + $0x9c8] sm:$0xf]  ;;  %v11486_v36 = vor.u32 %v16026_v18, %v11485_v17  ;;  %v15918_v17 = vld [vmem:[#allocation2 + $0x2cc] sm:$0xf] }
  0xcd   : > { %v16146_v20 = vld [vmem:[#allocation2 + $0x9e4] sm:$0xf0]  ;;  %2991 = vmatpush.bf16.msrb.mxu0 %v10718_v22  ;;  %3017 = vmatpush.bf16.msrb.mxu2 %v11230_v32  ;;  %v11071_v18 = vld [vmem:[#allocation2 + $0x2e8] sm:$0xf0] }
  0xce   : > { %v12221_v21 = vld [vmem:[#allocation2 + $0xbc8] sm:$0xf]  ;;  %v11966_v37 = vor.u32 %v16146_v20, %v11965_v19  ;;  %v11074_v26 = vor.u32 %v15918_v17, %v11071_v18  ;;  %v15846_v32 = vld [vmem:[#allocation2 + $0x8c] sm:$0xf] }
  0xcf   : > { %v16210_v23 = vld [vmem:[#allocation2 + $0xbe4] sm:$0xf0]  ;;  %3004 = vmatpush.bf16.msrb.mxu1 %v10974_v31  ;;  %3030 = vmatpush.bf16.msrb.mxu3 %v11486_v36  ;;  %v11039_v36 = vld [vmem:[#allocation2 + $0x2a8] sm:$0xf0] }
  0xd0   : > { %v12222_v38 = vor.u32 %v16210_v23, %v12221_v21  ;;  %v11933_v40 = vld [vmem:[#allocation2 + $0x988] sm:$0xf]  ;;  %3018 = vmatmul.bf16.vlgmr.msrb.gmra.mxu2 %v17681_v27  ;;  %2992 = vmatmul.bf16.vlgmr.msrb.gmra.mxu0 %v17683_v28  ;;  %v10818_v21 = vor.u32 %v15854_v15, %v10815_v16  ;;  %v15902_v47 = vld [vmem:[#allocation2 + $0x24c] sm:$0xf] }
  0xd1   : > { %v16138_v41 = vld [vmem:[#allocation2 + $0x9a4] sm:$0xf0]  ;;  %3036 = vmatpush.bf16.msra.mxu0 %v11966_v37  ;;  %3062 = vmatpush.bf16.msra.mxu2 %v10946_v39  ;;  %v10786_v39 = vor.u32 %v15846_v32, %v10783_v33  ;;  %v11007_v48 = vld [vmem:[#allocation2 + $0x268] sm:$0xf0] }
  0xd2   : > { %v12189_v42 = vld [vmem:[#allocation2 + $0xb88] sm:$0xf]  ;;  %v11934_v49 = vor.u32 %v16138_v41, %v11933_v40  ;;  %3031 = vmatmul.bf16.vlgmr.msrb.gmra.mxu3 %v17685_v29  ;;  %3005 = vmatmul.bf16.vlgmr.msrb.gmra.mxu1 %v17687_v34  ;;  %v11010_v57 = vor.u32 %v15902_v47, %v11007_v48  ;;  %v10719_v58 = vld [vmem:[#allocation2 + $0x28] sm:$0xf0] }
  0xd3   : > { %v16202_v44 = vld [vmem:[#allocation2 + $0xba4] sm:$0xf0]  ;;  %3049 = vmatpush.bf16.msra.mxu1 %v12222_v38  ;;  %3075 = vmatpush.bf16.msra.mxu3 %v11202_v43  ;;  %v11042_v43 = vor.u32 %v15910_v35, %v11039_v36  ;;  %v15894_v59 = vld [vmem:[#allocation2 + $0x20c] sm:$0xf] }
  0xd4   : > { %v12190_v50 = vor.u32 %v16202_v44, %v12189_v42  ;;  %v11901_v52 = vld [vmem:[#allocation2 + $0x948] sm:$0xf]  ;;  %v10975_v60 = vld [vmem:[#allocation2 + $0x228] sm:$0xf0] }
  0xd5   : > { %v16130_v53 = vld [vmem:[#allocation2 + $0x964] sm:$0xf0]  ;;  %3037 = vmatpush.bf16.msra.mxu0 %v11934_v49  ;;  %3063 = vmatpush.bf16.msra.mxu2 %v10914_v51  ;;  %v16206_v5 = vld [vmem:[#allocation2 + $0xbcc] sm:$0xf]  ;;  %v10978_v7 = vor.u32 %v15894_v59, %v10975_v60 }
  0xd6   : > { %v12157_v54 = vld [vmem:[#allocation2 + $0xb48] sm:$0xf]  ;;  %v11902_v61 = vor.u32 %v16130_v53, %v11901_v52  ;;  %v10754_v53 = vor.u32 %v15838_v45, %v10751_v46  ;;  %v12223_v6 = vld [vmem:[#allocation2 + $0xbe8] sm:$0xf0] }
  0xd7   : > { %v16194_v56 = vld [vmem:[#allocation2 + $0xb64] sm:$0xf0]  ;;  %3050 = vmatpush.bf16.msra.mxu1 %v12190_v50  ;;  %3076 = vmatpush.bf16.msra.mxu3 %v11170_v55  ;;  %v16134_v15 = vld [vmem:[#allocation2 + $0x98c] sm:$0xf] }
  0xd8   : > { %v12158_v62 = vor.u32 %v16194_v56, %v12157_v54  ;;  %v11869_v0 = vld [vmem:[#allocation2 + $0x908] sm:$0xf]  ;;  %v15830_v56 = vld [vmem:[#allocation2 + $0xc] sm:$0xf] }
  0xd9   : > { %v16122_v1 = vld [vmem:[#allocation2 + $0x924] sm:$0xf0]  ;;  %3038 = vmatpush.bf16.msra.mxu0 %v11902_v61  ;;  %3064 = vmatpush.bf16.msra.mxu2 %v10882_v63  ;;  %v16014_v61 = vld [vmem:[#allocation2 + $0x5cc] sm:$0xf]  ;;  %v10722_v4 = vor.u32 %v15830_v56, %v10719_v58 }
  0xda   : > { %v12125_v2 = vld [vmem:[#allocation2 + $0xb08] sm:$0xf]  ;;  %v11870_v29 = vor.u32 %v16122_v1, %v11869_v0  ;;  %v16078_v63 = vld [vmem:[#allocation2 + $0x7cc] sm:$0xf] }
  0xdb   : > { %v16186_v27 = vld [vmem:[#allocation2 + $0xb24] sm:$0xf0]  ;;  %3051 = vmatpush.bf16.msra.mxu1 %v12158_v62  ;;  %3077 = vmatpush.bf16.msra.mxu3 %v11138_v3  ;;  %v11455_v62 = vld [vmem:[#allocation2 + $0x5e8] sm:$0xf0] }
  0xdc   : > { %v12126_v8 = vor.u32 %v16186_v27, %v12125_v2  ;;  %v11837_v10 = vld [vmem:[#allocation2 + $0x8c8] sm:$0xf]  ;;  %v11711_v1 = vld [vmem:[#allocation2 + $0x7e8] sm:$0xf0] }
  0xdd   : > { %v16114_v11 = vld [vmem:[#allocation2 + $0x8e4] sm:$0xf0]  ;;  %3039 = vmatpush.bf16.msra.mxu0 %v11870_v29  ;;  %3065 = vmatpush.bf16.msra.mxu2 %v10850_v9  ;;  %v16142_v2 = vld [vmem:[#allocation2 + $0x9cc] sm:$0xf]  ;;  %v11458_v29 = vor.u32 %v16014_v61, %v11455_v62 }
  0xde   : > { %v12093_v12 = vld [vmem:[#allocation2 + $0xac8] sm:$0xf]  ;;  %v11838_v19 = vor.u32 %v16114_v11, %v11837_v10  ;;  %v11967_v3 = vld [vmem:[#allocation2 + $0x9e8] sm:$0xf0] }
  0xdf   : > { %v16178_v14 = vld [vmem:[#allocation2 + $0xae4] sm:$0xf0]  ;;  %3052 = vmatpush.bf16.msra.mxu1 %v12126_v8  ;;  %3078 = vmatpush.bf16.msra.mxu3 %v11106_v13  ;;  %v11714_v8 = vor.u32 %v16078_v63, %v11711_v1  ;;  %v11970_v9 = vor.u32 %v16142_v2, %v11967_v3  ;;  %v16006_v10 = vld [vmem:[#allocation2 + $0x58c] sm:$0xf]  ;;  %v12226_v13 = vor.u32 %v16206_v5, %v12223_v6  ;;  %v17713_v3 = vld [vmem:[#allocation4] sm:$0xff] }
  0xe0   : > { %v12094_v20 = vor.u32 %v16178_v14, %v12093_v12  ;;  %v11805_v22 = vld [vmem:[#allocation2 + $0x888] sm:$0xf]  ;;  %v11423_v11 = vld [vmem:[#allocation2 + $0x5a8] sm:$0xf0] }
  0xe1   : > { %v16106_v23 = vld [vmem:[#allocation2 + $0x8a4] sm:$0xf0]  ;;  %3040 = vmatpush.bf16.msra.mxu0 %v11838_v19  ;;  %3066 = vmatpush.bf16.msra.mxu2 %v10818_v21  ;;  %v16070_v12 = vld [vmem:[#allocation2 + $0x78c] sm:$0xf]  ;;  %v11426_v19 = vor.u32 %v16006_v10, %v11423_v11  ;;  %v2812_v10 = vperm.slane %v17713_v3, 0 }
  0xe2   : > { %v12061_v24 = vld [vmem:[#allocation2 + $0xa88] sm:$0xf]  ;;  %v11806_v37 = vor.u32 %v16106_v23, %v11805_v22  ;;  %v11679_v14 = vld [vmem:[#allocation2 + $0x7a8] sm:$0xf0] }
  0xe3   : > { %v16170_v31 = vld [vmem:[#allocation2 + $0xaa4] sm:$0xf0]  ;;  %3053 = vmatpush.bf16.msra.mxu1 %v12094_v20  ;;  %3079 = vmatpush.bf16.msra.mxu3 %v11074_v26  ;;  %v11935_v16 = vld [vmem:[#allocation2 + $0x9a8] sm:$0xf0]  ;;  %v11682_v20 = vor.u32 %v16070_v12, %v11679_v14 }
  0xe4   : > { %v12062_v38 = vor.u32 %v16170_v31, %v12061_v24  ;;  %v11773_v40 = vld [vmem:[#allocation2 + $0x848] sm:$0xf]  ;;  %v16198_v17 = vld [vmem:[#allocation2 + $0xb8c] sm:$0xf]  ;;  %v11938_v21 = vor.u32 %v16134_v15, %v11935_v16 }
  0xe5   : > { %v16098_v41 = vld [vmem:[#allocation2 + $0x864] sm:$0xf0]  ;;  %3041 = vmatpush.bf16.msra.mxu0 %v11806_v37  ;;  %3067 = vmatpush.bf16.msra.mxu2 %v10786_v39  ;;  %v12191_v18 = vld [vmem:[#allocation2 + $0xba8] sm:$0xf0] }
  0xe6   : > { %v12029_v42 = vld [vmem:[#allocation2 + $0xa48] sm:$0xf]  ;;  %v11774_v49 = vor.u32 %v16098_v41, %v11773_v40  ;;  %v15998_v22 = vld [vmem:[#allocation2 + $0x54c] sm:$0xf]  ;;  %v12194_v26 = vor.u32 %v16198_v17, %v12191_v18 }
  0xe7   : > { %v16162_v44 = vld [vmem:[#allocation2 + $0xa64] sm:$0xf0]  ;;  %3054 = vmatpush.bf16.msra.mxu1 %v12062_v38  ;;  %3080 = vmatpush.bf16.msra.mxu3 %v11042_v43  ;;  %v11391_v23 = vld [vmem:[#allocation2 + $0x568] sm:$0xf0] }
  0xe8   : > { %v11741_v50 = vld [vmem:[#allocation2 + $0x808] sm:$0xf]  ;;  %v12030_v52 = vor.u32 %v16162_v44, %v12029_v42  ;;  %v16062_v24 = vld [vmem:[#allocation2 + $0x74c] sm:$0xf]  ;;  %v11394_v37 = vor.u32 %v15998_v22, %v11391_v23 }
  0xe9   : > { %v16090_v51 = vld [vmem:[#allocation2 + $0x824] sm:$0xf0]  ;;  %3042 = vmatpush.bf16.msra.mxu0 %v11774_v49  ;;  %3068 = vmatpush.bf16.msra.mxu2 %v10754_v53  ;;  %v11647_v31 = vld [vmem:[#allocation2 + $0x768] sm:$0xf0] }
  0xea   : > { %v11997_v54 = vld [vmem:[#allocation2 + $0xa08] sm:$0xf]  ;;  %v11742_v0 = vor.u32 %v16090_v51, %v11741_v50  ;;  %v16126_v32 = vld [vmem:[#allocation2 + $0x94c] sm:$0xf]  ;;  %v11650_v38 = vor.u32 %v16062_v24, %v11647_v31 }
  0xeb   : > { %v16154_v55 = vld [vmem:[#allocation2 + $0xa24] sm:$0xf0]  ;;  %3055 = vmatpush.bf16.msra.mxu1 %v12030_v52  ;;  %3081 = vmatpush.bf16.msra.mxu3 %v11010_v57  ;;  %v11903_v33 = vld [vmem:[#allocation2 + $0x968] sm:$0xf0] }
  0xec   : > { %v11998_v27 = vor.u32 %v16154_v55, %v11997_v54  ;;  %v16190_v35 = vld [vmem:[#allocation2 + $0xb4c] sm:$0xf]  ;;  %v11906_v39 = vor.u32 %v16126_v32, %v11903_v33 }
  0xed   : > { %3043 = vmatpush.bf16.msra.mxu0 %v11742_v0  ;;  %3069 = vmatpush.bf16.msra.mxu2 %v10722_v4  ;;  %v12159_v36 = vld [vmem:[#allocation2 + $0xb68] sm:$0xf0] }
  0xee   : > { %v15990_v40 = vld [vmem:[#allocation2 + $0x50c] sm:$0xf]  ;;  %v12162_v43 = vor.u32 %v16190_v35, %v12159_v36 }
  0xef   : > { %3056 = vmatpush.bf16.msra.mxu1 %v11998_v27  ;;  %3082 = vmatpush.bf16.msra.mxu3 %v10978_v7  ;;  %v11359_v41 = vld [vmem:[#allocation2 + $0x528] sm:$0xf0] }
  0xf0   : > { %3044 = vmatmul.bf16.vlgmr.msra.gmra.mxu0 %v17693_v25  ;;  %3070 = vmatmul.bf16.vlgmr.msra.gmra.mxu2 %v17683_v28  ;;  %v16054_v42 = vld [vmem:[#allocation2 + $0x70c] sm:$0xf]  ;;  %v11362_v28 = vor.u32 %v15990_v40, %v11359_v41  ;;  %v11205_v40 = vld [vmem:[#allocation2 + $0x3d0] sm:$0xf] }
  0xf1   : > { %3088 = vmatpush.bf16.msrb.mxu0 %v11458_v29  ;;  %3114 = vmatpush.bf16.msrb.mxu2 %v11970_v9  ;;  %v11615_v25 = vld [vmem:[#allocation2 + $0x728] sm:$0xf0] }
  0xf2   : > { %3057 = vmatmul.bf16.vlgmr.msra.gmra.mxu1 %v17695_v30  ;;  %3083 = vmatmul.bf16.vlgmr.msra.gmra.mxu3 %v17687_v34  ;;  %v16118_v44 = vld [vmem:[#allocation2 + $0x90c] sm:$0xf]  ;;  %v11618_v47 = vor.u32 %v16054_v42, %v11615_v25  ;;  %v11461_v25 = vld [vmem:[#allocation2 + $0x5d0] sm:$0xf] }
  0xf3   : > { %3101 = vmatpush.bf16.msrb.mxu1 %v11714_v8  ;;  %3127 = vmatpush.bf16.msrb.mxu3 %v12226_v13  ;;  %v11871_v45 = vld [vmem:[#allocation2 + $0x928] sm:$0xf0] }
  0xf4   : > { %v16182_v46 = vld [vmem:[#allocation2 + $0xb0c] sm:$0xf]  ;;  %v11874_v34 = vor.u32 %v16118_v44, %v11871_v45  ;;  %v16019_v44 = vld [vmem:[#allocation2 + $0x5ec] sm:$0xf0] }
  0xf5   : > { %3089 = vmatpush.bf16.msrb.mxu0 %v11426_v19  ;;  %3115 = vmatpush.bf16.msrb.mxu2 %v11938_v21  ;;  %v12127_v30 = vld [vmem:[#allocation2 + $0xb28] sm:$0xf0] }
  0xf6   : > { %v15982_v48 = vld [vmem:[#allocation2 + $0x4cc] sm:$0xf]  ;;  %v12130_v51 = vor.u32 %v16182_v46, %v12127_v30  ;;  %v11717_v30 = vld [vmem:[#allocation2 + $0x7d0] sm:$0xf] }
  0xf7   : > { %3102 = vmatpush.bf16.msrb.mxu1 %v11682_v20  ;;  %3128 = vmatpush.bf16.msrb.mxu3 %v12194_v26  ;;  %v11327_v49 = vld [vmem:[#allocation2 + $0x4e8] sm:$0xf0]  ;;  %v2837_v20 = vpop.f32.mrf.mxu0 }
  0xf8   : > { %v16046_v50 = vld [vmem:[#allocation2 + $0x6cc] sm:$0xf]  ;;  %v11330_v57 = vor.u32 %v15982_v48, %v11327_v49  ;;  %v2838_v31 = vadd.f32 %v2837_v20, %v2812_v10  ;;  %v16003_v10 = vld [vmem:[#allocation2 + $0x56c] sm:$0xf0] }
  0xf9   : > { %3090 = vmatpush.bf16.msrb.mxu0 %v11394_v37  ;;  %3116 = vmatpush.bf16.msrb.mxu2 %v11906_v39  ;;  %v11583_v52 = vld [vmem:[#allocation2 + $0x6e8] sm:$0xf0]  ;;  %v15891_v39 = vld [vmem:[#allocation2 + $0x1ec] sm:$0xf0] }
  0xfa   : > { %v16110_v53 = vld [vmem:[#allocation2 + $0x8cc] sm:$0xf]  ;;  %v11586_v59 = vor.u32 %v16046_v50, %v11583_v52  ;;  %v2876_v50 = vpop.f32.mrf.mxu3  ;;  %v11462_v52 = vor.u32 %v16019_v44, %v11461_v25  ;;  %v11077_v25 = vld [vmem:[#allocation2 + $0x2d0] sm:$0xf] }
  0xfb   : > { %3103 = vmatpush.bf16.msrb.mxu1 %v11650_v38  ;;  %3129 = vmatpush.bf16.msrb.mxu3 %v12162_v43  ;;  %v11839_v54 = vld [vmem:[#allocation2 + $0x8e8] sm:$0xf0]  ;;  %v10949_v38 = vld [vmem:[#allocation2 + $0x1d0] sm:$0xf] }
  0xfc   : > { %v16174_v55 = vld [vmem:[#allocation2 + $0xacc] sm:$0xf]  ;;  %v11842_v60 = vor.u32 %v16110_v53, %v11839_v54  ;;  %v15955_v43 = vld [vmem:[#allocation2 + $0x3ec] sm:$0xf0]  ;;  %v10950_v48 = vor.u32 %v15891_v39, %v10949_v38 }
  0xfd   : > { %v12095_v56 = vld [vmem:[#allocation2 + $0xae8] sm:$0xf0]  ;;  %3091 = vmatpush.bf16.msrb.mxu0 %v11362_v28  ;;  %3117 = vmatpush.bf16.msrb.mxu2 %v11874_v34  ;;  %v16083_v28 = vld [vmem:[#allocation2 + $0x7ec] sm:$0xf0] }
  0xfe   : > { %v15974_v58 = vld [vmem:[#allocation2 + $0x48c] sm:$0xf]  ;;  %v12098_v0 = vor.u32 %v16174_v55, %v12095_v56  ;;  %v10917_v53 = vld [vmem:[#allocation2 + $0x190] sm:$0xf]  ;;  %v11718_v56 = vor.u32 %v16083_v28, %v11717_v30 }
  0xff   : > { %3104 = vmatpush.bf16.msrb.mxu1 %v11618_v47  ;;  %v11295_v61 = vld [vmem:[#allocation2 + $0x4a8] sm:$0xf0]  ;;  %3130 = vmatpush.bf16.msrb.mxu3 %v12130_v51  ;;  %v2863_v47 = vpop.f32.mrf.mxu2  ;;  %v11206_v51 = vor.u32 %v15955_v43, %v11205_v40  ;;  %v15883_v54 = vld [vmem:[#allocation2 + $0x1ac] sm:$0xf0] }
 0x100   : > { %v16038_v62 = vld [vmem:[#allocation2 + $0x68c] sm:$0xf]  ;;  %v11298_v5 = vor.u32 %v15974_v58, %v11295_v61  ;;  %v11173_v55 = vld [vmem:[#allocation2 + $0x390] sm:$0xf]  ;;  %v2839_v61 = vpop.f32.mrf.mxu0 }
 0x101   : > { %v11551_v63 = vld [vmem:[#allocation2 + $0x6a8] sm:$0xf0]  ;;  %3092 = vmatpush.bf16.msrb.mxu0 %v11330_v57  ;;  %3118 = vmatpush.bf16.msrb.mxu2 %v11842_v60  ;;  %v2850_v32 = vpop.f32.mrf.mxu1  ;;  %v15947_v57 = vld [vmem:[#allocation2 + $0x3ac] sm:$0xf0] }
 0x102   : > { %v16102_v1 = vld [vmem:[#allocation2 + $0x88c] sm:$0xf]  ;;  %v11554_v7 = vor.u32 %v16038_v62, %v11551_v63  ;;  %v2851_v41 = vadd.f32 %v2850_v32, %v2838_v31  ;;  %v11429_v58 = vld [vmem:[#allocation2 + $0x590] sm:$0xf] }
 0x103   : > { %v11807_v2 = vld [vmem:[#allocation2 + $0x8a8] sm:$0xf0]  ;;  %3105 = vmatpush.bf16.msrb.mxu1 %v11586_v59  ;;  %3131 = vmatpush.bf16.msrb.mxu3 %v12098_v0  ;;  %v16011_v59 = vld [vmem:[#allocation2 + $0x5ac] sm:$0xf0] }
 0x104   : > { %v16166_v27 = vld [vmem:[#allocation2 + $0xa8c] sm:$0xf]  ;;  %v11810_v29 = vor.u32 %v16102_v1, %v11807_v2  ;;  %v2864_v49 = vadd.f32 %v2863_v47, %v2851_v41  ;;  %v11685_v62 = vld [vmem:[#allocation2 + $0x790] sm:$0xf]  ;;  %v10918_v1 = vor.u32 %v15883_v54, %v10917_v53  ;;  %v11174_v2 = vor.u32 %v15947_v57, %v11173_v55 }
 0x105   : > { %v12063_v4 = vld [vmem:[#allocation2 + $0xaa8] sm:$0xf0]  ;;  %3093 = vmatpush.bf16.msrb.mxu0 %v11298_v5  ;;  %v16075_v63 = vld [vmem:[#allocation2 + $0x7ac] sm:$0xf0] }
 0x106   : > { %v15966_v6 = vld [vmem:[#allocation2 + $0x44c] sm:$0xf]  ;;  %v12066_v11 = vor.u32 %v16166_v27, %v12063_v4  ;;  %3119 = vmatpush.bf16.msrb.mxu2 %v11810_v29  ;;  %v2877_v60 = vadd.f32 %v2876_v50, %v2864_v49  ;;  %v11430_v27 = vor.u32 %v16011_v59, %v11429_v58  ;;  %v10885_v4 = vld [vmem:[#allocation2 + $0x150] sm:$0xf]  ;;  %v17716_v29 = vld [vmem:[#allocation1 + $0x24] sm:$0xff] }
 0x107   : > { %v11263_v8 = vld [vmem:[#allocation2 + $0x468] sm:$0xf0]  ;;  %3106 = vmatpush.bf16.msrb.mxu1 %v11554_v7  ;;  %v15875_v5 = vld [vmem:[#allocation2 + $0x16c] sm:$0xf0]  ;;  %v11686_v7 = vor.u32 %v16075_v63, %v11685_v62 }
 0x108   : > { %v16030_v9 = vld [vmem:[#allocation2 + $0x64c] sm:$0xf]  ;;  %v11266_v17 = vor.u32 %v15966_v6, %v11263_v8  ;;  %3132 = vmatpush.bf16.msrb.mxu3 %v12066_v11  ;;  %v11141_v6 = vld [vmem:[#allocation2 + $0x350] sm:$0xf] }
 0x109   : > { %v11519_v12 = vld [vmem:[#allocation2 + $0x668] sm:$0xf0]  ;;  %v2852_v0 = vpop.f32.mrf.mxu1  ;;  %v15939_v8 = vld [vmem:[#allocation2 + $0x36c] sm:$0xf0] }
 0x10a   : > { %v16094_v13 = vld [vmem:[#allocation2 + $0x84c] sm:$0xf]  ;;  %v11522_v21 = vor.u32 %v16030_v9, %v11519_v12  ;;  %3094 = vmatpush.bf16.msrb.mxu0 %v11266_v17  ;;  %v11397_v9 = vld [vmem:[#allocation2 + $0x550] sm:$0xf] }
 0x10b   : > { %v11775_v14 = vld [vmem:[#allocation2 + $0x868] sm:$0xf0]  ;;  %v11653_v11 = vld [vmem:[#allocation2 + $0x750] sm:$0xf]  ;;  %v11398_v20 = vor.u32 %v16003_v10, %v11397_v9 }
 0x10c   : > { %v16158_v15 = vld [vmem:[#allocation2 + $0xa4c] sm:$0xf]  ;;  %v11778_v22 = vor.u32 %v16094_v13, %v11775_v14  ;;  %3107 = vmatpush.bf16.msrb.mxu1 %v11522_v21  ;;  %v16067_v12 = vld [vmem:[#allocation2 + $0x76c] sm:$0xf0] }
 0x10d   : > { %v12031_v16 = vld [vmem:[#allocation2 + $0xa68] sm:$0xf0]  ;;  %v17725_v17 = vld [vmem:[#allocation1 + $0x1b] sm:$0xff] }
 0x10e   : > { %v15958_v18 = vld [vmem:[#allocation2 + $0x40c] sm:$0xf]  ;;  %v12034_v33 = vor.u32 %v16158_v15, %v12031_v16  ;;  %3120 = vmatpush.bf16.msrb.mxu2 %v11778_v22  ;;  %v2865_v15 = vpop.f32.mrf.mxu2  ;;  %v10886_v16 = vor.u32 %v15875_v5, %v10885_v4  ;;  %v10853_v21 = vld [vmem:[#allocation2 + $0x110] sm:$0xf] }
 0x10f   : > { %v11231_v19 = vld [vmem:[#allocation2 + $0x428] sm:$0xf0]  ;;  %v15867_v22 = vld [vmem:[#allocation2 + $0x12c] sm:$0xf0] }
 0x110   : > { %v16022_v23 = vld [vmem:[#allocation2 + $0x60c] sm:$0xf]  ;;  %v11234_v42 = vor.u32 %v15958_v18, %v11231_v19  ;;  %3133 = vmatpush.bf16.msrb.mxu3 %v12034_v33  ;;  %v2878_v18 = vpop.f32.mrf.mxu3  ;;  %v11142_v19 = vor.u32 %v15939_v8, %v11141_v6  ;;  %v11365_v31 = vld [vmem:[#allocation2 + $0x510] sm:$0xf] }
 0x111   : > { %v11487_v24 = vld [vmem:[#allocation2 + $0x628] sm:$0xf0]  ;;  %v15995_v32 = vld [vmem:[#allocation2 + $0x52c] sm:$0xf0]  ;;  %v2902_v39 = vpop.f32.mrf.mxu1 }
 0x112   : > { %v16086_v26 = vld [vmem:[#allocation2 + $0x80c] sm:$0xf]  ;;  %v11490_v45 = vor.u32 %v16022_v23, %v11487_v24  ;;  %3095 = vmatpush.bf16.msrb.mxu0 %v11234_v42  ;;  %v11109_v23 = vld [vmem:[#allocation2 + $0x310] sm:$0xf]  ;;  %v11654_v24 = vor.u32 %v16067_v12, %v11653_v11  ;;  %v11366_v41 = vor.u32 %v15995_v32, %v11365_v31 }
 0x113   : > { %v11743_v35 = vld [vmem:[#allocation2 + $0x828] sm:$0xf0]  ;;  %v11621_v33 = vld [vmem:[#allocation2 + $0x710] sm:$0xf] }
 0x114   : > { %v16150_v36 = vld [vmem:[#allocation2 + $0xa0c] sm:$0xf]  ;;  %v11746_v46 = vor.u32 %v16086_v26, %v11743_v35  ;;  %3108 = vmatpush.bf16.msrb.mxu1 %v11490_v45  ;;  %v15931_v26 = vld [vmem:[#allocation2 + $0x32c] sm:$0xf0] }
 0x115   : > { %v11999_v37 = vld [vmem:[#allocation2 + $0xa28] sm:$0xf0]  ;;  %v16059_v35 = vld [vmem:[#allocation2 + $0x72c] sm:$0xf0]  ;;  %v11110_v40 = vor.u32 %v15931_v26, %v11109_v23 }
 0x116   : > { %v12002_v34 = vor.u32 %v16150_v36, %v11999_v37  ;;  %3121 = vmatpush.bf16.msrb.mxu2 %v11746_v46  ;;  %3140 = vmatpush.bf16.msra.mxu0 %v10950_v48  ;;  %v17719_v13 = vld [vmem:[#allocation1 + $0x12] sm:$0xff]  ;;  %v2889_v36 = vpop.f32.mrf.mxu0  ;;  %v10854_v37 = vor.u32 %v15867_v22, %v10853_v21  ;;  %v11622_v44 = vor.u32 %v16059_v35, %v11621_v33  ;;  %v2813_v48 = vperm.slane %v17713_v3, 1  ;;  %v2915_v59 = vpop.f32.mrf.mxu2 }
 0x117   : > { %3096 = vmatmul.bf16.vlgmr.msrb.gmra.mxu0 %v17719_v13  ;;  %v17722_v14 = vld [vmem:[#allocation1 + $0x2d] sm:$0xff]  ;;  %3109 = vmatmul.bf16.vlgmr.msrb.gmra.mxu1 %v17725_v17  ;;  %v2890_v38 = vadd.f32 %v2889_v36, %v2877_v60  ;;  %v10821_v42 = vld [vmem:[#allocation2 + $0xd0] sm:$0xf] }
 0x118   : > { %3134 = vmatpush.bf16.msrb.mxu3 %v12002_v34  ;;  %3153 = vmatpush.bf16.msra.mxu1 %v11206_v51  ;;  %v15859_v43 = vld [vmem:[#allocation2 + $0xec] sm:$0xf0]  ;;  %v2916_v62 = vadd.f32 %v2915_v59, %v2813_v48  ;;  %v2928_v63 = vpop.f32.mrf.mxu3 }
 0x119   : > { %3122 = vmatmul.bf16.vlgmr.msrb.gmra.mxu2 %v17716_v29  ;;  %v15923_v45 = vld [vmem:[#allocation2 + $0x2ec] sm:$0xf0]  ;;  %v17728_v28 = vadd.f32 %v2902_v39, %v2890_v38  ;;  %v10822_v49 = vor.u32 %v15859_v43, %v10821_v42  ;;  %v15887_v43 = vld [vmem:[#allocation2 + $0x1d4] sm:$0xf] }
 0x11a   : > { %3166 = vmatpush.bf16.msra.mxu2 %v11462_v52  ;;  %3141 = vmatpush.bf16.msra.mxu0 %v10918_v1  ;;  %v11333_v46 = vld [vmem:[#allocation2 + $0x4d0] sm:$0xf]  ;;  %v11078_v50 = vor.u32 %v15923_v45, %v11077_v25  ;;  %v17731_v8 = vadd.f32 %v2928_v63, %v2916_v62  ;;  %v10951_v25 = vld [vmem:[#allocation2 + $0x1f0] sm:$0xf0] }
 0x11b   : > { %3135 = vmatmul.bf16.vlgmr.msrb.gmra.mxu3 %v17722_v14  ;;  %v15987_v30 = vld [vmem:[#allocation2 + $0x4ec] sm:$0xf0] }
 0x11c   : > { %3179 = vmatpush.bf16.msra.mxu3 %v11718_v56  ;;  %3154 = vmatpush.bf16.msra.mxu1 %v11174_v2  ;;  %v11589_v47 = vld [vmem:[#allocation2 + $0x6d0] sm:$0xf]  ;;  %v11334_v51 = vor.u32 %v15987_v30, %v11333_v46  ;;  %v2904_v2 = vpop.f32.mrf.mxu1  ;;  %v15951_v46 = vld [vmem:[#allocation2 + $0x3d4] sm:$0xf] }
 0x11d   : > { %v16051_v34 = vld [vmem:[#allocation2 + $0x6ec] sm:$0xf0]  ;;  %v11207_v30 = vld [vmem:[#allocation2 + $0x3f0] sm:$0xf0] }
 0x11e   : > { %3167 = vmatpush.bf16.msra.mxu2 %v11430_v27  ;;  %3142 = vmatpush.bf16.msra.mxu0 %v10886_v16  ;;  %v10789_v52 = vld [vmem:[#allocation2 + $0x90] sm:$0xf]  ;;  %v11590_v55 = vor.u32 %v16051_v34, %v11589_v47  ;;  %v2891_v0 = vpop.f32.mrf.mxu0  ;;  %v2917_v36 = vpop.f32.mrf.mxu2 }
 0x11f   : > { %v15851_v53 = vld [vmem:[#allocation2 + $0xac] sm:$0xf0] }
 0x120   : > { %3180 = vmatpush.bf16.msra.mxu3 %v11686_v7  ;;  %3155 = vmatpush.bf16.msra.mxu1 %v11142_v19  ;;  %v11045_v54 = vld [vmem:[#allocation2 + $0x290] sm:$0xf]  ;;  %v10790_v1 = vor.u32 %v15851_v53, %v10789_v52  ;;  %v11210_v53 = vor.u32 %v15951_v46, %v11207_v30 }
 0x121   : > { %v15915_v56 = vld [vmem:[#allocation2 + $0x2ac] sm:$0xf0] }
 0x122   : > { %3168 = vmatpush.bf16.msra.mxu2 %v11398_v20  ;;  %3143 = vmatpush.bf16.msra.mxu0 %v10854_v37  ;;  %v11301_v57 = vld [vmem:[#allocation2 + $0x490] sm:$0xf]  ;;  %v11046_v27 = vor.u32 %v15915_v56, %v11045_v54  ;;  %v10919_v56 = vld [vmem:[#allocation2 + $0x1b0] sm:$0xf0] }
 0x123   : > { %v15979_v58 = vld [vmem:[#allocation2 + $0x4ac] sm:$0xf0] }
 0x124   : > { %3181 = vmatpush.bf16.msra.mxu3 %v11654_v24  ;;  %3156 = vmatpush.bf16.msra.mxu1 %v11110_v40  ;;  %v11557_v60 = vld [vmem:[#allocation2 + $0x690] sm:$0xf]  ;;  %v11302_v4 = vor.u32 %v15979_v58, %v11301_v57  ;;  %v2930_v40 = vpop.f32.mrf.mxu3  ;;  %v15943_v57 = vld [vmem:[#allocation2 + $0x394] sm:$0xf] }
 0x125   : > { %v16043_v61 = vld [vmem:[#allocation2 + $0x6ac] sm:$0xf0]  ;;  %v11175_v58 = vld [vmem:[#allocation2 + $0x3b0] sm:$0xf0] }
 0x126   : > { %3169 = vmatpush.bf16.msra.mxu2 %v11366_v41  ;;  %3144 = vmatpush.bf16.msra.mxu0 %v10822_v49  ;;  %v10757_v5 = vld [vmem:[#allocation2 + $0x50] sm:$0xf]  ;;  %v11558_v9 = vor.u32 %v16043_v61, %v11557_v60  ;;  %v10954_v49 = vor.u32 %v15887_v43, %v10951_v25  ;;  %v10823_v43 = vld [vmem:[#allocation2 + $0xf0] sm:$0xf0] }
 0x127   : > { %v15843_v6 = vld [vmem:[#allocation2 + $0x6c] sm:$0xf0]  ;;  %v15919_v25 = vld [vmem:[#allocation2 + $0x2d4] sm:$0xf] }
 0x128   : > { %3182 = vmatpush.bf16.msra.mxu3 %v11622_v44  ;;  %3157 = vmatpush.bf16.msra.mxu1 %v11078_v50  ;;  %v11013_v7 = vld [vmem:[#allocation2 + $0x250] sm:$0xf]  ;;  %v10758_v18 = vor.u32 %v15843_v6, %v10757_v5  ;;  %v15935_v5 = vld [vmem:[#allocation2 + $0x354] sm:$0xf] }
 0x129   : > { %v15907_v10 = vld [vmem:[#allocation2 + $0x26c] sm:$0xf0]  ;;  %v11143_v6 = vld [vmem:[#allocation2 + $0x370] sm:$0xf0] }
 0x12a   : > { %3170 = vmatpush.bf16.msra.mxu2 %v11334_v51  ;;  %v11269_v11 = vld [vmem:[#allocation2 + $0x450] sm:$0xf]  ;;  %3145 = vmatpush.bf16.msra.mxu0 %v10790_v1  ;;  %v11014_v21 = vor.u32 %v15907_v10, %v11013_v7  ;;  %v11178_v1 = vor.u32 %v15943_v57, %v11175_v58  ;;  %v17734_v7 = vld [vmem:[#allocation1] sm:$0xff]  ;;  %v17738_v10 = vld [vmem:[#allocation1 + $0x9] sm:$0xff] }
 0x12b   : > { %v15971_v12 = vld [vmem:[#allocation2 + $0x46c] sm:$0xf0]  ;;  %v11047_v57 = vld [vmem:[#allocation2 + $0x2b0] sm:$0xf0] }
 0x12c   : > { %3183 = vmatpush.bf16.msra.mxu3 %v11590_v55  ;;  %v11525_v15 = vld [vmem:[#allocation2 + $0x650] sm:$0xf]  ;;  %3158 = vmatpush.bf16.msra.mxu1 %v11046_v27  ;;  %v11270_v22 = vor.u32 %v15971_v12, %v11269_v11  ;;  %v15879_v55 = vld [vmem:[#allocation2 + $0x194] sm:$0xf] }
 0x12d   : > { %v16035_v16 = vld [vmem:[#allocation2 + $0x66c] sm:$0xf0]  ;;  %v10922_v61 = vor.u32 %v15879_v55, %v10919_v56  ;;  %v15871_v27 = vld [vmem:[#allocation2 + $0x154] sm:$0xf] }
 0x12e   : > { %v10725_v19 = vld [vmem:[#allocation2 + $0x10] sm:$0xf]  ;;  %3171 = vmatpush.bf16.msra.mxu2 %v11302_v4  ;;  %v11526_v31 = vor.u32 %v16035_v16, %v11525_v15  ;;  %3146 = vmatpush.bf16.msra.mxu0 %v10758_v18  ;;  %v10887_v4 = vld [vmem:[#allocation2 + $0x170] sm:$0xf0] }
 0x12f   : > { %v15835_v20 = vld [vmem:[#allocation2 + $0x2c] sm:$0xf0]  ;;  %v10890_v12 = vor.u32 %v15871_v27, %v10887_v4  ;;  %v15911_v56 = vld [vmem:[#allocation2 + $0x294] sm:$0xf] }
 0x130   : > { %v10981_v23 = vld [vmem:[#allocation2 + $0x210] sm:$0xf]  ;;  %3184 = vmatpush.bf16.msra.mxu3 %v11558_v9  ;;  %v10726_v41 = vor.u32 %v15835_v20, %v10725_v19  ;;  %3159 = vmatpush.bf16.msra.mxu1 %v11014_v21  ;;  %v11146_v19 = vor.u32 %v15935_v5, %v11143_v6  ;;  %v15863_v21 = vld [vmem:[#allocation2 + $0x114] sm:$0xf]  ;;  %v11050_v27 = vor.u32 %v15911_v56, %v11047_v57 }
 0x131   : > { %v15899_v24 = vld [vmem:[#allocation2 + $0x22c] sm:$0xf0]  ;;  %v15839_v5 = vld [vmem:[#allocation2 + $0x54] sm:$0xf] }
 0x132   : > { %v11237_v26 = vld [vmem:[#allocation2 + $0x410] sm:$0xf]  ;;  %3172 = vmatpush.bf16.msra.mxu2 %v11270_v22  ;;  %v10982_v44 = vor.u32 %v15899_v24, %v10981_v23  ;;  %3147 = vmatpush.bf16.msra.mxu0 %v10726_v41  ;;  %v10855_v22 = vld [vmem:[#allocation2 + $0x130] sm:$0xf0] }
 0x133   : > { %v15963_v32 = vld [vmem:[#allocation2 + $0x42c] sm:$0xf0]  ;;  %v15927_v23 = vld [vmem:[#allocation2 + $0x314] sm:$0xf] }
 0x134   : > { %v11493_v33 = vld [vmem:[#allocation2 + $0x610] sm:$0xf]  ;;  %v11238_v45 = vor.u32 %v15963_v32, %v11237_v26  ;;  %3185 = vmatpush.bf16.msra.mxu3 %v11526_v31  ;;  %3160 = vmatpush.bf16.msra.mxu1 %v10982_v44  ;;  %v11111_v24 = vld [vmem:[#allocation2 + $0x330] sm:$0xf0]  ;;  %v2941_v31 = vpop.f32.mrf.mxu0 }
 0x135   : > { %v16027_v35 = vld [vmem:[#allocation2 + $0x62c] sm:$0xf0]  ;;  %3148 = vmatmul.bf16.vlgmr.msra.gmra.mxu0 %v17734_v7  ;;  %v11114_v40 = vor.u32 %v15927_v23, %v11111_v24  ;;  %v11079_v44 = vld [vmem:[#allocation2 + $0x2f0] sm:$0xf0]  ;;  %v2980_v55 = vpop.f32.mrf.mxu3 }
 0x136   : > { %v11973_v37 = vld [vmem:[#allocation2 + $0x9d0] sm:$0xf]  ;;  %v11494_v47 = vor.u32 %v16027_v35, %v11493_v33  ;;  %3173 = vmatpush.bf16.msra.mxu2 %v11238_v45  ;;  %v10858_v33 = vor.u32 %v15863_v21, %v10855_v22  ;;  %v10759_v6 = vld [vmem:[#allocation2 + $0x70] sm:$0xf0] }
 0x137   : > { %v16147_v38 = vld [vmem:[#allocation2 + $0x9ec] sm:$0xf0]  ;;  %3161 = vmatmul.bf16.vlgmr.msra.gmra.mxu1 %v17738_v10  ;;  %v15831_v22 = vld [vmem:[#allocation2 + $0x14] sm:$0xf] }
 0x138   : > { %v12229_v39 = vld [vmem:[#allocation2 + $0xbd0] sm:$0xf]  ;;  %v11974_v34 = vor.u32 %v16147_v38, %v11973_v37  ;;  %3186 = vmatpush.bf16.msra.mxu3 %v11494_v47  ;;  %v2942_v38 = vadd.f32 %v2941_v31, %v17731_v8  ;;  %v11082_v8 = vor.u32 %v15919_v25, %v11079_v44  ;;  %v15895_v31 = vld [vmem:[#allocation2 + $0x214] sm:$0xf] }
 0x139   : > { %v16211_v42 = vld [vmem:[#allocation2 + $0xbec] sm:$0xf0]  ;;  %3174 = vmatmul.bf16.vlgmr.msra.gmra.mxu2 %v17719_v13  ;;  %v16207_v25 = vld [vmem:[#allocation2 + $0xbd4] sm:$0xf] }
 0x13a   : > { %v12230_v48 = vor.u32 %v16211_v42, %v12229_v39  ;;  %v11941_v50 = vld [vmem:[#allocation2 + $0x990] sm:$0xf]  ;;  %3192 = vmatpush.bf16.msrb.mxu0 %v11974_v34  ;;  %3218 = vmatpush.bf16.msrb.mxu2 %v10954_v49  ;;  %v2954_v39 = vpop.f32.mrf.mxu1  ;;  %v15855_v42 = vld [vmem:[#allocation2 + $0xd4] sm:$0xf] }
 0x13b   : > { %v16139_v51 = vld [vmem:[#allocation2 + $0x9ac] sm:$0xf0]  ;;  %3187 = vmatmul.bf16.vlgmr.msra.gmra.mxu3 %v17725_v17  ;;  %v2955_v45 = vadd.f32 %v2954_v39, %v2942_v38  ;;  %v10826_v47 = vor.u32 %v15855_v42, %v10823_v43  ;;  %v11719_v39 = vld [vmem:[#allocation2 + $0x7f0] sm:$0xf0] }
 0x13c   : > { %v12197_v52 = vld [vmem:[#allocation2 + $0xb90] sm:$0xf]  ;;  %v11942_v59 = vor.u32 %v16139_v51, %v11941_v50  ;;  %3205 = vmatpush.bf16.msrb.mxu1 %v12230_v48  ;;  %3231 = vmatpush.bf16.msrb.mxu3 %v11210_v53  ;;  %v2967_v50 = vpop.f32.mrf.mxu2  ;;  %v10791_v53 = vld [vmem:[#allocation2 + $0xb0] sm:$0xf0] }
 0x13d   : > { %v16203_v54 = vld [vmem:[#allocation2 + $0xbac] sm:$0xf0]  ;;  %v12231_v44 = vld [vmem:[#allocation2 + $0xbf0] sm:$0xf0] }
 0x13e   : > { %v12198_v60 = vor.u32 %v16203_v54, %v12197_v52  ;;  %v11909_v62 = vld [vmem:[#allocation2 + $0x950] sm:$0xf]  ;;  %3193 = vmatpush.bf16.msrb.mxu0 %v11942_v59  ;;  %3219 = vmatpush.bf16.msrb.mxu2 %v10922_v61  ;;  %v15847_v52 = vld [vmem:[#allocation2 + $0x94] sm:$0xf]  ;;  %v2968_v54 = vadd.f32 %v2967_v50, %v2955_v45  ;;  %v12234_v50 = vor.u32 %v16207_v25, %v12231_v44 }
 0x13f   : > { %v16131_v63 = vld [vmem:[#allocation2 + $0x96c] sm:$0xf0] }
 0x140   : > { %v12165_v0 = vld [vmem:[#allocation2 + $0xb50] sm:$0xf]  ;;  %v11910_v9 = vor.u32 %v16131_v63, %v11909_v62  ;;  %3206 = vmatpush.bf16.msrb.mxu1 %v12198_v60  ;;  %3232 = vmatpush.bf16.msrb.mxu3 %v11178_v1  ;;  %v17742_v59 = vadd.f32 %v2980_v55, %v2968_v54  ;;  %v2943_v60 = vpop.f32.mrf.mxu0  ;;  %v10794_v62 = vor.u32 %v15847_v52, %v10791_v53  ;;  %v11943_v52 = vld [vmem:[#allocation2 + $0x9b0] sm:$0xf0] }
 0x141   : > { %v16195_v2 = vld [vmem:[#allocation2 + $0xb6c] sm:$0xf0]  ;;  %v16199_v53 = vld [vmem:[#allocation2 + $0xb94] sm:$0xf] }
 0x142   : > { %v12166_v11 = vor.u32 %v16195_v2, %v12165_v0  ;;  %v11877_v15 = vld [vmem:[#allocation2 + $0x910] sm:$0xf]  ;;  %3194 = vmatpush.bf16.msrb.mxu0 %v11910_v9  ;;  %3220 = vmatpush.bf16.msrb.mxu2 %v10890_v12  ;;  %v2956_v2 = vpop.f32.mrf.mxu1  ;;  %v15903_v9 = vld [vmem:[#allocation2 + $0x254] sm:$0xf] }
 0x143   : > { %v16123_v16 = vld [vmem:[#allocation2 + $0x92c] sm:$0xf0]  ;;  %v12199_v54 = vld [vmem:[#allocation2 + $0xbb0] sm:$0xf0] }
 0x144   : > { %v12133_v18 = vld [vmem:[#allocation2 + $0xb10] sm:$0xf]  ;;  %v11878_v26 = vor.u32 %v16123_v16, %v11877_v15  ;;  %3207 = vmatpush.bf16.msrb.mxu1 %v12166_v11  ;;  %3233 = vmatpush.bf16.msrb.mxu3 %v11146_v19  ;;  %v11015_v11 = vld [vmem:[#allocation2 + $0x270] sm:$0xf0]  ;;  %v10762_v19 = vor.u32 %v15839_v5, %v10759_v6  ;;  %v2969_v23 = vpop.f32.mrf.mxu2 }
 0x145   : > { %v16187_v20 = vld [vmem:[#allocation2 + $0xb2c] sm:$0xf0]  ;;  %v11018_v24 = vor.u32 %v15903_v9, %v11015_v11  ;;  %v11399_v60 = vld [vmem:[#allocation2 + $0x570] sm:$0xf0] }
 0x146   : > { %v12134_v32 = vor.u32 %v16187_v20, %v12133_v18  ;;  %v11845_v35 = vld [vmem:[#allocation2 + $0x8d0] sm:$0xf]  ;;  %3195 = vmatpush.bf16.msrb.mxu0 %v11878_v26  ;;  %3221 = vmatpush.bf16.msrb.mxu2 %v10858_v33  ;;  %v10727_v26 = vld [vmem:[#allocation2 + $0x30] sm:$0xf0]  ;;  %v2982_v33 = vpop.f32.mrf.mxu3 }
 0x147   : > { %v16115_v36 = vld [vmem:[#allocation2 + $0x8ec] sm:$0xf0]  ;;  %v10730_v43 = vor.u32 %v15831_v22, %v10727_v26  ;;  %v16191_v2 = vld [vmem:[#allocation2 + $0xb54] sm:$0xf] }
 0x148   : > { %v12101_v37 = vld [vmem:[#allocation2 + $0xad0] sm:$0xf]  ;;  %v11846_v46 = vor.u32 %v16115_v36, %v11845_v35  ;;  %3208 = vmatpush.bf16.msrb.mxu1 %v12134_v32  ;;  %3234 = vmatpush.bf16.msrb.mxu3 %v11114_v40  ;;  %v10983_v32 = vld [vmem:[#allocation2 + $0x230] sm:$0xf0] }
 0x149   : > { %v16179_v41 = vld [vmem:[#allocation2 + $0xaec] sm:$0xf0]  ;;  %v16015_v35 = vld [vmem:[#allocation2 + $0x5d4] sm:$0xf]  ;;  %v10986_v45 = vor.u32 %v15895_v31, %v10983_v32 }
 0x14a   : > { %v12102_v30 = vor.u32 %v16179_v41, %v12101_v37  ;;  %v11813_v34 = vld [vmem:[#allocation2 + $0x890] sm:$0xf]  ;;  %3196 = vmatpush.bf16.msrb.mxu0 %v11846_v46  ;;  %3222 = vmatpush.bf16.msrb.mxu2 %v10826_v47  ;;  %v11463_v36 = vld [vmem:[#allocation2 + $0x5f0] sm:$0xf0] }
 0x14b   : > { %v16107_v48 = vld [vmem:[#allocation2 + $0x8ac] sm:$0xf0]  ;;  %v16079_v37 = vld [vmem:[#allocation2 + $0x7d4] sm:$0xf]  ;;  %v11466_v46 = vor.u32 %v16015_v35, %v11463_v36 }
 0x14c   : > { %v12069_v49 = vld [vmem:[#allocation2 + $0xa90] sm:$0xf]  ;;  %v11814_v58 = vor.u32 %v16107_v48, %v11813_v34  ;;  %3209 = vmatpush.bf16.msrb.mxu1 %v12102_v30  ;;  %3235 = vmatpush.bf16.msrb.mxu3 %v11082_v8  ;;  %v16143_v40 = vld [vmem:[#allocation2 + $0x9d4] sm:$0xf]  ;;  %v11722_v30 = vor.u32 %v16079_v37, %v11719_v39 }
 0x14d   : > { %v16171_v51 = vld [vmem:[#allocation2 + $0xaac] sm:$0xf0]  ;;  %v11975_v41 = vld [vmem:[#allocation2 + $0x9f0] sm:$0xf0] }
 0x14e   : > { %v12070_v61 = vor.u32 %v16171_v51, %v12069_v49  ;;  %v11781_v63 = vld [vmem:[#allocation2 + $0x850] sm:$0xf]  ;;  %3197 = vmatpush.bf16.msrb.mxu0 %v11814_v58  ;;  %3223 = vmatpush.bf16.msrb.mxu2 %v10794_v62  ;;  %v11978_v47 = vor.u32 %v16143_v40, %v11975_v41  ;;  %v16007_v34 = vld [vmem:[#allocation2 + $0x594] sm:$0xf]  ;;  %v12202_v62 = vor.u32 %v16199_v53, %v12199_v54 }
 0x14f   : > { %v16099_v0 = vld [vmem:[#allocation2 + $0x86c] sm:$0xf0]  ;;  %v11431_v48 = vld [vmem:[#allocation2 + $0x5b0] sm:$0xf0]  ;;  %v3006_v37 = vpop.f32.mrf.mxu1 }
 0x150   : > { %v12037_v1 = vld [vmem:[#allocation2 + $0xa50] sm:$0xf]  ;;  %v11782_v12 = vor.u32 %v16099_v0, %v11781_v63  ;;  %3210 = vmatpush.bf16.msrb.mxu1 %v12070_v61  ;;  %3236 = vmatpush.bf16.msrb.mxu3 %v11050_v27  ;;  %v16071_v49 = vld [vmem:[#allocation2 + $0x794] sm:$0xf]  ;;  %v11434_v55 = vor.u32 %v16007_v34, %v11431_v48 }
 0x151   : > { %v16163_v4 = vld [vmem:[#allocation2 + $0xa6c] sm:$0xf0]  ;;  %v11687_v8 = vld [vmem:[#allocation2 + $0x7b0] sm:$0xf0] }
 0x152   : > { %v11749_v15 = vld [vmem:[#allocation2 + $0x810] sm:$0xf]  ;;  %v12038_v18 = vor.u32 %v16163_v4, %v12037_v1  ;;  %3198 = vmatpush.bf16.msrb.mxu0 %v11782_v12  ;;  %3224 = vmatpush.bf16.msrb.mxu2 %v10762_v19  ;;  %v16135_v51 = vld [vmem:[#allocation2 + $0x994] sm:$0xf]  ;;  %v11690_v56 = vor.u32 %v16071_v49, %v11687_v8 }
 0x153   : > { %v16091_v16 = vld [vmem:[#allocation2 + $0x82c] sm:$0xf0]  ;;  %v11946_v57 = vor.u32 %v16135_v51, %v11943_v52  ;;  %v15999_v58 = vld [vmem:[#allocation2 + $0x554] sm:$0xf]  ;;  %v3019_v34 = vpop.f32.mrf.mxu2 }
 0x154   : > { %v12005_v20 = vld [vmem:[#allocation2 + $0xa10] sm:$0xf]  ;;  %v11750_v38 = vor.u32 %v16091_v16, %v11749_v15  ;;  %3211 = vmatpush.bf16.msrb.mxu1 %v12038_v18  ;;  %3237 = vmatpush.bf16.msrb.mxu3 %v11018_v24  ;;  %v16063_v61 = vld [vmem:[#allocation2 + $0x754] sm:$0xf]  ;;  %v11402_v4 = vor.u32 %v15999_v58, %v11399_v60  ;;  %v2814_v15 = vperm.slane %v17713_v3, 2  ;;  %v2993_v24 = vpop.f32.mrf.mxu0 }
 0x155   : > { %v16155_v21 = vld [vmem:[#allocation2 + $0xa2c] sm:$0xf0]  ;;  %v11655_v63 = vld [vmem:[#allocation2 + $0x770] sm:$0xf0]  ;;  %v3032_v52 = vpop.f32.mrf.mxu3 }
 0x156   : > { %v12006_v42 = vor.u32 %v16155_v21, %v12005_v20  ;;  %3199 = vmatpush.bf16.msrb.mxu0 %v11750_v38  ;;  %3225 = vmatpush.bf16.msrb.mxu2 %v10730_v43  ;;  %v16127_v0 = vld [vmem:[#allocation2 + $0x954] sm:$0xf]  ;;  %v11658_v6 = vor.u32 %v16063_v61, %v11655_v63  ;;  %v2994_v36 = vadd.f32 %v2993_v24, %v2814_v15 }
 0x157   : > { %v11911_v1 = vld [vmem:[#allocation2 + $0x970] sm:$0xf0] }
 0x158   : > { %3212 = vmatpush.bf16.msrb.mxu1 %v12006_v42  ;;  %3238 = vmatpush.bf16.msrb.mxu3 %v10986_v45  ;;  %v12167_v27 = vld [vmem:[#allocation2 + $0xb70] sm:$0xf0]  ;;  %v11914_v9 = vor.u32 %v16127_v0, %v11911_v1  ;;  %v3007_v43 = vadd.f32 %v3006_v37, %v2994_v36  ;;  %v3008_v0 = vpop.f32.mrf.mxu1  ;;  %v15956_v37 = vld [vmem:[#allocation2 + $0x3f4] sm:$0xf0] }
 0x159   : > { %3200 = vmatmul.bf16.vlgmr.msrb.gmra.mxu0 %v17716_v29  ;;  %3226 = vmatmul.bf16.vlgmr.msrb.gmra.mxu2 %v17734_v7  ;;  %v15991_v5 = vld [vmem:[#allocation2 + $0x514] sm:$0xf]  ;;  %v12170_v16 = vor.u32 %v16191_v2, %v12167_v27  ;;  %v11661_v0 = vld [vmem:[#allocation2 + $0x758] sm:$0xf] }
 0x15a   : > { %3244 = vmatpush.bf16.msra.mxu0 %v11466_v46  ;;  %3270 = vmatpush.bf16.msra.mxu2 %v11978_v47  ;;  %v11367_v11 = vld [vmem:[#allocation2 + $0x530] sm:$0xf0]  ;;  %v3020_v51 = vadd.f32 %v3019_v34, %v3007_v43 }
 0x15b   : > { %3213 = vmatmul.bf16.vlgmr.msrb.gmra.mxu1 %v17722_v14  ;;  %3239 = vmatmul.bf16.vlgmr.msrb.gmra.mxu3 %v17738_v10  ;;  %v16055_v12 = vld [vmem:[#allocation2 + $0x714] sm:$0xf]  ;;  %v11370_v23 = vor.u32 %v15991_v5, %v11367_v11 }
 0x15c   : > { %3257 = vmatpush.bf16.msra.mxu1 %v11722_v30  ;;  %3283 = vmatpush.bf16.msra.mxu3 %v12234_v50  ;;  %v11623_v18 = vld [vmem:[#allocation2 + $0x730] sm:$0xf0] }
 0x15d   : > { %v16119_v19 = vld [vmem:[#allocation2 + $0x914] sm:$0xf]  ;;  %v11626_v26 = vor.u32 %v16055_v12, %v11623_v18 }
 0x15e   : > { %3245 = vmatpush.bf16.msra.mxu0 %v11434_v55  ;;  %3271 = vmatpush.bf16.msra.mxu2 %v11946_v57  ;;  %v11879_v20 = vld [vmem:[#allocation2 + $0x930] sm:$0xf0]  ;;  %v2995_v57 = vpop.f32.mrf.mxu0 }
 0x15f   : > { %v16183_v21 = vld [vmem:[#allocation2 + $0xb14] sm:$0xf]  ;;  %v11882_v31 = vor.u32 %v16119_v19, %v11879_v20  ;;  %v15876_v57 = vld [vmem:[#allocation2 + $0x174] sm:$0xf0] }
 0x160   : > { %3258 = vmatpush.bf16.msra.mxu1 %v11690_v56  ;;  %3284 = vmatpush.bf16.msra.mxu3 %v12202_v62  ;;  %v12135_v22 = vld [vmem:[#allocation2 + $0xb30] sm:$0xf0]  ;;  %v17749_v56 = vadd.f32 %v3032_v52, %v3020_v51  ;;  %v16076_v51 = vld [vmem:[#allocation2 + $0x7b4] sm:$0xf0] }
 0x161   : > { %v15983_v32 = vld [vmem:[#allocation2 + $0x4d4] sm:$0xf]  ;;  %v12138_v3 = vor.u32 %v16183_v21, %v12135_v22  ;;  %v3021_v21 = vpop.f32.mrf.mxu2 }
 0x162   : > { %3246 = vmatpush.bf16.msra.mxu0 %v11402_v4  ;;  %3272 = vmatpush.bf16.msra.mxu2 %v11914_v9  ;;  %v11335_v33 = vld [vmem:[#allocation2 + $0x4f0] sm:$0xf0] }
 0x163   : > { %v16047_v35 = vld [vmem:[#allocation2 + $0x6d4] sm:$0xf]  ;;  %v11338_v25 = vor.u32 %v15983_v32, %v11335_v33  ;;  %v10957_v32 = vld [vmem:[#allocation2 + $0x1d8] sm:$0xf] }
 0x164   : > { %3259 = vmatpush.bf16.msra.mxu1 %v11658_v6  ;;  %3285 = vmatpush.bf16.msra.mxu3 %v12170_v16  ;;  %v11591_v38 = vld [vmem:[#allocation2 + $0x6f0] sm:$0xf0]  ;;  %v15892_v33 = vld [vmem:[#allocation2 + $0x1f4] sm:$0xf0] }
 0x165   : > { %v16111_v39 = vld [vmem:[#allocation2 + $0x8d4] sm:$0xf]  ;;  %v11594_v44 = vor.u32 %v16047_v35, %v11591_v38  ;;  %v11213_v35 = vld [vmem:[#allocation2 + $0x3d8] sm:$0xf] }
 0x166   : > { %v11847_v40 = vld [vmem:[#allocation2 + $0x8f0] sm:$0xf0]  ;;  %3247 = vmatpush.bf16.msra.mxu0 %v11370_v23  ;;  %3273 = vmatpush.bf16.msra.mxu2 %v11882_v31  ;;  %v3034_v31 = vpop.f32.mrf.mxu3  ;;  %v16020_v38 = vld [vmem:[#allocation2 + $0x5f4] sm:$0xf0] }
 0x167   : > { %v16175_v41 = vld [vmem:[#allocation2 + $0xad4] sm:$0xf]  ;;  %v11850_v45 = vor.u32 %v16111_v39, %v11847_v40  ;;  %v15924_v31 = vld [vmem:[#allocation2 + $0x2f4] sm:$0xf0] }
 0x168   : > { %v12103_v42 = vld [vmem:[#allocation2 + $0xaf0] sm:$0xf0]  ;;  %3260 = vmatpush.bf16.msra.mxu1 %v11626_v26  ;;  %3286 = vmatpush.bf16.msra.mxu3 %v12138_v3  ;;  %v11469_v3 = vld [vmem:[#allocation2 + $0x5d8] sm:$0xf] }
 0x169   : > { %v15975_v46 = vld [vmem:[#allocation2 + $0x494] sm:$0xf]  ;;  %v12106_v48 = vor.u32 %v16175_v41, %v12103_v42  ;;  %v11725_v41 = vld [vmem:[#allocation2 + $0x7d8] sm:$0xf] }
 0x16a   : > { %v11303_v30 = vld [vmem:[#allocation2 + $0x4b0] sm:$0xf0]  ;;  %3248 = vmatpush.bf16.msra.mxu0 %v11338_v25  ;;  %3274 = vmatpush.bf16.msra.mxu2 %v11850_v45  ;;  %v16084_v42 = vld [vmem:[#allocation2 + $0x7f4] sm:$0xf0]  ;;  %v10958_v25 = vor.u32 %v15892_v33, %v10957_v32  ;;  %v11470_v45 = vor.u32 %v16020_v38, %v11469_v3  ;;  %v17758_v3 = vld [vmem:[#allocation4] sm:$0xff] }
 0x16b   : > { %v16039_v47 = vld [vmem:[#allocation2 + $0x694] sm:$0xf]  ;;  %v11306_v55 = vor.u32 %v15975_v46, %v11303_v30  ;;  %v10925_v46 = vld [vmem:[#allocation2 + $0x198] sm:$0xf]  ;;  %v11726_v34 = vor.u32 %v16084_v42, %v11725_v41 }
 0x16c   : > { %v11559_v49 = vld [vmem:[#allocation2 + $0x6b0] sm:$0xf0]  ;;  %3261 = vmatpush.bf16.msra.mxu1 %v11594_v44  ;;  %3287 = vmatpush.bf16.msra.mxu3 %v12106_v48  ;;  %v11214_v44 = vor.u32 %v15956_v37, %v11213_v35  ;;  %v15884_v30 = vld [vmem:[#allocation2 + $0x1b4] sm:$0xf0] }
 0x16d   : > { %v16103_v50 = vld [vmem:[#allocation2 + $0x894] sm:$0xf]  ;;  %v11562_v58 = vor.u32 %v16039_v47, %v11559_v49  ;;  %v11181_v47 = vld [vmem:[#allocation2 + $0x398] sm:$0xf]  ;;  %v10926_v52 = vor.u32 %v15884_v30, %v10925_v46 }
 0x16e   : > { %v11815_v8 = vld [vmem:[#allocation2 + $0x8b0] sm:$0xf0]  ;;  %3249 = vmatpush.bf16.msra.mxu0 %v11306_v55  ;;  %v15948_v48 = vld [vmem:[#allocation2 + $0x3b4] sm:$0xf0] }
 0x16f   : > { %v16167_v53 = vld [vmem:[#allocation2 + $0xa94] sm:$0xf]  ;;  %v11818_v60 = vor.u32 %v16103_v50, %v11815_v8  ;;  %v11437_v49 = vld [vmem:[#allocation2 + $0x598] sm:$0xf] }
 0x170   : > { %v12071_v54 = vld [vmem:[#allocation2 + $0xab0] sm:$0xf0]  ;;  %3262 = vmatpush.bf16.msra.mxu1 %v11562_v58  ;;  %v16012_v50 = vld [vmem:[#allocation2 + $0x5b4] sm:$0xf0] }
 0x171   : > { %v15967_v61 = vld [vmem:[#allocation2 + $0x454] sm:$0xf]  ;;  %v12074_v1 = vor.u32 %v16167_v53, %v12071_v54  ;;  %3275 = vmatpush.bf16.msra.mxu2 %v11818_v60  ;;  %v11693_v8 = vld [vmem:[#allocation2 + $0x798] sm:$0xf]  ;;  %v11182_v53 = vor.u32 %v15948_v48, %v11181_v47  ;;  %v11438_v54 = vor.u32 %v16012_v50, %v11437_v49 }
 0x172   : > { %v11271_v62 = vld [vmem:[#allocation2 + $0x470] sm:$0xf0]  ;;  %v10893_v55 = vld [vmem:[#allocation2 + $0x158] sm:$0xf]  ;;  %v11694_v60 = vor.u32 %v16076_v51, %v11693_v8 }
 0x173   : > { %v16031_v63 = vld [vmem:[#allocation2 + $0x654] sm:$0xf]  ;;  %v11274_v9 = vor.u32 %v15967_v61, %v11271_v62  ;;  %3288 = vmatpush.bf16.msra.mxu3 %v12074_v1  ;;  %v11149_v58 = vld [vmem:[#allocation2 + $0x358] sm:$0xf]  ;;  %v3071_v30 = vpop.f32.mrf.mxu2 }
 0x174   : > { %v11527_v2 = vld [vmem:[#allocation2 + $0x670] sm:$0xf0]  ;;  %v15940_v61 = vld [vmem:[#allocation2 + $0x374] sm:$0xf0] }
 0x175   : > { %v16095_v27 = vld [vmem:[#allocation2 + $0x854] sm:$0xf]  ;;  %v11530_v15 = vor.u32 %v16031_v63, %v11527_v2  ;;  %3250 = vmatpush.bf16.msra.mxu0 %v11274_v9  ;;  %v11405_v62 = vld [vmem:[#allocation2 + $0x558] sm:$0xf]  ;;  %v10894_v2 = vor.u32 %v15876_v57, %v10893_v55  ;;  %v3084_v49 = vpop.f32.mrf.mxu3 }
 0x176   : > { %v11783_v4 = vld [vmem:[#allocation2 + $0x870] sm:$0xf0]  ;;  %v16004_v63 = vld [vmem:[#allocation2 + $0x574] sm:$0xf0] }
 0x177   : > { %v16159_v5 = vld [vmem:[#allocation2 + $0xa54] sm:$0xf]  ;;  %v11786_v16 = vor.u32 %v16095_v27, %v11783_v4  ;;  %3263 = vmatpush.bf16.msra.mxu1 %v11530_v15  ;;  %v16068_v1 = vld [vmem:[#allocation2 + $0x774] sm:$0xf0]  ;;  %v11150_v27 = vor.u32 %v15940_v61, %v11149_v58  ;;  %v11406_v4 = vor.u32 %v16004_v63, %v11405_v62 }
 0x178   : > { %v12039_v6 = vld [vmem:[#allocation2 + $0xa70] sm:$0xf0]  ;;  %v11662_v9 = vor.u32 %v16068_v1, %v11661_v0  ;;  %v15996_v15 = vld [vmem:[#allocation2 + $0x534] sm:$0xf0] }
 0x179   : > { %v15959_v11 = vld [vmem:[#allocation2 + $0x414] sm:$0xf]  ;;  %v12042_v22 = vor.u32 %v16159_v5, %v12039_v6  ;;  %3276 = vmatpush.bf16.msra.mxu2 %v11786_v16  ;;  %v10861_v5 = vld [vmem:[#allocation2 + $0x118] sm:$0xf] }
 0x17a   : > { %v11239_v12 = vld [vmem:[#allocation2 + $0x430] sm:$0xf0]  ;;  %v15868_v6 = vld [vmem:[#allocation2 + $0x134] sm:$0xf0] }
 0x17b   : > { %v16023_v18 = vld [vmem:[#allocation2 + $0x614] sm:$0xf]  ;;  %v11242_v36 = vor.u32 %v15959_v11, %v11239_v12  ;;  %3289 = vmatpush.bf16.msra.mxu3 %v12042_v22  ;;  %v15932_v11 = vld [vmem:[#allocation2 + $0x334] sm:$0xf0] }
 0x17c   : > { %v11495_v19 = vld [vmem:[#allocation2 + $0x630] sm:$0xf0]  ;;  %v11373_v12 = vld [vmem:[#allocation2 + $0x518] sm:$0xf] }
 0x17d   : > { %v16087_v20 = vld [vmem:[#allocation2 + $0x814] sm:$0xf]  ;;  %v11498_v39 = vor.u32 %v16023_v18, %v11495_v19  ;;  %3251 = vmatpush.bf16.msra.mxu0 %v11242_v36  ;;  %v11629_v16 = vld [vmem:[#allocation2 + $0x718] sm:$0xf]  ;;  %v3045_v18 = vpop.f32.mrf.mxu0  ;;  %v11374_v21 = vor.u32 %v15996_v15, %v11373_v12 }
 0x17e   : > { %v11751_v23 = vld [vmem:[#allocation2 + $0x830] sm:$0xf0]  ;;  %v3046_v19 = vadd.f32 %v3045_v18, %v17749_v56  ;;  %v10829_v22 = vld [vmem:[#allocation2 + $0xd8] sm:$0xf]  ;;  %v2815_v56 = vperm.slane %v17758_v3, 3  ;;  %v3073_v18 = vpop.f32.mrf.mxu2 }
 0x17f   : > { %v16151_v24 = vld [vmem:[#allocation2 + $0xa14] sm:$0xf]  ;;  %v11754_v40 = vor.u32 %v16087_v20, %v11751_v23  ;;  %3264 = vmatpush.bf16.msra.mxu1 %v11498_v39  ;;  %v15860_v23 = vld [vmem:[#allocation2 + $0xf4] sm:$0xf0] }
 0x180   : > { %v12007_v26 = vld [vmem:[#allocation2 + $0xa30] sm:$0xf0]  ;;  %3252 = vmatmul.bf16.vlgmr.msra.gmra.mxu0 %v17719_v13  ;;  %v16060_v13 = vld [vmem:[#allocation2 + $0x734] sm:$0xf0]  ;;  %v10830_v38 = vor.u32 %v15860_v23, %v10829_v22  ;;  %v3072_v48 = vadd.f32 %v3071_v30, %v2815_v56  ;;  %v15888_v23 = vld [vmem:[#allocation2 + $0x1dc] sm:$0xf] }
 0x181   : > { %v12010_v43 = vor.u32 %v16151_v24, %v12007_v26  ;;  %3277 = vmatpush.bf16.msra.mxu2 %v11754_v40  ;;  %3296 = vmatpush.bf16.msrb.mxu0 %v10958_v25  ;;  %v11085_v24 = vld [vmem:[#allocation2 + $0x2d8] sm:$0xf]  ;;  %v11630_v26 = vor.u32 %v16060_v13, %v11629_v16 }
 0x182   : > { %3265 = vmatmul.bf16.vlgmr.msra.gmra.mxu1 %v17725_v17  ;;  %v3058_v17 = vpop.f32.mrf.mxu1  ;;  %v11341_v32 = vld [vmem:[#allocation2 + $0x4d8] sm:$0xf]  ;;  %v11086_v39 = vor.u32 %v15924_v31, %v11085_v24  ;;  %v17761_v58 = vadd.f32 %v3084_v49, %v3072_v48  ;;  %v10959_v24 = vld [vmem:[#allocation2 + $0x1f8] sm:$0xf0] }
 0x183   : > { %3290 = vmatpush.bf16.msra.mxu3 %v12010_v43  ;;  %3309 = vmatpush.bf16.msrb.mxu1 %v11214_v44  ;;  %v15988_v33 = vld [vmem:[#allocation2 + $0x4f4] sm:$0xf0]  ;;  %v17756_v35 = vadd.f32 %v3058_v17, %v3046_v19 }
 0x184   : > { %3278 = vmatmul.bf16.vlgmr.msra.gmra.mxu2 %v17716_v29  ;;  %v11117_v29 = vld [vmem:[#allocation2 + $0x318] sm:$0xf]  ;;  %v11342_v40 = vor.u32 %v15988_v33, %v11341_v32  ;;  %v15952_v32 = vld [vmem:[#allocation2 + $0x3dc] sm:$0xf] }
 0x185   : > { %3322 = vmatpush.bf16.msrb.mxu2 %v11470_v45  ;;  %3297 = vmatpush.bf16.msrb.mxu0 %v10926_v52  ;;  %v11118_v20 = vor.u32 %v15932_v11, %v11117_v29  ;;  %v11597_v36 = vld [vmem:[#allocation2 + $0x6d8] sm:$0xf]  ;;  %v3047_v50 = vpop.f32.mrf.mxu0  ;;  %v11215_v33 = vld [vmem:[#allocation2 + $0x3f8] sm:$0xf0] }
 0x186   : > { %3291 = vmatmul.bf16.vlgmr.msra.gmra.mxu3 %v17722_v14  ;;  %v10862_v14 = vor.u32 %v15868_v6, %v10861_v5  ;;  %v16052_v37 = vld [vmem:[#allocation2 + $0x6f4] sm:$0xf0] }
 0x187   : > { %3335 = vmatpush.bf16.msrb.mxu3 %v11726_v34  ;;  %3310 = vmatpush.bf16.msrb.mxu1 %v11182_v53  ;;  %v10797_v41 = vld [vmem:[#allocation2 + $0x98] sm:$0xf]  ;;  %v11598_v25 = vor.u32 %v16052_v37, %v11597_v36 }
 0x188   : > { %v15852_v42 = vld [vmem:[#allocation2 + $0xb4] sm:$0xf0] }
 0x189   : > { %3323 = vmatpush.bf16.msrb.mxu2 %v11438_v54  ;;  %3298 = vmatpush.bf16.msrb.mxu0 %v10894_v2  ;;  %v11053_v43 = vld [vmem:[#allocation2 + $0x298] sm:$0xf]  ;;  %v10798_v8 = vor.u32 %v15852_v42, %v10797_v41  ;;  %v11218_v42 = vor.u32 %v15952_v32, %v11215_v33 }
 0x18a   : > { %v15916_v44 = vld [vmem:[#allocation2 + $0x2b4] sm:$0xf0]  ;;  %v3060_v51 = vpop.f32.mrf.mxu1 }
 0x18b   : > { %3336 = vmatpush.bf16.msrb.mxu3 %v11694_v60  ;;  %3311 = vmatpush.bf16.msrb.mxu1 %v11150_v27  ;;  %v11309_v45 = vld [vmem:[#allocation2 + $0x498] sm:$0xf]  ;;  %v11054_v52 = vor.u32 %v15916_v44, %v11053_v43  ;;  %v10927_v44 = vld [vmem:[#allocation2 + $0x1b8] sm:$0xf0] }
 0x18c   : > { %v15980_v46 = vld [vmem:[#allocation2 + $0x4b4] sm:$0xf0] }
 0x18d   : > { %3324 = vmatpush.bf16.msrb.mxu2 %v11406_v4  ;;  %3299 = vmatpush.bf16.msrb.mxu0 %v10862_v14  ;;  %v11565_v47 = vld [vmem:[#allocation2 + $0x698] sm:$0xf]  ;;  %v11310_v53 = vor.u32 %v15980_v46, %v11309_v45  ;;  %v15944_v45 = vld [vmem:[#allocation2 + $0x39c] sm:$0xf] }
 0x18e   : > { %v16044_v34 = vld [vmem:[#allocation2 + $0x6b4] sm:$0xf0]  ;;  %v11183_v46 = vld [vmem:[#allocation2 + $0x3b8] sm:$0xf0] }
 0x18f   : > { %3337 = vmatpush.bf16.msrb.mxu3 %v11662_v9  ;;  %3312 = vmatpush.bf16.msrb.mxu1 %v11118_v20  ;;  %v10765_v54 = vld [vmem:[#allocation2 + $0x58] sm:$0xf]  ;;  %v11566_v60 = vor.u32 %v16044_v34, %v11565_v47  ;;  %v3086_v20 = vpop.f32.mrf.mxu3 }
 0x190   : > { %v15844_v55 = vld [vmem:[#allocation2 + $0x74] sm:$0xf0]  ;;  %v15856_v20 = vld [vmem:[#allocation2 + $0xdc] sm:$0xf] }
 0x191   : > { %3325 = vmatpush.bf16.msrb.mxu2 %v11374_v21  ;;  %3300 = vmatpush.bf16.msrb.mxu0 %v10830_v38  ;;  %v11021_v57 = vld [vmem:[#allocation2 + $0x258] sm:$0xf]  ;;  %v10766_v2 = vor.u32 %v15844_v55, %v10765_v54  ;;  %v10962_v38 = vor.u32 %v15888_v23, %v10959_v24  ;;  %v15936_v54 = vld [vmem:[#allocation2 + $0x35c] sm:$0xf] }
 0x192   : > { %v15908_v61 = vld [vmem:[#allocation2 + $0x274] sm:$0xf0]  ;;  %v11151_v55 = vld [vmem:[#allocation2 + $0x378] sm:$0xf0] }
 0x193   : > { %3338 = vmatpush.bf16.msrb.mxu3 %v11630_v26  ;;  %3313 = vmatpush.bf16.msrb.mxu1 %v11086_v39  ;;  %v11277_v62 = vld [vmem:[#allocation2 + $0x458] sm:$0xf]  ;;  %v11022_v5 = vor.u32 %v15908_v61, %v11021_v57  ;;  %v17765_v57 = vld [vmem:[#allocation1 + $0x12] sm:$0xff]  ;;  %v11087_v23 = vld [vmem:[#allocation2 + $0x2f8] sm:$0xf0] }
 0x194   : > { %v15972_v63 = vld [vmem:[#allocation2 + $0x474] sm:$0xf0] }
 0x195   : > { %3326 = vmatpush.bf16.msrb.mxu2 %v11342_v40  ;;  %v11533_v0 = vld [vmem:[#allocation2 + $0x658] sm:$0xf]  ;;  %3301 = vmatpush.bf16.msrb.mxu0 %v10798_v8  ;;  %v11278_v6 = vor.u32 %v15972_v63, %v11277_v62  ;;  %v11186_v8 = vor.u32 %v15944_v45, %v11183_v46 }
 0x196   : > { %v16036_v1 = vld [vmem:[#allocation2 + $0x674] sm:$0xf0] }
 0x197   : > { %3339 = vmatpush.bf16.msrb.mxu3 %v11598_v25  ;;  %v10733_v27 = vld [vmem:[#allocation2 + $0x18] sm:$0xf]  ;;  %3314 = vmatpush.bf16.msrb.mxu1 %v11054_v52  ;;  %v11534_v12 = vor.u32 %v16036_v1, %v11533_v0  ;;  %v15880_v25 = vld [vmem:[#allocation2 + $0x19c] sm:$0xf] }
 0x198   : > { %v15836_v4 = vld [vmem:[#allocation2 + $0x34] sm:$0xf0]  ;;  %v10930_v34 = vor.u32 %v15880_v25, %v10927_v44  ;;  %v15872_v52 = vld [vmem:[#allocation2 + $0x15c] sm:$0xf] }
 0x199   : > { %3327 = vmatpush.bf16.msrb.mxu2 %v11310_v53  ;;  %v10989_v29 = vld [vmem:[#allocation2 + $0x218] sm:$0xf]  ;;  %3302 = vmatpush.bf16.msrb.mxu0 %v10766_v2  ;;  %v10734_v21 = vor.u32 %v15836_v4, %v10733_v27  ;;  %v10895_v53 = vld [vmem:[#allocation2 + $0x178] sm:$0xf0]  ;;  %v11154_v2 = vor.u32 %v15936_v54, %v11151_v55 }
 0x19a   : > { %v15900_v9 = vld [vmem:[#allocation2 + $0x234] sm:$0xf0]  ;;  %v10898_v63 = vor.u32 %v15872_v52, %v10895_v53  ;;  %v15864_v27 = vld [vmem:[#allocation2 + $0x11c] sm:$0xf] }
 0x19b   : > { %v11245_v11 = vld [vmem:[#allocation2 + $0x418] sm:$0xf]  ;;  %3340 = vmatpush.bf16.msrb.mxu3 %v11566_v60  ;;  %3315 = vmatpush.bf16.msrb.mxu1 %v11022_v5  ;;  %v10990_v26 = vor.u32 %v15900_v9, %v10989_v29  ;;  %v10863_v4 = vld [vmem:[#allocation2 + $0x138] sm:$0xf0]  ;;  %v3097_v9 = vpop.f32.mrf.mxu0 }
 0x19c   : > { %v15964_v15 = vld [vmem:[#allocation2 + $0x434] sm:$0xf0]  ;;  %v15928_v5 = vld [vmem:[#allocation2 + $0x31c] sm:$0xf]  ;;  %v3098_v18 = vadd.f32 %v3097_v9, %v17761_v58 }
 0x19d   : > { %v11501_v16 = vld [vmem:[#allocation2 + $0x618] sm:$0xf]  ;;  %3328 = vmatpush.bf16.msrb.mxu2 %v11278_v6  ;;  %v11246_v31 = vor.u32 %v15964_v15, %v11245_v11  ;;  %3303 = vmatpush.bf16.msrb.mxu0 %v10734_v21  ;;  %v11119_v6 = vld [vmem:[#allocation2 + $0x338] sm:$0xf0] }
 0x19e   : > { %v16028_v13 = vld [vmem:[#allocation2 + $0x634] sm:$0xf0]  ;;  %v10831_v21 = vld [vmem:[#allocation2 + $0xf8] sm:$0xf0] }
 0x19f   : > { %v11981_v14 = vld [vmem:[#allocation2 + $0x9d8] sm:$0xf]  ;;  %3341 = vmatpush.bf16.msrb.mxu3 %v11534_v12  ;;  %v11502_v36 = vor.u32 %v16028_v13, %v11501_v16  ;;  %3316 = vmatpush.bf16.msrb.mxu1 %v10990_v26  ;;  %v10866_v12 = vor.u32 %v15864_v27, %v10863_v4  ;;  %v10834_v32 = vor.u32 %v15856_v20, %v10831_v21  ;;  %v11055_v25 = vld [vmem:[#allocation2 + $0x2b8] sm:$0xf0] }
 0x1a0   : > { %v16148_v19 = vld [vmem:[#allocation2 + $0x9f4] sm:$0xf0]  ;;  %3304 = vmatmul.bf16.vlgmr.msrb.gmra.mxu0 %v17734_v7  ;;  %v15840_v52 = vld [vmem:[#allocation2 + $0x5c] sm:$0xf] }
 0x1a1   : > { %v12237_v17 = vld [vmem:[#allocation2 + $0xbd8] sm:$0xf]  ;;  %v11982_v37 = vor.u32 %v16148_v19, %v11981_v14  ;;  %3329 = vmatpush.bf16.msrb.mxu2 %v11246_v31  ;;  %v3110_v14 = vpop.f32.mrf.mxu1  ;;  %v11122_v19 = vor.u32 %v15928_v5, %v11119_v6  ;;  %v10767_v53 = vld [vmem:[#allocation2 + $0x78] sm:$0xf0] }
 0x1a2   : > { %v16212_v22 = vld [vmem:[#allocation2 + $0xbf4] sm:$0xf0]  ;;  %3317 = vmatmul.bf16.vlgmr.msrb.gmra.mxu1 %v17738_v10  ;;  %v3111_v24 = vadd.f32 %v3110_v14, %v3098_v18  ;;  %v15904_v54 = vld [vmem:[#allocation2 + $0x25c] sm:$0xf] }
 0x1a3   : > { %v12238_v56 = vor.u32 %v16212_v22, %v12237_v17  ;;  %v11949_v39 = vld [vmem:[#allocation2 + $0x998] sm:$0xf]  ;;  %3342 = vmatpush.bf16.msrb.mxu3 %v11502_v36  ;;  %3348 = vmatpush.bf16.msra.mxu0 %v11982_v37  ;;  %v15920_v22 = vld [vmem:[#allocation2 + $0x2dc] sm:$0xf]  ;;  %v3099_v46 = vpop.f32.mrf.mxu0 }
 0x1a4   : > { %v16140_v40 = vld [vmem:[#allocation2 + $0x9b4] sm:$0xf0]  ;;  %3330 = vmatmul.bf16.vlgmr.msrb.gmra.mxu2 %v17765_v57  ;;  %v11090_v58 = vor.u32 %v15920_v22, %v11087_v23  ;;  %v11023_v55 = vld [vmem:[#allocation2 + $0x278] sm:$0xf0] }
 0x1a5   : > { %v12205_v41 = vld [vmem:[#allocation2 + $0xb98] sm:$0xf]  ;;  %v11950_v30 = vor.u32 %v16140_v40, %v11949_v39  ;;  %3361 = vmatpush.bf16.msra.mxu1 %v12238_v56  ;;  %3374 = vmatpush.bf16.msra.mxu2 %v10962_v38  ;;  %v3123_v56 = vpop.f32.mrf.mxu2  ;;  %v15848_v39 = vld [vmem:[#allocation2 + $0x9c] sm:$0xf]  ;;  %v11026_v4 = vor.u32 %v15904_v54, %v11023_v55 }
 0x1a6   : > { %v16204_v43 = vld [vmem:[#allocation2 + $0xbb4] sm:$0xf0]  ;;  %v10799_v40 = vld [vmem:[#allocation2 + $0xb8] sm:$0xf0] }
 0x1a7   : > { %v12206_v47 = vor.u32 %v16204_v43, %v12205_v41  ;;  %v11917_v48 = vld [vmem:[#allocation2 + $0x958] sm:$0xf]  ;;  %3387 = vmatpush.bf16.msra.mxu3 %v11218_v42  ;;  %3349 = vmatpush.bf16.msra.mxu0 %v11950_v30  ;;  %v3124_v41 = vadd.f32 %v3123_v56, %v3111_v24  ;;  %v3136_v42 = vpop.f32.mrf.mxu3  ;;  %v15912_v43 = vld [vmem:[#allocation2 + $0x29c] sm:$0xf] }
 0x1a8   : > { %v16132_v49 = vld [vmem:[#allocation2 + $0x974] sm:$0xf0]  ;;  %v10735_v5 = vld [vmem:[#allocation2 + $0x38] sm:$0xf0] }
 0x1a9   : > { %v12173_v50 = vld [vmem:[#allocation2 + $0xb58] sm:$0xf]  ;;  %v11918_v60 = vor.u32 %v16132_v49, %v11917_v48  ;;  %3362 = vmatpush.bf16.msra.mxu1 %v12206_v47  ;;  %3375 = vmatpush.bf16.msra.mxu2 %v10930_v34  ;;  %v17772_v45 = vadd.f32 %v3136_v42, %v3124_v41  ;;  %v10802_v47 = vor.u32 %v15848_v39, %v10799_v40  ;;  %v15896_v6 = vld [vmem:[#allocation2 + $0x21c] sm:$0xf] }
 0x1aa   : > { %v16196_v51 = vld [vmem:[#allocation2 + $0xb74] sm:$0xf0]  ;;  %v16144_v18 = vld [vmem:[#allocation2 + $0x9dc] sm:$0xf] }
 0x1ab   : > { %v17768_v61 = vld [vmem:[#allocation1 + $0x1b] sm:$0xff]  ;;  %v12174_v62 = vor.u32 %v16196_v51, %v12173_v50  ;;  %3388 = vmatpush.bf16.msra.mxu3 %v11186_v8  ;;  %3350 = vmatpush.bf16.msra.mxu0 %v11918_v60  ;;  %v3112_v50 = vpop.f32.mrf.mxu1  ;;  %v11058_v8 = vor.u32 %v15912_v43, %v11055_v25  ;;  %v11983_v14 = vld [vmem:[#allocation2 + $0x9f8] sm:$0xf0] }
 0x1ac   : > { %3343 = vmatmul.bf16.vlgmr.msrb.gmra.mxu3 %v17768_v61  ;;  %v11885_v0 = vld [vmem:[#allocation2 + $0x918] sm:$0xf]  ;;  %v16208_v20 = vld [vmem:[#allocation2 + $0xbdc] sm:$0xf] }
 0x1ad   : > { %v16124_v7 = vld [vmem:[#allocation2 + $0x934] sm:$0xf0]  ;;  %3363 = vmatpush.bf16.msra.mxu1 %v12174_v62  ;;  %3376 = vmatpush.bf16.msra.mxu2 %v10898_v63  ;;  %v3125_v27 = vpop.f32.mrf.mxu2  ;;  %v12239_v21 = vld [vmem:[#allocation2 + $0xbf8] sm:$0xf0] }
 0x1ae   : > { %v12141_v1 = vld [vmem:[#allocation2 + $0xb18] sm:$0xf]  ;;  %v11886_v29 = vor.u32 %v16124_v7, %v11885_v0  ;;  %v10770_v7 = vor.u32 %v15840_v52, %v10767_v53  ;;  %v16136_v56 = vld [vmem:[#allocation2 + $0x99c] sm:$0xf]  ;;  %v17241_v53 = vld [vmem:[#allocation1 + $0x9] sm:$0xff] }
 0x1af   : > { %v16188_v10 = vld [vmem:[#allocation2 + $0xb34] sm:$0xf0]  ;;  %3389 = vmatpush.bf16.msra.mxu3 %v11154_v2  ;;  %v3138_v9 = vpop.f32.mrf.mxu3  ;;  %v12207_v39 = vld [vmem:[#allocation2 + $0xbb8] sm:$0xf0] }
 0x1b0   : > { %v12142_v11 = vor.u32 %v16188_v10, %v12141_v1  ;;  %v11853_v15 = vld [vmem:[#allocation2 + $0x8d8] sm:$0xf]  ;;  %3351 = vmatpush.bf16.msra.mxu0 %v11886_v29  ;;  %v15832_v10 = vld [vmem:[#allocation2 + $0x1c] sm:$0xf] }
 0x1b1   : > { %v16116_v16 = vld [vmem:[#allocation2 + $0x8f4] sm:$0xf0]  ;;  %3377 = vmatpush.bf16.msra.mxu2 %v10866_v12  ;;  %v10991_v29 = vld [vmem:[#allocation2 + $0x238] sm:$0xf0] }
 0x1b2   : > { %v12109_v13 = vld [vmem:[#allocation2 + $0xad8] sm:$0xf]  ;;  %v11854_v26 = vor.u32 %v16116_v16, %v11853_v15  ;;  %3364 = vmatpush.bf16.msra.mxu1 %v12142_v11  ;;  %v16016_v11 = vld [vmem:[#allocation2 + $0x5dc] sm:$0xf]  ;;  %v10994_v22 = vor.u32 %v15896_v6, %v10991_v29  ;;  %v3149_v6 = vpop.f32.mrf.mxu0 }
 0x1b3   : > { %v16180_v17 = vld [vmem:[#allocation2 + $0xaf4] sm:$0xf0]  ;;  %3390 = vmatpush.bf16.msra.mxu3 %v11122_v19  ;;  %v11471_v12 = vld [vmem:[#allocation2 + $0x5f8] sm:$0xf0] }
 0x1b4   : > { %v12110_v31 = vor.u32 %v16180_v17, %v12109_v13  ;;  %v11821_v33 = vld [vmem:[#allocation2 + $0x898] sm:$0xf]  ;;  %3352 = vmatpush.bf16.msra.mxu0 %v11854_v26  ;;  %v16080_v15 = vld [vmem:[#allocation2 + $0x7dc] sm:$0xf]  ;;  %v10738_v17 = vor.u32 %v15832_v10, %v10735_v5  ;;  %v11474_v23 = vor.u32 %v16016_v11, %v11471_v12  ;;  %v11986_v26 = vor.u32 %v16144_v18, %v11983_v14 }
 0x1b5   : > { %v16108_v36 = vld [vmem:[#allocation2 + $0x8b4] sm:$0xf0]  ;;  %3378 = vmatpush.bf16.msra.mxu2 %v10834_v32  ;;  %v11727_v13 = vld [vmem:[#allocation2 + $0x7f8] sm:$0xf0] }
 0x1b6   : > { %v12077_v37 = vld [vmem:[#allocation2 + $0xa98] sm:$0xf]  ;;  %v11822_v44 = vor.u32 %v16108_v36, %v11821_v33  ;;  %3365 = vmatpush.bf16.msra.mxu1 %v12110_v31  ;;  %v11730_v24 = vor.u32 %v16080_v15, %v11727_v13  ;;  %v16008_v31 = vld [vmem:[#allocation2 + $0x59c] sm:$0xf]  ;;  %v12242_v36 = vor.u32 %v16208_v20, %v12239_v21  ;;  %v3162_v13 = vpop.f32.mrf.mxu1 }
 0x1b7   : > { %v16172_v38 = vld [vmem:[#allocation2 + $0xab4] sm:$0xf0]  ;;  %3391 = vmatpush.bf16.msra.mxu3 %v11090_v58  ;;  %v11439_v32 = vld [vmem:[#allocation2 + $0x5b8] sm:$0xf0] }
 0x1b8   : > { %v12078_v30 = vor.u32 %v16172_v38, %v12077_v37  ;;  %v11789_v34 = vld [vmem:[#allocation2 + $0x858] sm:$0xf]  ;;  %3353 = vmatpush.bf16.msra.mxu0 %v11822_v44  ;;  %v16072_v33 = vld [vmem:[#allocation2 + $0x79c] sm:$0xf]  ;;  %v11442_v40 = vor.u32 %v16008_v31, %v11439_v32 }
 0x1b9   : > { %v16100_v48 = vld [vmem:[#allocation2 + $0x874] sm:$0xf0]  ;;  %3379 = vmatpush.bf16.msra.mxu2 %v10802_v47  ;;  %v11695_v37 = vld [vmem:[#allocation2 + $0x7b8] sm:$0xf0] }
 0x1ba   : > { %v12045_v49 = vld [vmem:[#allocation2 + $0xa58] sm:$0xf]  ;;  %v11790_v60 = vor.u32 %v16100_v48, %v11789_v34  ;;  %3366 = vmatpush.bf16.msra.mxu1 %v12078_v30  ;;  %v11951_v58 = vld [vmem:[#allocation2 + $0x9b8] sm:$0xf0]  ;;  %v11698_v41 = vor.u32 %v16072_v33, %v11695_v37 }
 0x1bb   : > { %v16164_v51 = vld [vmem:[#allocation2 + $0xa74] sm:$0xf0]  ;;  %3392 = vmatpush.bf16.msra.mxu3 %v11058_v8  ;;  %v16200_v38 = vld [vmem:[#allocation2 + $0xb9c] sm:$0xf]  ;;  %v11954_v42 = vor.u32 %v16136_v56, %v11951_v58 }
 0x1bc   : > { %v11757_v62 = vld [vmem:[#allocation2 + $0x818] sm:$0xf]  ;;  %v12046_v0 = vor.u32 %v16164_v51, %v12045_v49  ;;  %3354 = vmatpush.bf16.msra.mxu0 %v11790_v60  ;;  %v16000_v43 = vld [vmem:[#allocation2 + $0x55c] sm:$0xf]  ;;  %v12210_v30 = vor.u32 %v16200_v38, %v12207_v39  ;;  %v17777_v49 = vld [vmem:[#allocation1 + $0x2d] sm:$0xff] }
 0x1bd   : > { %v16092_v63 = vld [vmem:[#allocation2 + $0x834] sm:$0xf0]  ;;  %3380 = vmatpush.bf16.msra.mxu2 %v10770_v7  ;;  %v11407_v25 = vld [vmem:[#allocation2 + $0x578] sm:$0xf0] }
 0x1be   : > { %v12013_v1 = vld [vmem:[#allocation2 + $0xa18] sm:$0xf]  ;;  %v11758_v16 = vor.u32 %v16092_v63, %v11757_v62  ;;  %3367 = vmatpush.bf16.msra.mxu1 %v12046_v0  ;;  %v16064_v44 = vld [vmem:[#allocation2 + $0x75c] sm:$0xf]  ;;  %v11410_v52 = vor.u32 %v16000_v43, %v11407_v25  ;;  %v2816_v0 = vperm.slane %v17758_v3, 4 }
 0x1bf   : > { %v16156_v2 = vld [vmem:[#allocation2 + $0xa34] sm:$0xf0]  ;;  %3393 = vmatpush.bf16.msra.mxu3 %v11026_v4  ;;  %v17774_v46 = vld [vmem:[#allocation1 + $0x24] sm:$0xff] }
 0x1c0   : > { %v12014_v19 = vor.u32 %v16156_v2, %v12013_v1  ;;  %3355 = vmatpush.bf16.msra.mxu0 %v11758_v16  ;;  %v11663_v47 = vld [vmem:[#allocation2 + $0x778] sm:$0xf0]  ;;  %v3150_v16 = vadd.f32 %v3149_v6, %v2816_v0 }
 0x1c1   : > { %3381 = vmatpush.bf16.msra.mxu2 %v10738_v17  ;;  %v16128_v34 = vld [vmem:[#allocation2 + $0x95c] sm:$0xf]  ;;  %v11666_v55 = vor.u32 %v16064_v44, %v11663_v47  ;;  %v3151_v44 = vpop.f32.mrf.mxu0 }
 0x1c2   : > { %3368 = vmatpush.bf16.msra.mxu1 %v12014_v19  ;;  %v11919_v48 = vld [vmem:[#allocation2 + $0x978] sm:$0xf0]  ;;  %v12325_v44 = vld [vmem:[#allocation6 + $0xa0] sm:$0xf] }
 0x1c3   : > { %3394 = vmatpush.bf16.msra.mxu3 %v10994_v22  ;;  %3356 = vmatmul.bf16.vlgmr.msra.gmra.mxu0 %v17774_v46  ;;  %v17240_v50 = vld [vmem:[#allocation1] sm:$0xff]  ;;  %v11922_v60 = vor.u32 %v16128_v34, %v11919_v48  ;;  %v3163_v22 = vadd.f32 %v3162_v13, %v3150_v16  ;;  %v12485_v16 = vld [vmem:[#allocation6 + $0x1e0] sm:$0xf] }
 0x1c4   : > { %3400 = vmatpush.bf16.msrb.mxu0 %v11474_v23  ;;  %3382 = vmatmul.bf16.vlgmr.msra.gmra.mxu2 %v17240_v50  ;;  %v16192_v8 = vld [vmem:[#allocation2 + $0xb5c] sm:$0xf] }
 0x1c5   : > { %3426 = vmatpush.bf16.msrb.mxu2 %v11986_v26  ;;  %3369 = vmatmul.bf16.vlgmr.msra.gmra.mxu1 %v17777_v49  ;;  %v12175_v51 = vld [vmem:[#allocation2 + $0xb78] sm:$0xf0] }
 0x1c6   : > { %3413 = vmatpush.bf16.msrb.mxu1 %v11730_v24  ;;  %3395 = vmatmul.bf16.vlgmr.msra.gmra.mxu3 %v17241_v53  ;;  %v15992_v54 = vld [vmem:[#allocation2 + $0x51c] sm:$0xf]  ;;  %v12178_v7 = vor.u32 %v16192_v8, %v12175_v51  ;;  %v3164_v8 = vpop.f32.mrf.mxu1 }
 0x1c7   : > { %3439 = vmatpush.bf16.msrb.mxu3 %v12242_v36  ;;  %v11375_v62 = vld [vmem:[#allocation2 + $0x538] sm:$0xf0]  ;;  %v3175_v36 = vpop.f32.mrf.mxu2  ;;  %v16299_v8 = vld [vmem:[#allocation6 + $0x2ac] sm:$0xf0] }
 0x1c8   : > { %3401 = vmatpush.bf16.msrb.mxu0 %v11442_v40  ;;  %v16056_v63 = vld [vmem:[#allocation2 + $0x71c] sm:$0xf]  ;;  %v11378_v5 = vor.u32 %v15992_v54, %v11375_v62  ;;  %v3176_v39 = vadd.f32 %v3175_v36, %v3163_v22  ;;  %v3188_v40 = vpop.f32.mrf.mxu3  ;;  %v16339_v22 = vld [vmem:[#allocation6 + $0x3ec] sm:$0xf0]  ;;  %v12469_v36 = vld [vmem:[#allocation6 + $0x1c0] sm:$0xf] }
 0x1c9   : > { %3427 = vmatpush.bf16.msrb.mxu2 %v11954_v42  ;;  %v11631_v1 = vld [vmem:[#allocation2 + $0x738] sm:$0xf0] }
 0x1ca   : > { %3414 = vmatpush.bf16.msrb.mxu1 %v11698_v41  ;;  %v16120_v2 = vld [vmem:[#allocation2 + $0x91c] sm:$0xf]  ;;  %v11634_v29 = vor.u32 %v16056_v63, %v11631_v1  ;;  %v17781_v25 = vadd.f32 %v3188_v40, %v3176_v39  ;;  %v12725_v39 = vld [vmem:[#allocation6 + $0x3c0] sm:$0xf]  ;;  %v16335_v40 = vld [vmem:[#allocation6 + $0x3cc] sm:$0xf0] }
 0x1cb   : > { %3440 = vmatpush.bf16.msrb.mxu3 %v12210_v30  ;;  %v11887_v10 = vld [vmem:[#allocation2 + $0x938] sm:$0xf0] }
 0x1cc   : > { %v16184_v27 = vld [vmem:[#allocation2 + $0xb1c] sm:$0xf]  ;;  %3402 = vmatpush.bf16.msrb.mxu0 %v11410_v52  ;;  %v11890_v9 = vor.u32 %v16120_v2, %v11887_v10 }
 0x1cd   : > { %v12143_v4 = vld [vmem:[#allocation2 + $0xb38] sm:$0xf0]  ;;  %3428 = vmatpush.bf16.msrb.mxu2 %v11922_v60 }
 0x1ce   : > { %3415 = vmatpush.bf16.msrb.mxu1 %v11666_v55  ;;  %v15984_v11 = vld [vmem:[#allocation2 + $0x4dc] sm:$0xf]  ;;  %v12146_v18 = vor.u32 %v16184_v27, %v12143_v4 }
 0x1cf   : > { %v11343_v12 = vld [vmem:[#allocation2 + $0x4f8] sm:$0xf0]  ;;  %3441 = vmatpush.bf16.msrb.mxu3 %v12178_v7  ;;  %v3177_v4 = vpop.f32.mrf.mxu2 }
 0x1d0   : > { %v16048_v15 = vld [vmem:[#allocation2 + $0x6dc] sm:$0xf]  ;;  %3403 = vmatpush.bf16.msrb.mxu0 %v11378_v5  ;;  %v11346_v23 = vor.u32 %v15984_v11, %v11343_v12  ;;  %v3190_v11 = vpop.f32.mrf.mxu3  ;;  %v12357_v12 = vld [vmem:[#allocation6 + $0xe0] sm:$0xf] }
 0x1d1   : > { %v11599_v14 = vld [vmem:[#allocation2 + $0x6f8] sm:$0xf0]  ;;  %3429 = vmatpush.bf16.msrb.mxu2 %v11890_v9  ;;  %v16259_v11 = vld [vmem:[#allocation6 + $0x16c] sm:$0xf0] }
 0x1d2   : > { %v16112_v19 = vld [vmem:[#allocation2 + $0x8dc] sm:$0xf]  ;;  %3416 = vmatpush.bf16.msrb.mxu1 %v11634_v29  ;;  %v11602_v24 = vor.u32 %v16048_v15, %v11599_v14  ;;  %v16243_v15 = vld [vmem:[#allocation6 + $0xec] sm:$0xf0]  ;;  %v12613_v14 = vld [vmem:[#allocation6 + $0x2e0] sm:$0xf] }
 0x1d3   : > { %v11855_v17 = vld [vmem:[#allocation2 + $0x8f8] sm:$0xf0]  ;;  %3442 = vmatpush.bf16.msrb.mxu3 %v12146_v18  ;;  %v16275_v18 = vld [vmem:[#allocation6 + $0x1ec] sm:$0xf0] }
 0x1d4   : > { %v16176_v20 = vld [vmem:[#allocation2 + $0xadc] sm:$0xf]  ;;  %v11858_v26 = vor.u32 %v16112_v19, %v11855_v17  ;;  %3404 = vmatpush.bf16.msrb.mxu0 %v11346_v23  ;;  %v16307_v19 = vld [vmem:[#allocation6 + $0x2ec] sm:$0xf0] }
 0x1d5   : > { %v12111_v21 = vld [vmem:[#allocation2 + $0xaf8] sm:$0xf0] }
 0x1d6   : > { %v15976_v31 = vld [vmem:[#allocation2 + $0x49c] sm:$0xf]  ;;  %v12114_v37 = vor.u32 %v16176_v20, %v12111_v21  ;;  %3417 = vmatpush.bf16.msrb.mxu1 %v11602_v24  ;;  %3430 = vmatpush.bf16.msrb.mxu2 %v11858_v26  ;;  %v12741_v21 = vld [vmem:[#allocation6 + $0x3e0] sm:$0xf]  ;;  %v12358_v24 = vor.u32 %v16243_v15, %v12357_v12  ;;  %v12486_v26 = vor.u32 %v16275_v18, %v12485_v16  ;;  %v16291_v15 = vld [vmem:[#allocation6 + $0x26c] sm:$0xf0] }
 0x1d7   : > { %v11311_v32 = vld [vmem:[#allocation2 + $0x4b8] sm:$0xf0]  ;;  %v12549_v12 = vld [vmem:[#allocation6 + $0x260] sm:$0xf] }
 0x1d8   : > { %v16040_v33 = vld [vmem:[#allocation2 + $0x69c] sm:$0xf]  ;;  %v11314_v43 = vor.u32 %v15976_v31, %v11311_v32  ;;  %3443 = vmatpush.bf16.msrb.mxu3 %v12114_v37  ;;  %v12614_v31 = vor.u32 %v16307_v19, %v12613_v14  ;;  %v12341_v32 = vld [vmem:[#allocation6 + $0xc0] sm:$0xf]  ;;  %v12742_v37 = vor.u32 %v16339_v22, %v12741_v21  ;;  %v12550_v19 = vor.u32 %v16291_v15, %v12549_v12 }
 0x1d9   : > { %v11567_v56 = vld [vmem:[#allocation2 + $0x6b8] sm:$0xf0]  ;;  %v12677_v16 = vld [vmem:[#allocation6 + $0x360] sm:$0xf] }
 0x1da   : > { %v16104_v58 = vld [vmem:[#allocation2 + $0x89c] sm:$0xf]  ;;  %v11570_v30 = vor.u32 %v16040_v33, %v11567_v56  ;;  %3405 = vmatpush.bf16.msrb.mxu0 %v11314_v43  ;;  %v16239_v33 = vld [vmem:[#allocation6 + $0xcc] sm:$0xf0]  ;;  %v12405_v21 = vld [vmem:[#allocation6 + $0x140] sm:$0xf] }
 0x1db   : > { %v11823_v38 = vld [vmem:[#allocation2 + $0x8b8] sm:$0xf0]  ;;  %v16271_v56 = vld [vmem:[#allocation6 + $0x1cc] sm:$0xf0] }
 0x1dc   : > { %v16168_v41 = vld [vmem:[#allocation2 + $0xa9c] sm:$0xf]  ;;  %v11826_v47 = vor.u32 %v16104_v58, %v11823_v38  ;;  %3418 = vmatpush.bf16.msrb.mxu1 %v11570_v30  ;;  %v12597_v58 = vld [vmem:[#allocation6 + $0x2c0] sm:$0xf]  ;;  %v16303_v38 = vld [vmem:[#allocation6 + $0x2cc] sm:$0xf0] }
 0x1dd   : > { %v12079_v42 = vld [vmem:[#allocation2 + $0xab8] sm:$0xf0]  ;;  %v12598_v43 = vor.u32 %v16303_v38, %v12597_v58  ;;  %v16235_v30 = vld [vmem:[#allocation6 + $0xac] sm:$0xf0] }
 0x1de   : > { %v15968_v34 = vld [vmem:[#allocation2 + $0x45c] sm:$0xf]  ;;  %v12082_v51 = vor.u32 %v16168_v41, %v12079_v42  ;;  %3431 = vmatpush.bf16.msrb.mxu2 %v11826_v47  ;;  %v12342_v41 = vor.u32 %v16239_v33, %v12341_v32  ;;  %v12470_v42 = vor.u32 %v16271_v56, %v12469_v36  ;;  %v12453_v47 = vld [vmem:[#allocation6 + $0x1a0] sm:$0xf]  ;;  %v16319_v33 = vld [vmem:[#allocation6 + $0x34c] sm:$0xf0]  ;;  %v17793_v36 = vpop.f32.mrf.mxu3 }
 0x1df   : > { %v11279_v48 = vld [vmem:[#allocation2 + $0x478] sm:$0xf0]  ;;  %v12661_v32 = vld [vmem:[#allocation6 + $0x340] sm:$0xf] }
 0x1e0   : > { %v16032_v50 = vld [vmem:[#allocation2 + $0x65c] sm:$0xf]  ;;  %v11282_v62 = vor.u32 %v15968_v34, %v11279_v48  ;;  %3444 = vmatpush.bf16.msrb.mxu3 %v12082_v51  ;;  %v12726_v34 = vor.u32 %v16335_v40, %v12725_v39  ;;  %v16267_v48 = vld [vmem:[#allocation6 + $0x1ac] sm:$0xf0]  ;;  %v12709_v51 = vld [vmem:[#allocation6 + $0x3a0] sm:$0xf] }
 0x1e1   : > { %v11535_v52 = vld [vmem:[#allocation2 + $0x678] sm:$0xf0]  ;;  %v12261_v40 = vld [vmem:[#allocation6 + $0x20] sm:$0xf] }
 0x1e2   : > { %v16096_v53 = vld [vmem:[#allocation2 + $0x85c] sm:$0xf]  ;;  %v11538_v7 = vor.u32 %v16032_v50, %v11535_v52  ;;  %3406 = vmatpush.bf16.msrb.mxu0 %v11282_v62  ;;  %v12581_v50 = vld [vmem:[#allocation6 + $0x2a0] sm:$0xf]  ;;  %v16331_v52 = vld [vmem:[#allocation6 + $0x3ac] sm:$0xf0] }
 0x1e3   : > { %v11791_v54 = vld [vmem:[#allocation2 + $0x878] sm:$0xf0]  ;;  %v12437_v62 = vld [vmem:[#allocation6 + $0x180] sm:$0xf] }
 0x1e4   : > { %v16160_v55 = vld [vmem:[#allocation2 + $0xa5c] sm:$0xf]  ;;  %v11794_v1 = vor.u32 %v16096_v53, %v11791_v54  ;;  %3419 = vmatpush.bf16.msrb.mxu1 %v11538_v7  ;;  %v12326_v53 = vor.u32 %v16235_v30, %v12325_v44  ;;  %v12454_v54 = vor.u32 %v16267_v48, %v12453_v47  ;;  %v12565_v7 = vld [vmem:[#allocation6 + $0x280] sm:$0xf]  ;;  %v16251_v44 = vld [vmem:[#allocation6 + $0x12c] sm:$0xf0] }
 0x1e5   : > { %v12047_v60 = vld [vmem:[#allocation2 + $0xa78] sm:$0xf0]  ;;  %v12517_v30 = vld [vmem:[#allocation6 + $0x220] sm:$0xf]  ;;  %v16283_v47 = vld [vmem:[#allocation6 + $0x22c] sm:$0xf0] }
 0x1e6   : > { %v15960_v63 = vld [vmem:[#allocation2 + $0x41c] sm:$0xf]  ;;  %v12050_v5 = vor.u32 %v16160_v55, %v12047_v60  ;;  %3432 = vmatpush.bf16.msrb.mxu2 %v11794_v1  ;;  %v12582_v55 = vor.u32 %v16299_v8, %v12581_v50  ;;  %v12309_v60 = vld [vmem:[#allocation6 + $0x80] sm:$0xf]  ;;  %v16315_v48 = vld [vmem:[#allocation6 + $0x32c] sm:$0xf0] }
 0x1e7   : > { %v11247_v0 = vld [vmem:[#allocation2 + $0x438] sm:$0xf0]  ;;  %v12693_v1 = vld [vmem:[#allocation6 + $0x380] sm:$0xf] }
 0x1e8   : > { %v16024_v2 = vld [vmem:[#allocation2 + $0x61c] sm:$0xf]  ;;  %v11250_v13 = vor.u32 %v15960_v63, %v11247_v0  ;;  %3445 = vmatpush.bf16.msrb.mxu3 %v12050_v5  ;;  %v12710_v63 = vor.u32 %v16331_v52, %v12709_v51  ;;  %v16263_v0 = vld [vmem:[#allocation6 + $0x18c] sm:$0xf0]  ;;  %v12293_v5 = vld [vmem:[#allocation6 + $0x60] sm:$0xf]  ;;  %v12518_v52 = vor.u32 %v16283_v47, %v12517_v30 }
 0x1e9   : > { %v11503_v10 = vld [vmem:[#allocation2 + $0x638] sm:$0xf0]  ;;  %v12245_v8 = vld [vmem:[#allocation6] sm:$0xf]  ;;  %v16359_v30 = vld [vmem:[#allocation6 + $0x48c] sm:$0xf0] }
 0x1ea   : > { %v16088_v27 = vld [vmem:[#allocation2 + $0x81c] sm:$0xf]  ;;  %v11506_v17 = vor.u32 %v16024_v2, %v11503_v10  ;;  %3407 = vmatpush.bf16.msrb.mxu0 %v11250_v13  ;;  %v17787_v2 = vpop.f32.mrf.mxu0  ;;  %v17789_v10 = vpop.f32.mrf.mxu1  ;;  %v16323_v13 = vld [vmem:[#allocation6 + $0x36c] sm:$0xf0]  ;;  %v12949_v47 = vld [vmem:[#allocation6 + $0x580] sm:$0xf] }
 0x1eb   : > { %v11759_v6 = vld [vmem:[#allocation2 + $0x838] sm:$0xf0]  ;;  %v12678_v22 = vor.u32 %v16323_v13, %v12677_v16  ;;  %v13125_v16 = vld [vmem:[#allocation6 + $0x6e0] sm:$0xf]  ;;  %v16435_v13 = vld [vmem:[#allocation6 + $0x6ec] sm:$0xf0] }
 0x1ec   : > { %v16152_v29 = vld [vmem:[#allocation2 + $0xa1c] sm:$0xf]  ;;  %v11762_v20 = vor.u32 %v16088_v27, %v11759_v6  ;;  %3420 = vmatpush.bf16.msrb.mxu1 %v11506_v17  ;;  %v12438_v27 = vor.u32 %v16263_v0, %v12437_v62  ;;  %v16227_v6 = vld [vmem:[#allocation6 + $0x6c] sm:$0xf0]  ;;  %v12277_v17 = vld [vmem:[#allocation6 + $0x40] sm:$0xf] }
 0x1ed   : > { %v12015_v9 = vld [vmem:[#allocation2 + $0xa38] sm:$0xf0]  ;;  %3408 = vmatmul.bf16.vlgmr.msrb.gmra.mxu0 %v17765_v57  ;;  %v16231_v57 = vld [vmem:[#allocation6 + $0x8c] sm:$0xf0]  ;;  %v12294_v18 = vor.u32 %v16227_v6, %v12293_v5  ;;  %v3452_v5 = vmax.f32 %v17728_v28, 0.0  ;;  %v2817_v28 = vperm.slane %v17758_v3, 5 }
 0x1ee   : > { %v12018_v23 = vor.u32 %v16152_v29, %v12015_v9  ;;  %3433 = vmatpush.bf16.msrb.mxu2 %v11762_v20  ;;  %5014 = vmatpush.bf16.msra.mxu0 %v12358_v24  ;;  %v12421_v29 = vld [vmem:[#allocation6 + $0x160] sm:$0xf]  ;;  %v16223_v20 = vld [vmem:[#allocation6 + $0x4c] sm:$0xf0] }
 0x1ef   : > { %3421 = vmatmul.bf16.vlgmr.msrb.gmra.mxu1 %v17768_v61  ;;  %v16295_v61 = vld [vmem:[#allocation6 + $0x28c] sm:$0xf0]  ;;  %v12422_v14 = vor.u32 %v16259_v11, %v12421_v29  ;;  %v12533_v24 = vld [vmem:[#allocation6 + $0x240] sm:$0xf]  ;;  %v12278_v56 = vor.u32 %v16223_v20, %v12277_v17  ;;  %v3454_v11 = vmax.f32 %v17756_v35, 0.0 }
 0x1f0   : > { %3446 = vmatpush.bf16.msrb.mxu3 %v12018_v23  ;;  %5027 = vmatpush.bf16.msra.mxu1 %v12486_v26  ;;  %v12566_v4 = vor.u32 %v16295_v61, %v12565_v7  ;;  %v16255_v23 = vld [vmem:[#allocation6 + $0x14c] sm:$0xf0]  ;;  %v12869_v61 = vld [vmem:[#allocation6 + $0x4e0] sm:$0xf] }
 0x1f1   : > { %3434 = vmatmul.bf16.vlgmr.msrb.gmra.mxu2 %v17774_v46  ;;  %v16327_v46 = vld [vmem:[#allocation6 + $0x38c] sm:$0xf0]  ;;  %v12406_v38 = vor.u32 %v16255_v23, %v12405_v21  ;;  %v12981_v20 = vld [vmem:[#allocation6 + $0x5c0] sm:$0xf]  ;;  %v17804_v23 = vpack.c.bf16 %v3454_v11, %v3454_v11  ;;  %v3202_v11 = vadd.f32 %v17787_v2, %v17781_v25 }
 0x1f2   : > { %5040 = vmatpush.bf16.msra.mxu2 %v12614_v31  ;;  %5015 = vmatpush.bf16.msra.mxu0 %v12342_v41  ;;  %v12694_v9 = vor.u32 %v16327_v46, %v12693_v1  ;;  %v16287_v26 = vld [vmem:[#allocation6 + $0x24c] sm:$0xf0]  ;;  %v17791_v31 = vpop.f32.mrf.mxu2  ;;  %v3216_v58 = vpop.f32.mrf.mxu1 }
 0x1f3   : > { %3447 = vmatmul.bf16.vlgmr.msrb.gmra.mxu3 %v17777_v49  ;;  %v12310_v49 = vor.u32 %v16231_v57, %v12309_v60  ;;  %v12534_v39 = vor.u32 %v16287_v26, %v12533_v24  ;;  %v16219_v41 = vld [vmem:[#allocation6 + $0x2c] sm:$0xf0]  ;;  %v12501_v57 = vld [vmem:[#allocation6 + $0x200] sm:$0xf]  ;;  %v3242_v46 = vpop.f32.mrf.mxu3 }
 0x1f4   : > { %5053 = vmatpush.bf16.msra.mxu3 %v12742_v37  ;;  %5028 = vmatpush.bf16.msra.mxu1 %v12470_v42  ;;  %v3203_v37 = vpop.f32.mrf.mxu0  ;;  %v12389_v42 = vld [vmem:[#allocation6 + $0x120] sm:$0xf]  ;;  %v12262_v50 = vor.u32 %v16219_v41, %v12261_v40  ;;  %v16279_v62 = vld [vmem:[#allocation6 + $0x20c] sm:$0xf0] }
 0x1f5   : > { %v12390_v51 = vor.u32 %v16251_v44, %v12389_v42  ;;  %v16311_v7 = vld [vmem:[#allocation6 + $0x30c] sm:$0xf0]  ;;  %v12502_v29 = vor.u32 %v16279_v62, %v12501_v57  ;;  %v13109_v24 = vld [vmem:[#allocation6 + $0x6c0] sm:$0xf] }
 0x1f6   : > { %5041 = vmatpush.bf16.msra.mxu2 %v12598_v43  ;;  %5016 = vmatpush.bf16.msra.mxu0 %v12326_v53  ;;  %v12662_v43 = vor.u32 %v16319_v33, %v12661_v32  ;;  %v16215_v53 = vld [vmem:[#allocation6 + $0xc] sm:$0xf0]  ;;  %v3228_v33 = vadd.f32 %v17791_v31, %v2817_v28  ;;  %v12837_v37 = vld [vmem:[#allocation6 + $0x4a0] sm:$0xf] }
 0x1f7   : > { %v16371_v1 = vld [vmem:[#allocation6 + $0x4ec] sm:$0xf0]  ;;  %v12965_v58 = vld [vmem:[#allocation6 + $0x5a0] sm:$0xf] }
 0x1f8   : > { %5054 = vmatpush.bf16.msra.mxu3 %v12726_v34  ;;  %5029 = vmatpush.bf16.msra.mxu1 %v12454_v54  ;;  %v12645_v34 = vld [vmem:[#allocation6 + $0x320] sm:$0xf]  ;;  %v12870_v15 = vor.u32 %v16371_v1, %v12869_v61  ;;  %v16367_v17 = vld [vmem:[#allocation6 + $0x4cc] sm:$0xf0] }
 0x1f9   : > { %v12373_v54 = vld [vmem:[#allocation6 + $0x100] sm:$0xf]  ;;  %v12646_v60 = vor.u32 %v16315_v48, %v12645_v34  ;;  %v16399_v21 = vld [vmem:[#allocation6 + $0x5cc] sm:$0xf0] }
 0x1fa   : > { %5042 = vmatpush.bf16.msra.mxu2 %v12582_v55  ;;  %5017 = vmatpush.bf16.msra.mxu0 %v12310_v49  ;;  %v16247_v55 = vld [vmem:[#allocation6 + $0x10c] sm:$0xf0]  ;;  %v3229_v0 = vpop.f32.mrf.mxu2  ;;  %v12246_v49 = vor.u32 %v16215_v53, %v12245_v8  ;;  %v12982_v3 = vor.u32 %v16399_v21, %v12981_v20  ;;  %v13093_v41 = vld [vmem:[#allocation6 + $0x6a0] sm:$0xf] }
 0x1fb   : > { %v12374_v6 = vor.u32 %v16247_v55, %v12373_v54  ;;  %v16431_v26 = vld [vmem:[#allocation6 + $0x6cc] sm:$0xf0]  ;;  %v12821_v44 = vld [vmem:[#allocation6 + $0x480] sm:$0xf] }
 0x1fc   : > { %5055 = vmatpush.bf16.msra.mxu3 %v12710_v63  ;;  %5030 = vmatpush.bf16.msra.mxu1 %v12438_v27  ;;  %v12629_v63 = vld [vmem:[#allocation6 + $0x300] sm:$0xf]  ;;  %v16427_v42 = vld [vmem:[#allocation6 + $0x6ac] sm:$0xf0] }
 0x1fd   : > { %v12997_v27 = vld [vmem:[#allocation6 + $0x5e0] sm:$0xf]  ;;  %v12630_v12 = vor.u32 %v16311_v7, %v12629_v63  ;;  %v16391_v34 = vld [vmem:[#allocation6 + $0x58c] sm:$0xf0]  ;;  %v13094_v48 = vor.u32 %v16427_v42, %v13093_v41  ;;  %v3253_v8 = vpop.f32.mrf.mxu0  ;;  %v16241_v41 = vld [vmem:[#allocation6 + $0xe4] sm:$0xf] }
 0x1fe   : > { %5043 = vmatpush.bf16.msra.mxu2 %v12566_v4  ;;  %5018 = vmatpush.bf16.msra.mxu0 %v12294_v18  ;;  %v16403_v4 = vld [vmem:[#allocation6 + $0x5ec] sm:$0xf0]  ;;  %v3455_v18 = vmax.f32 %v17772_v45, 0.0  ;;  %v12950_v53 = vor.u32 %v16391_v34, %v12949_v47  ;;  %v12805_v54 = vld [vmem:[#allocation6 + $0x460] sm:$0xf] }
 0x1ff   : > { %v16355_v55 = vld [vmem:[#allocation6 + $0x46c] sm:$0xf0]  ;;  %v3266_v57 = vpop.f32.mrf.mxu1  ;;  %v12933_v62 = vld [vmem:[#allocation6 + $0x560] sm:$0xf]  ;;  %v12359_v42 = vld [vmem:[#allocation6 + $0xf0] sm:$0xf0] }
 0x200   : > { %5056 = vmatpush.bf16.msra.mxu3 %v12694_v9  ;;  %5031 = vmatpush.bf16.msra.mxu1 %v12422_v14  ;;  %v3453_v9 = vmax.f32 %v17742_v59, 0.0  ;;  %v12998_v14 = vor.u32 %v16403_v4, %v12997_v27  ;;  %v13126_v59 = vor.u32 %v16435_v13, %v13125_v16  ;;  %v17806_v32 = vpack.c.bf16 %v3455_v18, %v3455_v18  ;;  %v13061_v61 = vld [vmem:[#allocation6 + $0x660] sm:$0xf]  ;;  %v16419_v1 = vld [vmem:[#allocation6 + $0x66c] sm:$0xf0] }
 0x201   : > { %v12806_v0 = vor.u32 %v16355_v55, %v12805_v54  ;;  %v16351_v27 = vld [vmem:[#allocation6 + $0x44c] sm:$0xf0]  ;;  %v13045_v13 = vld [vmem:[#allocation6 + $0x640] sm:$0xf]  ;;  %v12615_v54 = vld [vmem:[#allocation6 + $0x2f0] sm:$0xf0] }
 0x202   : > { %5044 = vmatpush.bf16.msra.mxu2 %v12550_v19  ;;  %5019 = vmatpush.bf16.msra.mxu0 %v12278_v56  ;;  %v12853_v19 = vld [vmem:[#allocation6 + $0x4c0] sm:$0xf]  ;;  %v17802_v35 = vpack.c.bf16 %v3453_v9, %v3453_v9  ;;  %v16363_v56 = vld [vmem:[#allocation6 + $0x4ac] sm:$0xf0]  ;;  %v13062_v9 = vor.u32 %v16419_v1, %v13061_v61 }
 0x203   : > { %v12854_v45 = vor.u32 %v16367_v17, %v12853_v19  ;;  %v12838_v40 = vor.u32 %v16363_v56, %v12837_v37  ;;  %v16415_v18 = vld [vmem:[#allocation6 + $0x64c] sm:$0xf0]  ;;  %v12773_v19 = vld [vmem:[#allocation6 + $0x420] sm:$0xf] }
 0x204   : > { %5057 = vmatpush.bf16.msra.mxu3 %v12678_v22  ;;  %5032 = vmatpush.bf16.msra.mxu1 %v12406_v38  ;;  %v17800_v22 = vpack.c.bf16 %v3452_v5, %v3452_v5  ;;  %v16395_v38 = vld [vmem:[#allocation6 + $0x5ac] sm:$0xf0]  ;;  %v12917_v5 = vld [vmem:[#allocation6 + $0x540] sm:$0xf] }
 0x205   : > { %v12966_v31 = vor.u32 %v16395_v38, %v12965_v58  ;;  %v3255_v16 = vpop.f32.mrf.mxu0  ;;  %v16347_v17 = vld [vmem:[#allocation6 + $0x42c] sm:$0xf0]  ;;  %v12901_v20 = vld [vmem:[#allocation6 + $0x520] sm:$0xf] }
 0x206   : > { %5045 = vmatpush.bf16.msra.mxu2 %v12534_v39  ;;  %5020 = vmatpush.bf16.msra.mxu0 %v12262_v50  ;;  %v13110_v39 = vor.u32 %v16431_v26, %v13109_v24  ;;  %v12822_v50 = vor.u32 %v16359_v30, %v12821_v44  ;;  %v16379_v21 = vld [vmem:[#allocation6 + $0x52c] sm:$0xf0]  ;;  %v3215_v24 = vadd.f32 %v17789_v10, %v3202_v11  ;;  %v12885_v56 = vld [vmem:[#allocation6 + $0x500] sm:$0xf]  ;;  %v16273_v44 = vld [vmem:[#allocation6 + $0x1e4] sm:$0xf] }
 0x207   : > { %v3279_v4 = vpop.f32.mrf.mxu2  ;;  %v3268_v28 = vpop.f32.mrf.mxu1  ;;  %v12774_v2 = vor.u32 %v16347_v17, %v12773_v19  ;;  %v16343_v26 = vld [vmem:[#allocation6 + $0x40c] sm:$0xf0]  ;;  %v12902_v37 = vor.u32 %v16379_v21, %v12901_v20  ;;  %v13253_v38 = vld [vmem:[#allocation6 + $0x7e0] sm:$0xf]  ;;  %v12487_v30 = vld [vmem:[#allocation6 + $0x1f0] sm:$0xf0] }
 0x208   : > { %5058 = vmatpush.bf16.msra.mxu3 %v12662_v43  ;;  %5033 = vmatpush.bf16.msra.mxu1 %v12390_v51  ;;  %v3241_v43 = vadd.f32 %v17793_v36, %v3228_v33  ;;  %v13077_v51 = vld [vmem:[#allocation6 + $0x680] sm:$0xf]  ;;  %v16387_v36 = vld [vmem:[#allocation6 + $0x56c] sm:$0xf0]  ;;  %v3456_v47 = vmax.f32 %v3215_v24, 0.0 }
 0x209   : > { %v12934_v46 = vor.u32 %v16387_v36, %v12933_v62  ;;  %v16411_v33 = vld [vmem:[#allocation6 + $0x62c] sm:$0xf0]  ;;  %v13237_v55 = vld [vmem:[#allocation6 + $0x7c0] sm:$0xf]  ;;  %v12343_v62 = vld [vmem:[#allocation6 + $0xd0] sm:$0xf0] }
 0x20a   : > { %5046 = vmatpush.bf16.msra.mxu2 %v12518_v52  ;;  %5021 = vmatpush.bf16.msra.mxu0 %v12246_v49  ;;  %v16423_v52 = vld [vmem:[#allocation6 + $0x68c] sm:$0xf0]  ;;  %v12789_v49 = vld [vmem:[#allocation6 + $0x440] sm:$0xf]  ;;  %v16233_v11 = vld [vmem:[#allocation6 + $0xa4] sm:$0xf] }
 0x20b   : > { %v13078_v63 = vor.u32 %v16423_v52, %v13077_v51  ;;  %v12362_v52 = vor.u32 %v16241_v41, %v12359_v42  ;;  %v16463_v36 = vld [vmem:[#allocation6 + $0x7cc] sm:$0xf0]  ;;  %v16265_v16 = vld [vmem:[#allocation6 + $0x1a4] sm:$0xf]  ;;  %v12583_v17 = vld [vmem:[#allocation6 + $0x2b0] sm:$0xf0] }
 0x20c   : > { %5059 = vmatpush.bf16.msra.mxu3 %v12646_v60  ;;  %5034 = vmatpush.bf16.msra.mxu1 %v12374_v6  ;;  %v3254_v60 = vadd.f32 %v3253_v8, %v3241_v43  ;;  %v16383_v6 = vld [vmem:[#allocation6 + $0x54c] sm:$0xf0]  ;;  %v13238_v61 = vor.u32 %v16463_v36, %v13237_v55  ;;  %v13205_v28 = vld [vmem:[#allocation6 + $0x780] sm:$0xf]  ;;  %v12295_v41 = vld [vmem:[#allocation6 + $0x70] sm:$0xf0] }
 0x20d   : > { %5022 = vmatmul.bf16.vlgmr.msra.gmra.mxu0 %v17800_v22  ;;  %v16407_v8 = vld [vmem:[#allocation6 + $0x60c] sm:$0xf0]  ;;  %v12407_v55 = vld [vmem:[#allocation6 + $0x150] sm:$0xf0]  ;;  %v16217_v36 = vld [vmem:[#allocation6 + $0x24] sm:$0xf] }
 0x20e   : > { %5047 = vmatpush.bf16.msra.mxu2 %v12502_v29  ;;  %5066 = vmatpush.bf16.msrb.mxu0 %v12870_v15  ;;  %v3267_v7 = vadd.f32 %v3266_v57, %v3254_v60  ;;  %v3292_v29 = vpop.f32.mrf.mxu3  ;;  %v12490_v60 = vor.u32 %v16273_v44, %v12487_v30  ;;  %v16237_v57 = vld [vmem:[#allocation6 + $0xc4] sm:$0xf]  ;;  %v16455_v20 = vld [vmem:[#allocation6 + $0x78c] sm:$0xf0]  ;;  %v12423_v44 = vld [vmem:[#allocation6 + $0x170] sm:$0xf0] }
 0x20f   : > { %5035 = vmatmul.bf16.vlgmr.msra.gmra.mxu1 %v17802_v35  ;;  %v3281_v58 = vpop.f32.mrf.mxu2  ;;  %v13206_v24 = vor.u32 %v16455_v20, %v13205_v28  ;;  %v13141_v28 = vld [vmem:[#allocation6 + $0x700] sm:$0xf]  ;;  %v16439_v20 = vld [vmem:[#allocation6 + $0x70c] sm:$0xf0] }
 0x210   : > { %5060 = vmatpush.bf16.msra.mxu3 %v12630_v12  ;;  %5079 = vmatpush.bf16.msrb.mxu1 %v12998_v14  ;;  %v12790_v12 = vor.u32 %v16351_v27, %v12789_v49  ;;  %v3280_v15 = vadd.f32 %v3279_v4, %v3267_v7  ;;  %v12918_v14 = vor.u32 %v16383_v6, %v12917_v5  ;;  %v16301_v49 = vld [vmem:[#allocation6 + $0x2c4] sm:$0xf]  ;;  %v12599_v5 = vld [vmem:[#allocation6 + $0x2d0] sm:$0xf0]  ;;  %v13221_v6 = vld [vmem:[#allocation6 + $0x7a0] sm:$0xf] }
 0x211   : > { %5048 = vmatmul.bf16.vlgmr.msra.gmra.mxu2 %v17804_v23  ;;  %v17819_v27 = vpack.c.bf16 %v3456_v47, %v3456_v47  ;;  %v12346_v4 = vor.u32 %v16237_v57, %v12343_v62  ;;  %v13189_v58 = vld [vmem:[#allocation6 + $0x760] sm:$0xf] }
 0x212   : > { %5092 = vmatpush.bf16.msrb.mxu2 %v13126_v59  ;;  %5067 = vmatpush.bf16.msrb.mxu0 %v12854_v45  ;;  %v12757_v59 = vld [vmem:[#allocation6 + $0x400] sm:$0xf]  ;;  %v13046_v45 = vor.u32 %v16415_v18, %v13045_v13  ;;  %v3293_v25 = vadd.f32 %v3292_v29, %v3280_v15  ;;  %v16459_v29 = vld [vmem:[#allocation6 + $0x7ac] sm:$0xf0]  ;;  %v12455_v13 = vld [vmem:[#allocation6 + $0x1b0] sm:$0xf0]  ;;  %v12602_v18 = vor.u32 %v16301_v49, %v12599_v5 }
 0x213   : > { %5061 = vmatmul.bf16.vlgmr.msra.gmra.mxu3 %v17806_v32  ;;  %v13222_v15 = vor.u32 %v16459_v29, %v13221_v6  ;;  %v12458_v21 = vor.u32 %v16265_v16, %v12455_v13  ;;  %v12263_v49 = vld [vmem:[#allocation6 + $0x30] sm:$0xf0]  ;;  %v13157_v5 = vld [vmem:[#allocation6 + $0x720] sm:$0xf]  ;;  %v16443_v6 = vld [vmem:[#allocation6 + $0x72c] sm:$0xf0] }
 0x214   : > { %5080 = vmatpush.bf16.msrb.mxu1 %v12982_v3  ;;  %v13029_v3 = vld [vmem:[#allocation6 + $0x620] sm:$0xf]  ;;  %v3457_v34 = vmax.f32 %v3293_v25, 0.0  ;;  %v16261_v25 = vld [vmem:[#allocation6 + $0x184] sm:$0xf]  ;;  %v17831_v29 = vld [vmem:[#allocation4] sm:$0xff] }
 0x215   : > { %v13030_v10 = vor.u32 %v16411_v33, %v13029_v3  ;;  %v16293_v3 = vld [vmem:[#allocation6 + $0x284] sm:$0xf]  ;;  %v12247_v13 = vld [vmem:[#allocation6 + $0x10] sm:$0xf0] }
 0x216   : > { %5093 = vmatpush.bf16.msrb.mxu2 %v13110_v39  ;;  %5068 = vmatpush.bf16.msrb.mxu0 %v12838_v40  ;;  %v16467_v39 = vld [vmem:[#allocation6 + $0x7ec] sm:$0xf0]  ;;  %v3294_v43 = vpop.f32.mrf.mxu3  ;;  %v17817_v1 = vpack.c.bf16 %v3457_v34, %v3457_v34  ;;  %v12551_v34 = vld [vmem:[#allocation6 + $0x270] sm:$0xf0]  ;;  %v16213_v16 = vld [vmem:[#allocation6 + $0x4] sm:$0xf] }
 0x217   : > { %v16375_v40 = vld [vmem:[#allocation6 + $0x50c] sm:$0xf0] }
 0x218   : > { %5081 = vmatpush.bf16.msrb.mxu1 %v12966_v31  ;;  %v13254_v31 = vor.u32 %v16467_v39, %v13253_v38  ;;  %v12886_v51 = vor.u32 %v16375_v40, %v12885_v56  ;;  %v12567_v56 = vld [vmem:[#allocation6 + $0x290] sm:$0xf0]  ;;  %v16451_v38 = vld [vmem:[#allocation6 + $0x76c] sm:$0xf0]  ;;  %v16225_v40 = vld [vmem:[#allocation6 + $0x64] sm:$0xf] }
 0x219   : > { %v13190_v43 = vor.u32 %v16451_v38, %v13189_v58  ;;  %v12570_v30 = vor.u32 %v16293_v3, %v12567_v56  ;;  %v12298_v47 = vor.u32 %v16225_v40, %v12295_v41  ;;  %v12871_v3 = vld [vmem:[#allocation6 + $0x4f0] sm:$0xf0]  ;;  %v16401_v58 = vld [vmem:[#allocation6 + $0x5e4] sm:$0xf]  ;;  %v12250_v41 = vor.u32 %v16213_v16, %v12247_v13 }
 0x21a   : > { %5094 = vmatpush.bf16.msrb.mxu2 %v13094_v48  ;;  %5069 = vmatpush.bf16.msrb.mxu0 %v12822_v50  ;;  %v12758_v48 = vor.u32 %v16343_v26, %v12757_v59  ;;  %v13013_v50 = vld [vmem:[#allocation6 + $0x600] sm:$0xf]  ;;  %v16229_v59 = vld [vmem:[#allocation6 + $0x84] sm:$0xf]  ;;  %v12999_v38 = vld [vmem:[#allocation6 + $0x5f0] sm:$0xf0] }
 0x21b   : > { %5105 = vmatpush.bf16.msrb.mxu3 %v13254_v31  ;;  %v13014_v7 = vor.u32 %v16407_v8, %v13013_v50  ;;  %v16257_v31 = vld [vmem:[#allocation6 + $0x164] sm:$0xf]  ;;  %v16447_v50 = vld [vmem:[#allocation6 + $0x74c] sm:$0xf0] }
 0x21c   : > { %5082 = vmatpush.bf16.msrb.mxu1 %v12950_v53  ;;  %v16305_v53 = vld [vmem:[#allocation6 + $0x2e4] sm:$0xf]  ;;  %v12426_v8 = vor.u32 %v16257_v31, %v12423_v44  ;;  %v12503_v44 = vld [vmem:[#allocation6 + $0x210] sm:$0xf0] }
 0x21d   : > { %v16277_v31 = vld [vmem:[#allocation6 + $0x204] sm:$0xf] }
 0x21e   : > { %5095 = vmatpush.bf16.msrb.mxu2 %v13078_v63  ;;  %5070 = vmatpush.bf16.msrb.mxu0 %v12806_v0  ;;  %v16269_v63 = vld [vmem:[#allocation6 + $0x1c4] sm:$0xf]  ;;  %v12471_v0 = vld [vmem:[#allocation6 + $0x1d0] sm:$0xf0] }
 0x21f   : > { %5106 = vmatpush.bf16.msrb.mxu3 %v13238_v61  ;;  %v17825_v42 = vpop.f32.mrf.mxu1  ;;  %v12535_v61 = vld [vmem:[#allocation6 + $0x250] sm:$0xf0]  ;;  %v16389_v13 = vld [vmem:[#allocation6 + $0x584] sm:$0xf] }
 0x220   : > { %5083 = vmatpush.bf16.msrb.mxu1 %v12934_v46  ;;  %v12618_v46 = vor.u32 %v16305_v53, %v12615_v54  ;;  %v16253_v54 = vld [vmem:[#allocation6 + $0x144] sm:$0xf] }
 0x222   : > { %5096 = vmatpush.bf16.msrb.mxu2 %v13062_v9  ;;  %5071 = vmatpush.bf16.msrb.mxu0 %v12790_v12  ;;  %v12474_v9 = vor.u32 %v16269_v63, %v12471_v0  ;;  %v12327_v12 = vld [vmem:[#allocation6 + $0xb0] sm:$0xf0] }
 0x223   : > { %v12330_v19 = vor.u32 %v16233_v11, %v12327_v12  ;;  %5107 = vmatpush.bf16.msrb.mxu3 %v13222_v15  ;;  %v16249_v11 = vld [vmem:[#allocation6 + $0x124] sm:$0xf]  ;;  %v12391_v12 = vld [vmem:[#allocation6 + $0x130] sm:$0xf0]  ;;  %v13158_v15 = vor.u32 %v16443_v6, %v13157_v5 }
 0x224   : > { %5084 = vmatpush.bf16.msrb.mxu1 %v12918_v14  ;;  %v16297_v14 = vld [vmem:[#allocation6 + $0x2a4] sm:$0xf]  ;;  %v12695_v6 = vld [vmem:[#allocation6 + $0x390] sm:$0xf0] }
 0x225   : > { %v12586_v26 = vor.u32 %v16297_v14, %v12583_v17  ;;  %v16281_v14 = vld [vmem:[#allocation6 + $0x224] sm:$0xf]  ;;  %v12519_v17 = vld [vmem:[#allocation6 + $0x230] sm:$0xf0] }
 0x226   : > { %5097 = vmatpush.bf16.msrb.mxu2 %v13046_v45  ;;  %5072 = vmatpush.bf16.msrb.mxu0 %v12774_v2  ;;  %v12311_v45 = vld [vmem:[#allocation6 + $0x90] sm:$0xf0]  ;;  %v12522_v40 = vor.u32 %v16281_v14, %v12519_v17  ;;  %v16325_v5 = vld [vmem:[#allocation6 + $0x384] sm:$0xf] }
 0x227   : > { %v12439_v2 = vld [vmem:[#allocation6 + $0x190] sm:$0xf0]  ;;  %v12314_v33 = vor.u32 %v16229_v59, %v12311_v45  ;;  %5108 = vmatpush.bf16.msrb.mxu3 %v13206_v24  ;;  %v16245_v59 = vld [vmem:[#allocation6 + $0x104] sm:$0xf]  ;;  %v13142_v45 = vor.u32 %v16439_v20, %v13141_v28 }
 0x228   : > { %5085 = vmatpush.bf16.msrb.mxu1 %v12902_v37  ;;  %v17823_v37 = vpop.f32.mrf.mxu0  ;;  %v12442_v39 = vor.u32 %v16261_v25, %v12439_v2  ;;  %v16337_v24 = vld [vmem:[#allocation6 + $0x3e4] sm:$0xf]  ;;  %v12743_v25 = vld [vmem:[#allocation6 + $0x3f0] sm:$0xf0] }
 0x229   : > { %v12375_v2 = vld [vmem:[#allocation6 + $0x110] sm:$0xf0]  ;;  %v16321_v14 = vld [vmem:[#allocation6 + $0x364] sm:$0xf] }
 0x22a   : > { %5098 = vmatpush.bf16.msrb.mxu2 %v13030_v10  ;;  %5073 = vmatpush.bf16.msrb.mxu0 %v12758_v48  ;;  %v16289_v10 = vld [vmem:[#allocation6 + $0x264] sm:$0xf]  ;;  %v13173_v48 = vld [vmem:[#allocation6 + $0x740] sm:$0xf] }
 0x22b   : > { %5109 = vmatpush.bf16.msrb.mxu3 %v13190_v43  ;;  %v13174_v53 = vor.u32 %v16447_v50, %v13173_v48  ;;  %v12554_v57 = vor.u32 %v16289_v10, %v12551_v34  ;;  %v13002_v34 = vor.u32 %v16401_v58, %v12999_v38  ;;  %v16365_v48 = vld [vmem:[#allocation6 + $0x4c4] sm:$0xf]  ;;  %v12855_v50 = vld [vmem:[#allocation6 + $0x4d0] sm:$0xf0] }
 0x22c   : > { %5086 = vmatpush.bf16.msrb.mxu1 %v12886_v51  ;;  %v16221_v51 = vld [vmem:[#allocation6 + $0x44] sm:$0xf]  ;;  %v12663_v58 = vld [vmem:[#allocation6 + $0x350] sm:$0xf0] }
 0x22d   : > { %5074 = vmatmul.bf16.vlgmr.msrb.gmra.mxu0 %v17819_v27  ;;  %v16353_v20 = vld [vmem:[#allocation6 + $0x464] sm:$0xf] }
 0x22e   : > { %5118 = vmatpush.bf16.msra.mxu0 %v12362_v52  ;;  %5099 = vmatpush.bf16.msrb.mxu2 %v13014_v7  ;;  %v12279_v52 = vld [vmem:[#allocation6 + $0x50] sm:$0xf0]  ;;  %v16285_v7 = vld [vmem:[#allocation6 + $0x244] sm:$0xf] }
 0x22f   : > { %5087 = vmatmul.bf16.vlgmr.msrb.gmra.mxu1 %v17817_v1  ;;  %v12282_v62 = vor.u32 %v16221_v51, %v12279_v52  ;;  %v17829_v0 = vpop.f32.mrf.mxu3  ;;  %5110 = vmatpush.bf16.msrb.mxu3 %v13174_v53  ;;  %v16397_v51 = vld [vmem:[#allocation6 + $0x5c4] sm:$0xf]  ;;  %v12983_v52 = vld [vmem:[#allocation6 + $0x5d0] sm:$0xf0]  ;;  %v12506_v53 = vor.u32 %v16277_v31, %v12503_v44 }
 0x230   : > { %5131 = vmatpush.bf16.msra.mxu1 %v12490_v60  ;;  %v17827_v60 = vpop.f32.mrf.mxu2  ;;  %v3307_v63 = vpop.f32.mrf.mxu0  ;;  %v16381_v31 = vld [vmem:[#allocation6 + $0x544] sm:$0xf]  ;;  %v12919_v44 = vld [vmem:[#allocation6 + $0x550] sm:$0xf0] }
 0x231   : > { %v16361_v63 = vld [vmem:[#allocation6 + $0x4a4] sm:$0xf] }
 0x232   : > { %5144 = vmatpush.bf16.msra.mxu2 %v12618_v46  ;;  %5119 = vmatpush.bf16.msra.mxu0 %v12346_v4  ;;  %v12410_v46 = vor.u32 %v16253_v54, %v12407_v55  ;;  %v3320_v4 = vpop.f32.mrf.mxu1  ;;  %v12858_v55 = vor.u32 %v16365_v48, %v12855_v50  ;;  %v16345_v48 = vld [vmem:[#allocation6 + $0x424] sm:$0xf] }
 0x233   : > { %5111 = vmatpush.bf16.msrb.mxu3 %v13158_v15  ;;  %v12698_v15 = vor.u32 %v16325_v5, %v12695_v6  ;;  %v16429_v50 = vld [vmem:[#allocation6 + $0x6c4] sm:$0xf] }
 0x234   : > { %5132 = vmatpush.bf16.msra.mxu1 %v12474_v9  ;;  %v2818_v9 = vperm.slane %v17831_v29, 6  ;;  %v16373_v6 = vld [vmem:[#allocation6 + $0x504] sm:$0xf] }
 0x236   : > { %5145 = vmatpush.bf16.msra.mxu2 %v12602_v18  ;;  %5120 = vmatpush.bf16.msra.mxu0 %v12330_v19  ;;  %v12538_v18 = vor.u32 %v16285_v7, %v12535_v61  ;;  %v12266_v19 = vor.u32 %v16217_v36, %v12263_v49  ;;  %v3306_v56 = vadd.f32 %v17823_v37, %v2818_v9  ;;  %v12727_v37 = vld [vmem:[#allocation6 + $0x3d0] sm:$0xf0] }
 0x237   : > { %v3346_v43 = vpop.f32.mrf.mxu3  ;;  %5112 = vmatpush.bf16.msrb.mxu3 %v13142_v45  ;;  %v12986_v36 = vor.u32 %v16397_v51, %v12983_v52  ;;  %v12839_v7 = vld [vmem:[#allocation6 + $0x4b0] sm:$0xf0] }
 0x238   : > { %5133 = vmatpush.bf16.msra.mxu1 %v12458_v21  ;;  %v12394_v21 = vor.u32 %v16249_v11, %v12391_v12  ;;  %v12967_v49 = vld [vmem:[#allocation6 + $0x5b0] sm:$0xf0]  ;;  %v12842_v4 = vor.u32 %v16361_v63, %v12839_v7  ;;  %v16357_v11 = vld [vmem:[#allocation6 + $0x484] sm:$0xf] }
 0x239   : > { %v12823_v12 = vld [vmem:[#allocation6 + $0x490] sm:$0xf0] }
 0x23a   : > { %5146 = vmatpush.bf16.msra.mxu2 %v12586_v26  ;;  %5121 = vmatpush.bf16.msra.mxu0 %v12314_v33  ;;  %v16369_v26 = vld [vmem:[#allocation6 + $0x4e4] sm:$0xf]  ;;  %v12746_v33 = vor.u32 %v16337_v24, %v12743_v25  ;;  %v12775_v52 = vld [vmem:[#allocation6 + $0x430] sm:$0xf0] }
 0x23b   : > { %v12874_v10 = vor.u32 %v16369_v26, %v12871_v3  ;;  %v16385_v25 = vld [vmem:[#allocation6 + $0x564] sm:$0xf] }
 0x23c   : > { %5134 = vmatpush.bf16.msra.mxu1 %v12442_v39  ;;  %v3333_v39 = vpop.f32.mrf.mxu2  ;;  %5157 = vmatpush.bf16.msra.mxu3 %v12746_v33  ;;  %v16433_v26 = vld [vmem:[#allocation6 + $0x6e4] sm:$0xf]  ;;  %v13127_v33 = vld [vmem:[#allocation6 + $0x6f0] sm:$0xf0] }
 0x23d   : > { %v16349_v39 = vld [vmem:[#allocation6 + $0x444] sm:$0xf] }
 0x23e   : > { %5147 = vmatpush.bf16.msra.mxu2 %v12570_v30  ;;  %5122 = vmatpush.bf16.msra.mxu0 %v12298_v47  ;;  %v12378_v30 = vor.u32 %v16245_v59, %v12375_v2  ;;  %v16333_v47 = vld [vmem:[#allocation6 + $0x3c4] sm:$0xf]  ;;  %v12935_v2 = vld [vmem:[#allocation6 + $0x570] sm:$0xf0] }
 0x23f   : > { %v12730_v54 = vor.u32 %v16333_v47, %v12727_v37  ;;  %v12938_v38 = vor.u32 %v16385_v25, %v12935_v2  ;;  %v13111_v37 = vld [vmem:[#allocation6 + $0x6d0] sm:$0xf0]  ;;  %v12349_v25 = vld [vmem:[#allocation6 + $0xc8] sm:$0xf]  ;;  %v16240_v2 = vld [vmem:[#allocation6 + $0xd4] sm:$0xf0] }
 0x240   : > { %5135 = vmatpush.bf16.msra.mxu1 %v12426_v8  ;;  %v3319_v8 = vadd.f32 %v17825_v42, %v3306_v56  ;;  %v3357_v17 = vpop.f32.mrf.mxu0  ;;  %v16317_v56 = vld [vmem:[#allocation6 + $0x344] sm:$0xf]  ;;  %v13114_v7 = vor.u32 %v16429_v50, %v13111_v37  ;;  %v12317_v37 = vld [vmem:[#allocation6 + $0x88] sm:$0xf] }
 0x241   : > { %5158 = vmatpush.bf16.msra.mxu3 %v12730_v54  ;;  %v16313_v54 = vld [vmem:[#allocation6 + $0x324] sm:$0xf] }
 0x242   : > { %5148 = vmatpush.bf16.msra.mxu2 %v12554_v57  ;;  %5123 = vmatpush.bf16.msra.mxu0 %v12282_v62  ;;  %v16329_v57 = vld [vmem:[#allocation6 + $0x3a4] sm:$0xf]  ;;  %v12711_v62 = vld [vmem:[#allocation6 + $0x3b0] sm:$0xf0]  ;;  %v3332_v42 = vadd.f32 %v17827_v60, %v3319_v8  ;;  %v12826_v60 = vor.u32 %v16357_v11, %v12823_v12  ;;  %v3370_v24 = vpop.f32.mrf.mxu1  ;;  %v12922_v8 = vor.u32 %v16381_v31, %v12919_v44  ;;  %v12461_v31 = vld [vmem:[#allocation6 + $0x1a8] sm:$0xf] }
 0x243   : > { %v12714_v61 = vor.u32 %v16329_v57, %v12711_v62  ;;  %v16377_v57 = vld [vmem:[#allocation6 + $0x524] sm:$0xf]  ;;  %v12903_v62 = vld [vmem:[#allocation6 + $0x530] sm:$0xf0]  ;;  %v16268_v44 = vld [vmem:[#allocation6 + $0x1b4] sm:$0xf0] }
 0x244   : > { %5136 = vmatpush.bf16.msra.mxu1 %v12410_v46  ;;  %v16393_v46 = vld [vmem:[#allocation6 + $0x5a4] sm:$0xf]  ;;  %v3345_v16 = vadd.f32 %v17829_v0, %v3332_v42  ;;  %v12778_v42 = vor.u32 %v16345_v48, %v12775_v52  ;;  %v12906_v5 = vor.u32 %v16377_v57, %v12903_v62  ;;  %v12631_v11 = vld [vmem:[#allocation6 + $0x310] sm:$0xf0]  ;;  %v12462_v50 = vor.u32 %v16268_v44, %v12461_v31  ;;  %v12589_v31 = vld [vmem:[#allocation6 + $0x2a8] sm:$0xf] }
 0x245   : > { %v12970_v9 = vor.u32 %v16393_v46, %v12967_v49  ;;  %5159 = vmatpush.bf16.msra.mxu3 %v12714_v61  ;;  %v16341_v61 = vld [vmem:[#allocation6 + $0x404] sm:$0xf]  ;;  %v12759_v46 = vld [vmem:[#allocation6 + $0x410] sm:$0xf0]  ;;  %v16300_v44 = vld [vmem:[#allocation6 + $0x2b4] sm:$0xf0] }
 0x246   : > { %5149 = vmatpush.bf16.msra.mxu2 %v12538_v18  ;;  %5124 = vmatpush.bf16.msra.mxu0 %v12266_v19  ;;  %v12951_v18 = vld [vmem:[#allocation6 + $0x590] sm:$0xf0]  ;;  %v3358_v45 = vadd.f32 %v3357_v17, %v3345_v16  ;;  %v16425_v49 = vld [vmem:[#allocation6 + $0x6a4] sm:$0xf]  ;;  %v16244_v16 = vld [vmem:[#allocation6 + $0xf4] sm:$0xf0] }
 0x247   : > { %v12679_v19 = vld [vmem:[#allocation6 + $0x370] sm:$0xf0]  ;;  %v12954_v28 = vor.u32 %v16389_v13, %v12951_v18 }
 0x248   : > { %5137 = vmatpush.bf16.msra.mxu1 %v12394_v21  ;;  %v12807_v21 = vld [vmem:[#allocation6 + $0x470] sm:$0xf0]  ;;  %v12682_v59 = vor.u32 %v16321_v14, %v12679_v19  ;;  %v3371_v0 = vadd.f32 %v3370_v24, %v3358_v45  ;;  %v16276_v14 = vld [vmem:[#allocation6 + $0x1f4] sm:$0xf0]  ;;  %v12762_v19 = vor.u32 %v16341_v61, %v12759_v46 }
 0x249   : > { %5160 = vmatpush.bf16.msra.mxu3 %v12698_v15  ;;  %v12810_v3 = vor.u32 %v16353_v20, %v12807_v21  ;;  %v17844_v51 = vpop.f32.mrf.mxu3  ;;  %v12887_v12 = vld [vmem:[#allocation6 + $0x510] sm:$0xf0]  ;;  %v12365_v15 = vld [vmem:[#allocation6 + $0xe8] sm:$0xf] }
 0x24a   : > { %5150 = vmatpush.bf16.msra.mxu2 %v12522_v40  ;;  %5125 = vmatpush.bf16.msra.mxu0 %v12250_v41  ;;  %v12791_v40 = vld [vmem:[#allocation6 + $0x450] sm:$0xf0]  ;;  %v12666_v41 = vor.u32 %v16317_v56, %v12663_v58  ;;  %v3458_v43 = vmax.f32 %v3371_v0, 0.0  ;;  %v12890_v21 = vor.u32 %v16373_v6, %v12887_v12  ;;  %v12477_v0 = vld [vmem:[#allocation6 + $0x1c8] sm:$0xf]  ;;  %v12350_v58 = vor.u32 %v16240_v2, %v12349_v25 }
 0x24b   : > { %v12794_v47 = vor.u32 %v16349_v39, %v12791_v40  ;;  %v13079_v20 = vld [vmem:[#allocation6 + $0x690] sm:$0xf0]  ;;  %v12333_v39 = vld [vmem:[#allocation6 + $0xa8] sm:$0xf]  ;;  %v16236_v40 = vld [vmem:[#allocation6 + $0xb4] sm:$0xf0] }
 0x24c   : > { %5138 = vmatpush.bf16.msra.mxu1 %v12378_v30  ;;  %v13130_v30 = vor.u32 %v16433_v26, %v13127_v33  ;;  %v16417_v33 = vld [vmem:[#allocation6 + $0x664] sm:$0xf]  ;;  %v13063_v56 = vld [vmem:[#allocation6 + $0x670] sm:$0xf0]  ;;  %v12334_v48 = vor.u32 %v16236_v40, %v12333_v39  ;;  %v12621_v12 = vld [vmem:[#allocation6 + $0x2e8] sm:$0xf] }
 0x24d   : > { %5126 = vmatmul.bf16.vlgmr.msra.gmra.mxu0 %v17800_v22  ;;  %5161 = vmatpush.bf16.msra.mxu3 %v12682_v59  ;;  %v12366_v59 = vor.u32 %v16244_v16, %v12365_v15  ;;  %v13031_v57 = vld [vmem:[#allocation6 + $0x630] sm:$0xf0]  ;;  %v16308_v15 = vld [vmem:[#allocation6 + $0x2f4] sm:$0xf0] }
 0x24e   : > { %5170 = vmatpush.bf16.msrb.mxu0 %v12874_v10  ;;  %5151 = vmatpush.bf16.msra.mxu2 %v12506_v53  ;;  %v17840_v10 = vpack.c.bf16 %v3458_v43, %v3458_v43  ;;  %v3359_v53 = vpop.f32.mrf.mxu0  ;;  %v13066_v43 = vor.u32 %v16417_v33, %v13063_v56  ;;  %v13015_v6 = vld [vmem:[#allocation6 + $0x610] sm:$0xf0]  ;;  %v16220_v25 = vld [vmem:[#allocation6 + $0x34] sm:$0xf0] }
 0x24f   : > { %5139 = vmatmul.bf16.vlgmr.msra.gmra.mxu1 %v17802_v35  ;;  %v12445_v53 = vld [vmem:[#allocation6 + $0x188] sm:$0xf]  ;;  %v16252_v33 = vld [vmem:[#allocation6 + $0x134] sm:$0xf0]  ;;  %v13255_v39 = vld [vmem:[#allocation6 + $0x7f0] sm:$0xf0] }
 0x250   : > { %5183 = vmatpush.bf16.msrb.mxu1 %v13002_v34  ;;  %v17842_v34 = vpop.f32.mrf.mxu2  ;;  %5100 = vmatmul.bf16.vlgmr.msrb.gmra.mxu2 %v17840_v10 }
 0x251   : > { %5162 = vmatpush.bf16.msra.mxu3 %v12666_v41  ;;  %v3398_v45 = vpop.f32.mrf.mxu3  ;;  %v2819_v41 = vperm.slane %v17831_v29, 7 }
 0x252   : > { %5171 = vmatpush.bf16.msrb.mxu0 %v12858_v55  ;;  %v12647_v55 = vld [vmem:[#allocation6 + $0x330] sm:$0xf0]  ;;  %5196 = vmatpush.bf16.msrb.mxu2 %v13130_v30  ;;  %v16413_v30 = vld [vmem:[#allocation6 + $0x644] sm:$0xf] }
 0x253   : > { %v12650_v63 = vor.u32 %v16313_v54, %v12647_v55  ;;  %v3384_v29 = vadd.f32 %v17842_v34, %v2819_v41  ;;  %v16264_v54 = vld [vmem:[#allocation6 + $0x194] sm:$0xf0]  ;;  %v16409_v55 = vld [vmem:[#allocation6 + $0x624] sm:$0xf] }
 0x254   : > { %5184 = vmatpush.bf16.msrb.mxu1 %v12986_v36  ;;  %v3372_v36 = vpop.f32.mrf.mxu1  ;;  %v13034_v46 = vor.u32 %v16409_v55, %v13031_v57  ;;  %v16404_v55 = vld [vmem:[#allocation6 + $0x5f4] sm:$0xf0] }
 0x255   : > { %5163 = vmatpush.bf16.msra.mxu3 %v12650_v63  ;;  %v12446_v36 = vor.u32 %v16264_v54, %v12445_v53  ;;  %v12301_v63 = vld [vmem:[#allocation6 + $0x68] sm:$0xf]  ;;  %v3397_v61 = vadd.f32 %v17844_v51, %v3384_v29  ;;  %v16372_v29 = vld [vmem:[#allocation6 + $0x4f4] sm:$0xf0]  ;;  %v12590_v53 = vor.u32 %v16300_v44, %v12589_v31  ;;  %v13191_v31 = vld [vmem:[#allocation6 + $0x770] sm:$0xf0] }
 0x256   : > { %5172 = vmatpush.bf16.msrb.mxu0 %v12842_v4  ;;  %v13095_v4 = vld [vmem:[#allocation6 + $0x6b0] sm:$0xf0]  ;;  %5197 = vmatpush.bf16.msrb.mxu2 %v13114_v7  ;;  %v16228_v7 = vld [vmem:[#allocation6 + $0x74] sm:$0xf0]  ;;  %v12413_v51 = vld [vmem:[#allocation6 + $0x148] sm:$0xf] }
 0x257   : > { %v13098_v18 = vor.u32 %v16425_v49, %v13095_v4  ;;  %v12429_v49 = vld [vmem:[#allocation6 + $0x168] sm:$0xf]  ;;  %v16260_v4 = vld [vmem:[#allocation6 + $0x174] sm:$0xf0] }
 0x258   : > { %5185 = vmatpush.bf16.msrb.mxu1 %v12970_v9  ;;  %v16309_v9 = vld [vmem:[#allocation6 + $0x304] sm:$0xf]  ;;  %v3385_v17 = vpop.f32.mrf.mxu2  ;;  %v12430_v16 = vor.u32 %v16260_v4, %v12429_v49  ;;  %v13005_v54 = vld [vmem:[#allocation6 + $0x5e8] sm:$0xf]  ;;  %v16296_v49 = vld [vmem:[#allocation6 + $0x294] sm:$0xf0] }
 0x259   : > { %v12634_v13 = vor.u32 %v16309_v9, %v12631_v11  ;;  %v12302_v11 = vor.u32 %v16228_v7, %v12301_v63  ;;  %v13239_v63 = vld [vmem:[#allocation6 + $0x7d0] sm:$0xf0] }
 0x25a   : > { %5173 = vmatpush.bf16.msrb.mxu0 %v12826_v60  ;;  %v12493_v60 = vld [vmem:[#allocation6 + $0x1e8] sm:$0xf]  ;;  %5198 = vmatpush.bf16.msrb.mxu2 %v13098_v18  ;;  %v16224_v18 = vld [vmem:[#allocation6 + $0x54] sm:$0xf0] }
 0x25b   : > { %5164 = vmatpush.bf16.msra.mxu3 %v12634_v13  ;;  %v12494_v24 = vor.u32 %v16276_v14, %v12493_v60  ;;  %v12285_v13 = vld [vmem:[#allocation6 + $0x48] sm:$0xf]  ;;  %v16256_v14 = vld [vmem:[#allocation6 + $0x154] sm:$0xf0] }
 0x25c   : > { %5186 = vmatpush.bf16.msrb.mxu1 %v12954_v28  ;;  %v16421_v28 = vld [vmem:[#allocation6 + $0x684] sm:$0xf]  ;;  %v12414_v45 = vor.u32 %v16256_v14, %v12413_v51  ;;  %v16292_v51 = vld [vmem:[#allocation6 + $0x274] sm:$0xf0] }
 0x25d   : > { %v13082_v26 = vor.u32 %v16421_v28, %v13079_v20  ;;  %v12286_v28 = vor.u32 %v16224_v18, %v12285_v13  ;;  %v12605_v20 = vld [vmem:[#allocation6 + $0x2c8] sm:$0xf]  ;;  %v13223_v13 = vld [vmem:[#allocation6 + $0x7b0] sm:$0xf0] }
 0x25e   : > { %5174 = vmatpush.bf16.msrb.mxu0 %v12810_v3  ;;  %v16272_v3 = vld [vmem:[#allocation6 + $0x1d4] sm:$0xf0] }
 0x25f   : > { %5199 = vmatpush.bf16.msrb.mxu2 %v13082_v26 }
 0x260   : > { %5187 = vmatpush.bf16.msrb.mxu1 %v12938_v38  ;;  %v12478_v38 = vor.u32 %v16272_v3, %v12477_v0  ;;  %5152 = vmatmul.bf16.vlgmr.msra.gmra.mxu2 %v17804_v23  ;;  %v12397_v3 = vld [vmem:[#allocation6 + $0x128] sm:$0xf] }
 0x262   : > { %5175 = vmatpush.bf16.msrb.mxu0 %v12794_v47  ;;  %v13047_v47 = vld [vmem:[#allocation6 + $0x650] sm:$0xf0] }
 0x263   : > { %5200 = vmatpush.bf16.msrb.mxu2 %v13066_v43  ;;  %v13050_v52 = vor.u32 %v16413_v30, %v13047_v47  ;;  %v12253_v43 = vld [vmem:[#allocation6 + $0x8] sm:$0xf]  ;;  %v12398_v30 = vor.u32 %v16252_v33, %v12397_v3  ;;  %v16216_v47 = vld [vmem:[#allocation6 + $0x14] sm:$0xf0] }
 0x264   : > { %5188 = vmatpush.bf16.msrb.mxu1 %v12922_v8  ;;  %v16232_v8 = vld [vmem:[#allocation6 + $0x94] sm:$0xf0]  ;;  %v12829_v33 = vld [vmem:[#allocation6 + $0x488] sm:$0xf] }
 0x265   : > { %v12318_v62 = vor.u32 %v16232_v8, %v12317_v37  ;;  %v12877_v8 = vld [vmem:[#allocation6 + $0x4e8] sm:$0xf] }
 0x266   : > { %5176 = vmatpush.bf16.msrb.mxu0 %v12778_v42 }
 0x267   : > { %5201 = vmatpush.bf16.msrb.mxu2 %v13050_v52 }
 0x268   : > { %5189 = vmatpush.bf16.msrb.mxu1 %v12906_v5  ;;  %v16405_v5 = vld [vmem:[#allocation6 + $0x604] sm:$0xf] }
 0x269   : > { %v13018_v60 = vor.u32 %v16405_v5, %v13015_v6  ;;  %v12861_v5 = vld [vmem:[#allocation6 + $0x4c8] sm:$0xf]  ;;  %v16368_v6 = vld [vmem:[#allocation6 + $0x4d4] sm:$0xf0] }
 0x26a   : > { %5177 = vmatpush.bf16.msrb.mxu0 %v12762_v19  ;;  %v3409_v42 = vpop.f32.mrf.mxu0  ;;  %v12622_v19 = vor.u32 %v16308_v15, %v12621_v12  ;;  %v16400_v12 = vld [vmem:[#allocation6 + $0x5d4] sm:$0xf0]  ;;  %v12862_v18 = vor.u32 %v16368_v6, %v12861_v5  ;;  %v13133_v5 = vld [vmem:[#allocation6 + $0x6e8] sm:$0xf] }
 0x26b   : > { %v3410_v9 = vadd.f32 %v3409_v42, %v3397_v61  ;;  %5202 = vmatpush.bf16.msrb.mxu2 %v13034_v46  ;;  %v12878_v42 = vor.u32 %v16372_v29, %v12877_v8  ;;  %v12573_v46 = vld [vmem:[#allocation6 + $0x288] sm:$0xf]  ;;  %v16436_v6 = vld [vmem:[#allocation6 + $0x6f4] sm:$0xf0] }
 0x26c   : > { %5190 = vmatpush.bf16.msrb.mxu1 %v12890_v21  ;;  %v3422_v34 = vpop.f32.mrf.mxu1  ;;  %v16304_v21 = vld [vmem:[#allocation6 + $0x2d4] sm:$0xf0]  ;;  %v12574_v15 = vor.u32 %v16296_v49, %v12573_v46  ;;  %v12797_v46 = vld [vmem:[#allocation6 + $0x448] sm:$0xf] }
 0x26d   : > { %5178 = vmatmul.bf16.vlgmr.msrb.gmra.mxu0 %v17819_v27  ;;  %v3423_v17 = vadd.f32 %v3422_v34, %v3410_v9  ;;  %v13006_v34 = vor.u32 %v16404_v55, %v13005_v54 }
 0x26e   : > { %5222 = vmatpush.bf16.msra.mxu0 %v12366_v59 }
 0x26f   : > { %5191 = vmatmul.bf16.vlgmr.msrb.gmra.mxu1 %v17817_v1  ;;  %5203 = vmatpush.bf16.msrb.mxu2 %v13018_v60  ;;  %v12557_v60 = vld [vmem:[#allocation6 + $0x268] sm:$0xf] }
 0x270   : > { %5235 = vmatpush.bf16.msra.mxu1 %v12494_v24  ;;  %v12269_v24 = vld [vmem:[#allocation6 + $0x28] sm:$0xf] }
 0x271   : > { %v12270_v41 = vor.u32 %v16220_v25, %v12269_v24  ;;  %v13207_v24 = vld [vmem:[#allocation6 + $0x790] sm:$0xf0] }
 0x272   : > { %5223 = vmatpush.bf16.msra.mxu0 %v12350_v58  ;;  %v3411_v0 = vpop.f32.mrf.mxu0  ;;  %v12606_v58 = vor.u32 %v16304_v21, %v12605_v20  ;;  %5204 = vmatmul.bf16.vlgmr.msrb.gmra.mxu2 %v17840_v10  ;;  %v12973_v20 = vld [vmem:[#allocation6 + $0x5a8] sm:$0xf]  ;;  %v16396_v21 = vld [vmem:[#allocation6 + $0x5b4] sm:$0xf0] }
 0x273   : > { %5248 = vmatpush.bf16.msra.mxu2 %v12622_v19  ;;  %v12845_v19 = vld [vmem:[#allocation6 + $0x4a8] sm:$0xf]  ;;  %v16288_v0 = vld [vmem:[#allocation6 + $0x254] sm:$0xf0]  ;;  %v12974_v3 = vor.u32 %v16396_v21, %v12973_v20 }
 0x274   : > { %5236 = vmatpush.bf16.msra.mxu1 %v12478_v38  ;;  %v3435_v59 = vpop.f32.mrf.mxu2  ;;  %v3424_v56 = vpop.f32.mrf.mxu1  ;;  %v16465_v38 = vld [vmem:[#allocation6 + $0x7e4] sm:$0xf]  ;;  %v16432_v20 = vld [vmem:[#allocation6 + $0x6d4] sm:$0xf0] }
 0x275   : > { %v3436_v2 = vadd.f32 %v3435_v59, %v3423_v17  ;;  %v13258_v52 = vor.u32 %v16465_v38, %v13255_v39  ;;  %v16364_v17 = vld [vmem:[#allocation6 + $0x4b4] sm:$0xf0]  ;;  %v12558_v59 = vor.u32 %v16292_v51, %v12557_v60  ;;  %v12957_v38 = vld [vmem:[#allocation6 + $0x588] sm:$0xf]  ;;  %v13134_v60 = vor.u32 %v16436_v6, %v13133_v5  ;;  %v12351_v6 = vld [vmem:[#allocation6 + $0xd8] sm:$0xf0] }
 0x276   : > { %5224 = vmatpush.bf16.msra.mxu0 %v12334_v48  ;;  %v3448_v26 = vpop.f32.mrf.mxu3  ;;  %v12381_v48 = vld [vmem:[#allocation6 + $0x108] sm:$0xf]  ;;  %v12846_v25 = vor.u32 %v16364_v17, %v12845_v19  ;;  %v16360_v56 = vld [vmem:[#allocation6 + $0x494] sm:$0xf0] }
 0x277   : > { %v3449_v40 = vadd.f32 %v3448_v26, %v3436_v2  ;;  %5249 = vmatpush.bf16.msra.mxu2 %v12606_v58  ;;  %v17859_v2 = vld [vmem:[#allocation7] sm:$0xf]  ;;  %v12541_v26 = vld [vmem:[#allocation6 + $0x248] sm:$0xf]  ;;  %v16392_v39 = vld [vmem:[#allocation6 + $0x594] sm:$0xf0]  ;;  %v12830_v44 = vor.u32 %v16360_v56, %v12829_v33 }
 0x278   : > { %5237 = vmatpush.bf16.msra.mxu1 %v12462_v50  ;;  %v16248_v50 = vld [vmem:[#allocation6 + $0x114] sm:$0xf0]  ;;  %v12781_v51 = vld [vmem:[#allocation6 + $0x428] sm:$0xf]  ;;  %v13143_v33 = vld [vmem:[#allocation6 + $0x710] sm:$0xf0] }
 0x279   : > { %v3459_v37 = vmax.f32 %v3449_v40, 0.0  ;;  %v12382_v61 = vor.u32 %v16248_v50, %v12381_v48  ;;  %v5006_v40 = vperm.slane %v17859_v2, 0  ;;  %v12958_v48 = vor.u32 %v16392_v39, %v12957_v38  ;;  %v12813_v50 = vld [vmem:[#allocation6 + $0x468] sm:$0xf]  ;;  %v16348_v17 = vld [vmem:[#allocation6 + $0x434] sm:$0xf0] }
 0x27a   : > { %5225 = vmatpush.bf16.msra.mxu0 %v12318_v62  ;;  %v12254_v62 = vor.u32 %v16216_v47, %v12253_v43  ;;  %v16449_v43 = vld [vmem:[#allocation6 + $0x764] sm:$0xf]  ;;  %v16284_v47 = vld [vmem:[#allocation6 + $0x234] sm:$0xf0]  ;;  %v12749_v39 = vld [vmem:[#allocation6 + $0x3e8] sm:$0xf] }
 0x27b   : > { %v17854_v57 = vpack.c.bf16 %v3459_v37, %v3459_v37  ;;  %5250 = vmatpush.bf16.msra.mxu2 %v12590_v53  ;;  %v16356_v37 = vld [vmem:[#allocation6 + $0x474] sm:$0xf0]  ;;  %v13194_v29 = vor.u32 %v16449_v43, %v13191_v31 }
 0x27c   : > { %5238 = vmatpush.bf16.msra.mxu1 %v12446_v36  ;;  %v16461_v36 = vld [vmem:[#allocation6 + $0x7c4] sm:$0xf]  ;;  %v3437_v7 = vpop.f32.mrf.mxu2  ;;  %v16388_v53 = vld [vmem:[#allocation6 + $0x574] sm:$0xf0] }
 0x27d   : > { %5113 = vmatmul.bf16.vlgmr.msrb.gmra.mxu3 %v17854_v57  ;;  %v13242_v9 = vor.u32 %v16461_v36, %v13239_v63  ;;  %v16445_v36 = vld [vmem:[#allocation6 + $0x744] sm:$0xf]  ;;  %v13175_v63 = vld [vmem:[#allocation6 + $0x750] sm:$0xf0]  ;;  %v12814_v7 = vor.u32 %v16356_v37, %v12813_v50  ;;  %v16344_v31 = vld [vmem:[#allocation6 + $0x414] sm:$0xf0] }
 0x27e   : > { %5226 = vmatpush.bf16.msra.mxu0 %v12302_v11  ;;  %v3450_v4 = vpop.f32.mrf.mxu3  ;;  %5209 = vmatpush.bf16.msrb.mxu3 %v13258_v52  ;;  %v12989_v11 = vld [vmem:[#allocation6 + $0x5c8] sm:$0xf]  ;;  %v16376_v50 = vld [vmem:[#allocation6 + $0x514] sm:$0xf0]  ;;  %v16242_v37 = vld [vmem:[#allocation6 + $0xec] sm:$0xf] }
 0x27f   : > { %v12990_v14 = vor.u32 %v16400_v12, %v12989_v11  ;;  %5251 = vmatpush.bf16.msra.mxu2 %v12574_v15  ;;  %v12941_v52 = vld [vmem:[#allocation6 + $0x568] sm:$0xf]  ;;  %v16384_v12 = vld [vmem:[#allocation6 + $0x554] sm:$0xf0] }
 0x280   : > { %5239 = vmatpush.bf16.msra.mxu1 %v12430_v16  ;;  %v16457_v16 = vld [vmem:[#allocation6 + $0x7a4] sm:$0xf]  ;;  %v12942_v4 = vor.u32 %v16388_v53, %v12941_v52  ;;  %v12925_v11 = vld [vmem:[#allocation6 + $0x548] sm:$0xf]  ;;  %v16274_v52 = vld [vmem:[#allocation6 + $0x1ec] sm:$0xf] }
 0x281   : > { %v12926_v19 = vor.u32 %v16384_v12, %v12925_v11  ;;  %v12495_v53 = vld [vmem:[#allocation6 + $0x1f8] sm:$0xf0] }
 0x282   : > { %5227 = vmatpush.bf16.msra.mxu0 %v12286_v28  ;;  %5210 = vmatpush.bf16.msrb.mxu3 %v13242_v9  ;;  %v13226_v28 = vor.u32 %v16457_v16, %v13223_v13  ;;  %v13178_v9 = vor.u32 %v16445_v36, %v13175_v63  ;;  %v16441_v16 = vld [vmem:[#allocation6 + $0x724] sm:$0xf]  ;;  %v13159_v13 = vld [vmem:[#allocation6 + $0x730] sm:$0xf0]  ;;  %v16336_v36 = vld [vmem:[#allocation6 + $0x3d4] sm:$0xf0] }
 0x283   : > { %5252 = vmatpush.bf16.msra.mxu2 %v12558_v59  ;;  %v12479_v11 = vld [vmem:[#allocation6 + $0x1d8] sm:$0xf0] }
 0x284   : > { %5240 = vmatpush.bf16.msra.mxu1 %v12414_v45  ;;  %v16453_v45 = vld [vmem:[#allocation6 + $0x784] sm:$0xf] }
 0x285   : > { %v13210_v58 = vor.u32 %v16453_v45, %v13207_v24  ;;  %v13162_v24 = vor.u32 %v16441_v16, %v13159_v13  ;;  %v16332_v16 = vld [vmem:[#allocation6 + $0x3b4] sm:$0xf0]  ;;  %v13069_v13 = vld [vmem:[#allocation6 + $0x668] sm:$0xf] }
 0x286   : > { %5228 = vmatpush.bf16.msra.mxu0 %v12270_v41  ;;  %5211 = vmatpush.bf16.msrb.mxu3 %v13226_v28  ;;  %v12542_v41 = vor.u32 %v16288_v0, %v12541_v26  ;;  %v13117_v28 = vld [vmem:[#allocation6 + $0x6c8] sm:$0xf]  ;;  %v16380_v26 = vld [vmem:[#allocation6 + $0x534] sm:$0xf0] }
 0x287   : > { %v13118_v38 = vor.u32 %v16432_v20, %v13117_v28  ;;  %v16266_v28 = vld [vmem:[#allocation6 + $0x1ac] sm:$0xf]  ;;  %v12463_v20 = vld [vmem:[#allocation6 + $0x1b8] sm:$0xf0] }
 0x288   : > { %5241 = vmatpush.bf16.msra.mxu1 %v12398_v30  ;;  %v12525_v30 = vld [vmem:[#allocation6 + $0x228] sm:$0xf]  ;;  %5253 = vmatpush.bf16.msra.mxu2 %v12542_v41 }
 0x289   : > { %v12765_v41 = vld [vmem:[#allocation6 + $0x408] sm:$0xf] }
 0x28a   : > { %5229 = vmatpush.bf16.msra.mxu0 %v12254_v62  ;;  %5212 = vmatpush.bf16.msrb.mxu3 %v13210_v58  ;;  %v5023_v8 = vpop.f32.mrf.mxu0  ;;  %v12526_v62 = vor.u32 %v16284_v47, %v12525_v30  ;;  %v12782_v58 = vor.u32 %v16348_v17, %v12781_v51  ;;  %v16428_v30 = vld [vmem:[#allocation6 + $0x6b4] sm:$0xf0]  ;;  %v12335_v17 = vld [vmem:[#allocation6 + $0xb8] sm:$0xf0] }
 0x28b   : > { %v5024_v54 = vadd.f32 %v5023_v8, %v5006_v40  ;;  %v16340_v40 = vld [vmem:[#allocation6 + $0x3f4] sm:$0xf0] }
 0x28c   : > { %5242 = vmatpush.bf16.msra.mxu1 %v12382_v61  ;;  %v5036_v55 = vpop.f32.mrf.mxu1  ;;  %v12509_v61 = vld [vmem:[#allocation6 + $0x208] sm:$0xf]  ;;  %5254 = vmatpush.bf16.msra.mxu2 %v12526_v62  ;;  %v12750_v8 = vor.u32 %v16340_v40, %v12749_v39  ;;  %v12447_v39 = vld [vmem:[#allocation6 + $0x198] sm:$0xf0] }
 0x28d   : > { %5230 = vmatmul.bf16.vlgmr.msra.gmra.mxu0 %v17800_v22  ;;  %v5037_v49 = vadd.f32 %v5036_v55, %v5024_v54  ;;  %5165 = vmatmul.bf16.vlgmr.msra.gmra.mxu3 %v17806_v32  ;;  %v12766_v54 = vor.u32 %v16344_v31, %v12765_v41  ;;  %v12733_v62 = vld [vmem:[#allocation6 + $0x3c8] sm:$0xf] }
 0x28e   : > { %5274 = vmatpush.bf16.msrb.mxu0 %v12878_v42  ;;  %v16280_v42 = vld [vmem:[#allocation6 + $0x214] sm:$0xf0]  ;;  %5213 = vmatpush.bf16.msrb.mxu3 %v13194_v29  ;;  %v12367_v29 = vld [vmem:[#allocation6 + $0xf8] sm:$0xf0]  ;;  %v12734_v5 = vor.u32 %v16336_v36, %v12733_v62  ;;  %v12685_v41 = vld [vmem:[#allocation6 + $0x368] sm:$0xf] }
 0x28f   : > { %5243 = vmatmul.bf16.vlgmr.msra.gmra.mxu1 %v17802_v35  ;;  %v12510_v15 = vor.u32 %v16280_v42, %v12509_v61  ;;  %v13085_v61 = vld [vmem:[#allocation6 + $0x688] sm:$0xf]  ;;  %v16424_v42 = vld [vmem:[#allocation6 + $0x694] sm:$0xf0] }
 0x290   : > { %5287 = vmatpush.bf16.msrb.mxu1 %v13006_v34  ;;  %v16352_v34 = vld [vmem:[#allocation6 + $0x454] sm:$0xf0]  ;;  %v13086_v12 = vor.u32 %v16424_v42, %v13085_v61  ;;  %v13037_v31 = vld [vmem:[#allocation6 + $0x628] sm:$0xf] }
 0x291   : > { %5255 = vmatpush.bf16.msra.mxu2 %v12510_v15  ;;  %v12717_v15 = vld [vmem:[#allocation6 + $0x3a8] sm:$0xf] }
 0x292   : > { %5275 = vmatpush.bf16.msrb.mxu0 %v12862_v18  ;;  %v12798_v18 = vor.u32 %v16352_v34, %v12797_v46  ;;  %5214 = vmatpush.bf16.msrb.mxu3 %v13178_v9  ;;  %v5025_v45 = vpop.f32.mrf.mxu0  ;;  %v16238_v34 = vld [vmem:[#allocation6 + $0xcc] sm:$0xf] }
 0x293   : > { %v16270_v9 = vld [vmem:[#allocation6 + $0x1cc] sm:$0xf]  ;;  %v16328_v45 = vld [vmem:[#allocation6 + $0x394] sm:$0xf0] }
 0x294   : > { %5288 = vmatpush.bf16.msrb.mxu1 %v12990_v14  ;;  %v5049_v14 = vpop.f32.mrf.mxu2  ;;  %v5038_v0 = vpop.f32.mrf.mxu1  ;;  %5256 = vmatmul.bf16.vlgmr.msra.gmra.mxu2 %v17804_v23  ;;  %v12482_v51 = vor.u32 %v16270_v9, %v12479_v11  ;;  %v16254_v9 = vld [vmem:[#allocation6 + $0x14c] sm:$0xf]  ;;  %v12415_v11 = vld [vmem:[#allocation6 + $0x158] sm:$0xf0] }
 0x295   : > { %v5050_v21 = vadd.f32 %v5049_v14, %v5037_v49  ;;  %5300 = vmatpush.bf16.msrb.mxu2 %v13134_v60  ;;  %v12370_v49 = vor.u32 %v16242_v37, %v12367_v29  ;;  %v12354_v60 = vor.u32 %v16238_v34, %v12351_v6  ;;  %v16234_v14 = vld [vmem:[#allocation6 + $0xac] sm:$0xf]  ;;  %v12466_v0 = vor.u32 %v16266_v28, %v12463_v20  ;;  %v12303_v37 = vld [vmem:[#allocation6 + $0x78] sm:$0xf0] }
 0x296   : > { %5276 = vmatpush.bf16.msrb.mxu0 %v12846_v25  ;;  %v5062_v59 = vpop.f32.mrf.mxu3  ;;  %v12909_v25 = vld [vmem:[#allocation6 + $0x528] sm:$0xf]  ;;  %5215 = vmatpush.bf16.msrb.mxu3 %v13162_v24  ;;  %v12431_v29 = vld [vmem:[#allocation6 + $0x178] sm:$0xf0]  ;;  %v16250_v28 = vld [vmem:[#allocation6 + $0x12c] sm:$0xf] }
 0x297   : > { %v17863_v56 = vadd.f32 %v5062_v59, %v5050_v21  ;;  %v12910_v43 = vor.u32 %v16380_v26, %v12909_v25  ;;  %v12701_v59 = vld [vmem:[#allocation6 + $0x388] sm:$0xf]  ;;  %v16416_v25 = vld [vmem:[#allocation6 + $0x654] sm:$0xf0]  ;;  %v12338_v26 = vor.u32 %v16234_v14, %v12335_v17  ;;  %v12287_v6 = vld [vmem:[#allocation6 + $0x58] sm:$0xf0] }
 0x298   : > { %5289 = vmatpush.bf16.msrb.mxu1 %v12974_v3  ;;  %v16437_v3 = vld [vmem:[#allocation6 + $0x704] sm:$0xf]  ;;  %v13053_v24 = vld [vmem:[#allocation6 + $0x648] sm:$0xf]  ;;  %v12607_v14 = vld [vmem:[#allocation6 + $0x2d8] sm:$0xf0] }
 0x299   : > { %v13146_v47 = vor.u32 %v16437_v3, %v13143_v33  ;;  %5301 = vmatpush.bf16.msrb.mxu2 %v13118_v38  ;;  %v16230_v3 = vld [vmem:[#allocation6 + $0x8c] sm:$0xf]  ;;  %v12702_v33 = vor.u32 %v16328_v45, %v12701_v59  ;;  %v13054_v40 = vor.u32 %v16416_v25, %v13053_v24  ;;  %v12271_v17 = vld [vmem:[#allocation6 + $0x38] sm:$0xf0]  ;;  %v12637_v59 = vld [vmem:[#allocation6 + $0x308] sm:$0xf] }
 0x29a   : > { %5277 = vmatpush.bf16.msrb.mxu0 %v12830_v44  ;;  %v13101_v44 = vld [vmem:[#allocation6 + $0x6a8] sm:$0xf]  ;;  %v16262_v38 = vld [vmem:[#allocation6 + $0x18c] sm:$0xf]  ;;  %v12399_v20 = vld [vmem:[#allocation6 + $0x138] sm:$0xf0] }
 0x29b   : > { %v13102_v55 = vor.u32 %v16428_v30, %v13101_v44  ;;  %5216 = vmatpush.bf16.msrb.mxu3 %v13146_v47  ;;  %v16412_v44 = vld [vmem:[#allocation6 + $0x634] sm:$0xf0]  ;;  %v12450_v47 = vor.u32 %v16262_v38, %v12447_v39  ;;  %v16298_v38 = vld [vmem:[#allocation6 + $0x2ac] sm:$0xf]  ;;  %v12591_v39 = vld [vmem:[#allocation6 + $0x2b8] sm:$0xf0] }
 0x29c   : > { %5290 = vmatpush.bf16.msrb.mxu1 %v12958_v48  ;;  %v12893_v48 = vld [vmem:[#allocation6 + $0x508] sm:$0xf]  ;;  %v5051_v63 = vpop.f32.mrf.mxu2  ;;  %v16312_v45 = vld [vmem:[#allocation6 + $0x314] sm:$0xf0] }
 0x29d   : > { %5302 = vmatpush.bf16.msrb.mxu2 %v13102_v55  ;;  %v16320_v55 = vld [vmem:[#allocation6 + $0x354] sm:$0xf0]  ;;  %v13021_v63 = vld [vmem:[#allocation6 + $0x608] sm:$0xf] }
 0x29e   : > { %5278 = vmatpush.bf16.msrb.mxu0 %v12814_v7  ;;  %v12894_v7 = vor.u32 %v16376_v50, %v12893_v48  ;;  %v5064_v46 = vpop.f32.mrf.mxu3  ;;  %5217 = vmatmul.bf16.vlgmr.msrb.gmra.mxu3 %v17854_v57  ;;  %v16226_v48 = vld [vmem:[#allocation6 + $0x6c] sm:$0xf] }
 0x29f   : > { %5261 = vmatpush.bf16.msra.mxu3 %v12750_v8  ;;  %v16258_v8 = vld [vmem:[#allocation6 + $0x16c] sm:$0xf]  ;;  %v12306_v61 = vor.u32 %v16226_v48, %v12303_v37  ;;  %v13007_v37 = vld [vmem:[#allocation6 + $0x5f8] sm:$0xf0] }
 0x2a0   : > { %5291 = vmatpush.bf16.msrb.mxu1 %v12942_v4  ;;  %v12498_v4 = vor.u32 %v16274_v52, %v12495_v53  ;;  %v13038_v53 = vor.u32 %v16412_v44, %v13037_v31  ;;  %v12434_v42 = vor.u32 %v16258_v8, %v12431_v29  ;;  %v16222_v46 = vld [vmem:[#allocation6 + $0x4c] sm:$0xf]  ;;  %v12383_v31 = vld [vmem:[#allocation6 + $0x118] sm:$0xf0]  ;;  %v13245_v8 = vld [vmem:[#allocation6 + $0x7c8] sm:$0xf] }
 0x2a1   : > { %5303 = vmatpush.bf16.msrb.mxu2 %v13086_v12  ;;  %v16402_v48 = vld [vmem:[#allocation6 + $0x5ec] sm:$0xf]  ;;  %v16464_v29 = vld [vmem:[#allocation6 + $0x7d4] sm:$0xf0] }
 0x2a2   : > { %5279 = vmatpush.bf16.msrb.mxu0 %v12798_v18  ;;  %v16420_v18 = vld [vmem:[#allocation6 + $0x674] sm:$0xf0] }
 0x2a3   : > { %5262 = vmatpush.bf16.msra.mxu3 %v12734_v5  ;;  %v13070_v21 = vor.u32 %v16420_v18, %v13069_v13  ;;  %v12290_v13 = vor.u32 %v16222_v46, %v12287_v6  ;;  %v12418_v18 = vor.u32 %v16254_v9, %v12415_v11  ;;  %v16290_v6 = vld [vmem:[#allocation6 + $0x26c] sm:$0xf]  ;;  %v12559_v9 = vld [vmem:[#allocation6 + $0x278] sm:$0xf0] }
 0x2a4   : > { %5292 = vmatpush.bf16.msrb.mxu1 %v12926_v19  ;;  %v12718_v19 = vor.u32 %v16332_v16, %v12717_v15  ;;  %v16316_v15 = vld [vmem:[#allocation6 + $0x334] sm:$0xf0] }
 0x2a5   : > { %5304 = vmatpush.bf16.msrb.mxu2 %v13070_v21 }
 0x2a6   : > { %5280 = vmatpush.bf16.msrb.mxu0 %v12782_v58  ;;  %v12319_v58 = vld [vmem:[#allocation6 + $0x98] sm:$0xf0] }
 0x2a7   : > { %5263 = vmatpush.bf16.msra.mxu3 %v12718_v19  ;;  %v12322_v30 = vor.u32 %v16230_v3, %v12319_v58  ;;  %v16214_v58 = vld [vmem:[#allocation6 + $0xc] sm:$0xf] }
 0x2a8   : > { %5293 = vmatpush.bf16.msrb.mxu1 %v12910_v43  ;;  %v16324_v43 = vld [vmem:[#allocation6 + $0x374] sm:$0xf0] }
 0x2a9   : > { %v12686_v50 = vor.u32 %v16324_v43, %v12685_v41  ;;  %5305 = vmatpush.bf16.msrb.mxu2 %v13054_v40  ;;  %v12638_v40 = vor.u32 %v16312_v45, %v12637_v59  ;;  %v12255_v41 = vld [vmem:[#allocation6 + $0x18] sm:$0xf0]  ;;  %v16246_v43 = vld [vmem:[#allocation6 + $0x10c] sm:$0xf] }
 0x2aa   : > { %5281 = vmatpush.bf16.msrb.mxu0 %v12766_v54  ;;  %v5075_v52 = vpop.f32.mrf.mxu0  ;;  %v12669_v54 = vld [vmem:[#allocation6 + $0x348] sm:$0xf]  ;;  %v16358_v59 = vld [vmem:[#allocation6 + $0x48c] sm:$0xf]  ;;  %v12831_v45 = vld [vmem:[#allocation6 + $0x498] sm:$0xf0] }
 0x2ab   : > { %5264 = vmatpush.bf16.msra.mxu3 %v12702_v33  ;;  %v5076_v62 = vadd.f32 %v5075_v52, %v17863_v56  ;;  %v12670_v5 = vor.u32 %v16320_v55, %v12669_v54  ;;  %v12653_v56 = vld [vmem:[#allocation6 + $0x328] sm:$0xf]  ;;  %v12402_v33 = vor.u32 %v16250_v28, %v12399_v20  ;;  %v12258_v52 = vor.u32 %v16214_v58, %v12255_v41  ;;  %v12575_v54 = vld [vmem:[#allocation6 + $0x298] sm:$0xf0] }
 0x2ac   : > { %5294 = vmatpush.bf16.msrb.mxu1 %v12894_v7  ;;  %v5088_v36 = vpop.f32.mrf.mxu1  ;;  %v16408_v7 = vld [vmem:[#allocation6 + $0x614] sm:$0xf0]  ;;  %v12654_v19 = vor.u32 %v16316_v15, %v12653_v56  ;;  %v12386_v55 = vor.u32 %v16246_v43, %v12383_v31  ;;  %v16362_v15 = vld [vmem:[#allocation6 + $0x4ac] sm:$0xf]  ;;  %v12834_v58 = vor.u32 %v16358_v59, %v12831_v45  ;;  %v12815_v41 = vld [vmem:[#allocation6 + $0x478] sm:$0xf0] }
 0x2ad   : > { %5282 = vmatmul.bf16.vlgmr.msrb.gmra.mxu0 %v17819_v27  ;;  %v17870_v34 = vadd.f32 %v5088_v36, %v5076_v62  ;;  %5306 = vmatpush.bf16.msrb.mxu2 %v13038_v53  ;;  %v13022_v12 = vor.u32 %v16408_v7, %v13021_v63  ;;  %v16294_v53 = vld [vmem:[#allocation6 + $0x28c] sm:$0xf]  ;;  %v13010_v36 = vor.u32 %v16402_v48, %v13007_v37  ;;  %v16448_v48 = vld [vmem:[#allocation6 + $0x754] sm:$0xf0]  ;;  %v13103_v45 = vld [vmem:[#allocation6 + $0x6b8] sm:$0xf0] }
 0x2ae   : > { %5326 = vmatpush.bf16.msra.mxu0 %v12370_v49  ;;  %v16306_v49 = vld [vmem:[#allocation6 + $0x2ec] sm:$0xf]  ;;  %v13246_v63 = vor.u32 %v16464_v29, %v13245_v8  ;;  %v12578_v46 = vor.u32 %v16294_v53, %v12575_v54  ;;  %v12511_v8 = vld [vmem:[#allocation6 + $0x218] sm:$0xf0] }
 0x2af   : > { %5295 = vmatmul.bf16.vlgmr.msrb.gmra.mxu1 %v17817_v1  ;;  %5265 = vmatpush.bf16.msra.mxu3 %v12686_v50  ;;  %v12594_v50 = vor.u32 %v16298_v38, %v12591_v39  ;;  %v16366_v7 = vld [vmem:[#allocation6 + $0x4cc] sm:$0xf]  ;;  %v13135_v53 = vld [vmem:[#allocation6 + $0x6f8] sm:$0xf0] }
 0x2b0   : > { %5339 = vmatpush.bf16.msra.mxu1 %v12498_v4  ;;  %v12623_v4 = vld [vmem:[#allocation6 + $0x2f8] sm:$0xf0]  ;;  %v16386_v43 = vld [vmem:[#allocation6 + $0x56c] sm:$0xf] }
 0x2b1   : > { %v12626_v16 = vor.u32 %v16306_v49, %v12623_v4  ;;  %5307 = vmatpush.bf16.msrb.mxu2 %v13022_v12  ;;  %v12991_v49 = vld [vmem:[#allocation6 + $0x5d8] sm:$0xf0]  ;;  %v13229_v4 = vld [vmem:[#allocation6 + $0x7a8] sm:$0xf]  ;;  %v16426_v59 = vld [vmem:[#allocation6 + $0x6ac] sm:$0xf] }
 0x2b2   : > { %5327 = vmatpush.bf16.msra.mxu0 %v12354_v60  ;;  %v16218_v60 = vld [vmem:[#allocation6 + $0x2c] sm:$0xf]  ;;  %v5077_v21 = vpop.f32.mrf.mxu0 }
 0x2b3   : > { %5266 = vmatpush.bf16.msra.mxu3 %v12670_v5  ;;  %v12274_v3 = vor.u32 %v16218_v60, %v12271_v17  ;;  %v16460_v5 = vld [vmem:[#allocation6 + $0x7b4] sm:$0xf0]  ;;  %v12975_v60 = vld [vmem:[#allocation6 + $0x5b8] sm:$0xf0] }
 0x2b4   : > { %5340 = vmatpush.bf16.msra.mxu1 %v12482_v51  ;;  %v16302_v51 = vld [vmem:[#allocation6 + $0x2cc] sm:$0xf]  ;;  %v5090_v24 = vpop.f32.mrf.mxu1  ;;  %5308 = vmatmul.bf16.vlgmr.msrb.gmra.mxu2 %v17840_v10  ;;  %v13230_v56 = vor.u32 %v16460_v5, %v13229_v4  ;;  %v12543_v17 = vld [vmem:[#allocation6 + $0x258] sm:$0xf0] }
 0x2b5   : > { %5352 = vmatpush.bf16.msra.mxu2 %v12626_v16  ;;  %v12610_v25 = vor.u32 %v16302_v51, %v12607_v14  ;;  %v12847_v16 = vld [vmem:[#allocation6 + $0x4b8] sm:$0xf0]  ;;  %v13213_v51 = vld [vmem:[#allocation6 + $0x788] sm:$0xf]  ;;  %v16456_v14 = vld [vmem:[#allocation6 + $0x794] sm:$0xf0] }
 0x2b6   : > { %5328 = vmatpush.bf16.msra.mxu0 %v12338_v26  ;;  %v13261_v26 = vld [vmem:[#allocation6 + $0x7e8] sm:$0xf]  ;;  %v12850_v28 = vor.u32 %v16362_v15, %v12847_v16  ;;  %v13214_v21 = vor.u32 %v16456_v14, %v13213_v51  ;;  %v16390_v24 = vld [vmem:[#allocation6 + $0x58c] sm:$0xf]  ;;  %v12783_v15 = vld [vmem:[#allocation6 + $0x438] sm:$0xf0] }
 0x2b7   : > { %5267 = vmatpush.bf16.msra.mxu3 %v12654_v19  ;;  %v16286_v19 = vld [vmem:[#allocation6 + $0x24c] sm:$0xf]  ;;  %v16440_v51 = vld [vmem:[#allocation6 + $0x714] sm:$0xf0] }
 0x2b8   : > { %5341 = vmatpush.bf16.msra.mxu1 %v12466_v0  ;;  %v16468_v0 = vld [vmem:[#allocation6 + $0x7f4] sm:$0xf0]  ;;  %v16378_v16 = vld [vmem:[#allocation6 + $0x52c] sm:$0xf] }
 0x2b9   : > { %v13262_v44 = vor.u32 %v16468_v0, %v13261_v26  ;;  %5353 = vmatpush.bf16.msra.mxu2 %v12610_v25  ;;  %v12959_v25 = vld [vmem:[#allocation6 + $0x598] sm:$0xf0]  ;;  %v13197_v26 = vld [vmem:[#allocation6 + $0x768] sm:$0xf]  ;;  %v16452_v0 = vld [vmem:[#allocation6 + $0x774] sm:$0xf0] }
 0x2ba   : > { %5329 = vmatpush.bf16.msra.mxu0 %v12322_v30  ;;  %v16370_v30 = vld [vmem:[#allocation6 + $0x4ec] sm:$0xf]  ;;  %v12962_v38 = vor.u32 %v16390_v24, %v12959_v25  ;;  %v13198_v39 = vor.u32 %v16452_v0, %v13197_v26  ;;  %v12767_v25 = vld [vmem:[#allocation6 + $0x418] sm:$0xf0] }
 0x2bb   : > { %5268 = vmatpush.bf16.msra.mxu3 %v12638_v40  ;;  %v16354_v40 = vld [vmem:[#allocation6 + $0x46c] sm:$0xf]  ;;  %v12895_v0 = vld [vmem:[#allocation6 + $0x518] sm:$0xf0] }
 0x2bc   : > { %5342 = vmatpush.bf16.msra.mxu1 %v12450_v47  ;;  %v12879_v47 = vld [vmem:[#allocation6 + $0x4f8] sm:$0xf0]  ;;  %v12818_v29 = vor.u32 %v16354_v40, %v12815_v41  ;;  %v16374_v26 = vld [vmem:[#allocation6 + $0x50c] sm:$0xf]  ;;  %v13749_v40 = vld [vmem:[#allocation9 + $0x3c0] sm:$0xf] }
 0x2bd   : > { %v12882_v62 = vor.u32 %v16370_v30, %v12879_v47  ;;  %5354 = vmatpush.bf16.msra.mxu2 %v12594_v50  ;;  %v12943_v30 = vld [vmem:[#allocation6 + $0x578] sm:$0xf0]  ;;  %v13181_v47 = vld [vmem:[#allocation6 + $0x748] sm:$0xf]  ;;  %v16593_v41 = vld [vmem:[#allocation9 + $0x3dc] sm:$0xf0] }
 0x2be   : > { %5330 = vmatpush.bf16.msra.mxu0 %v12306_v61  ;;  %v12863_v61 = vld [vmem:[#allocation6 + $0x4d8] sm:$0xf0]  ;;  %5269 = vmatmul.bf16.vlgmr.msra.gmra.mxu3 %v17806_v32 }
 0x2bf   : > { %5313 = vmatpush.bf16.msrb.mxu3 %v13262_v44  ;;  %v12866_v11 = vor.u32 %v16366_v7, %v12863_v61  ;;  %v16382_v7 = vld [vmem:[#allocation6 + $0x54c] sm:$0xf] }
 0x2c0   : > { %5343 = vmatpush.bf16.msra.mxu1 %v12434_v42  ;;  %v16398_v42 = vld [vmem:[#allocation6 + $0x5cc] sm:$0xf] }
 0x2c1   : > { %v12994_v12 = vor.u32 %v16398_v42, %v12991_v49  ;;  %5355 = vmatpush.bf16.msra.mxu2 %v12578_v46  ;;  %v12927_v42 = vld [vmem:[#allocation6 + $0x558] sm:$0xf0]  ;;  %v13165_v46 = vld [vmem:[#allocation6 + $0x728] sm:$0xf]  ;;  %v16444_v49 = vld [vmem:[#allocation6 + $0x734] sm:$0xf0] }
 0x2c2   : > { %5331 = vmatpush.bf16.msra.mxu0 %v12290_v13  ;;  %v16394_v13 = vld [vmem:[#allocation6 + $0x5ac] sm:$0xf] }
 0x2c3   : > { %5314 = vmatpush.bf16.msrb.mxu3 %v13246_v63  ;;  %v12978_v20 = vor.u32 %v16394_v13, %v12975_v60  ;;  %v12799_v63 = vld [vmem:[#allocation6 + $0x458] sm:$0xf0]  ;;  %v13149_v60 = vld [vmem:[#allocation6 + $0x708] sm:$0xf] }
 0x2c4   : > { %5344 = vmatpush.bf16.msra.mxu1 %v12418_v18  ;;  %v12562_v18 = vor.u32 %v16290_v6, %v12559_v9  ;;  %v16430_v6 = vld [vmem:[#allocation6 + $0x6cc] sm:$0xf]  ;;  %v13119_v9 = vld [vmem:[#allocation6 + $0x6d8] sm:$0xf0] }
 0x2c6   : > { %5332 = vmatpush.bf16.msra.mxu0 %v12274_v3  ;;  %5356 = vmatpush.bf16.msra.mxu2 %v12562_v18  ;;  %v5007_v3 = vperm.slane %v17859_v2, 1  ;;  %v16278_v2 = vld [vmem:[#allocation6 + $0x20c] sm:$0xf]  ;;  %v12911_v18 = vld [vmem:[#allocation6 + $0x538] sm:$0xf0] }
 0x2c7   : > { %5315 = vmatpush.bf16.msrb.mxu3 %v13230_v56  ;;  %v12514_v61 = vor.u32 %v16278_v2, %v12511_v8  ;;  %v16346_v56 = vld [vmem:[#allocation6 + $0x42c] sm:$0xf]  ;;  %v12914_v24 = vor.u32 %v16378_v16, %v12911_v18  ;;  %v13750_v2 = vor.u32 %v16593_v41, %v13749_v40  ;;  %v13397_v16 = vld [vmem:[#allocation9 + $0x100] sm:$0xf] }
 0x2c8   : > { %5345 = vmatpush.bf16.msra.mxu1 %v12402_v33  ;;  %v16282_v33 = vld [vmem:[#allocation6 + $0x22c] sm:$0xf]  ;;  %v13333_v41 = vld [vmem:[#allocation9 + $0x80] sm:$0xf] }
 0x2c9   : > { %v16322_v18 = vld [vmem:[#allocation6 + $0x36c] sm:$0xf] }
 0x2ca   : > { %5333 = vmatpush.bf16.msra.mxu0 %v12258_v52  ;;  %v5127_v31 = vpop.f32.mrf.mxu0  ;;  %v16434_v52 = vld [vmem:[#allocation6 + $0x6ec] sm:$0xf] }
 0x2cb   : > { %5316 = vmatpush.bf16.msrb.mxu3 %v13214_v21  ;;  %v5128_v50 = vadd.f32 %v5127_v31, %v5007_v3  ;;  %v13138_v4 = vor.u32 %v16434_v52, %v13135_v53  ;;  %v16342_v21 = vld [vmem:[#allocation6 + $0x40c] sm:$0xf]  ;;  %v13717_v52 = vld [vmem:[#allocation9 + $0x380] sm:$0xf] }
 0x2cc   : > { %5346 = vmatpush.bf16.msra.mxu1 %v12386_v55  ;;  %v5140_v37 = vpop.f32.mrf.mxu1  ;;  %v12946_v55 = vor.u32 %v16386_v43, %v12943_v30  ;;  %v12770_v43 = vor.u32 %v16342_v21, %v12767_v25  ;;  %v16422_v31 = vld [vmem:[#allocation6 + $0x68c] sm:$0xf]  ;;  %v12898_v30 = vor.u32 %v16374_v26, %v12895_v0  ;;  %v16585_v53 = vld [vmem:[#allocation9 + $0x39c] sm:$0xf0]  ;;  %v12671_v26 = vld [vmem:[#allocation6 + $0x358] sm:$0xf0] }
 0x2cd   : > { %5334 = vmatmul.bf16.vlgmr.msra.gmra.mxu0 %v17800_v22  ;;  %v12546_v22 = vor.u32 %v16286_v19, %v12543_v17  ;;  %v17877_v54 = vadd.f32 %v5140_v37, %v5128_v50  ;;  %v13122_v19 = vor.u32 %v16430_v6, %v13119_v9  ;;  %v16338_v17 = vld [vmem:[#allocation6 + $0x3ec] sm:$0xf]  ;;  %v16521_v50 = vld [vmem:[#allocation9 + $0x19c] sm:$0xf0] }
 0x2ce   : > { %5378 = vmatpush.bf16.msrb.mxu0 %v12882_v62  ;;  %v13182_v62 = vor.u32 %v16448_v48, %v13181_v47  ;;  %v16330_v37 = vld [vmem:[#allocation6 + $0x3ac] sm:$0xf]  ;;  %v16577_v6 = vld [vmem:[#allocation9 + $0x35c] sm:$0xf0] }
 0x2cf   : > { %5347 = vmatmul.bf16.vlgmr.msra.gmra.mxu1 %v17802_v35  ;;  %v12527_v35 = vld [vmem:[#allocation6 + $0x238] sm:$0xf0]  ;;  %5357 = vmatpush.bf16.msra.mxu2 %v12546_v22  ;;  %v13150_v22 = vor.u32 %v16440_v51, %v13149_v60  ;;  %v13365_v21 = vld [vmem:[#allocation9 + $0xc0] sm:$0xf] }
 0x2d0   : > { %5391 = vmatpush.bf16.msrb.mxu1 %v13010_v36  ;;  %v12530_v44 = vor.u32 %v16282_v33, %v12527_v35  ;;  %5317 = vmatpush.bf16.msrb.mxu3 %v13198_v39  ;;  %v16350_v36 = vld [vmem:[#allocation6 + $0x44c] sm:$0xf]  ;;  %v13493_v33 = vld [vmem:[#allocation9 + $0x1c0] sm:$0xf]  ;;  %v12735_v39 = vld [vmem:[#allocation6 + $0x3d8] sm:$0xf0] }
 0x2d1   : > { %v12802_v5 = vor.u32 %v16350_v36, %v12799_v63  ;;  %v16529_v35 = vld [vmem:[#allocation9 + $0x1dc] sm:$0xf0]  ;;  %v12687_v51 = vld [vmem:[#allocation6 + $0x378] sm:$0xf0] }
 0x2d2   : > { %5379 = vmatpush.bf16.msrb.mxu0 %v12866_v11  ;;  %v12930_v11 = vor.u32 %v16382_v7, %v12927_v42  ;;  %v5129_v13 = vpop.f32.mrf.mxu0  ;;  %v13494_v47 = vor.u32 %v16529_v35, %v13493_v33  ;;  %v13429_v7 = vld [vmem:[#allocation9 + $0x140] sm:$0xf]  ;;  %v16326_v42 = vld [vmem:[#allocation6 + $0x38c] sm:$0xf] }
 0x2d3   : > { %5358 = vmatpush.bf16.msra.mxu2 %v12530_v44  ;;  %v13087_v44 = vld [vmem:[#allocation6 + $0x698] sm:$0xf0]  ;;  %v17883_v9 = vpop.f32.mrf.mxu2  ;;  %v16505_v13 = vld [vmem:[#allocation9 + $0x11c] sm:$0xf0] }
 0x2d4   : > { %5392 = vmatpush.bf16.msrb.mxu1 %v12994_v12  ;;  %5318 = vmatpush.bf16.msrb.mxu3 %v13182_v62  ;;  %v13166_v12 = vor.u32 %v16444_v49, %v13165_v46  ;;  %v5142_v14 = vpop.f32.mrf.mxu1  ;;  %v13090_v8 = vor.u32 %v16422_v31, %v13087_v44  ;;  %v13071_v62 = vld [vmem:[#allocation6 + $0x678] sm:$0xf0]  ;;  %v13718_v46 = vor.u32 %v16585_v53, %v13717_v52  ;;  %v13621_v0 = vld [vmem:[#allocation9 + $0x2c0] sm:$0xf]  ;;  %v16310_v52 = vld [vmem:[#allocation6 + $0x30c] sm:$0xf] }
 0x2d5   : > { %v13653_v14 = vld [vmem:[#allocation9 + $0x300] sm:$0xf]  ;;  %v12639_v53 = vld [vmem:[#allocation6 + $0x318] sm:$0xf0] }
 0x2d6   : > { %5380 = vmatpush.bf16.msrb.mxu0 %v12850_v28  ;;  %v12751_v28 = vld [vmem:[#allocation6 + $0x3f8] sm:$0xf0] }
 0x2d7   : > { %5359 = vmatpush.bf16.msra.mxu2 %v12514_v61  ;;  %v12754_v3 = vor.u32 %v16338_v17, %v12751_v28  ;;  %v16513_v61 = vld [vmem:[#allocation9 + $0x15c] sm:$0xf0]  ;;  %v16410_v17 = vld [vmem:[#allocation6 + $0x62c] sm:$0xf]  ;;  %v13398_v28 = vor.u32 %v16505_v13, %v13397_v16  ;;  %v13247_v16 = vld [vmem:[#allocation6 + $0x7d8] sm:$0xf0] }
 0x2d8   : > { %5393 = vmatpush.bf16.msrb.mxu1 %v12978_v20  ;;  %v12786_v20 = vor.u32 %v16346_v56, %v12783_v15  ;;  %5319 = vmatpush.bf16.msrb.mxu3 %v13166_v12  ;;  %v13055_v12 = vld [vmem:[#allocation6 + $0x658] sm:$0xf0]  ;;  %v13430_v56 = vor.u32 %v16513_v61, %v13429_v7  ;;  %v13557_v61 = vld [vmem:[#allocation9 + $0x240] sm:$0xf] }
 0x2d9   : > { %v13263_v7 = vld [vmem:[#allocation6 + $0x7f8] sm:$0xf0]  ;;  %v13525_v13 = vld [vmem:[#allocation9 + $0x200] sm:$0xf] }
 0x2da   : > { %5381 = vmatpush.bf16.msrb.mxu0 %v12834_v58  ;;  %5360 = vmatmul.bf16.vlgmr.msra.gmra.mxu2 %v17804_v23  ;;  %v16334_v58 = vld [vmem:[#allocation6 + $0x3cc] sm:$0xf]  ;;  %v13461_v23 = vld [vmem:[#allocation9 + $0x180] sm:$0xf] }
 0x2db   : > { %5404 = vmatpush.bf16.msrb.mxu2 %v13138_v4  ;;  %v12738_v48 = vor.u32 %v16334_v58, %v12735_v39  ;;  %v13462_v36 = vor.u32 %v16521_v50, %v13461_v23  ;;  %v12703_v4 = vld [vmem:[#allocation6 + $0x398] sm:$0xf0]  ;;  %v5103_v35 = vpop.f32.mrf.mxu2  ;;  %v16406_v58 = vld [vmem:[#allocation6 + $0x60c] sm:$0xf]  ;;  %v16553_v23 = vld [vmem:[#allocation9 + $0x29c] sm:$0xf0] }
 0x2dc   : > { %5394 = vmatpush.bf16.msrb.mxu1 %v12962_v38  ;;  %v13106_v38 = vor.u32 %v16426_v59, %v13103_v45  ;;  %5320 = vmatpush.bf16.msrb.mxu3 %v13150_v22  ;;  %v12706_v15 = vor.u32 %v16326_v42, %v12703_v4  ;;  %v16497_v59 = vld [vmem:[#allocation9 + $0xdc] sm:$0xf0]  ;;  %v16318_v45 = vld [vmem:[#allocation6 + $0x34c] sm:$0xf] }
 0x2dd   : > { %v13366_v39 = vor.u32 %v16497_v59, %v13365_v21  ;;  %v12674_v40 = vor.u32 %v16318_v45, %v12671_v26  ;;  %v16545_v42 = vld [vmem:[#allocation9 + $0x25c] sm:$0xf0]  ;;  %v13231_v21 = vld [vmem:[#allocation6 + $0x7b8] sm:$0xf0]  ;;  %v16581_v45 = vld [vmem:[#allocation9 + $0x384] sm:$0xf] }
 0x2de   : > { %5382 = vmatpush.bf16.msrb.mxu0 %v12818_v29  ;;  %v12719_v29 = vld [vmem:[#allocation6 + $0x3b8] sm:$0xf0]  ;;  %v13269_v4 = vld [vmem:[#allocation9] sm:$0xf]  ;;  %v16454_v35 = vld [vmem:[#allocation6 + $0x78c] sm:$0xf] }
 0x2df   : > { %5405 = vmatpush.bf16.msrb.mxu2 %v13122_v19  ;;  %5321 = vmatmul.bf16.vlgmr.msrb.gmra.mxu3 %v17854_v57  ;;  %v12722_v63 = vor.u32 %v16330_v37, %v12719_v29  ;;  %v16569_v19 = vld [vmem:[#allocation9 + $0x31c] sm:$0xf0] }
 0x2e0   : > { %5395 = vmatpush.bf16.msrb.mxu1 %v12946_v55  ;;  %5365 = vmatpush.bf16.msra.mxu3 %v12754_v3  ;;  %v16418_v55 = vld [vmem:[#allocation6 + $0x66c] sm:$0xf]  ;;  %v16561_v3 = vld [vmem:[#allocation9 + $0x2dc] sm:$0xf0] }
 0x2e1   : > { %v13074_v49 = vor.u32 %v16418_v55, %v13071_v62  ;;  %v13622_v31 = vor.u32 %v16561_v3, %v13621_v0  ;;  %v16466_v55 = vld [vmem:[#allocation6 + $0x7ec] sm:$0xf]  ;;  %v16509_v0 = vld [vmem:[#allocation9 + $0x144] sm:$0xf] }
 0x2e2   : > { %5383 = vmatpush.bf16.msrb.mxu0 %v12802_v5  ;;  %v13685_v5 = vld [vmem:[#allocation9 + $0x340] sm:$0xf]  ;;  %v13431_v3 = vld [vmem:[#allocation9 + $0x160] sm:$0xf0] }
 0x2e3   : > { %5406 = vmatpush.bf16.msrb.mxu2 %v13106_v38  ;;  %v13023_v38 = vld [vmem:[#allocation6 + $0x618] sm:$0xf0] }
 0x2e4   : > { %5396 = vmatpush.bf16.msrb.mxu1 %v12930_v11  ;;  %5366 = vmatpush.bf16.msra.mxu3 %v12738_v48  ;;  %v16414_v11 = vld [vmem:[#allocation6 + $0x64c] sm:$0xf]  ;;  %v13026_v44 = vor.u32 %v16406_v58, %v13023_v38  ;;  %v13589_v48 = vld [vmem:[#allocation9 + $0x280] sm:$0xf]  ;;  %v13215_v58 = vld [vmem:[#allocation6 + $0x798] sm:$0xf0] }
 0x2e5   : > { %v13058_v60 = vor.u32 %v16414_v11, %v13055_v12  ;;  %v13590_v62 = vor.u32 %v16553_v23, %v13589_v48  ;;  %v16525_v11 = vld [vmem:[#allocation9 + $0x1c4] sm:$0xf]  ;;  %v17895_v23 = vld [vmem:[#allocation7] sm:$0xf] }
 0x2e6   : > { %5384 = vmatpush.bf16.msrb.mxu0 %v12786_v20  ;;  %v12690_v20 = vor.u32 %v16322_v18, %v12687_v51  ;;  %v13495_v12 = vld [vmem:[#allocation9 + $0x1e0] sm:$0xf0]  ;;  %v16537_v18 = vld [vmem:[#allocation9 + $0x21c] sm:$0xf0] }
 0x2e7   : > { %5407 = vmatpush.bf16.msrb.mxu2 %v13090_v8  ;;  %v16481_v8 = vld [vmem:[#allocation9 + $0x5c] sm:$0xf0]  ;;  %v13751_v51 = vld [vmem:[#allocation9 + $0x3e0] sm:$0xf0] }
 0x2e8   : > { %5397 = vmatpush.bf16.msrb.mxu1 %v12914_v24  ;;  %5367 = vmatpush.bf16.msra.mxu3 %v12722_v63  ;;  %v13654_v24 = vor.u32 %v16569_v19, %v13653_v14  ;;  %v17889_v63 = vpop.f32.mrf.mxu2  ;;  %v13498_v14 = vor.u32 %v16525_v11, %v13495_v12  ;;  %v16517_v19 = vld [vmem:[#allocation9 + $0x184] sm:$0xf] }
 0x2ea   : > { %5385 = vmatpush.bf16.msrb.mxu0 %v12770_v43  ;;  %v17885_v22 = vpop.f32.mrf.mxu0  ;;  %v16489_v43 = vld [vmem:[#allocation9 + $0x9c] sm:$0xf0] }
 0x2eb   : > { %5408 = vmatpush.bf16.msrb.mxu2 %v13074_v49  ;;  %v13334_v50 = vor.u32 %v16489_v43, %v13333_v41  ;;  %v12642_v49 = vor.u32 %v16310_v52, %v12639_v53  ;;  %v13434_v41 = vor.u32 %v16509_v0, %v13431_v3  ;;  %v16501_v43 = vld [vmem:[#allocation9 + $0x104] sm:$0xf] }
 0x2ec   : > { %5398 = vmatpush.bf16.msrb.mxu1 %v12898_v30  ;;  %5368 = vmatpush.bf16.msra.mxu3 %v12706_v15  ;;  %v17887_v33 = vpop.f32.mrf.mxu1  ;;  %v16314_v30 = vld [vmem:[#allocation6 + $0x32c] sm:$0xf]  ;;  %v13558_v15 = vor.u32 %v16545_v42, %v13557_v61  ;;  %v16493_v52 = vld [vmem:[#allocation9 + $0xc4] sm:$0xf] }
 0x2ed   : > { %5386 = vmatmul.bf16.vlgmr.msrb.gmra.mxu0 %v17819_v27  ;;  %v13686_v27 = vor.u32 %v16577_v6, %v13685_v5  ;;  %v16473_v5 = vld [vmem:[#allocation9 + $0x1c] sm:$0xf0]  ;;  %v13266_v6 = vor.u32 %v16466_v55, %v13263_v7  ;;  %v13367_v53 = vld [vmem:[#allocation9 + $0xe0] sm:$0xf0]  ;;  %v5102_v55 = vadd.f32 %v17883_v9, %v17870_v34  ;;  %v13183_v7 = vld [vmem:[#allocation6 + $0x758] sm:$0xf0] }
 0x2ee   : > { %7011 = vmatpush.bf16.msra.mxu0 %v13494_v47  ;;  %v12655_v47 = vld [vmem:[#allocation6 + $0x338] sm:$0xf0]  ;;  %v13370_v11 = vor.u32 %v16493_v52, %v13367_v53  ;;  %v16541_v3 = vld [vmem:[#allocation9 + $0x244] sm:$0xf]  ;;  %v13469_v53 = vld [vmem:[#allocation9 + $0x188] sm:$0xf] }
 0x2ef   : > { %5399 = vmatmul.bf16.vlgmr.msrb.gmra.mxu1 %v17817_v1  ;;  %v13039_v1 = vld [vmem:[#allocation6 + $0x638] sm:$0xf0]  ;;  %5409 = vmatpush.bf16.msrb.mxu2 %v13058_v60  ;;  %v12658_v37 = vor.u32 %v16314_v30, %v12655_v47  ;;  %v16589_v60 = vld [vmem:[#allocation9 + $0x3c4] sm:$0xf]  ;;  %v16450_v30 = vld [vmem:[#allocation6 + $0x76c] sm:$0xf] }
 0x2f0   : > { %7024 = vmatpush.bf16.msra.mxu1 %v13750_v2  ;;  %v13042_v25 = vor.u32 %v16410_v17, %v13039_v1  ;;  %5369 = vmatpush.bf16.msra.mxu3 %v12690_v20  ;;  %v13301_v2 = vld [vmem:[#allocation9 + $0x40] sm:$0xf]  ;;  %v13463_v17 = vld [vmem:[#allocation9 + $0x1a0] sm:$0xf0]  ;;  %v13526_v1 = vor.u32 %v16537_v18, %v13525_v13  ;;  %v16458_v20 = vld [vmem:[#allocation6 + $0x7ac] sm:$0xf]  ;;  %v13754_v59 = vor.u32 %v16589_v60, %v13751_v51 }
 0x2f1   : > { %v13234_v26 = vor.u32 %v16458_v20, %v13231_v21  ;;  %v13199_v47 = vld [vmem:[#allocation6 + $0x778] sm:$0xf0]  ;;  %v16442_v13 = vld [vmem:[#allocation6 + $0x72c] sm:$0xf]  ;;  %v16549_v60 = vld [vmem:[#allocation9 + $0x284] sm:$0xf] }
 0x2f2   : > { %7012 = vmatpush.bf16.msra.mxu0 %v13462_v36  ;;  %v5181_v29 = vpop.f32.mrf.mxu0  ;;  %v13167_v18 = vld [vmem:[#allocation6 + $0x738] sm:$0xf0]  ;;  %v13591_v51 = vld [vmem:[#allocation9 + $0x2a0] sm:$0xf0] }
 0x2f3   : > { %5410 = vmatpush.bf16.msrb.mxu2 %v13042_v25  ;;  %v13466_v25 = vor.u32 %v16517_v19, %v13463_v17  ;;  %v13202_v29 = vor.u32 %v16450_v30, %v13199_v47  ;;  %v14005_v19 = vld [vmem:[#allocation9 + $0x5c0] sm:$0xf]  ;;  %v13303_v20 = vld [vmem:[#allocation9 + $0x60] sm:$0xf0]  ;;  %v16530_v30 = vld [vmem:[#allocation9 + $0x1e4] sm:$0xf0] }
 0x2f4   : > { %7025 = vmatpush.bf16.msra.mxu1 %v13718_v46  ;;  %5370 = vmatpush.bf16.msra.mxu3 %v12674_v40  ;;  %v5194_v36 = vpop.f32.mrf.mxu1  ;;  %v13302_v46 = vor.u32 %v16481_v8, %v13301_v2  ;;  %v13687_v40 = vld [vmem:[#allocation9 + $0x360] sm:$0xf0]  ;;  %v16657_v17 = vld [vmem:[#allocation9 + $0x5dc] sm:$0xf0] }
 0x2f5   : > { %v13655_v2 = vld [vmem:[#allocation9 + $0x320] sm:$0xf0]  ;;  %v16446_v36 = vld [vmem:[#allocation6 + $0x74c] sm:$0xf]  ;;  %v14006_v21 = vor.u32 %v16657_v17, %v14005_v19 }
 0x2f6   : > { %7013 = vmatpush.bf16.msra.mxu0 %v13430_v56  ;;  %v16462_v56 = vld [vmem:[#allocation6 + $0x7cc] sm:$0xf] }
 0x2f7   : > { %5411 = vmatpush.bf16.msrb.mxu2 %v13026_v44  ;;  %v13373_v19 = vld [vmem:[#allocation9 + $0xc8] sm:$0xf] }
 0x2f8   : > { %7026 = vmatpush.bf16.msra.mxu1 %v13686_v27  ;;  %5371 = vmatpush.bf16.msra.mxu3 %v12658_v37  ;;  %v13270_v27 = vor.u32 %v16473_v5, %v13269_v4  ;;  %v16565_v37 = vld [vmem:[#allocation9 + $0x304] sm:$0xf]  ;;  %v16498_v17 = vld [vmem:[#allocation9 + $0xe4] sm:$0xf0] }
 0x2f9   : > { %v13658_v61 = vor.u32 %v16565_v37, %v13655_v2  ;;  %v16557_v4 = vld [vmem:[#allocation9 + $0x2c4] sm:$0xf]  ;;  %v13941_v2 = vld [vmem:[#allocation9 + $0x540] sm:$0xf] }
 0x2fa   : > { %7014 = vmatpush.bf16.msra.mxu0 %v13398_v28  ;;  %5412 = vmatmul.bf16.vlgmr.msrb.gmra.mxu2 %v17840_v10  ;;  %v13250_v10 = vor.u32 %v16462_v56, %v13247_v16  ;;  %v5155_v28 = vpop.f32.mrf.mxu2  ;;  %v13623_v5 = vld [vmem:[#allocation9 + $0x2e0] sm:$0xf0]  ;;  %v13186_v56 = vor.u32 %v16446_v36, %v13183_v7  ;;  %v5154_v7 = vadd.f32 %v17889_v63, %v17877_v54  ;;  %v16506_v63 = vld [vmem:[#allocation9 + $0x124] sm:$0xf0] }
 0x2fb   : > { %v13335_v16 = vld [vmem:[#allocation9 + $0xa0] sm:$0xf0]  ;;  %7037 = vmatpush.bf16.msra.mxu2 %v14006_v21  ;;  %v13374_v21 = vor.u32 %v16498_v17, %v13373_v19  ;;  %v16510_v17 = vld [vmem:[#allocation9 + $0x14c] sm:$0xf] }
 0x2fc   : > { %7027 = vmatpush.bf16.msra.mxu1 %v13654_v24  ;;  %5372 = vmatpush.bf16.msra.mxu3 %v12642_v49  ;;  %v13719_v24 = vld [vmem:[#allocation9 + $0x3a0] sm:$0xf0] }
 0x2fd   : > { %v13722_v38 = vor.u32 %v16581_v45, %v13719_v24  ;;  %v16477_v28 = vld [vmem:[#allocation9 + $0x44] sm:$0xf]  ;;  %v16438_v45 = vld [vmem:[#allocation6 + $0x70c] sm:$0xf]  ;;  %v13151_v24 = vld [vmem:[#allocation6 + $0x718] sm:$0xf0] }
 0x2fe   : > { %7015 = vmatpush.bf16.msra.mxu0 %v13366_v39  ;;  %v16573_v39 = vld [vmem:[#allocation9 + $0x344] sm:$0xf] }
 0x2ff   : > { %5373 = vmatmul.bf16.vlgmr.msra.gmra.mxu3 %v17806_v32  ;;  %v13218_v32 = vor.u32 %v16454_v35, %v13215_v58  ;;  %v13690_v48 = vor.u32 %v16573_v39, %v13687_v40  ;;  %v13559_v35 = vld [vmem:[#allocation9 + $0x260] sm:$0xf0]  ;;  %v13306_v58 = vor.u32 %v16477_v28, %v13303_v20  ;;  %v16649_v39 = vld [vmem:[#allocation9 + $0x59c] sm:$0xf0]  ;;  %v13154_v40 = vor.u32 %v16438_v45, %v13151_v24  ;;  %v13341_v24 = vld [vmem:[#allocation9 + $0x88] sm:$0xf] }
 0x300   : > { %7028 = vmatpush.bf16.msra.mxu1 %v13622_v31  ;;  %5417 = vmatpush.bf16.msrb.mxu3 %v13266_v6  ;;  %v13399_v31 = vld [vmem:[#allocation9 + $0x120] sm:$0xf0]  ;;  %v5114_v49 = vpop.f32.mrf.mxu3  ;;  %v13562_v47 = vor.u32 %v16541_v3, %v13559_v35  ;;  %v13813_v28 = vld [vmem:[#allocation9 + $0x440] sm:$0xf]  ;;  %v16594_v35 = vld [vmem:[#allocation9 + $0x3e4] sm:$0xf0] }
 0x301   : > { %v13402_v8 = vor.u32 %v16501_v43, %v13399_v31  ;;  %v5115_v6 = vadd.f32 %v5114_v49, %v5102_v55  ;;  %v13501_v31 = vld [vmem:[#allocation9 + $0x1c8] sm:$0xf]  ;;  %v16609_v20 = vld [vmem:[#allocation9 + $0x45c] sm:$0xf0] }
 0x302   : > { %7016 = vmatpush.bf16.msra.mxu0 %v13334_v50  ;;  %v17893_v44 = vpop.f32.mrf.mxu2  ;;  %v5008_v50 = vperm.slane %v17895_v23, 2  ;;  %v16522_v55 = vld [vmem:[#allocation9 + $0x1a4] sm:$0xf0] }
 0x303   : > { %v17902_v34 = vmax.f32 %v5115_v6, 0.0  ;;  %v16514_v6 = vld [vmem:[#allocation9 + $0x164] sm:$0xf0] }
 0x304   : > { %7029 = vmatpush.bf16.msra.mxu1 %v13590_v62  ;;  %5418 = vmatpush.bf16.msrb.mxu3 %v13250_v10 }
 0x306   : > { %7017 = vmatpush.bf16.msra.mxu0 %v13302_v46 }
 0x308   : > { %7030 = vmatpush.bf16.msra.mxu1 %v13558_v15  ;;  %5419 = vmatpush.bf16.msrb.mxu3 %v13234_v26  ;;  %v16485_v15 = vld [vmem:[#allocation9 + $0x84] sm:$0xf]  ;;  %v5116_v0 = vpop.f32.mrf.mxu3 }
 0x309   : > { %v13338_v10 = vor.u32 %v16485_v15, %v13335_v16  ;;  %v13757_v0 = vld [vmem:[#allocation9 + $0x3c8] sm:$0xf] }
 0x30a   : > { %7018 = vmatpush.bf16.msra.mxu0 %v13270_v27  ;;  %v5231_v62 = vpop.f32.mrf.mxu0  ;;  %v5207_v9 = vpop.f32.mrf.mxu2  ;;  %v13626_v27 = vor.u32 %v16557_v4, %v13623_v5  ;;  %v13437_v5 = vld [vmem:[#allocation9 + $0x148] sm:$0xf] }
 0x30b   : > { %v5232_v42 = vadd.f32 %v5231_v62, %v5008_v50  ;;  %v13527_v50 = vld [vmem:[#allocation9 + $0x220] sm:$0xf0]  ;;  %v13438_v15 = vor.u32 %v16514_v6, %v13437_v5  ;;  %v13693_v5 = vld [vmem:[#allocation9 + $0x348] sm:$0xf] }
 0x30c   : > { %7031 = vmatpush.bf16.msra.mxu1 %v13526_v1  ;;  %5420 = vmatpush.bf16.msrb.mxu3 %v13218_v32  ;;  %v5244_v46 = vpop.f32.mrf.mxu1  ;;  %v13170_v1 = vor.u32 %v16442_v13, %v13167_v18  ;;  %v13271_v32 = vld [vmem:[#allocation9 + $0x20] sm:$0xf0]  ;;  %v13845_v18 = vld [vmem:[#allocation9 + $0x480] sm:$0xf]  ;;  %v16578_v6 = vld [vmem:[#allocation9 + $0x364] sm:$0xf0] }
 0x30d   : > { %v17900_v12 = vadd.f32 %v5244_v46, %v5232_v42  ;;  %v16633_v42 = vld [vmem:[#allocation9 + $0x51c] sm:$0xf0]  ;;  %v13470_v46 = vor.u32 %v16522_v55, %v13469_v53  ;;  %v16645_v53 = vld [vmem:[#allocation9 + $0x584] sm:$0xf] }
 0x30e   : > { %7063 = vmatpush.bf16.msrb.mxu0 %v13498_v14  ;;  %v17906_v14 = vpack.c.bf16 %v17902_v34, %v17902_v34  ;;  %v13975_v55 = vld [vmem:[#allocation9 + $0x5a0] sm:$0xf0] }
 0x310   : > { %7076 = vmatpush.bf16.msrb.mxu1 %v13754_v59  ;;  %5421 = vmatpush.bf16.msrb.mxu3 %v13202_v29  ;;  %v13502_v29 = vor.u32 %v16530_v30, %v13501_v31  ;;  %v5166_v36 = vpop.f32.mrf.mxu3  ;;  %v13309_v31 = vld [vmem:[#allocation9 + $0x48] sm:$0xf] }
 0x311   : > { %7019 = vmatmul.bf16.vlgmr.msra.gmra.mxu0 %v17906_v14  ;;  %v5167_v4 = vadd.f32 %v5166_v36, %v5154_v7  ;;  %v16482_v30 = vld [vmem:[#allocation9 + $0x64] sm:$0xf0] }
 0x312   : > { %7064 = vmatpush.bf16.msrb.mxu0 %v13466_v25  ;;  %v5233_v59 = vpop.f32.mrf.mxu0  ;;  %v13594_v25 = vor.u32 %v16549_v60, %v13591_v51  ;;  %v13277_v36 = vld [vmem:[#allocation9 + $0x8] sm:$0xf] }
 0x313   : > { %v5180_v54 = vadd.f32 %v17885_v22, %v5167_v4  ;;  %v13814_v59 = vor.u32 %v16609_v20, %v13813_v28  ;;  %v16474_v7 = vld [vmem:[#allocation9 + $0x24] sm:$0xf0]  ;;  %v13503_v4 = vld [vmem:[#allocation9 + $0x1e8] sm:$0xf0] }
 0x314   : > { %7077 = vmatpush.bf16.msrb.mxu1 %v13722_v38  ;;  %5422 = vmatpush.bf16.msrb.mxu3 %v13186_v56  ;;  %v5246_v26 = vpop.f32.mrf.mxu1  ;;  %v13973_v38 = vld [vmem:[#allocation9 + $0x580] sm:$0xf]  ;;  %v13439_v28 = vld [vmem:[#allocation9 + $0x168] sm:$0xf0]  ;;  %v13629_v20 = vld [vmem:[#allocation9 + $0x2c8] sm:$0xf] }
 0x315   : > { %v13974_v43 = vor.u32 %v16649_v39, %v13973_v38  ;;  %v16625_v56 = vld [vmem:[#allocation9 + $0x4dc] sm:$0xf0] }
 0x316   : > { %7065 = vmatpush.bf16.msrb.mxu0 %v13434_v41  ;;  %v16469_v41 = vld [vmem:[#allocation9 + $0x4] sm:$0xf]  ;;  %v16601_v38 = vld [vmem:[#allocation9 + $0x41c] sm:$0xf0] }
 0x317   : > { %7038 = vmatpush.bf16.msra.mxu2 %v13974_v43  ;;  %v13274_v37 = vor.u32 %v16469_v41, %v13271_v32  ;;  %v17914_v13 = vpop.f32.mrf.mxu2  ;;  %v16653_v41 = vld [vmem:[#allocation9 + $0x5c4] sm:$0xf] }
 0x318   : > { %7078 = vmatpush.bf16.msrb.mxu1 %v13690_v48  ;;  %5423 = vmatpush.bf16.msrb.mxu3 %v13170_v1  ;;  %v16533_v48 = vld [vmem:[#allocation9 + $0x204] sm:$0xf]  ;;  %v5168_v9 = vpop.f32.mrf.mxu3 }
 0x319   : > { %v13530_v62 = vor.u32 %v16533_v48, %v13527_v50  ;;  %v14007_v32 = vld [vmem:[#allocation9 + $0x5e0] sm:$0xf0]  ;;  %v13758_v48 = vor.u32 %v16594_v35, %v13757_v0  ;;  %v13661_v9 = vld [vmem:[#allocation9 + $0x308] sm:$0xf]  ;;  %v16502_v0 = vld [vmem:[#allocation9 + $0x10c] sm:$0xf] }
 0x31a   : > { %7066 = vmatpush.bf16.msrb.mxu0 %v13402_v8  ;;  %v16641_v8 = vld [vmem:[#allocation9 + $0x55c] sm:$0xf0]  ;;  %v16554_v35 = vld [vmem:[#allocation9 + $0x2a4] sm:$0xf0] }
 0x31b   : > { %v13942_v52 = vor.u32 %v16641_v8, %v13941_v2  ;;  %v13725_v8 = vld [vmem:[#allocation9 + $0x388] sm:$0xf] }
 0x31c   : > { %7079 = vmatpush.bf16.msrb.mxu1 %v13658_v61  ;;  %5424 = vmatpush.bf16.msrb.mxu3 %v13154_v40  ;;  %v13909_v61 = vld [vmem:[#allocation9 + $0x500] sm:$0xf] }
 0x31d   : > { %7039 = vmatpush.bf16.msra.mxu2 %v13942_v52  ;;  %v13910_v49 = vor.u32 %v16633_v42, %v13909_v61  ;;  %v13310_v52 = vor.u32 %v16482_v30, %v13309_v31  ;;  %v13978_v61 = vor.u32 %v16645_v53, %v13975_v55  ;;  %v16494_v31 = vld [vmem:[#allocation9 + $0xcc] sm:$0xf] }
 0x31e   : > { %7067 = vmatpush.bf16.msrb.mxu0 %v13370_v11  ;;  %v13877_v11 = vld [vmem:[#allocation9 + $0x4c0] sm:$0xf]  ;;  %v13375_v30 = vld [vmem:[#allocation9 + $0xe8] sm:$0xf0] }
 0x31f   : > { %5425 = vmatmul.bf16.vlgmr.msrb.gmra.mxu3 %v17854_v57  ;;  %v13878_v16 = vor.u32 %v16625_v56, %v13877_v11  ;;  %v13405_v57 = vld [vmem:[#allocation9 + $0x108] sm:$0xf]  ;;  %v5259_v3 = vpop.f32.mrf.mxu2  ;;  %v13278_v11 = vor.u32 %v16474_v7, %v13277_v36  ;;  %v16637_v56 = vld [vmem:[#allocation9 + $0x544] sm:$0xf]  ;;  %v13343_v36 = vld [vmem:[#allocation9 + $0xa8] sm:$0xf0] }
 0x320   : > { %7080 = vmatpush.bf16.msrb.mxu1 %v13626_v27  ;;  %v16617_v27 = vld [vmem:[#allocation9 + $0x49c] sm:$0xf0]  ;;  %v13406_v60 = vor.u32 %v16506_v63, %v13405_v57  ;;  %v16518_v57 = vld [vmem:[#allocation9 + $0x18c] sm:$0xf]  ;;  %v13597_v3 = vld [vmem:[#allocation9 + $0x288] sm:$0xf] }
 0x321   : > { %7040 = vmatpush.bf16.msra.mxu2 %v13910_v49  ;;  %v13846_v51 = vor.u32 %v16617_v27, %v13845_v18  ;;  %v5218_v26 = vpop.f32.mrf.mxu3  ;;  %v16526_v49 = vld [vmem:[#allocation9 + $0x1cc] sm:$0xf]  ;;  %v16570_v18 = vld [vmem:[#allocation9 + $0x324] sm:$0xf0]  ;;  %v16629_v27 = vld [vmem:[#allocation9 + $0x504] sm:$0xf] }
 0x322   : > { %7068 = vmatpush.bf16.msrb.mxu0 %v13338_v10  ;;  %v5193_v10 = vadd.f32 %v17887_v33, %v5180_v54  ;;  %v13694_v54 = vor.u32 %v16578_v6, %v13693_v5  ;;  %v13471_v63 = vld [vmem:[#allocation9 + $0x1a8] sm:$0xf0]  ;;  %v13662_v19 = vor.u32 %v16570_v18, %v13661_v9  ;;  %v16597_v6 = vld [vmem:[#allocation9 + $0x404] sm:$0xf] }
 0x323   : > { %v13759_v5 = vld [vmem:[#allocation9 + $0x3e8] sm:$0xf0] }
 0x324   : > { %7081 = vmatpush.bf16.msrb.mxu1 %v13594_v25  ;;  %v5206_v45 = vadd.f32 %v17893_v44, %v5193_v10  ;;  %v16490_v25 = vld [vmem:[#allocation9 + $0xa4] sm:$0xf0] }
 0x325   : > { %7041 = vmatpush.bf16.msra.mxu2 %v13878_v16  ;;  %v13342_v39 = vor.u32 %v16490_v25, %v13341_v24  ;;  %v13506_v16 = vor.u32 %v16526_v49, %v13503_v4  ;;  %v13442_v24 = vor.u32 %v16510_v17, %v13439_v28  ;;  %v16590_v49 = vld [vmem:[#allocation9 + $0x3cc] sm:$0xf]  ;;  %v14229_v17 = vld [vmem:[#allocation9 + $0x780] sm:$0xf] }
 0x326   : > { %7069 = vmatpush.bf16.msrb.mxu0 %v13306_v58  ;;  %v5219_v33 = vadd.f32 %v5218_v26, %v5206_v45  ;;  %v13781_v58 = vld [vmem:[#allocation9 + $0x400] sm:$0xf]  ;;  %v13879_v45 = vld [vmem:[#allocation9 + $0x4e0] sm:$0xf0]  ;;  %v13762_v18 = vor.u32 %v16590_v49, %v13759_v5  ;;  %v16550_v5 = vld [vmem:[#allocation9 + $0x28c] sm:$0xf] }
 0x327   : > { %v13782_v40 = vor.u32 %v16601_v38, %v13781_v58  ;;  %v16613_v38 = vld [vmem:[#allocation9 + $0x484] sm:$0xf]  ;;  %v16713_v28 = vld [vmem:[#allocation9 + $0x79c] sm:$0xf0] }
 0x328   : > { %7082 = vmatpush.bf16.msrb.mxu1 %v13562_v47  ;;  %v5431_v43 = vmax.f32 %v5219_v33, 0.0  ;;  %v14010_v47 = vor.u32 %v16653_v41, %v14007_v32  ;;  %v13407_v33 = vld [vmem:[#allocation9 + $0x128] sm:$0xf0] }
 0x329   : > { %7042 = vmatpush.bf16.msra.mxu2 %v13846_v51  ;;  %v5220_v42 = vpop.f32.mrf.mxu3  ;;  %v13474_v51 = vor.u32 %v16518_v57, %v13471_v63  ;;  %v13410_v41 = vor.u32 %v16502_v0, %v13407_v33  ;;  %v16478_v57 = vld [vmem:[#allocation9 + $0x4c] sm:$0xf] }
 0x32a   : > { %7070 = vmatpush.bf16.msrb.mxu0 %v13274_v37  ;;  %v17917_v1 = vpop.f32.mrf.mxu0  ;;  %v5438_v50 = vrot.slane %v5431_v43, 7  ;;  %v17922_v37 = vpack.c.bf16 %v5431_v43, %v5431_v43  ;;  %v13598_v43 = vor.u32 %v16554_v35, %v13597_v3  ;;  %v13533_v42 = vld [vmem:[#allocation9 + $0x208] sm:$0xf]  ;;  %v13311_v63 = vld [vmem:[#allocation9 + $0x68] sm:$0xf0] }
 0x32b   : > { %v16574_v0 = vld [vmem:[#allocation9 + $0x34c] sm:$0xf]  ;;  %v14197_v35 = vld [vmem:[#allocation9 + $0x740] sm:$0xf] }
 0x32c   : > { %7083 = vmatpush.bf16.msrb.mxu1 %v13530_v62  ;;  %v17919_v22 = vpop.f32.mrf.mxu1  ;;  %v17926_v62 = vsel %vm5441_vm0, %v17902_v34, %v5438_v50  ;;  %v16605_v50 = vld [vmem:[#allocation9 + $0x444] sm:$0xf]  ;;  %v13695_v33 = vld [vmem:[#allocation9 + $0x368] sm:$0xf0] }
 0x32d   : > { %7071 = vmatmul.bf16.vlgmr.msrb.gmra.mxu0 %v17906_v14  ;;  %7043 = vmatpush.bf16.msra.mxu2 %v13814_v59  ;;  %v16621_v59 = vld [vmem:[#allocation9 + $0x4c4] sm:$0xf] }
 0x32e   : > { %7115 = vmatpush.bf16.msra.mxu0 %v13502_v29  ;;  %v16586_v29 = vld [vmem:[#allocation9 + $0x3a4] sm:$0xf0]  ;;  %7032 = vmatmul.bf16.vlgmr.msra.gmra.mxu1 %v17922_v37  ;;  %v13882_v25 = vor.u32 %v16621_v59, %v13879_v45  ;;  %v14230_v59 = vor.u32 %v16713_v28, %v14229_v17  ;;  %v13349_v17 = vld [vmem:[#allocation9 + $0x90] sm:$0xf] }
 0x330   : > { %7128 = vmatpush.bf16.msra.mxu1 %v13758_v48 }
 0x331   : > { %7044 = vmatpush.bf16.msra.mxu2 %v13782_v40  ;;  %v5009_v40 = vperm.slane %v17895_v23, 3  ;;  %v16486_v23 = vld [vmem:[#allocation9 + $0x8c] sm:$0xf] }
 0x332   : > { %7116 = vmatpush.bf16.msra.mxu0 %v13470_v46  ;;  %v5285_v44 = vpop.f32.mrf.mxu0  ;;  %v13726_v46 = vor.u32 %v16586_v29, %v13725_v8 }
 0x333   : > { %v16546_v44 = vld [vmem:[#allocation9 + $0x264] sm:$0xf0] }
 0x334   : > { %v5298_v2 = vpop.f32.mrf.mxu1  ;;  %7129 = vmatpush.bf16.msra.mxu1 %v13726_v46  ;;  %v16538_v46 = vld [vmem:[#allocation9 + $0x224] sm:$0xf0] }
 0x335   : > { %7089 = vmatpush.bf16.msrb.mxu2 %v14010_v47  ;;  %v13565_v47 = vld [vmem:[#allocation9 + $0x248] sm:$0xf]  ;;  %v13815_v2 = vld [vmem:[#allocation9 + $0x460] sm:$0xf0] }
 0x336   : > { %7117 = vmatpush.bf16.msra.mxu0 %v13438_v15  ;;  %v13943_v15 = vld [vmem:[#allocation9 + $0x560] sm:$0xf0]  ;;  %v13818_v53 = vor.u32 %v16605_v50, %v13815_v2  ;;  %v13566_v55 = vor.u32 %v16546_v44, %v13565_v47  ;;  %v5258_v47 = vadd.f32 %v17914_v13, %v17900_v12  ;;  %v14165_v44 = vld [vmem:[#allocation9 + $0x700] sm:$0xf] }
 0x337   : > { %v13946_v34 = vor.u32 %v16637_v56, %v13943_v15  ;;  %v17930_v58 = vpop.f32.mrf.mxu2  ;;  %v13346_v56 = vor.u32 %v16486_v23, %v13343_v36  ;;  %v13631_v23 = vld [vmem:[#allocation9 + $0x2e8] sm:$0xf0]  ;;  %v14133_v36 = vld [vmem:[#allocation9 + $0x6c0] sm:$0xf] }
 0x338   : > { %7130 = vmatpush.bf16.msra.mxu1 %v13694_v54  ;;  %v13534_v54 = vor.u32 %v16538_v46, %v13533_v42  ;;  %v16689_v42 = vld [vmem:[#allocation9 + $0x6dc] sm:$0xf0] }
 0x339   : > { %7090 = vmatpush.bf16.msrb.mxu2 %v13978_v61  ;;  %v14134_v13 = vor.u32 %v16689_v42, %v14133_v36  ;;  %v16709_v42 = vld [vmem:[#allocation9 + $0x784] sm:$0xf] }
 0x33a   : > { %7118 = vmatpush.bf16.msra.mxu0 %v13406_v60  ;;  %v13911_v60 = vld [vmem:[#allocation9 + $0x520] sm:$0xf0] }
 0x33b   : > { %v13914_v10 = vor.u32 %v16629_v27, %v13911_v60  ;;  %v16582_v60 = vld [vmem:[#allocation9 + $0x38c] sm:$0xf] }
 0x33c   : > { %7131 = vmatpush.bf16.msra.mxu1 %v13662_v19  ;;  %v13314_v19 = vor.u32 %v16478_v57, %v13311_v63  ;;  %v13381_v63 = vld [vmem:[#allocation9 + $0xd0] sm:$0xf] }
 0x33d   : > { %7091 = vmatpush.bf16.msrb.mxu2 %v13946_v34  ;;  %v16721_v34 = vld [vmem:[#allocation9 + $0x7dc] sm:$0xf0] }
 0x33e   : > { %7119 = vmatpush.bf16.msra.mxu0 %v13374_v21  ;;  %v16562_v21 = vld [vmem:[#allocation9 + $0x2e4] sm:$0xf0]  ;;  %7084 = vmatmul.bf16.vlgmr.msrb.gmra.mxu1 %v17922_v37 }
 0x33f   : > { %v13630_v26 = vor.u32 %v16562_v21, %v13629_v20  ;;  %v5311_v4 = vpop.f32.mrf.mxu2  ;;  %v16470_v20 = vld [vmem:[#allocation9 + $0xc] sm:$0xf] }
 0x340   : > { %v13279_v21 = vld [vmem:[#allocation9 + $0x28] sm:$0xf0]  ;;  %v13413_v4 = vld [vmem:[#allocation9 + $0x110] sm:$0xf] }
 0x341   : > { %7092 = vmatpush.bf16.msrb.mxu2 %v13914_v10  ;;  %7132 = vmatpush.bf16.msra.mxu1 %v13630_v26  ;;  %v17936_v61 = vpop.f32.mrf.mxu3  ;;  %v16531_v26 = vld [vmem:[#allocation9 + $0x1ec] sm:$0xf0]  ;;  %v13282_v3 = vor.u32 %v16470_v20, %v13279_v21 }
 0x342   : > { %7120 = vmatpush.bf16.msra.mxu0 %v13342_v39  ;;  %v13847_v39 = vld [vmem:[#allocation9 + $0x4a0] sm:$0xf0] }
 0x343   : > { %v13850_v32 = vor.u32 %v16613_v38, %v13847_v39  ;;  %v16705_v38 = vld [vmem:[#allocation9 + $0x75c] sm:$0xf0] }
 0x345   : > { %7093 = vmatpush.bf16.msrb.mxu2 %v13882_v25  ;;  %7133 = vmatpush.bf16.msra.mxu1 %v13598_v43  ;;  %v13509_v25 = vld [vmem:[#allocation9 + $0x1d0] sm:$0xf] }
 0x346   : > { %7121 = vmatpush.bf16.msra.mxu0 %v13310_v52  ;;  %v13378_v52 = vor.u32 %v16494_v31, %v13375_v30  ;;  %v13510_v39 = vor.u32 %v16531_v26, %v13509_v25  ;;  %v16523_v43 = vld [vmem:[#allocation9 + $0x1ac] sm:$0xf0]  ;;  %v16566_v31 = vld [vmem:[#allocation9 + $0x30c] sm:$0xf]  ;;  %v14037_v26 = vld [vmem:[#allocation9 + $0x600] sm:$0xf] }
 0x347   : > { %v13663_v30 = vld [vmem:[#allocation9 + $0x328] sm:$0xf0] }
 0x348   : > { %v13535_v25 = vld [vmem:[#allocation9 + $0x228] sm:$0xf0] }
 0x349   : > { %7094 = vmatpush.bf16.msrb.mxu2 %v13850_v32  ;;  %7134 = vmatpush.bf16.msra.mxu1 %v13566_v55  ;;  %v5272_v45 = vpop.f32.mrf.mxu3  ;;  %v13477_v32 = vld [vmem:[#allocation9 + $0x190] sm:$0xf]  ;;  %v16558_v55 = vld [vmem:[#allocation9 + $0x2cc] sm:$0xf] }
 0x34a   : > { %7122 = vmatpush.bf16.msra.mxu0 %v13278_v11  ;;  %v5335_v48 = vpop.f32.mrf.mxu0  ;;  %v13783_v11 = vld [vmem:[#allocation9 + $0x420] sm:$0xf0]  ;;  %v13478_v50 = vor.u32 %v16523_v43, %v13477_v32  ;;  %v13634_v49 = vor.u32 %v16558_v55, %v13631_v23  ;;  %v16534_v45 = vld [vmem:[#allocation9 + $0x20c] sm:$0xf]  ;;  %v16587_v55 = vld [vmem:[#allocation9 + $0x3ac] sm:$0xf0] }
 0x34b   : > { %v5336_v8 = vadd.f32 %v5335_v48, %v5009_v40  ;;  %v13786_v15 = vor.u32 %v16597_v6, %v13783_v11  ;;  %v14198_v40 = vor.u32 %v16705_v38, %v14197_v35  ;;  %v16697_v48 = vld [vmem:[#allocation9 + $0x71c] sm:$0xf0]  ;;  %v13599_v6 = vld [vmem:[#allocation9 + $0x2a8] sm:$0xf0]  ;;  %v13765_v35 = vld [vmem:[#allocation9 + $0x3d0] sm:$0xf] }
 0x34c   : > { %v5348_v29 = vpop.f32.mrf.mxu1  ;;  %v14166_v2 = vor.u32 %v16697_v48, %v14165_v44  ;;  %v14101_v11 = vld [vmem:[#allocation9 + $0x680] sm:$0xf]  ;;  %v16595_v38 = vld [vmem:[#allocation9 + $0x3ec] sm:$0xf0]  ;;  %v16717_v32 = vld [vmem:[#allocation9 + $0x7c4] sm:$0xf] }
 0x34d   : > { %7123 = vmatmul.bf16.vlgmr.msra.gmra.mxu0 %v17906_v14  ;;  %v17934_v7 = vadd.f32 %v5348_v29, %v5336_v8  ;;  %7095 = vmatpush.bf16.msrb.mxu2 %v13818_v53  ;;  %v5271_v8 = vadd.f32 %v17936_v61, %v5258_v47  ;;  %v13666_v29 = vor.u32 %v16566_v31, %v13663_v30  ;;  %v16515_v53 = vld [vmem:[#allocation9 + $0x16c] sm:$0xf0]  ;;  %v14263_v43 = vld [vmem:[#allocation9 + $0x7e0] sm:$0xf0] }
 0x34e   : > { %7167 = vmatpush.bf16.msrb.mxu0 %v13506_v16  ;;  %v14261_v16 = vld [vmem:[#allocation9 + $0x7c0] sm:$0xf]  ;;  %7135 = vmatpush.bf16.msra.mxu1 %v13534_v54  ;;  %v16507_v61 = vld [vmem:[#allocation9 + $0x12c] sm:$0xf0]  ;;  %v13602_v54 = vor.u32 %v16550_v5, %v13599_v6  ;;  %v13538_v31 = vor.u32 %v16534_v45, %v13535_v25  ;;  %v14266_v44 = vor.u32 %v16717_v32, %v14263_v43  ;;  %v13949_v6 = vld [vmem:[#allocation9 + $0x548] sm:$0xf] }
 0x34f   : > { %v14262_v9 = vor.u32 %v16721_v34, %v14261_v16  ;;  %v5284_v46 = vadd.f32 %v17917_v1, %v5271_v8  ;;  %v13414_v34 = vor.u32 %v16507_v61, %v13413_v4  ;;  %v16499_v1 = vld [vmem:[#allocation9 + $0xec] sm:$0xf0]  ;;  %v14167_v45 = vld [vmem:[#allocation9 + $0x720] sm:$0xf0] }
 0x350   : > { %v13317_v30 = vld [vmem:[#allocation9 + $0x50] sm:$0xf]  ;;  %v14135_v32 = vld [vmem:[#allocation9 + $0x6e0] sm:$0xf0] }
 0x351   : > { %7096 = vmatpush.bf16.msrb.mxu2 %v13786_v15  ;;  %7050 = vmatpush.bf16.msra.mxu3 %v14262_v9  ;;  %v5297_v57 = vadd.f32 %v17919_v22, %v5284_v46  ;;  %v16542_v9 = vld [vmem:[#allocation9 + $0x24c] sm:$0xf]  ;;  %v16491_v22 = vld [vmem:[#allocation9 + $0xac] sm:$0xf0] }
 0x352   : > { %7168 = vmatpush.bf16.msrb.mxu0 %v13474_v51  ;;  %v5337_v27 = vpop.f32.mrf.mxu0  ;;  %v13727_v51 = vld [vmem:[#allocation9 + $0x3a8] sm:$0xf0]  ;;  %7180 = vmatpush.bf16.msrb.mxu1 %v13762_v18  ;;  %v16483_v47 = vld [vmem:[#allocation9 + $0x6c] sm:$0xf0] }
 0x353   : > { %7136 = vmatmul.bf16.vlgmr.msra.gmra.mxu1 %v17922_v37  ;;  %v13567_v18 = vld [vmem:[#allocation9 + $0x268] sm:$0xf0]  ;;  %v5310_v20 = vadd.f32 %v17930_v58, %v5297_v57  ;;  %v13318_v36 = vor.u32 %v16483_v47, %v13317_v30  ;;  %v16475_v46 = vld [vmem:[#allocation9 + $0x2c] sm:$0xf0] }
 0x354   : > { %v5350_v10 = vpop.f32.mrf.mxu1  ;;  %v13570_v21 = vor.u32 %v16542_v9, %v13567_v18 }
 0x355   : > { %7051 = vmatpush.bf16.msra.mxu3 %v14230_v59  ;;  %v14013_v59 = vld [vmem:[#allocation9 + $0x5c8] sm:$0xf] }
 0x356   : > { %7169 = vmatpush.bf16.msrb.mxu0 %v13442_v24  ;;  %v13730_v24 = vor.u32 %v16582_v60, %v13727_v51  ;;  %v14069_v60 = vld [vmem:[#allocation9 + $0x640] sm:$0xf] }
 0x357   : > { %v16673_v51 = vld [vmem:[#allocation9 + $0x65c] sm:$0xf0] }
 0x358   : > { %7181 = vmatpush.bf16.msrb.mxu1 %v13730_v24  ;;  %v14070_v28 = vor.u32 %v16673_v51, %v14069_v60 }
 0x359   : > { %7052 = vmatpush.bf16.msra.mxu3 %v14198_v40 }
 0x35a   : > { %7170 = vmatpush.bf16.msrb.mxu0 %v13410_v41  ;;  %v13698_v41 = vor.u32 %v16574_v0, %v13695_v33  ;;  %v16665_v0 = vld [vmem:[#allocation9 + $0x61c] sm:$0xf0] }
 0x35c   : > { %7182 = vmatpush.bf16.msrb.mxu1 %v13698_v41  ;;  %v13350_v41 = vor.u32 %v16491_v22, %v13349_v17  ;;  %v16519_v17 = vld [vmem:[#allocation9 + $0x194] sm:$0xf]  ;;  %v16571_v22 = vld [vmem:[#allocation9 + $0x32c] sm:$0xf0] }
 0x35d   : > { %7053 = vmatpush.bf16.msra.mxu3 %v14166_v2  ;;  %v17944_v16 = vpop.f32.mrf.mxu2  ;;  %v13981_v2 = vld [vmem:[#allocation9 + $0x588] sm:$0xf] }
 0x35e   : > { %7171 = vmatpush.bf16.msrb.mxu0 %v13378_v52  ;;  %v13445_v52 = vld [vmem:[#allocation9 + $0x150] sm:$0xf] }
 0x35f   : > { %v13446_v12 = vor.u32 %v16515_v53, %v13445_v52  ;;  %v16650_v52 = vld [vmem:[#allocation9 + $0x5a4] sm:$0xf0]  ;;  %v13733_v53 = vld [vmem:[#allocation9 + $0x390] sm:$0xf] }
 0x360   : > { %7183 = vmatpush.bf16.msrb.mxu1 %v13666_v29  ;;  %v13982_v61 = vor.u32 %v16650_v52, %v13981_v2  ;;  %v13734_v5 = vor.u32 %v16587_v55, %v13733_v53  ;;  %v16618_v2 = vld [vmem:[#allocation9 + $0x4a4] sm:$0xf0]  ;;  %v16555_v52 = vld [vmem:[#allocation9 + $0x2ac] sm:$0xf0]  ;;  %v16677_v55 = vld [vmem:[#allocation9 + $0x684] sm:$0xf] }
 0x361   : > { %7054 = vmatpush.bf16.msra.mxu3 %v14134_v13  ;;  %v13285_v13 = vld [vmem:[#allocation9 + $0x10] sm:$0xf] }
 0x362   : > { %7172 = vmatpush.bf16.msrb.mxu0 %v13346_v56  ;;  %v16681_v56 = vld [vmem:[#allocation9 + $0x69c] sm:$0xf0]  ;;  %v5322_v24 = vpop.f32.mrf.mxu3  ;;  %v13286_v57 = vor.u32 %v16475_v46, %v13285_v13  ;;  %v13821_v46 = vld [vmem:[#allocation9 + $0x448] sm:$0xf] }
 0x363   : > { %v14102_v15 = vor.u32 %v16681_v56, %v14101_v11  ;;  %v5323_v33 = vadd.f32 %v5322_v24, %v5310_v20  ;;  %v16527_v11 = vld [vmem:[#allocation9 + $0x1d4] sm:$0xf]  ;;  %v16634_v20 = vld [vmem:[#allocation9 + $0x524] sm:$0xf0] }
 0x364   : > { %7184 = vmatpush.bf16.msrb.mxu1 %v13634_v49  ;;  %v13511_v56 = vld [vmem:[#allocation9 + $0x1f0] sm:$0xf0] }
 0x365   : > { %7055 = vmatpush.bf16.msra.mxu3 %v14102_v15  ;;  %v5363_v40 = vpop.f32.mrf.mxu2  ;;  %v17952_v58 = vmax.f32 %v5323_v33, 0.0  ;;  %v16642_v15 = vld [vmem:[#allocation9 + $0x564] sm:$0xf0]  ;;  %v13514_v9 = vor.u32 %v16527_v11, %v13511_v56  ;;  %v16669_v11 = vld [vmem:[#allocation9 + $0x644] sm:$0xf] }
 0x366   : > { %7173 = vmatpush.bf16.msrb.mxu0 %v13314_v19  ;;  %v13382_v19 = vor.u32 %v16499_v1, %v13381_v63  ;;  %v16701_v63 = vld [vmem:[#allocation9 + $0x744] sm:$0xf]  ;;  %v13950_v60 = vor.u32 %v16642_v15, %v13949_v6  ;;  %v13885_v33 = vld [vmem:[#allocation9 + $0x4c8] sm:$0xf]  ;;  %v16563_v40 = vld [vmem:[#allocation9 + $0x2ec] sm:$0xf0] }
 0x367   : > { %v17956_v8 = vpack.c.bf16 %v17952_v58, %v17952_v58  ;;  %v14199_v1 = vld [vmem:[#allocation9 + $0x760] sm:$0xf0]  ;;  %v16547_v6 = vld [vmem:[#allocation9 + $0x26c] sm:$0xf0] }
 0x368   : > { %7185 = vmatpush.bf16.msrb.mxu1 %v13602_v54  ;;  %v16579_v54 = vld [vmem:[#allocation9 + $0x36c] sm:$0xf0]  ;;  %v14202_v18 = vor.u32 %v16701_v63, %v14199_v1  ;;  %v14071_v56 = vld [vmem:[#allocation9 + $0x660] sm:$0xf0] }
 0x369   : > { %7056 = vmatpush.bf16.msra.mxu3 %v14070_v28  ;;  %7045 = vmatmul.bf16.vlgmr.msra.gmra.mxu2 %v17956_v8  ;;  %v13479_v28 = vld [vmem:[#allocation9 + $0x1b0] sm:$0xf0]  ;;  %v14074_v63 = vor.u32 %v16669_v11, %v14071_v56 }
 0x36a   : > { %7174 = vmatpush.bf16.msrb.mxu0 %v13282_v3  ;;  %v17947_v27 = vpop.f32.mrf.mxu0  ;;  %v16658_v3 = vld [vmem:[#allocation9 + $0x5e4] sm:$0xf0]  ;;  %v5324_v4 = vpop.f32.mrf.mxu3  ;;  %v13482_v24 = vor.u32 %v16519_v17, %v13479_v28  ;;  %v13541_v17 = vld [vmem:[#allocation9 + $0x210] sm:$0xf]  ;;  %v16567_v11 = vld [vmem:[#allocation9 + $0x314] sm:$0xf] }
 0x36b   : > { %v14014_v48 = vor.u32 %v16658_v3, %v14013_v59  ;;  %v16693_v59 = vld [vmem:[#allocation9 + $0x704] sm:$0xf]  ;;  %v16511_v3 = vld [vmem:[#allocation9 + $0x154] sm:$0xf]  ;;  %v16539_v28 = vld [vmem:[#allocation9 + $0x22c] sm:$0xf0] }
 0x36c   : > { %v17949_v10 = vpop.f32.mrf.mxu1  ;;  %7186 = vmatpush.bf16.msrb.mxu1 %v13570_v21  ;;  %v13669_v21 = vld [vmem:[#allocation9 + $0x310] sm:$0xf]  ;;  %v14170_v25 = vor.u32 %v16693_v59, %v14167_v45  ;;  %v13383_v4 = vld [vmem:[#allocation9 + $0xf0] sm:$0xf0]  ;;  %v16661_v59 = vld [vmem:[#allocation9 + $0x604] sm:$0xf] }
 0x36d   : > { %7175 = vmatmul.bf16.vlgmr.msrb.gmra.mxu0 %v17906_v14  ;;  %7141 = vmatpush.bf16.msra.mxu2 %v14014_v48  ;;  %v16503_v48 = vld [vmem:[#allocation9 + $0x114] sm:$0xf]  ;;  %v14039_v45 = vld [vmem:[#allocation9 + $0x620] sm:$0xf0] }
 0x36e   : > { %7219 = vmatpush.bf16.msra.mxu0 %v13510_v39  ;;  %v14038_v39 = vor.u32 %v16665_v0, %v14037_v26  ;;  %v13670_v0 = vor.u32 %v16571_v22, %v13669_v21  ;;  %v13767_v22 = vld [vmem:[#allocation9 + $0x3f0] sm:$0xf0] }
 0x36f   : > { %v13671_v56 = vld [vmem:[#allocation9 + $0x330] sm:$0xf0] }
 0x370   : > { %7057 = vmatpush.bf16.msra.mxu3 %v14038_v39  ;;  %7187 = vmatpush.bf16.msrb.mxu1 %v13538_v31  ;;  %v13637_v39 = vld [vmem:[#allocation9 + $0x2d0] sm:$0xf] }
 0x371   : > { %7142 = vmatpush.bf16.msra.mxu2 %v13982_v61  ;;  %v13638_v47 = vor.u32 %v16563_v40, %v13637_v39  ;;  %v16610_v61 = vld [vmem:[#allocation9 + $0x464] sm:$0xf0]  ;;  %v16646_v39 = vld [vmem:[#allocation9 + $0x58c] sm:$0xf] }
 0x372   : > { %7220 = vmatpush.bf16.msra.mxu0 %v13478_v50  ;;  %v13766_v50 = vor.u32 %v16595_v38, %v13765_v35  ;;  %v5389_v29 = vpop.f32.mrf.mxu0  ;;  %v13447_v35 = vld [vmem:[#allocation9 + $0x170] sm:$0xf0]  ;;  %v16626_v38 = vld [vmem:[#allocation9 + $0x4e4] sm:$0xf0]  ;;  %v13822_v1 = vor.u32 %v16610_v61, %v13821_v46  ;;  %v13983_v40 = vld [vmem:[#allocation9 + $0x5a8] sm:$0xf0] }
 0x373   : > { %7188 = vmatmul.bf16.vlgmr.msrb.gmra.mxu1 %v17922_v37  ;;  %v13450_v43 = vor.u32 %v16511_v3, %v13447_v35  ;;  %v13886_v30 = vor.u32 %v16626_v38, %v13885_v33  ;;  %v13605_v29 = vld [vmem:[#allocation9 + $0x290] sm:$0xf]  ;;  %v16479_v35 = vld [vmem:[#allocation9 + $0x54] sm:$0xf]  ;;  %v13485_v61 = vld [vmem:[#allocation9 + $0x198] sm:$0xf] }
 0x374   : > { %7102 = vmatpush.bf16.msrb.mxu3 %v14266_v44  ;;  %v5402_v23 = vpop.f32.mrf.mxu1  ;;  %7232 = vmatpush.bf16.msra.mxu1 %v13766_v50  ;;  %v13853_v44 = vld [vmem:[#allocation9 + $0x488] sm:$0xf]  ;;  %v13415_v50 = vld [vmem:[#allocation9 + $0x130] sm:$0xf0]  ;;  %v13606_v13 = vor.u32 %v16555_v52, %v13605_v29  ;;  %v13517_v29 = vld [vmem:[#allocation9 + $0x1d8] sm:$0xf] }
 0x375   : > { %7143 = vmatpush.bf16.msra.mxu2 %v13950_v60  ;;  %v14103_v23 = vld [vmem:[#allocation9 + $0x6a0] sm:$0xf0]  ;;  %v16654_v60 = vld [vmem:[#allocation9 + $0x5cc] sm:$0xf]  ;;  %v13319_v38 = vld [vmem:[#allocation9 + $0x70] sm:$0xf0] }
 0x376   : > { %7221 = vmatpush.bf16.msra.mxu0 %v13446_v12  ;;  %v14231_v12 = vld [vmem:[#allocation9 + $0x7a0] sm:$0xf0]  ;;  %v16532_v52 = vld [vmem:[#allocation9 + $0x1f4] sm:$0xf0] }
 0x377   : > { %v14234_v49 = vor.u32 %v16709_v42, %v14231_v12  ;;  %v14106_v42 = vor.u32 %v16677_v55, %v14103_v23  ;;  %v13854_v12 = vor.u32 %v16618_v2, %v13853_v44  ;;  %v16471_v44 = vld [vmem:[#allocation9 + $0x14] sm:$0xf]  ;;  %v13951_v2 = vld [vmem:[#allocation9 + $0x568] sm:$0xf0] }
 0x378   : > { %7233 = vmatpush.bf16.msra.mxu1 %v13734_v5  ;;  %v13573_v5 = vld [vmem:[#allocation9 + $0x250] sm:$0xf]  ;;  %v16575_v55 = vld [vmem:[#allocation9 + $0x354] sm:$0xf] }
 0x379   : > { %7103 = vmatpush.bf16.msrb.mxu3 %v14234_v49  ;;  %7097 = vmatmul.bf16.vlgmr.msrb.gmra.mxu2 %v17956_v8  ;;  %v16495_v49 = vld [vmem:[#allocation9 + $0xd4] sm:$0xf] }
 0x37a   : > { %7222 = vmatpush.bf16.msra.mxu0 %v13414_v34  ;;  %v13701_v34 = vld [vmem:[#allocation9 + $0x350] sm:$0xf]  ;;  %v13386_v15 = vor.u32 %v16495_v49, %v13383_v4  ;;  %v13703_v23 = vld [vmem:[#allocation9 + $0x370] sm:$0xf0]  ;;  %v13919_v4 = vld [vmem:[#allocation9 + $0x528] sm:$0xf0] }
 0x37b   : > { %v13702_v51 = vor.u32 %v16579_v54, %v13701_v34  ;;  %v13789_v34 = vld [vmem:[#allocation9 + $0x408] sm:$0xf]  ;;  %v13706_v49 = vor.u32 %v16575_v55, %v13703_v23  ;;  %v16659_v55 = vld [vmem:[#allocation9 + $0x5ec] sm:$0xf0]  ;;  %v5448_v23 = vlaneseq }
 0x37c   : > { %v16602_v54 = vld [vmem:[#allocation9 + $0x424] sm:$0xf0] }
 0x37d   : > { %7104 = vmatpush.bf16.msrb.mxu3 %v14202_v18  ;;  %7234 = vmatpush.bf16.msra.mxu1 %v13702_v51  ;;  %v17961_v53 = vpop.f32.mrf.mxu2  ;;  %v13351_v18 = vld [vmem:[#allocation9 + $0xb0] sm:$0xf0]  ;;  %v14015_v51 = vld [vmem:[#allocation9 + $0x5e8] sm:$0xf0]  ;;  %vm17988_vm3 = vcmp.lt.s32.totalorder %v5448_v23, 512 }
 0x37e   : > { %7223 = vmatpush.bf16.msra.mxu0 %v13382_v19  ;;  %v13917_v19 = vld [vmem:[#allocation9 + $0x508] sm:$0xf]  ;;  %v14018_v33 = vor.u32 %v16654_v60, %v14015_v51  ;;  %v16559_v60 = vld [vmem:[#allocation9 + $0x2d4] sm:$0xf] }
 0x37f   : > { %v13918_v26 = vor.u32 %v16634_v20, %v13917_v19  ;;  %v16591_v20 = vld [vmem:[#allocation9 + $0x3d4] sm:$0xf] }
 0x380   : > { %v13770_v3 = vor.u32 %v16591_v20, %v13767_v22  ;;  %v13639_v51 = vld [vmem:[#allocation9 + $0x2f0] sm:$0xf0]  ;;  %v13421_v22 = vld [vmem:[#allocation9 + $0x118] sm:$0xf] }
 0x381   : > { %7105 = vmatpush.bf16.msrb.mxu3 %v14170_v25  ;;  %7144 = vmatpush.bf16.msra.mxu2 %v13918_v26  ;;  %v14042_v25 = vor.u32 %v16661_v59, %v14039_v45  ;;  %v13790_v26 = vor.u32 %v16602_v54, %v13789_v34  ;;  %v13642_v20 = vor.u32 %v16559_v60, %v13639_v51  ;;  %v16508_v59 = vld [vmem:[#allocation9 + $0x134] sm:$0xf0]  ;;  %v16551_v45 = vld [vmem:[#allocation9 + $0x294] sm:$0xf]  ;;  %v14237_v60 = vld [vmem:[#allocation9 + $0x788] sm:$0xf] }
 0x382   : > { %7224 = vmatpush.bf16.msra.mxu0 %v13350_v41  ;;  %v16685_v41 = vld [vmem:[#allocation9 + $0x6c4] sm:$0xf]  ;;  %7235 = vmatpush.bf16.msra.mxu1 %v13670_v0  ;;  %v5374_v19 = vpop.f32.mrf.mxu3  ;;  %v13542_v0 = vor.u32 %v16539_v28, %v13541_v17  ;;  %v16614_v17 = vld [vmem:[#allocation9 + $0x48c] sm:$0xf]  ;;  %v16714_v51 = vld [vmem:[#allocation9 + $0x7a4] sm:$0xf0] }
 0x383   : > { %v14138_v31 = vor.u32 %v16685_v41, %v14135_v32  ;;  %v16583_v41 = vld [vmem:[#allocation9 + $0x394] sm:$0xf] }
 0x384   : > { %v13735_v32 = vld [vmem:[#allocation9 + $0x3b0] sm:$0xf0] }
 0x385   : > { %7106 = vmatpush.bf16.msrb.mxu3 %v14138_v31  ;;  %7145 = vmatpush.bf16.msra.mxu2 %v13886_v30  ;;  %v5415_v21 = vpop.f32.mrf.mxu2  ;;  %v13986_v30 = vor.u32 %v16646_v39, %v13983_v40  ;;  %v16543_v39 = vld [vmem:[#allocation9 + $0x254] sm:$0xf] }
 0x386   : > { %7225 = vmatpush.bf16.msra.mxu0 %v13318_v36  ;;  %v13418_v36 = vor.u32 %v16503_v48, %v13415_v50  ;;  %7236 = vmatpush.bf16.msra.mxu1 %v13638_v47  ;;  %v13738_v47 = vor.u32 %v16583_v41, %v13735_v32  ;;  %v13287_v48 = vld [vmem:[#allocation9 + $0x30] sm:$0xf0]  ;;  %v16638_v50 = vld [vmem:[#allocation9 + $0x54c] sm:$0xf] }
 0x387   : > { %v13855_v21 = vld [vmem:[#allocation9 + $0x4a8] sm:$0xf0]  ;;  %v13575_v40 = vld [vmem:[#allocation9 + $0x270] sm:$0xf0] }
 0x389   : > { %7107 = vmatpush.bf16.msrb.mxu3 %v14106_v42  ;;  %7146 = vmatpush.bf16.msra.mxu2 %v13854_v12  ;;  %v13954_v42 = vor.u32 %v16638_v50, %v13951_v2  ;;  %v13518_v12 = vor.u32 %v16532_v52, %v13517_v29  ;;  %v16492_v50 = vld [vmem:[#allocation9 + $0xb4] sm:$0xf0]  ;;  %v14269_v29 = vld [vmem:[#allocation9 + $0x7c8] sm:$0xf]  ;;  %v14021_v52 = vld [vmem:[#allocation9 + $0x5d0] sm:$0xf] }
 0x38a   : > { %7226 = vmatpush.bf16.msra.mxu0 %v13286_v57  ;;  %v16487_v57 = vld [vmem:[#allocation9 + $0x94] sm:$0xf]  ;;  %7237 = vmatpush.bf16.msra.mxu1 %v13606_v13  ;;  %v5376_v31 = vpop.f32.mrf.mxu3  ;;  %v16630_v13 = vld [vmem:[#allocation9 + $0x50c] sm:$0xf] }
 0x38b   : > { %v13922_v34 = vor.u32 %v16630_v13, %v13919_v4  ;;  %v16598_v31 = vld [vmem:[#allocation9 + $0x40c] sm:$0xf] }
 0x38d   : > { %7227 = vmatmul.bf16.vlgmr.msra.gmra.mxu0 %v17906_v14  ;;  %7108 = vmatpush.bf16.msrb.mxu3 %v14074_v63  ;;  %v13674_v63 = vor.u32 %v16567_v11, %v13671_v56  ;;  %v13325_v11 = vld [vmem:[#allocation9 + $0x58] sm:$0xf] }
 0x38e   : > { %7271 = vmatpush.bf16.msrb.mxu0 %v13514_v9  ;;  %v13574_v9 = vor.u32 %v16547_v6, %v13573_v5  ;;  %7147 = vmatpush.bf16.msra.mxu2 %v13822_v1  ;;  %v17966_v46 = vpop.f32.mrf.mxu0  ;;  %v16524_v5 = vld [vmem:[#allocation9 + $0x1b4] sm:$0xf0]  ;;  %v5362_v6 = vadd.f32 %v17944_v16, %v17934_v7  ;;  %v13887_v1 = vld [vmem:[#allocation9 + $0x4e8] sm:$0xf0] }
 0x38f   : > { %v13486_v54 = vor.u32 %v16524_v5, %v13485_v61  ;;  %v13773_v61 = vld [vmem:[#allocation9 + $0x3d8] sm:$0xf] }
 0x390   : > { %7238 = vmatpush.bf16.msra.mxu1 %v13574_v9  ;;  %v13453_v9 = vld [vmem:[#allocation9 + $0x158] sm:$0xf] }
 0x391   : > { %7109 = vmatpush.bf16.msrb.mxu3 %v14042_v25  ;;  %v13858_v25 = vor.u32 %v16614_v17, %v13855_v21  ;;  %v16596_v5 = vld [vmem:[#allocation9 + $0x3f4] sm:$0xf0] }
 0x392   : > { %7272 = vmatpush.bf16.msrb.mxu0 %v13482_v24  ;;  %v13354_v24 = vor.u32 %v16487_v57, %v13351_v18  ;;  %7148 = vmatpush.bf16.msra.mxu2 %v13790_v26  ;;  %v16622_v57 = vld [vmem:[#allocation9 + $0x4cc] sm:$0xf]  ;;  %v16516_v18 = vld [vmem:[#allocation9 + $0x174] sm:$0xf0]  ;;  %v13422_v26 = vor.u32 %v16508_v59, %v13421_v22 }
 0x393   : > { %v13890_v16 = vor.u32 %v16622_v57, %v13887_v1  ;;  %v16484_v56 = vld [vmem:[#allocation9 + $0x74] sm:$0xf0]  ;;  %v17980_v1 = vld [vmem:[#allocation10] sm:$0xff] }
 0x394   : > { %7239 = vmatpush.bf16.msra.mxu1 %v13542_v0  ;;  %v16606_v0 = vld [vmem:[#allocation9 + $0x44c] sm:$0xf]  ;;  %v16588_v17 = vld [vmem:[#allocation9 + $0x3b4] sm:$0xf0] }
 0x395   : > { %7149 = vmatmul.bf16.vlgmr.msra.gmra.mxu2 %v17956_v8 }
 0x396   : > { %7273 = vmatpush.bf16.msrb.mxu0 %v13450_v43  ;;  %v13322_v43 = vor.u32 %v16479_v35, %v13319_v38  ;;  %7193 = vmatpush.bf16.msrb.mxu2 %v14018_v33  ;;  %v7022_v28 = vpop.f32.mrf.mxu0  ;;  %v13389_v35 = vld [vmem:[#allocation9 + $0xd8] sm:$0xf] }
 0x397   : > { %7240 = vmatmul.bf16.vlgmr.msra.gmra.mxu1 %v17922_v37  ;;  %v16500_v38 = vld [vmem:[#allocation9 + $0xf4] sm:$0xf0] }
 0x398   : > { %7284 = vmatpush.bf16.msrb.mxu1 %v13770_v3  ;;  %v13823_v3 = vld [vmem:[#allocation9 + $0x468] sm:$0xf0]  ;;  %v13293_v28 = vld [vmem:[#allocation9 + $0x18] sm:$0xf] }
 0x399   : > { %v13826_v32 = vor.u32 %v16606_v0, %v13823_v3  ;;  %v13519_v0 = vld [vmem:[#allocation9 + $0x1f8] sm:$0xf0]  ;;  %v16706_v3 = vld [vmem:[#allocation9 + $0x764] sm:$0xf0] }
 0x39a   : > { %7274 = vmatpush.bf16.msrb.mxu0 %v13418_v36  ;;  %v13290_v36 = vor.u32 %v16471_v44, %v13287_v48  ;;  %7194 = vmatpush.bf16.msrb.mxu2 %v13986_v30  ;;  %v13791_v44 = vld [vmem:[#allocation9 + $0x428] sm:$0xf0]  ;;  %v13357_v48 = vld [vmem:[#allocation9 + $0x98] sm:$0xf] }
 0x39b   : > { %v13358_v4 = vor.u32 %v16492_v50, %v13357_v48  ;;  %v14173_v50 = vld [vmem:[#allocation9 + $0x708] sm:$0xf] }
 0x39c   : > { %7285 = vmatpush.bf16.msrb.mxu1 %v13738_v47 }
 0x39e   : > { %7275 = vmatpush.bf16.msrb.mxu0 %v13386_v15  ;;  %v5375_v15 = vadd.f32 %v5374_v19, %v5362_v6  ;;  %7195 = vmatpush.bf16.msrb.mxu2 %v13954_v42  ;;  %v13454_v19 = vor.u32 %v16516_v18, %v13453_v9  ;;  %v16535_v42 = vld [vmem:[#allocation9 + $0x214] sm:$0xf]  ;;  %v14022_v6 = vor.u32 %v16659_v55, %v14021_v52  ;;  %v13677_v52 = vld [vmem:[#allocation9 + $0x318] sm:$0xf]  ;;  %v13861_v9 = vld [vmem:[#allocation9 + $0x490] sm:$0xf] }
 0x39f   : > { %v13774_v18 = vor.u32 %v16596_v5, %v13773_v61  ;;  %v16572_v55 = vld [vmem:[#allocation9 + $0x334] sm:$0xf0]  ;;  %v16627_v61 = vld [vmem:[#allocation9 + $0x4ec] sm:$0xf0] }
 0x3a0   : > { %7286 = vmatpush.bf16.msrb.mxu1 %v13706_v49  ;;  %v5388_v7 = vadd.f32 %v17947_v27, %v5375_v15  ;;  %v13794_v49 = vor.u32 %v16598_v31, %v13791_v44  ;;  %v13487_v44 = vld [vmem:[#allocation9 + $0x1b8] sm:$0xf0]  ;;  %v13678_v5 = vor.u32 %v16572_v55, %v13677_v52  ;;  %v14023_v52 = vld [vmem:[#allocation9 + $0x5f0] sm:$0xf0] }
 0x3a2   : > { %7276 = vmatpush.bf16.msrb.mxu0 %v13354_v24  ;;  %7196 = vmatpush.bf16.msrb.mxu2 %v13922_v34  ;;  %v13607_v24 = vld [vmem:[#allocation9 + $0x2b0] sm:$0xf0]  ;;  %v5401_v27 = vadd.f32 %v17949_v10, %v5388_v7  ;;  %v5426_v30 = vpop.f32.mrf.mxu3  ;;  %v13578_v10 = vor.u32 %v16543_v39, %v13575_v40  ;;  %v13709_v39 = vld [vmem:[#allocation9 + $0x358] sm:$0xf] }
 0x3a3   : > { %v13610_v33 = vor.u32 %v16551_v45, %v13607_v24  ;;  %v16476_v45 = vld [vmem:[#allocation9 + $0x34] sm:$0xf0]  ;;  %v13957_v24 = vld [vmem:[#allocation9 + $0x550] sm:$0xf] }
 0x3a4   : > { %7287 = vmatpush.bf16.msrb.mxu1 %v13674_v63  ;;  %v5414_v41 = vadd.f32 %v17961_v53, %v5401_v27  ;;  %v5439_v53 = vrot.slane %v17952_v58, 6  ;;  %v13989_v58 = vld [vmem:[#allocation9 + $0x590] sm:$0xf]  ;;  %v16528_v27 = vld [vmem:[#allocation9 + $0x1dc] sm:$0xf] }
 0x3a5   : > { %v16651_v63 = vld [vmem:[#allocation9 + $0x5ac] sm:$0xf0]  ;;  %v16580_v40 = vld [vmem:[#allocation9 + $0x374] sm:$0xf0] }
 0x3a6   : > { %7277 = vmatpush.bf16.msrb.mxu0 %v13322_v43  ;;  %7197 = vmatpush.bf16.msrb.mxu2 %v13890_v16  ;;  %v13390_v43 = vor.u32 %v16500_v38, %v13389_v35  ;;  %v5427_v2 = vadd.f32 %v5426_v30, %v5414_v41  ;;  %v13326_v16 = vor.u32 %v16484_v56, %v13325_v11  ;;  %v6995_v35 = vperm.slane %v17980_v1, 0  ;;  %v16635_v30 = vld [vmem:[#allocation9 + $0x52c] sm:$0xf0]  ;;  %v13455_v11 = vld [vmem:[#allocation9 + $0x178] sm:$0xf0] }
 0x3a7   : > { %v13990_v59 = vor.u32 %v16651_v63, %v13989_v58  ;;  %v13294_v38 = vor.u32 %v16476_v45, %v13293_v28  ;;  %v13710_v48 = vor.u32 %v16580_v40, %v13709_v39  ;;  %v13645_v56 = vld [vmem:[#allocation9 + $0x2d8] sm:$0xf]  ;;  %v14109_v63 = vld [vmem:[#allocation9 + $0x688] sm:$0xf]  ;;  %v13829_v45 = vld [vmem:[#allocation9 + $0x450] sm:$0xf] }
 0x3a8   : > { %7288 = vmatpush.bf16.msrb.mxu1 %v13642_v20  ;;  %v5433_v13 = vmax.f32 %v5427_v2, 0.0  ;;  %v16698_v2 = vld [vmem:[#allocation9 + $0x724] sm:$0xf0] }
 0x3a9   : > { %v14045_v39 = vld [vmem:[#allocation9 + $0x608] sm:$0xf] }
 0x3aa   : > { %7278 = vmatpush.bf16.msrb.mxu0 %v13290_v36  ;;  %7198 = vmatpush.bf16.msrb.mxu2 %v13858_v25  ;;  %v17975_v47 = vpop.f32.mrf.mxu0  ;;  %v16722_v36 = vld [vmem:[#allocation9 + $0x7e4] sm:$0xf0]  ;;  %v5440_v15 = vrot.slane %v5433_v13, 5  ;;  %v17978_v34 = vpack.c.bf16 %v5433_v13, %v5433_v13  ;;  %v5428_v21 = vpop.f32.mrf.mxu3  ;;  %v16643_v25 = vld [vmem:[#allocation9 + $0x56c] sm:$0xf0]  ;;  %v14174_v13 = vor.u32 %v16698_v2, %v14173_v50 }
 0x3ab   : > { %v13958_v41 = vor.u32 %v16643_v25, %v13957_v24  ;;  %v16611_v24 = vld [vmem:[#allocation9 + $0x46c] sm:$0xf0]  ;;  %v14271_v2 = vld [vmem:[#allocation9 + $0x7e8] sm:$0xf0] }
 0x3ac   : > { %7289 = vmatpush.bf16.msrb.mxu1 %v13610_v33  ;;  %v5444_v7 = vsel %vm5443_vm1, %v5439_v53, %v5440_v15  ;;  %7058 = vmatmul.bf16.vlgmr.msra.gmra.mxu3 %v17978_v34  ;;  %v14205_v33 = vld [vmem:[#allocation9 + $0x748] sm:$0xf]  ;;  %v16564_v15 = vld [vmem:[#allocation9 + $0x2f4] sm:$0xf0] }
 0x3ad   : > { %7279 = vmatmul.bf16.vlgmr.msrb.gmra.mxu0 %v17906_v14  ;;  %v5446_v20 = vsel %vm5445_vm2, %v17926_v62, %v5444_v7  ;;  %v14206_v31 = vor.u32 %v16706_v3, %v14205_v33  ;;  %v16504_v7 = vld [vmem:[#allocation9 + $0x11c] sm:$0xf]  ;;  %v6996_v33 = vperm.slane %v17980_v1, 1  ;;  %v13581_v3 = vld [vmem:[#allocation9 + $0x258] sm:$0xf] }
 0x3ae   : > { %7323 = vmatpush.bf16.msra.mxu0 %v13518_v12  ;;  %v13543_v12 = vld [vmem:[#allocation9 + $0x230] sm:$0xf0]  ;;  %7199 = vmatpush.bf16.msrb.mxu2 %v13826_v32  ;;  %5452 = vst.msk [vmem:[%s486_s15] sm:$0xf] %vm17988_vm3, %v5446_v20  ;;  %v13522_v32 = vor.u32 %v16528_v27, %v13519_v0  ;;  %v16674_v27 = vld [vmem:[#allocation9 + $0x664] sm:$0xf0] }
 0x3af   : > { %v13546_v57 = vor.u32 %v16535_v42, %v13543_v12  ;;  %v16496_v0 = vld [vmem:[#allocation9 + $0xdc] sm:$0xf]  ;;  %v7073_v50 = vadd.f32 %v17975_v47, %v6996_v33 }
 0x3b0   : > { %7290 = vmatpush.bf16.msrb.mxu1 %v13578_v10  ;;  %v16520_v10 = vld [vmem:[#allocation9 + $0x19c] sm:$0xf] }
 0x3b1   : > { %v13490_v12 = vor.u32 %v16520_v10, %v13487_v44  ;;  %v16488_v10 = vld [vmem:[#allocation9 + $0x9c] sm:$0xf] }
 0x3b2   : > { %7324 = vmatpush.bf16.msra.mxu0 %v13486_v54  ;;  %v14270_v54 = vor.u32 %v16722_v36, %v14269_v29  ;;  %7200 = vmatpush.bf16.msrb.mxu2 %v13794_v49  ;;  %v7074_v22 = vpop.f32.mrf.mxu0  ;;  %v7021_v29 = vadd.f32 %v17966_v46, %v6995_v35  ;;  %v7033_v36 = vpop.f32.mrf.mxu1  ;;  %v14141_v49 = vld [vmem:[#allocation9 + $0x6c8] sm:$0xf]  ;;  %v16548_v35 = vld [vmem:[#allocation9 + $0x274] sm:$0xf0]  ;;  %v13359_v44 = vld [vmem:[#allocation9 + $0xb8] sm:$0xf0] }
 0x3b3   : > { %v16690_v46 = vld [vmem:[#allocation9 + $0x6e4] sm:$0xf0] }
 0x3b4   : > { %7154 = vmatpush.bf16.msra.mxu3 %v14270_v54  ;;  %7291 = vmatpush.bf16.msrb.mxu1 %v13546_v57  ;;  %v18002_v53 = vadd.f32 %v7033_v36, %v7021_v29  ;;  %v14142_v57 = vor.u32 %v16690_v46, %v14141_v49  ;;  %v16655_v29 = vld [vmem:[#allocation9 + $0x5d4] sm:$0xf] }
 0x3b5   : > { %7201 = vmatmul.bf16.vlgmr.msrb.gmra.mxu2 %v17956_v8  ;;  %v14026_v47 = vor.u32 %v16655_v29, %v14023_v52  ;;  %v13895_v29 = vld [vmem:[#allocation9 + $0x4f0] sm:$0xf0] }
 0x3b6   : > { %7325 = vmatpush.bf16.msra.mxu0 %v13454_v19  ;;  %v13741_v19 = vld [vmem:[#allocation9 + $0x398] sm:$0xf]  ;;  %7245 = vmatpush.bf16.msra.mxu2 %v14022_v6  ;;  %v16512_v6 = vld [vmem:[#allocation9 + $0x15c] sm:$0xf] }
 0x3b7   : > { %v13742_v62 = vor.u32 %v16588_v17, %v13741_v19  ;;  %7292 = vmatmul.bf16.vlgmr.msrb.gmra.mxu1 %v17922_v37  ;;  %v13458_v58 = vor.u32 %v16512_v6, %v13455_v11  ;;  %v13613_v19 = vld [vmem:[#allocation9 + $0x298] sm:$0xf]  ;;  %v16480_v11 = vld [vmem:[#allocation9 + $0x5c] sm:$0xf] }
 0x3b8   : > { %7336 = vmatpush.bf16.msra.mxu1 %v13774_v18  ;;  %v16619_v18 = vld [vmem:[#allocation9 + $0x4ac] sm:$0xf0]  ;;  %v16556_v17 = vld [vmem:[#allocation9 + $0x2b4] sm:$0xf0] }
 0x3b9   : > { %v13862_v20 = vor.u32 %v16619_v18, %v13861_v9  ;;  %v13991_v9 = vld [vmem:[#allocation9 + $0x5b0] sm:$0xf0] }
 0x3ba   : > { %7326 = vmatpush.bf16.msra.mxu0 %v13422_v26  ;;  %v14238_v26 = vor.u32 %v16714_v51, %v14237_v60  ;;  %7246 = vmatpush.bf16.msra.mxu2 %v13990_v59  ;;  %v13646_v60 = vor.u32 %v16564_v15, %v13645_v56  ;;  %v16682_v51 = vld [vmem:[#allocation9 + $0x6a4] sm:$0xf0]  ;;  %v7035_v28 = vpop.f32.mrf.mxu1  ;;  %v13327_v56 = vld [vmem:[#allocation9 + $0x78] sm:$0xf0] }
 0x3bb   : > { %v14110_v21 = vor.u32 %v16682_v51, %v14109_v63  ;;  %v14077_v59 = vld [vmem:[#allocation9 + $0x648] sm:$0xf]  ;;  %v16647_v63 = vld [vmem:[#allocation9 + $0x594] sm:$0xf]  ;;  %v13330_v18 = vor.u32 %v16480_v11, %v13327_v56  ;;  %v13743_v51 = vld [vmem:[#allocation9 + $0x3b8] sm:$0xf0] }
 0x3bc   : > { %7155 = vmatpush.bf16.msra.mxu3 %v14238_v26  ;;  %7337 = vmatpush.bf16.msra.mxu1 %v13742_v62  ;;  %v13614_v26 = vor.u32 %v16556_v17, %v13613_v19  ;;  %v13391_v62 = vld [vmem:[#allocation9 + $0xf8] sm:$0xf0]  ;;  %v14078_v40 = vor.u32 %v16674_v27, %v14077_v59  ;;  %v13994_v17 = vor.u32 %v16647_v63, %v13991_v9  ;;  %v16702_v28 = vld [vmem:[#allocation9 + $0x74c] sm:$0xf]  ;;  %v16639_v59 = vld [vmem:[#allocation9 + $0x554] sm:$0xf] }
 0x3bd   : > { %7110 = vmatmul.bf16.vlgmr.msrb.gmra.mxu3 %v17978_v34  ;;  %v13295_v19 = vld [vmem:[#allocation9 + $0x38] sm:$0xf0]  ;;  %v16670_v56 = vld [vmem:[#allocation9 + $0x64c] sm:$0xf]  ;;  %v13831_v63 = vld [vmem:[#allocation9 + $0x470] sm:$0xf0] }
 0x3be   : > { %7327 = vmatpush.bf16.msra.mxu0 %v13390_v43  ;;  %v13925_v43 = vld [vmem:[#allocation9 + $0x510] sm:$0xf]  ;;  %7247 = vmatpush.bf16.msra.mxu2 %v13958_v41  ;;  %v13394_v41 = vor.u32 %v16496_v0, %v13391_v62  ;;  %v13711_v27 = vld [vmem:[#allocation9 + $0x378] sm:$0xf0]  ;;  %v6997_v62 = vperm.slane %v17980_v1, 2 }
 0x3bf   : > { %v13926_v42 = vor.u32 %v16635_v30, %v13925_v43  ;;  %v13797_v43 = vld [vmem:[#allocation9 + $0x410] sm:$0xf]  ;;  %v13582_v30 = vor.u32 %v16548_v35, %v13581_v3  ;;  %v16694_v3 = vld [vmem:[#allocation9 + $0x70c] sm:$0xf]  ;;  %v16544_v9 = vld [vmem:[#allocation9 + $0x25c] sm:$0xf] }
 0x3c0   : > { %7156 = vmatpush.bf16.msra.mxu3 %v14206_v31  ;;  %7338 = vmatpush.bf16.msra.mxu1 %v13710_v48  ;;  %v16603_v31 = vld [vmem:[#allocation9 + $0x42c] sm:$0xf0]  ;;  %v16718_v48 = vld [vmem:[#allocation9 + $0x7cc] sm:$0xf] }
 0x3c1   : > { %v13798_v36 = vor.u32 %v16603_v31, %v13797_v43  ;;  %v14274_v6 = vor.u32 %v16718_v48, %v14271_v2  ;;  %v14175_v35 = vld [vmem:[#allocation9 + $0x728] sm:$0xf0]  ;;  %v16623_v2 = vld [vmem:[#allocation9 + $0x4d4] sm:$0xf] }
 0x3c2   : > { %7328 = vmatpush.bf16.msra.mxu0 %v13358_v4  ;;  %v13893_v4 = vld [vmem:[#allocation9 + $0x4d0] sm:$0xf]  ;;  %7248 = vmatpush.bf16.msra.mxu2 %v13926_v42  ;;  %v7085_v55 = vpop.f32.mrf.mxu1  ;;  %v13549_v42 = vld [vmem:[#allocation9 + $0x218] sm:$0xf]  ;;  %v14178_v43 = vor.u32 %v16694_v3, %v14175_v35 }
 0x3c3   : > { %v13894_v54 = vor.u32 %v16627_v61, %v13893_v4  ;;  %v13362_v4 = vor.u32 %v16488_v10, %v13359_v44  ;;  %v16592_v61 = vld [vmem:[#allocation9 + $0x3dc] sm:$0xf]  ;;  %v16686_v10 = vld [vmem:[#allocation9 + $0x6cc] sm:$0xf]  ;;  %v14245_v35 = vld [vmem:[#allocation9 + $0x790] sm:$0xf] }
 0x3c4   : > { %7157 = vmatpush.bf16.msra.mxu3 %v14174_v13  ;;  %7339 = vmatpush.bf16.msra.mxu1 %v13678_v5  ;;  %v18010_v13 = vadd.f32 %v7085_v55, %v7073_v50  ;;  %v13775_v5 = vld [vmem:[#allocation9 + $0x3f8] sm:$0xf0]  ;;  %v14143_v44 = vld [vmem:[#allocation9 + $0x6e8] sm:$0xf0] }
 0x3c5   : > { %v16560_v55 = vld [vmem:[#allocation9 + $0x2dc] sm:$0xf] }
 0x3c6   : > { %7329 = vmatpush.bf16.msra.mxu0 %v13326_v16  ;;  %v13423_v16 = vld [vmem:[#allocation9 + $0x138] sm:$0xf0]  ;;  %7249 = vmatpush.bf16.msra.mxu2 %v13894_v54  ;;  %v16710_v54 = vld [vmem:[#allocation9 + $0x78c] sm:$0xf] }
 0x3c7   : > { %v13426_v22 = vor.u32 %v16504_v7, %v13423_v16  ;;  %v16472_v16 = vld [vmem:[#allocation9 + $0x1c] sm:$0xf] }
 0x3c8   : > { %7158 = vmatpush.bf16.msra.mxu3 %v14142_v57  ;;  %7340 = vmatpush.bf16.msra.mxu1 %v13646_v60  ;;  %v14239_v57 = vld [vmem:[#allocation9 + $0x7a8] sm:$0xf0]  ;;  %v16584_v60 = vld [vmem:[#allocation9 + $0x39c] sm:$0xf] }
 0x3c9   : > { %v14242_v7 = vor.u32 %v16710_v54, %v14239_v57 }
 0x3ca   : > { %7330 = vmatpush.bf16.msra.mxu0 %v13294_v38  ;;  %v18006_v25 = vpop.f32.mrf.mxu0  ;;  %7250 = vmatpush.bf16.msra.mxu2 %v13862_v20  ;;  %v13830_v38 = vor.u32 %v16611_v24, %v13829_v45  ;;  %v14207_v20 = vld [vmem:[#allocation9 + $0x768] sm:$0xf0]  ;;  %v13959_v45 = vld [vmem:[#allocation9 + $0x570] sm:$0xf0]  ;;  %v13298_v24 = vor.u32 %v16472_v16, %v13295_v19 }
 0x3cb   : > { %v14210_v0 = vor.u32 %v16702_v28, %v14207_v20  ;;  %v13962_v33 = vor.u32 %v16639_v59, %v13959_v45  ;;  %v7125_v31 = vadd.f32 %v18006_v25, %v6997_v62  ;;  %v16678_v25 = vld [vmem:[#allocation9 + $0x68c] sm:$0xf]  ;;  %v16599_v19 = vld [vmem:[#allocation9 + $0x414] sm:$0xf]  ;;  %v14277_v20 = vld [vmem:[#allocation9 + $0x7d0] sm:$0xf] }
 0x3cc   : > { %7159 = vmatpush.bf16.msra.mxu3 %v14110_v21  ;;  %7341 = vmatpush.bf16.msra.mxu1 %v13614_v26  ;;  %v7087_v21 = vpop.f32.mrf.mxu1  ;;  %v16576_v26 = vld [vmem:[#allocation9 + $0x35c] sm:$0xf]  ;;  %v14047_v16 = vld [vmem:[#allocation9 + $0x628] sm:$0xf0]  ;;  %v16660_v59 = vld [vmem:[#allocation9 + $0x5f4] sm:$0xf0] }
 0x3cd   : > { %7331 = vmatmul.bf16.vlgmr.msra.gmra.mxu0 %v17906_v14  ;;  %v16723_v21 = vld [vmem:[#allocation9 + $0x7ec] sm:$0xf0]  ;;  %v16536_v45 = vld [vmem:[#allocation9 + $0x21c] sm:$0xf] }
 0x3ce   : > { %7375 = vmatpush.bf16.msrb.mxu0 %v13522_v32  ;;  %v16666_v32 = vld [vmem:[#allocation9 + $0x624] sm:$0xf0]  ;;  %7251 = vmatpush.bf16.msra.mxu2 %v13830_v38  ;;  %v13714_v38 = vor.u32 %v16576_v26, %v13711_v27  ;;  %v14278_v62 = vor.u32 %v16723_v21, %v14277_v20  ;;  %v16764_v21 = vld [vmem:[#allocation12 + $0x134] sm:$0xf0] }
 0x3cf   : > { %v14046_v49 = vor.u32 %v16666_v32, %v14045_v39  ;;  %v16631_v39 = vld [vmem:[#allocation9 + $0x514] sm:$0xf]  ;;  %v13679_v32 = vld [vmem:[#allocation9 + $0x338] sm:$0xf0] }
 0x3d0   : > { %7160 = vmatpush.bf16.msra.mxu3 %v14078_v40  ;;  %7342 = vmatpush.bf16.msra.mxu1 %v13582_v30  ;;  %v13927_v40 = vld [vmem:[#allocation9 + $0x530] sm:$0xf0] }
 0x3d1   : > { %v13930_v30 = vor.u32 %v16631_v39, %v13927_v40  ;;  %v13997_v39 = vld [vmem:[#allocation9 + $0x598] sm:$0xf] }
 0x3d2   : > { %7376 = vmatpush.bf16.msrb.mxu0 %v13490_v12  ;;  %v16540_v12 = vld [vmem:[#allocation9 + $0x234] sm:$0xf0]  ;;  %v7126_v46 = vpop.f32.mrf.mxu0  ;;  %7252 = vmatpush.bf16.msra.mxu2 %v13798_v36  ;;  %v13647_v36 = vld [vmem:[#allocation9 + $0x2f8] sm:$0xf0] }
 0x3d3   : > { %v13550_v15 = vor.u32 %v16540_v12, %v13549_v42  ;;  %v14146_v42 = vor.u32 %v16686_v10, %v14143_v44  ;;  %v13898_v12 = vor.u32 %v16623_v2, %v13895_v29  ;;  %v16552_v46 = vld [vmem:[#allocation9 + $0x29c] sm:$0xf]  ;;  %v16652_v40 = vld [vmem:[#allocation9 + $0x5b4] sm:$0xf0]  ;;  %v14181_v2 = vld [vmem:[#allocation9 + $0x710] sm:$0xf] }
 0x3d4   : > { %7161 = vmatpush.bf16.msra.mxu3 %v14046_v49  ;;  %v7137_v48 = vpop.f32.mrf.mxu1  ;;  %v14111_v49 = vld [vmem:[#allocation9 + $0x6a8] sm:$0xf0]  ;;  %v16644_v10 = vld [vmem:[#allocation9 + $0x574] sm:$0xf0]  ;;  %v16699_v29 = vld [vmem:[#allocation9 + $0x72c] sm:$0xf0] }
 0x3d5   : > { %7343 = vmatpush.bf16.msra.mxu1 %v13550_v15  ;;  %7253 = vmatmul.bf16.vlgmr.msra.gmra.mxu2 %v17956_v8  ;;  %v18018_v52 = vadd.f32 %v7137_v48, %v7125_v31  ;;  %v14079_v15 = vld [vmem:[#allocation9 + $0x668] sm:$0xf0]  ;;  %v16707_v31 = vld [vmem:[#allocation9 + $0x76c] sm:$0xf0]  ;;  %v6998_v48 = vperm.slane %v17980_v1, 3 }
 0x3d6   : > { %7377 = vmatpush.bf16.msrb.mxu0 %v13458_v58  ;;  %v13778_v58 = vor.u32 %v16592_v61, %v13775_v5  ;;  %7297 = vmatpush.bf16.msrb.mxu2 %v14026_v47  ;;  %v16615_v61 = vld [vmem:[#allocation9 + $0x494] sm:$0xf] }
 0x3d7   : > { %7162 = vmatmul.bf16.vlgmr.msra.gmra.mxu3 %v17978_v34  ;;  %v13863_v5 = vld [vmem:[#allocation9 + $0x4b0] sm:$0xf0] }
 0x3d8   : > { %7206 = vmatpush.bf16.msrb.mxu3 %v14274_v6  ;;  %7344 = vmatmul.bf16.vlgmr.msra.gmra.mxu1 %v17922_v37  ;;  %v14114_v6 = vor.u32 %v16678_v25, %v14111_v49  ;;  %v13866_v11 = vor.u32 %v16615_v61, %v13863_v5  ;;  %v14149_v49 = vld [vmem:[#allocation9 + $0x6d0] sm:$0xf]  ;;  %v16628_v5 = vld [vmem:[#allocation9 + $0x4f4] sm:$0xf0] }
 0x3d9   : > { %7388 = vmatpush.bf16.msrb.mxu1 %v13778_v58  ;;  %v16607_v58 = vld [vmem:[#allocation9 + $0x454] sm:$0xf] }
 0x3da   : > { %7378 = vmatpush.bf16.msrb.mxu0 %v13426_v22  ;;  %v13746_v22 = vor.u32 %v16584_v60, %v13743_v51  ;;  %7298 = vmatpush.bf16.msrb.mxu2 %v13994_v17  ;;  %v14082_v60 = vor.u32 %v16670_v56, %v14079_v15  ;;  %v16662_v51 = vld [vmem:[#allocation9 + $0x60c] sm:$0xf]  ;;  %v13799_v17 = vld [vmem:[#allocation9 + $0x430] sm:$0xf0]  ;;  %v14117_v56 = vld [vmem:[#allocation9 + $0x690] sm:$0xf] }
 0x3db   : > { %v14050_v26 = vor.u32 %v16662_v51, %v14047_v16  ;;  %v16683_v15 = vld [vmem:[#allocation9 + $0x6ac] sm:$0xf0] }
 0x3dc   : > { %7207 = vmatpush.bf16.msrb.mxu3 %v14242_v7  ;;  %v7139_v54 = vpop.f32.mrf.mxu1  ;;  %v13834_v7 = vor.u32 %v16607_v58, %v13831_v63  ;;  %v14461_v58 = vld [vmem:[#allocation12 + $0x150] sm:$0xf]  ;;  %v16770_v63 = vld [vmem:[#allocation12 + $0x164] sm:$0xf0] }
 0x3dd   : > { %7389 = vmatpush.bf16.msrb.mxu1 %v13746_v22  ;;  %v14029_v22 = vld [vmem:[#allocation9 + $0x5d8] sm:$0xf]  ;;  %v16675_v51 = vld [vmem:[#allocation9 + $0x66c] sm:$0xf0] }
 0x3de   : > { %7379 = vmatpush.bf16.msrb.mxu0 %v13394_v41  ;;  %v16568_v41 = vld [vmem:[#allocation9 + $0x31c] sm:$0xf]  ;;  %7299 = vmatpush.bf16.msrb.mxu2 %v13962_v33  ;;  %v14030_v33 = vor.u32 %v16660_v59, %v14029_v22  ;;  %v13869_v54 = vld [vmem:[#allocation9 + $0x498] sm:$0xf] }
 0x3df   : > { %v13682_v50 = vor.u32 %v16568_v41, %v13679_v32  ;;  %v13998_v32 = vor.u32 %v16652_v40, %v13997_v39  ;;  %v14413_v39 = vld [vmem:[#allocation12 + $0xf0] sm:$0xf]  ;;  %v16758_v40 = vld [vmem:[#allocation12 + $0x104] sm:$0xf0] }
 0x3e0   : > { %7208 = vmatpush.bf16.msrb.mxu3 %v14210_v0  ;;  %v13802_v0 = vor.u32 %v16599_v19, %v13799_v17  ;;  %v13837_v19 = vld [vmem:[#allocation9 + $0x458] sm:$0xf] }
 0x3e1   : > { %7390 = vmatpush.bf16.msrb.mxu1 %v13714_v38  ;;  %v16715_v38 = vld [vmem:[#allocation9 + $0x7ac] sm:$0xf0]  ;;  %v16612_v17 = vld [vmem:[#allocation9 + $0x474] sm:$0xf0] }
 0x3e2   : > { %7380 = vmatpush.bf16.msrb.mxu0 %v13362_v4  ;;  %7300 = vmatpush.bf16.msrb.mxu2 %v13930_v30  ;;  %v13650_v4 = vor.u32 %v16560_v55, %v13647_v36  ;;  %v14246_v41 = vor.u32 %v16715_v38, %v14245_v35  ;;  %v13965_v30 = vld [vmem:[#allocation9 + $0x558] sm:$0xf]  ;;  %v13838_v59 = vor.u32 %v16612_v17, %v13837_v19  ;;  %v14031_v35 = vld [vmem:[#allocation9 + $0x5f8] sm:$0xf0]  ;;  %v16812_v17 = vld [vmem:[#allocation12 + $0x2b4] sm:$0xf0] }
 0x3e3   : > { %v13933_v55 = vld [vmem:[#allocation9 + $0x518] sm:$0xf] }
 0x3e4   : > { %7209 = vmatpush.bf16.msrb.mxu3 %v14178_v43  ;;  %v14213_v43 = vld [vmem:[#allocation9 + $0x750] sm:$0xf]  ;;  %v16636_v36 = vld [vmem:[#allocation9 + $0x534] sm:$0xf0] }
 0x3e5   : > { %7391 = vmatpush.bf16.msrb.mxu1 %v13682_v50  ;;  %v14214_v44 = vor.u32 %v16707_v31, %v14213_v43  ;;  %v13966_v50 = vor.u32 %v16644_v10, %v13965_v30  ;;  %v13934_v25 = vor.u32 %v16636_v36, %v13933_v55  ;;  %v14414_v31 = vor.u32 %v16758_v40, %v14413_v39  ;;  %v16711_v10 = vld [vmem:[#allocation9 + $0x794] sm:$0xf]  ;;  %v16806_v39 = vld [vmem:[#allocation12 + $0x284] sm:$0xf0] }
 0x3e6   : > { %7381 = vmatpush.bf16.msrb.mxu0 %v13330_v18  ;;  %7301 = vmatpush.bf16.msrb.mxu2 %v13898_v12  ;;  %v13583_v18 = vld [vmem:[#allocation9 + $0x278] sm:$0xf0] }
 0x3e7   : > { %v13586_v28 = vor.u32 %v16544_v9, %v13583_v18 }
 0x3e8   : > { %7210 = vmatpush.bf16.msrb.mxu3 %v14146_v42  ;;  %v14182_v42 = vor.u32 %v16699_v29, %v14181_v2  ;;  %v14389_v2 = vld [vmem:[#allocation12 + $0xc0] sm:$0xf]  ;;  %v16752_v29 = vld [vmem:[#allocation12 + $0xd4] sm:$0xf0] }
 0x3e9   : > { %7392 = vmatpush.bf16.msrb.mxu1 %v13650_v4  ;;  %v16691_v4 = vld [vmem:[#allocation9 + $0x6ec] sm:$0xf0]  ;;  %v14390_v55 = vor.u32 %v16752_v29, %v14389_v2  ;;  %v16800_v2 = vld [vmem:[#allocation12 + $0x254] sm:$0xf0] }
 0x3ea   : > { %7382 = vmatpush.bf16.msrb.mxu0 %v13298_v24  ;;  %v18020_v47 = vpop.f32.mrf.mxu0  ;;  %7302 = vmatpush.bf16.msrb.mxu2 %v13866_v11  ;;  %v13551_v24 = vld [vmem:[#allocation9 + $0x238] sm:$0xf0] }
 0x3eb   : > { %v13554_v3 = vor.u32 %v16536_v45, %v13551_v24  ;;  %v7177_v12 = vadd.f32 %v18020_v47, %v6998_v48  ;;  %v14118_v47 = vor.u32 %v16683_v15, %v14117_v56  ;;  %v14053_v45 = vld [vmem:[#allocation9 + $0x610] sm:$0xf]  ;;  %v16648_v48 = vld [vmem:[#allocation9 + $0x59c] sm:$0xf] }
 0x3ec   : > { %7211 = vmatpush.bf16.msrb.mxu3 %v14114_v6  ;;  %v18029_v6 = vpop.f32.mrf.mxu2  ;;  %v16667_v24 = vld [vmem:[#allocation9 + $0x62c] sm:$0xf0] }
 0x3ed   : > { %7383 = vmatmul.bf16.vlgmr.msrb.gmra.mxu0 %v17906_v14  ;;  %v13615_v14 = vld [vmem:[#allocation9 + $0x2b8] sm:$0xf0]  ;;  %v14054_v38 = vor.u32 %v16667_v24, %v14053_v45  ;;  %v16818_v56 = vld [vmem:[#allocation12 + $0x2e4] sm:$0xf0]  ;;  %v14151_v24 = vld [vmem:[#allocation9 + $0x6f0] sm:$0xf0] }
 0x3ee   : > { %v13618_v57 = vor.u32 %v16552_v46, %v13615_v14  ;;  %7303 = vmatpush.bf16.msrb.mxu2 %v13834_v7  ;;  %v14150_v14 = vor.u32 %v16691_v4, %v14149_v49  ;;  %v14462_v7 = vor.u32 %v16770_v63, %v14461_v58  ;;  %v14365_v4 = vld [vmem:[#allocation12 + $0x90] sm:$0xf]  ;;  %v14183_v58 = vld [vmem:[#allocation9 + $0x730] sm:$0xf0] }
 0x3f0   : > { %7393 = vmatpush.bf16.msrb.mxu1 %v13618_v57  ;;  %7212 = vmatpush.bf16.msrb.mxu3 %v14082_v60  ;;  %v7189_v61 = vpop.f32.mrf.mxu1  ;;  %v16620_v57 = vld [vmem:[#allocation9 + $0x4b4] sm:$0xf0]  ;;  %v14085_v60 = vld [vmem:[#allocation9 + $0x650] sm:$0xf] }
 0x3f1   : > { %v18027_v46 = vadd.f32 %v7189_v61, %v7177_v12  ;;  %v13870_v18 = vor.u32 %v16620_v57, %v13869_v54  ;;  %9761 = vmatpush.bf16.msra.mxu0 %v14462_v7  ;;  %v14086_v20 = vor.u32 %v16675_v51, %v14085_v60  ;;  %v16703_v12 = vld [vmem:[#allocation9 + $0x754] sm:$0xf]  ;;  %v16746_v61 = vld [vmem:[#allocation12 + $0xa4] sm:$0xf0]  ;;  %v6999_v54 = vperm.slane %v17980_v1, 4 }
 0x3f2   : > { %v7178_v27 = vpop.f32.mrf.mxu0  ;;  %7304 = vmatpush.bf16.msrb.mxu2 %v13802_v0  ;;  %v16604_v0 = vld [vmem:[#allocation9 + $0x434] sm:$0xf0]  ;;  %v16740_v60 = vld [vmem:[#allocation12 + $0x74] sm:$0xf0]  ;;  %v14629_v51 = vld [vmem:[#allocation12 + $0x2a0] sm:$0xf] }
 0x3f3   : > { %v16632_v7 = vld [vmem:[#allocation9 + $0x51c] sm:$0xf] }
 0x3f4   : > { %7394 = vmatpush.bf16.msrb.mxu1 %v13586_v28  ;;  %7213 = vmatpush.bf16.msrb.mxu3 %v14050_v26  ;;  %v14437_v28 = vld [vmem:[#allocation12 + $0x120] sm:$0xf]  ;;  %v7048_v22 = vpop.f32.mrf.mxu2  ;;  %v13805_v26 = vld [vmem:[#allocation9 + $0x418] sm:$0xf] }
 0x3f5   : > { %7305 = vmatmul.bf16.vlgmr.msrb.gmra.mxu2 %v17956_v8  ;;  %v14438_v27 = vor.u32 %v16764_v21, %v14437_v28  ;;  %v14630_v28 = vor.u32 %v16812_v17, %v14629_v51  ;;  %v16687_v22 = vld [vmem:[#allocation9 + $0x6d4] sm:$0xf]  ;;  %v14533_v51 = vld [vmem:[#allocation12 + $0x1e0] sm:$0xf] }
 0x3f6   : > { %7349 = vmatpush.bf16.msra.mxu2 %v14030_v33  ;;  %v14279_v33 = vld [vmem:[#allocation9 + $0x7f0] sm:$0xf0]  ;;  %v14154_v40 = vor.u32 %v16687_v22, %v14151_v24  ;;  %v16716_v24 = vld [vmem:[#allocation9 + $0x7b4] sm:$0xf0] }
 0x3f7   : > { %7214 = vmatmul.bf16.vlgmr.msrb.gmra.mxu3 %v17978_v34  ;;  %9762 = vmatpush.bf16.msra.mxu0 %v14438_v27  ;;  %v13903_v27 = vld [vmem:[#allocation9 + $0x4f8] sm:$0xf0] }
 0x3f8   : > { %7258 = vmatpush.bf16.msra.mxu3 %v14278_v62  ;;  %7395 = vmatpush.bf16.msrb.mxu1 %v13554_v3  ;;  %v7191_v16 = vpop.f32.mrf.mxu1  ;;  %v16719_v62 = vld [vmem:[#allocation9 + $0x7d4] sm:$0xf]  ;;  %v16656_v3 = vld [vmem:[#allocation9 + $0x5dc] sm:$0xf] }
 0x3f9   : > { %v14282_v43 = vor.u32 %v16719_v62, %v14279_v33  ;;  %v14034_v30 = vor.u32 %v16656_v3, %v14031_v35  ;;  %v13935_v16 = vld [vmem:[#allocation9 + $0x538] sm:$0xf0]  ;;  %v14317_v62 = vld [vmem:[#allocation12 + $0x30] sm:$0xf]  ;;  %v16734_v33 = vld [vmem:[#allocation12 + $0x44] sm:$0xf0] }
 0x3fa   : > { %7350 = vmatpush.bf16.msra.mxu2 %v13998_v32  ;;  %v13806_v32 = vor.u32 %v16604_v0, %v13805_v26  ;;  %v13938_v45 = vor.u32 %v16632_v7, %v13935_v16  ;;  %v16624_v26 = vld [vmem:[#allocation9 + $0x4dc] sm:$0xf]  ;;  %v14605_v3 = vld [vmem:[#allocation12 + $0x270] sm:$0xf]  ;;  %v16788_v7 = vld [vmem:[#allocation12 + $0x1f4] sm:$0xf0] }
 0x3fb   : > { %7396 = vmatmul.bf16.vlgmr.msrb.gmra.mxu1 %v17922_v37  ;;  %v13901_v37 = vld [vmem:[#allocation9 + $0x4d8] sm:$0xf]  ;;  %9763 = vmatpush.bf16.msra.mxu0 %v14414_v31  ;;  %v16616_v31 = vld [vmem:[#allocation9 + $0x49c] sm:$0xf]  ;;  %v14534_v17 = vor.u32 %v16788_v7, %v14533_v51 }
 0x3fc   : > { %7259 = vmatpush.bf16.msra.mxu3 %v14246_v41  ;;  %v13902_v11 = vor.u32 %v16628_v5, %v13901_v37  ;;  %v18033_v36 = vpop.f32.mrf.mxu2  ;;  %v14653_v37 = vld [vmem:[#allocation12 + $0x2d0] sm:$0xf]  ;;  %v16640_v5 = vld [vmem:[#allocation9 + $0x55c] sm:$0xf] }
 0x3fd   : > { %v14654_v15 = vor.u32 %v16818_v56, %v14653_v37  ;;  %v14845_v16 = vld [vmem:[#allocation12 + $0x450] sm:$0xf] }
 0x3fe   : > { %7351 = vmatpush.bf16.msra.mxu2 %v13966_v50  ;;  %v13999_v50 = vld [vmem:[#allocation9 + $0x5b8] sm:$0xf0] }
 0x3ff   : > { %v14002_v49 = vor.u32 %v16648_v48, %v13999_v50  ;;  %9764 = vmatpush.bf16.msra.mxu0 %v14390_v55  ;;  %9774 = vmatpush.bf16.msra.mxu1 %v14654_v15  ;;  %v14581_v48 = vld [vmem:[#allocation12 + $0x240] sm:$0xf] }
 0x400   : > { %7260 = vmatpush.bf16.msra.mxu3 %v14214_v44  ;;  %v14247_v44 = vld [vmem:[#allocation9 + $0x7b0] sm:$0xf0] }
 0x402   : > { %7352 = vmatpush.bf16.msra.mxu2 %v13934_v25  ;;  %v14215_v25 = vld [vmem:[#allocation9 + $0x770] sm:$0xf0] }
 0x403   : > { %v14218_v57 = vor.u32 %v16703_v12, %v14215_v25  ;;  %9775 = vmatpush.bf16.msra.mxu1 %v14630_v28  ;;  %v16671_v25 = vld [vmem:[#allocation9 + $0x654] sm:$0xf] }
 0x404   : > { %7261 = vmatpush.bf16.msra.mxu3 %v14182_v42  ;;  %v14250_v42 = vor.u32 %v16711_v10, %v14247_v44  ;;  %v14293_v10 = vld [vmem:[#allocation12] sm:$0xf]  ;;  %v16728_v44 = vld [vmem:[#allocation12 + $0x14] sm:$0xf0] }
 0x405   : > { %v14294_v50 = vor.u32 %v16728_v44, %v14293_v10  ;;  %v14189_v44 = vld [vmem:[#allocation9 + $0x718] sm:$0xf] }
 0x406   : > { %7353 = vmatpush.bf16.msra.mxu2 %v13902_v11  ;;  %v14366_v11 = vor.u32 %v16746_v61, %v14365_v4  ;;  %v16608_v4 = vld [vmem:[#allocation9 + $0x45c] sm:$0xf] }
 0x408   : > { %7262 = vmatpush.bf16.msra.mxu3 %v14150_v14  ;;  %v13967_v14 = vld [vmem:[#allocation9 + $0x578] sm:$0xf0]  ;;  %9765 = vmatpush.bf16.msra.mxu0 %v14366_v11  ;;  %v16794_v11 = vld [vmem:[#allocation12 + $0x224] sm:$0xf0] }
 0x409   : > { %v13970_v63 = vor.u32 %v16640_v5, %v13967_v14  ;;  %v13839_v5 = vld [vmem:[#allocation9 + $0x478] sm:$0xf0]  ;;  %v14557_v14 = vld [vmem:[#allocation12 + $0x210] sm:$0xf] }
 0x40a   : > { %v18031_v9 = vpop.f32.mrf.mxu0  ;;  %7354 = vmatpush.bf16.msra.mxu2 %v13870_v18  ;;  %v14341_v18 = vld [vmem:[#allocation12 + $0x60] sm:$0xf]  ;;  %v14558_v56 = vor.u32 %v16794_v11, %v14557_v14 }
 0x40b   : > { %v14342_v19 = vor.u32 %v16740_v60, %v14341_v18  ;;  %v14285_v18 = vld [vmem:[#allocation9 + $0x7d8] sm:$0xf] }
 0x40c   : > { %7263 = vmatpush.bf16.msra.mxu3 %v14118_v47  ;;  %v16695_v47 = vld [vmem:[#allocation9 + $0x714] sm:$0xf]  ;;  %v16724_v60 = vld [vmem:[#allocation9 + $0x7f4] sm:$0xf0] }
 0x40d   : > { %v14186_v21 = vor.u32 %v16695_v47, %v14183_v58  ;;  %9766 = vmatpush.bf16.msra.mxu0 %v14342_v19  ;;  %v13842_v47 = vor.u32 %v16608_v4, %v13839_v5  ;;  %v16600_v58 = vld [vmem:[#allocation9 + $0x41c] sm:$0xf]  ;;  %v16866_v19 = vld [vmem:[#allocation12 + $0x464] sm:$0xf0]  ;;  %v14286_v22 = vor.u32 %v16724_v60, %v14285_v18 }
 0x40e   : > { %7355 = vmatpush.bf16.msra.mxu2 %v13838_v59  ;;  %v7229_v59 = vadd.f32 %v18031_v9, %v6999_v54  ;;  %v13906_v9 = vor.u32 %v16624_v26, %v13903_v27  ;;  %v16663_v54 = vld [vmem:[#allocation9 + $0x614] sm:$0xf]  ;;  %v14846_v26 = vor.u32 %v16866_v19, %v14845_v16  ;;  %v14509_v27 = vld [vmem:[#allocation12 + $0x1b0] sm:$0xf]  ;;  %v16842_v5 = vld [vmem:[#allocation12 + $0x3a4] sm:$0xf0] }
 0x40f   : > { %v14093_v16 = vld [vmem:[#allocation9 + $0x658] sm:$0xf] }
 0x410   : > { %7264 = vmatpush.bf16.msra.mxu3 %v14086_v20  ;;  %v7100_v20 = vpop.f32.mrf.mxu2  ;;  %v16676_v19 = vld [vmem:[#allocation9 + $0x674] sm:$0xf0] }
 0x412   : > { %v7230_v41 = vpop.f32.mrf.mxu0  ;;  %7356 = vmatpush.bf16.msra.mxu2 %v13806_v32  ;;  %v14606_v32 = vor.u32 %v16806_v39, %v14605_v3  ;;  %v14221_v39 = vld [vmem:[#allocation9 + $0x758] sm:$0xf] }
 0x413   : > { %v16679_v41 = vld [vmem:[#allocation9 + $0x694] sm:$0xf] }
 0x414   : > { %7265 = vmatpush.bf16.msra.mxu3 %v14054_v38  ;;  %v7241_v0 = vpop.f32.mrf.mxu1  ;;  %v14318_v38 = vor.u32 %v16734_v33, %v14317_v62  ;;  %9776 = vmatpush.bf16.msra.mxu1 %v14606_v32  ;;  %v14821_v62 = vld [vmem:[#allocation12 + $0x420] sm:$0xf]  ;;  %v16860_v33 = vld [vmem:[#allocation12 + $0x434] sm:$0xf0] }
 0x415   : > { %7357 = vmatmul.bf16.vlgmr.msra.gmra.mxu2 %v17956_v8  ;;  %v18039_v35 = vadd.f32 %v7241_v0, %v7229_v59  ;;  %v14253_v59 = vld [vmem:[#allocation9 + $0x798] sm:$0xf]  ;;  %v16782_v0 = vld [vmem:[#allocation12 + $0x1c4] sm:$0xf0]  ;;  %v14485_v32 = vld [vmem:[#allocation12 + $0x180] sm:$0xf] }
 0x416   : > { %7401 = vmatpush.bf16.msrb.mxu2 %v14034_v30  ;;  %v13871_v30 = vld [vmem:[#allocation9 + $0x4b8] sm:$0xf0]  ;;  %9767 = vmatpush.bf16.msra.mxu0 %v14318_v38  ;;  %v14510_v3 = vor.u32 %v16782_v0, %v14509_v27  ;;  %v14254_v38 = vor.u32 %v16716_v24, %v14253_v59  ;;  %v14094_v59 = vor.u32 %v16676_v19, %v14093_v16  ;;  %v14061_v24 = vld [vmem:[#allocation9 + $0x618] sm:$0xf]  ;;  %v16932_v16 = vld [vmem:[#allocation12 + $0x674] sm:$0xf0] }
 0x417   : > { %7266 = vmatmul.bf16.vlgmr.msra.gmra.mxu3 %v17978_v34  ;;  %v13874_v12 = vor.u32 %v16616_v31, %v13871_v30  ;;  %v16854_v31 = vld [vmem:[#allocation12 + $0x404] sm:$0xf0] }
 0x418   : > { %7310 = vmatpush.bf16.msrb.mxu3 %v14282_v43  ;;  %v14119_v43 = vld [vmem:[#allocation9 + $0x6b0] sm:$0xf0]  ;;  %v18041_v29 = vpop.f32.mrf.mxu2 }
 0x419   : > { %v14122_v55 = vor.u32 %v16679_v41, %v14119_v43  ;;  %v14822_v41 = vor.u32 %v16860_v33, %v14821_v62  ;;  %v14797_v43 = vld [vmem:[#allocation12 + $0x3f0] sm:$0xf]  ;;  %v14287_v33 = vld [vmem:[#allocation9 + $0x7f8] sm:$0xf0] }
 0x41a   : > { %7402 = vmatpush.bf16.msrb.mxu2 %v14002_v49  ;;  %v14087_v49 = vld [vmem:[#allocation9 + $0x670] sm:$0xf0]  ;;  %9768 = vmatpush.bf16.msra.mxu0 %v14294_v50  ;;  %v14798_v50 = vor.u32 %v16854_v31, %v14797_v43 }
 0x41b   : > { %v14090_v15 = vor.u32 %v16671_v25, %v14087_v49  ;;  %v14157_v25 = vld [vmem:[#allocation9 + $0x6d8] sm:$0xf] }
 0x41c   : > { %7311 = vmatpush.bf16.msrb.mxu3 %v14250_v42  ;;  %v14582_v42 = vor.u32 %v16800_v2, %v14581_v48  ;;  %v7243_v37 = vpop.f32.mrf.mxu1  ;;  %v16700_v48 = vld [vmem:[#allocation9 + $0x734] sm:$0xf0]  ;;  %v14773_v2 = vld [vmem:[#allocation12 + $0x3c0] sm:$0xf] }
 0x41d   : > { %v16692_v49 = vld [vmem:[#allocation9 + $0x6f4] sm:$0xf0] }
 0x41e   : > { %7403 = vmatpush.bf16.msrb.mxu2 %v13970_v63  ;;  %9777 = vmatpush.bf16.msra.mxu1 %v14582_v42  ;;  %v13807_v63 = vld [vmem:[#allocation9 + $0x438] sm:$0xf0]  ;;  %v7000_v42 = vperm.slane %v17980_v1, 5  ;;  %v14749_v37 = vld [vmem:[#allocation12 + $0x390] sm:$0xf]  ;;  %v14158_v11 = vor.u32 %v16692_v49, %v14157_v25 }
 0x41f   : > { %v16684_v1 = vld [vmem:[#allocation9 + $0x6b4] sm:$0xf0]  ;;  %v14223_v49 = vld [vmem:[#allocation9 + $0x778] sm:$0xf0] }
 0x420   : > { %7312 = vmatpush.bf16.msrb.mxu3 %v14218_v57  ;;  %v14055_v57 = vld [vmem:[#allocation9 + $0x630] sm:$0xf0]  ;;  %v7152_v28 = vpop.f32.mrf.mxu2 }
 0x421   : > { %v14058_v20 = vor.u32 %v16663_v54, %v14055_v57  ;;  %v14125_v54 = vld [vmem:[#allocation9 + $0x698] sm:$0xf]  ;;  %v14750_v57 = vor.u32 %v16842_v5, %v14749_v37  ;;  %v16830_v28 = vld [vmem:[#allocation12 + $0x344] sm:$0xf0]  ;;  %v16944_v37 = vld [vmem:[#allocation12 + $0x6d4] sm:$0xf0] }
 0x422   : > { %7404 = vmatpush.bf16.msrb.mxu2 %v13938_v45  ;;  %9778 = vmatpush.bf16.msra.mxu1 %v14558_v56  ;;  %v7047_v56 = vadd.f32 %v18029_v6, %v18002_v53  ;;  %v14126_v51 = vor.u32 %v16684_v1, %v14125_v54  ;;  %v14191_v54 = vld [vmem:[#allocation9 + $0x738] sm:$0xf0]  ;;  %v15133_v1 = vld [vmem:[#allocation12 + $0x690] sm:$0xf] }
 0x424   : > { %7313 = vmatpush.bf16.msrb.mxu3 %v14186_v21  ;;  %v13810_v21 = vor.u32 %v16600_v58, %v13807_v63  ;;  %v14725_v58 = vld [vmem:[#allocation12 + $0x360] sm:$0xf]  ;;  %v16836_v63 = vld [vmem:[#allocation12 + $0x374] sm:$0xf0] }
 0x425   : > { %v14726_v53 = vor.u32 %v16836_v63, %v14725_v58 }
 0x426   : > { %7405 = vmatpush.bf16.msrb.mxu2 %v13906_v9  ;;  %9779 = vmatpush.bf16.msra.mxu1 %v14534_v17  ;;  %v16776_v9 = vld [vmem:[#allocation12 + $0x194] sm:$0xf0]  ;;  %v14701_v17 = vld [vmem:[#allocation12 + $0x330] sm:$0xf] }
 0x427   : > { %v14486_v30 = vor.u32 %v16776_v9, %v14485_v32  ;;  %v14702_v27 = vor.u32 %v16830_v28, %v14701_v17  ;;  %v16956_v32 = vld [vmem:[#allocation12 + $0x734] sm:$0xf0] }
 0x428   : > { %7314 = vmatpush.bf16.msrb.mxu3 %v14154_v40  ;;  %v16708_v40 = vld [vmem:[#allocation9 + $0x774] sm:$0xf0] }
 0x429   : > { %v14222_v10 = vor.u32 %v16708_v40, %v14221_v39  ;;  %v15205_v39 = vld [vmem:[#allocation12 + $0x720] sm:$0xf] }
 0x42a   : > { %v18043_v61 = vpop.f32.mrf.mxu0  ;;  %7406 = vmatpush.bf16.msrb.mxu2 %v13874_v12  ;;  %9780 = vmatpush.bf16.msra.mxu1 %v14510_v3  ;;  %v14190_v12 = vor.u32 %v16700_v48, %v14189_v44  ;;  %v14677_v3 = vld [vmem:[#allocation12 + $0x300] sm:$0xf]  ;;  %v15206_v31 = vor.u32 %v16956_v32, %v15205_v39  ;;  %v14255_v44 = vld [vmem:[#allocation9 + $0x7b8] sm:$0xf0]  ;;  %v15181_v48 = vld [vmem:[#allocation12 + $0x6f0] sm:$0xf] }
 0x42b   : > { %v16920_v39 = vld [vmem:[#allocation12 + $0x614] sm:$0xf0]  ;;  %v15421_v32 = vld [vmem:[#allocation12 + $0x8d0] sm:$0xf] }
 0x42c   : > { %7315 = vmatpush.bf16.msrb.mxu3 %v14122_v55  ;;  %v16848_v55 = vld [vmem:[#allocation12 + $0x3d4] sm:$0xf0] }
 0x42d   : > { %v14774_v4 = vor.u32 %v16848_v55, %v14773_v2  ;;  %v7099_v55 = vadd.f32 %v18033_v36, %v18010_v13  ;;  %v16938_v13 = vld [vmem:[#allocation12 + $0x6a4] sm:$0xf0] }
 0x42e   : > { %7407 = vmatpush.bf16.msrb.mxu2 %v13842_v47  ;;  %9781 = vmatpush.bf16.msra.mxu1 %v14486_v30 }
 0x42f   : > { %v7059_v47 = vpop.f32.mrf.mxu3 }
 0x430   : > { %7316 = vmatpush.bf16.msrb.mxu3 %v14090_v15  ;;  %v7060_v18 = vadd.f32 %v7059_v47, %v7047_v56  ;;  %v16696_v56 = vld [vmem:[#allocation9 + $0x71c] sm:$0xf]  ;;  %v18066_v47 = vld [vmem:[#allocation10] sm:$0xff] }
 0x431   : > { %v7001_v58 = vperm.slane %v18066_v47, 6  ;;  %v14194_v63 = vor.u32 %v16696_v56, %v14191_v54  ;;  %v15013_v54 = vld [vmem:[#allocation12 + $0x5a0] sm:$0xf] }
 0x432   : > { %v7282_v45 = vpop.f32.mrf.mxu0  ;;  %7408 = vmatpush.bf16.msrb.mxu2 %v13810_v21  ;;  %v15229_v21 = vld [vmem:[#allocation12 + $0x750] sm:$0xf] }
 0x433   : > { %v16962_v45 = vld [vmem:[#allocation12 + $0x764] sm:$0xf0] }
 0x434   : > { %7317 = vmatpush.bf16.msrb.mxu3 %v14058_v20  ;;  %v7293_v14 = vpop.f32.mrf.mxu1  ;;  %v15230_v0 = vor.u32 %v16962_v45, %v15229_v21  ;;  %v16680_v21 = vld [vmem:[#allocation9 + $0x69c] sm:$0xf]  ;;  %v15085_v45 = vld [vmem:[#allocation12 + $0x630] sm:$0xf] }
 0x435   : > { %7409 = vmatmul.bf16.vlgmr.msrb.gmra.mxu2 %v17956_v8  ;;  %v7281_v8 = vadd.f32 %v18043_v61, %v7000_v42  ;;  %v7427_v61 = vmax.f32 %v7060_v18, 0.0 }
 0x436   : > { %9787 = vmatpush.bf16.msra.mxu2 %v14846_v26  ;;  %v16720_v26 = vld [vmem:[#allocation9 + $0x7dc] sm:$0xf]  ;;  %9813 = vmatpush.bf16.msrb.mxu0 %v15230_v0 }
 0x437   : > { %7318 = vmatmul.bf16.vlgmr.msrb.gmra.mxu3 %v17978_v34  ;;  %v18051_v15 = vadd.f32 %v7293_v14, %v7281_v8  ;;  %v18058_v20 = vpack.c.bf16 %v7427_v61, %v7427_v61  ;;  %v7061_v62 = vpop.f32.mrf.mxu3  ;;  %v14290_v9 = vor.u32 %v16720_v26, %v14287_v33  ;;  %v15109_v61 = vld [vmem:[#allocation12 + $0x660] sm:$0xf]  ;;  %v7151_v26 = vadd.f32 %v18041_v29, %v18018_v52  ;;  %v14095_v33 = vld [vmem:[#allocation9 + $0x678] sm:$0xf0] }
 0x438   : > { %7362 = vmatpush.bf16.msra.mxu3 %v14286_v22  ;;  %v7202_v60 = vpop.f32.mrf.mxu2  ;;  %v15110_v19 = vor.u32 %v16932_v16, %v15109_v61  ;;  %v16767_v52 = vld [vmem:[#allocation12 + $0x154] sm:$0xf]  ;;  %v16992_v61 = vld [vmem:[#allocation12 + $0x854] sm:$0xf0] }
 0x439   : > { %v18054_v7 = vadd.f32 %v7202_v60, %v18027_v46  ;;  %9769 = vmatmul.bf16.vlgmr.msra.gmra.mxu0 %v18058_v20  ;;  %v16668_v46 = vld [vmem:[#allocation9 + $0x634] sm:$0xf0]  ;;  %v16688_v60 = vld [vmem:[#allocation9 + $0x6dc] sm:$0xf] }
 0x43a   : > { %9788 = vmatpush.bf16.msra.mxu2 %v14822_v41  ;;  %v14062_v41 = vor.u32 %v16668_v46, %v14061_v24  ;;  %9814 = vmatpush.bf16.msrb.mxu0 %v15206_v31  ;;  %v16926_v24 = vld [vmem:[#allocation12 + $0x644] sm:$0xf0] }
 0x43b   : > { %v15086_v46 = vor.u32 %v16926_v24, %v15085_v45  ;;  %v17010_v31 = vld [vmem:[#allocation12 + $0x8e4] sm:$0xf0]  ;;  %v15325_v45 = vld [vmem:[#allocation12 + $0x810] sm:$0xf] }
 0x43c   : > { %7363 = vmatpush.bf16.msra.mxu3 %v14254_v38  ;;  %v7295_v22 = vpop.f32.mrf.mxu1  ;;  %v16824_v38 = vld [vmem:[#allocation12 + $0x314] sm:$0xf0]  ;;  %v16986_v24 = vld [vmem:[#allocation12 + $0x824] sm:$0xf0] }
 0x43d   : > { %v14678_v43 = vor.u32 %v16824_v38, %v14677_v3  ;;  %v14127_v22 = vld [vmem:[#allocation9 + $0x6b8] sm:$0xf0]  ;;  %v15061_v38 = vld [vmem:[#allocation12 + $0x600] sm:$0xf] }
 0x43e   : > { %9789 = vmatpush.bf16.msra.mxu2 %v14798_v50  ;;  %v16950_v50 = vld [vmem:[#allocation12 + $0x704] sm:$0xf0]  ;;  %v14130_v0 = vor.u32 %v16680_v21, %v14127_v22  ;;  %v14391_v21 = vld [vmem:[#allocation12 + $0xd8] sm:$0xf0] }
 0x43f   : > { %v15182_v2 = vor.u32 %v16950_v50, %v15181_v48  ;;  %v14463_v48 = vld [vmem:[#allocation12 + $0x168] sm:$0xf0] }
 0x440   : > { %7364 = vmatpush.bf16.msra.mxu3 %v14222_v10  ;;  %v7204_v40 = vpop.f32.mrf.mxu2  ;;  %v16712_v10 = vld [vmem:[#allocation9 + $0x79c] sm:$0xf]  ;;  %v7111_v25 = vpop.f32.mrf.mxu3 }
 0x441   : > { %v14258_v42 = vor.u32 %v16712_v10, %v14255_v44  ;;  %v7112_v5 = vadd.f32 %v7111_v25, %v7099_v55  ;;  %9815 = vmatpush.bf16.msrb.mxu0 %v15182_v2  ;;  %v14063_v10 = vld [vmem:[#allocation9 + $0x638] sm:$0xf0]  ;;  %v15422_v44 = vor.u32 %v17010_v31, %v15421_v32  ;;  %v15037_v2 = vld [vmem:[#allocation12 + $0x5d0] sm:$0xf]  ;;  %v16914_v55 = vld [vmem:[#allocation12 + $0x5e4] sm:$0xf0] }
 0x442   : > { %9790 = vmatpush.bf16.msra.mxu2 %v14774_v4  ;;  %v15157_v4 = vld [vmem:[#allocation12 + $0x6c0] sm:$0xf]  ;;  %v14941_v32 = vld [vmem:[#allocation12 + $0x510] sm:$0xf]  ;;  %v16737_v31 = vld [vmem:[#allocation12 + $0x64] sm:$0xf] }
 0x443   : > { %v15158_v8 = vor.u32 %v16944_v37, %v15157_v4  ;;  %v7428_v14 = vmax.f32 %v7112_v5, 0.0  ;;  %9826 = vmatpush.bf16.msrb.mxu1 %v15422_v44  ;;  %v17004_v4 = vld [vmem:[#allocation12 + $0x8b4] sm:$0xf0]  ;;  %v16761_v37 = vld [vmem:[#allocation12 + $0x124] sm:$0xf] }
 0x444   : > { %7365 = vmatpush.bf16.msra.mxu3 %v14190_v12  ;;  %v16704_v12 = vld [vmem:[#allocation9 + $0x75c] sm:$0xf]  ;;  %v14439_v5 = vld [vmem:[#allocation12 + $0x138] sm:$0xf0] }
 0x445   : > { %v18064_v36 = vpack.c.bf16 %v7428_v14, %v7428_v14  ;;  %9816 = vmatpush.bf16.msrb.mxu0 %v15158_v8  ;;  %v15038_v14 = vor.u32 %v16914_v55, %v15037_v2  ;;  %v14442_v56 = vor.u32 %v16761_v37, %v14439_v5  ;;  %v14917_v2 = vld [vmem:[#allocation12 + $0x4e0] sm:$0xf]  ;;  %v16884_v55 = vld [vmem:[#allocation12 + $0x4f4] sm:$0xf0] }
 0x446   : > { %9791 = vmatpush.bf16.msra.mxu2 %v14750_v57  ;;  %v15134_v57 = vor.u32 %v16938_v13, %v15133_v1  ;;  %v16908_v1 = vld [vmem:[#allocation12 + $0x5b4] sm:$0xf0]  ;;  %v14918_v37 = vor.u32 %v16884_v55, %v14917_v2  ;;  %v16791_v55 = vld [vmem:[#allocation12 + $0x214] sm:$0xf] }
 0x447   : > { %9782 = vmatmul.bf16.vlgmr.msra.gmra.mxu1 %v18064_v36  ;;  %v15014_v16 = vor.u32 %v16908_v1, %v15013_v54  ;;  %v16968_v54 = vld [vmem:[#allocation12 + $0x794] sm:$0xf0]  ;;  %v16725_v1 = vld [vmem:[#allocation12 + $0x4] sm:$0xf] }
 0x448   : > { %7366 = vmatpush.bf16.msra.mxu3 %v14158_v11  ;;  %v14226_v11 = vor.u32 %v16704_v12, %v14223_v49  ;;  %v7113_v18 = vpop.f32.mrf.mxu3  ;;  %v15397_v12 = vld [vmem:[#allocation12 + $0x8a0] sm:$0xf] }
 0x449   : > { %9817 = vmatpush.bf16.msrb.mxu0 %v15134_v57  ;;  %v15373_v57 = vld [vmem:[#allocation12 + $0x870] sm:$0xf] }
 0x44a   : > { %v18056_v6 = vpop.f32.mrf.mxu0  ;;  %9792 = vmatpush.bf16.msra.mxu2 %v14726_v53 }
 0x44b   : > { %v7333_v53 = vadd.f32 %v18056_v6, %v7001_v58  ;;  %v16672_v6 = vld [vmem:[#allocation9 + $0x65c] sm:$0xf]  ;;  %v16998_v58 = vld [vmem:[#allocation12 + $0x884] sm:$0xf0] }
 0x44c   : > { %7367 = vmatpush.bf16.msra.mxu3 %v14126_v51  ;;  %v14159_v51 = vld [vmem:[#allocation9 + $0x6f8] sm:$0xf0]  ;;  %v15374_v18 = vor.u32 %v16998_v58, %v15373_v57  ;;  %v14295_v57 = vld [vmem:[#allocation12 + $0x18] sm:$0xf0]  ;;  %v15613_v58 = vld [vmem:[#allocation12 + $0xa50] sm:$0xf] }
 0x44d   : > { %v14162_v17 = vor.u32 %v16688_v60, %v14159_v51  ;;  %9818 = vmatpush.bf16.msrb.mxu0 %v15110_v19  ;;  %v14415_v60 = vld [vmem:[#allocation12 + $0x108] sm:$0xf0]  ;;  %v15349_v51 = vld [vmem:[#allocation12 + $0x840] sm:$0xf]  ;;  %v14989_v19 = vld [vmem:[#allocation12 + $0x570] sm:$0xf] }
 0x44e   : > { %9793 = vmatpush.bf16.msra.mxu2 %v14702_v27  ;;  %v15350_v22 = vor.u32 %v16992_v61, %v15349_v51  ;;  %v16815_v61 = vld [vmem:[#allocation12 + $0x2d4] sm:$0xf] }
 0x450   : > { %7368 = vmatpush.bf16.msra.mxu3 %v14094_v59 }
 0x451   : > { %9819 = vmatpush.bf16.msrb.mxu0 %v15086_v46 }
 0x452   : > { %v7334_v30 = vpop.f32.mrf.mxu0  ;;  %9794 = vmatpush.bf16.msra.mxu2 %v14678_v43  ;;  %v14098_v43 = vor.u32 %v16672_v6, %v14095_v33  ;;  %v16743_v6 = vld [vmem:[#allocation12 + $0x94] sm:$0xf]  ;;  %v14367_v33 = vld [vmem:[#allocation12 + $0xa8] sm:$0xf0] }
 0x453   : > { %v16664_v30 = vld [vmem:[#allocation9 + $0x61c] sm:$0xf] }
 0x454   : > { %7369 = vmatpush.bf16.msra.mxu3 %v14062_v41  ;;  %v15062_v41 = vor.u32 %v16920_v39, %v15061_v38  ;;  %v14066_v49 = vor.u32 %v16664_v30, %v14063_v10  ;;  %v15301_v38 = vld [vmem:[#allocation12 + $0x7e0] sm:$0xf]  ;;  %v16980_v39 = vld [vmem:[#allocation12 + $0x7f4] sm:$0xf0] }
 0x455   : > { %v7345_v28 = vpop.f32.mrf.mxu1 }
 0x456   : > { %v18071_v59 = vadd.f32 %v7345_v28, %v7333_v53  ;;  %9820 = vmatpush.bf16.msrb.mxu0 %v15062_v41  ;;  %v16749_v28 = vld [vmem:[#allocation12 + $0xc4] sm:$0xf]  ;;  %v7002_v41 = vperm.slane %v18066_v47, 7 }
 0x457   : > { %7370 = vmatmul.bf16.vlgmr.msra.gmra.mxu3 %v17978_v34 }
 0x458   : > { %7414 = vmatpush.bf16.msrb.mxu3 %v14290_v9  ;;  %v18075_v27 = vpop.f32.mrf.mxu2 }
 0x45a   : > { %v7163_v62 = vpop.f32.mrf.mxu3 }
 0x45b   : > { %v7164_v3 = vadd.f32 %v7163_v62, %v7151_v26  ;;  %v14965_v26 = vld [vmem:[#allocation12 + $0x540] sm:$0xf]  ;;  %v16896_v62 = vld [vmem:[#allocation12 + $0x554] sm:$0xf0] }
 0x45c   : > { %7415 = vmatpush.bf16.msrb.mxu3 %v14258_v42  ;;  %v14466_v42 = vor.u32 %v16767_v52, %v14463_v48  ;;  %v14343_v52 = vld [vmem:[#allocation12 + $0x78] sm:$0xf0] }
 0x45d   : > { %v7429_v9 = vmax.f32 %v7164_v3, 0.0  ;;  %v7347_v29 = vpop.f32.mrf.mxu1  ;;  %v15326_v3 = vor.u32 %v16986_v24, %v15325_v45  ;;  %v14346_v44 = vor.u32 %v16737_v31, %v14343_v52  ;;  %v17052_v45 = vld [vmem:[#allocation12 + $0xa34] sm:$0xf0]  ;;  %v16809_v24 = vld [vmem:[#allocation12 + $0x2a4] sm:$0xf] }
 0x45e   : > { %9865 = vmatpush.bf16.msra.mxu0 %v14466_v42  ;;  %v15302_v29 = vor.u32 %v16980_v39, %v15301_v38  ;;  %v15277_v42 = vld [vmem:[#allocation12 + $0x7b0] sm:$0xf]  ;;  %v17046_v38 = vld [vmem:[#allocation12 + $0xa04] sm:$0xf0]  ;;  %v16803_v39 = vld [vmem:[#allocation12 + $0x274] sm:$0xf] }
 0x45f   : > { %v18079_v50 = vpack.c.bf16 %v7429_v9, %v7429_v9  ;;  %v14370_v9 = vor.u32 %v16743_v6, %v14367_v33  ;;  %v17040_v31 = vld [vmem:[#allocation12 + $0x9d4] sm:$0xf0]  ;;  %v16797_v52 = vld [vmem:[#allocation12 + $0x244] sm:$0xf] }
 0x460   : > { %7416 = vmatpush.bf16.msrb.mxu3 %v14226_v11  ;;  %v7256_v25 = vpop.f32.mrf.mxu2  ;;  %v15398_v11 = vor.u32 %v17004_v4, %v15397_v12  ;;  %v16974_v12 = vld [vmem:[#allocation12 + $0x7c4] sm:$0xf0]  ;;  %v14319_v4 = vld [vmem:[#allocation12 + $0x48] sm:$0xf0] }
 0x461   : > { %9795 = vmatmul.bf16.vlgmr.msra.gmra.mxu2 %v18079_v50  ;;  %v16731_v25 = vld [vmem:[#allocation12 + $0x34] sm:$0xf] }
 0x462   : > { %v7165_v8 = vpop.f32.mrf.mxu3  ;;  %9827 = vmatpush.bf16.msrb.mxu1 %v15398_v11  ;;  %9866 = vmatpush.bf16.msra.mxu0 %v14442_v56  ;;  %v14322_v5 = vor.u32 %v16731_v25, %v14319_v4  ;;  %v15253_v56 = vld [vmem:[#allocation12 + $0x780] sm:$0xf]  ;;  %v16785_v4 = vld [vmem:[#allocation12 + $0x1e4] sm:$0xf] }
 0x463   : > { %v14893_v8 = vld [vmem:[#allocation12 + $0x4b0] sm:$0xf]  ;;  %v15493_v25 = vld [vmem:[#allocation12 + $0x960] sm:$0xf] }
 0x464   : > { %7417 = vmatpush.bf16.msrb.mxu3 %v14194_v63  ;;  %v16755_v63 = vld [vmem:[#allocation12 + $0xf4] sm:$0xf] }
 0x465   : > { %v14418_v53 = vor.u32 %v16755_v63, %v14415_v60  ;;  %v17058_v63 = vld [vmem:[#allocation12 + $0xa64] sm:$0xf0]  ;;  %v14298_v60 = vor.u32 %v16725_v1, %v14295_v57  ;;  %v14511_v1 = vld [vmem:[#allocation12 + $0x1c8] sm:$0xf0] }
 0x466   : > { %9828 = vmatpush.bf16.msrb.mxu1 %v15374_v18  ;;  %v15614_v51 = vor.u32 %v17058_v63, %v15613_v58  ;;  %v16959_v63 = vld [vmem:[#allocation12 + $0x754] sm:$0xf] }
 0x467   : > { %9867 = vmatpush.bf16.msra.mxu0 %v14418_v53 }
 0x468   : > { %7418 = vmatpush.bf16.msrb.mxu3 %v14162_v17  ;;  %v16902_v17 = vld [vmem:[#allocation12 + $0x584] sm:$0xf0]  ;;  %9839 = vmatpush.bf16.msrb.mxu2 %v15614_v51 }
 0x469   : > { %v14990_v46 = vor.u32 %v16902_v17, %v14989_v19  ;;  %v14869_v17 = vld [vmem:[#allocation12 + $0x480] sm:$0xf] }
 0x46a   : > { %v18077_v40 = vpop.f32.mrf.mxu0  ;;  %9829 = vmatpush.bf16.msrb.mxu1 %v15350_v22  ;;  %v15589_v22 = vld [vmem:[#allocation12 + $0xa20] sm:$0xf] }
 0x46b   : > { %v7385_v30 = vadd.f32 %v18077_v40, %v7002_v41 }
 0x46c   : > { %7419 = vmatpush.bf16.msrb.mxu3 %v14130_v0  ;;  %v14394_v0 = vor.u32 %v16749_v28, %v14391_v21  ;;  %v16872_v28 = vld [vmem:[#allocation12 + $0x494] sm:$0xf0] }
 0x46e   : > { %9868 = vmatpush.bf16.msra.mxu0 %v14394_v0  ;;  %9830 = vmatpush.bf16.msrb.mxu1 %v15326_v3  ;;  %v14631_v0 = vld [vmem:[#allocation12 + $0x2b8] sm:$0xf0] }
 0x46f   : > { %v14634_v33 = vor.u32 %v16809_v24, %v14631_v0  ;;  %v16953_v0 = vld [vmem:[#allocation12 + $0x724] sm:$0xf] }
 0x470   : > { %7420 = vmatpush.bf16.msrb.mxu3 %v14098_v43  ;;  %v16890_v43 = vld [vmem:[#allocation12 + $0x524] sm:$0xf0] }
 0x471   : > { %v14942_v10 = vor.u32 %v16890_v43, %v14941_v32  ;;  %v15541_v43 = vld [vmem:[#allocation12 + $0x9c0] sm:$0xf] }
 0x472   : > { %v7386_v13 = vpop.f32.mrf.mxu0  ;;  %9869 = vmatpush.bf16.msra.mxu0 %v14370_v9  ;;  %9831 = vmatpush.bf16.msrb.mxu1 %v15302_v29  ;;  %v15542_v29 = vor.u32 %v17040_v31, %v15541_v43  ;;  %v16947_v31 = vld [vmem:[#allocation12 + $0x6f4] sm:$0xf] }
 0x473   : > { %v15254_v13 = vor.u32 %v16968_v54, %v15253_v56  ;;  %v16779_v56 = vld [vmem:[#allocation12 + $0x1b4] sm:$0xf] }
 0x474   : > { %7421 = vmatpush.bf16.msrb.mxu3 %v14066_v49  ;;  %v15278_v49 = vor.u32 %v16974_v12, %v15277_v42  ;;  %v14559_v42 = vld [vmem:[#allocation12 + $0x228] sm:$0xf0]  ;;  %v14514_v57 = vor.u32 %v16779_v56, %v14511_v1  ;;  %v17082_v1 = vld [vmem:[#allocation12 + $0xb24] sm:$0xf0] }
 0x475   : > { %v14562_v12 = vor.u32 %v16791_v55, %v14559_v42  ;;  %v16941_v55 = vld [vmem:[#allocation12 + $0x6c4] sm:$0xf]  ;;  %v15159_v42 = vld [vmem:[#allocation12 + $0x6d8] sm:$0xf0]  ;;  %v15135_v56 = vld [vmem:[#allocation12 + $0x6a8] sm:$0xf0] }
 0x476   : > { %9870 = vmatpush.bf16.msra.mxu0 %v14346_v44  ;;  %9832 = vmatpush.bf16.msrb.mxu1 %v15278_v49  ;;  %v15517_v44 = vld [vmem:[#allocation12 + $0x990] sm:$0xf]  ;;  %v17028_v49 = vld [vmem:[#allocation12 + $0x974] sm:$0xf0] }
 0x477   : > { %7422 = vmatmul.bf16.vlgmr.msrb.gmra.mxu3 %v17978_v34  ;;  %v14966_v34 = vor.u32 %v16896_v62, %v14965_v26  ;;  %v15590_v26 = vor.u32 %v17052_v45, %v15589_v22  ;;  %v15805_v22 = vld [vmem:[#allocation12 + $0xbd0] sm:$0xf]  ;;  %v17106_v45 = vld [vmem:[#allocation12 + $0xbe4] sm:$0xf0] }
 0x478   : > { %9800 = vmatpush.bf16.msra.mxu3 %v15038_v14  ;;  %v7397_v48 = vpop.f32.mrf.mxu1  ;;  %v16878_v14 = vld [vmem:[#allocation12 + $0x4c4] sm:$0xf0]  ;;  %v18087_v11 = vpop.f32.mrf.mxu2 }
 0x479   : > { %v18085_v47 = vadd.f32 %v7397_v48, %v7385_v30  ;;  %v14894_v18 = vor.u32 %v16878_v14, %v14893_v8  ;;  %9840 = vmatpush.bf16.msrb.mxu2 %v15590_v26  ;;  %v14583_v30 = vld [vmem:[#allocation12 + $0x258] sm:$0xf0]  ;;  %v17034_v48 = vld [vmem:[#allocation12 + $0x9a4] sm:$0xf0]  ;;  %v15469_v8 = vld [vmem:[#allocation12 + $0x930] sm:$0xf] }
 0x47a   : > { %v7215_v40 = vpop.f32.mrf.mxu3  ;;  %9871 = vmatpush.bf16.msra.mxu0 %v14322_v5  ;;  %9833 = vmatpush.bf16.msrb.mxu1 %v15254_v13  ;;  %v15518_v2 = vor.u32 %v17034_v48, %v15517_v44  ;;  %v14535_v5 = vld [vmem:[#allocation12 + $0x1f8] sm:$0xf0]  ;;  %v17022_v14 = vld [vmem:[#allocation12 + $0x944] sm:$0xf0]  ;;  %v7255_v13 = vadd.f32 %v18075_v27, %v18039_v35  ;;  %v15806_v35 = vor.u32 %v17106_v45, %v15805_v22  ;;  %v16863_v27 = vld [vmem:[#allocation12 + $0x454] sm:$0xf] }
 0x47b   : > { %v7216_v19 = vadd.f32 %v7215_v40, %v18054_v7  ;;  %v15565_v7 = vld [vmem:[#allocation12 + $0x9f0] sm:$0xf]  ;;  %v14538_v40 = vor.u32 %v16785_v4, %v14535_v5  ;;  %v15470_v54 = vor.u32 %v17022_v14, %v15469_v8  ;;  %v16851_v44 = vld [vmem:[#allocation12 + $0x3f4] sm:$0xf]  ;;  %v14799_v48 = vld [vmem:[#allocation12 + $0x408] sm:$0xf0]  ;;  %v15162_v8 = vor.u32 %v16941_v55, %v15159_v42 }
 0x47c   : > { %9801 = vmatpush.bf16.msra.mxu3 %v15014_v16  ;;  %v14655_v16 = vld [vmem:[#allocation12 + $0x2e8] sm:$0xf0]  ;;  %v15566_v41 = vor.u32 %v17046_v38, %v15565_v7  ;;  %v16857_v7 = vld [vmem:[#allocation12 + $0x424] sm:$0xf]  ;;  %v14775_v5 = vld [vmem:[#allocation12 + $0x3d8] sm:$0xf0] }
 0x47d   : > { %v14658_v21 = vor.u32 %v16815_v61, %v14655_v16  ;;  %v7430_v62 = vmax.f32 %v7216_v19, 0.0  ;;  %v15445_v61 = vld [vmem:[#allocation12 + $0x900] sm:$0xf]  ;;  %v17016_v16 = vld [vmem:[#allocation12 + $0x914] sm:$0xf0] }
 0x47e   : > { %9872 = vmatpush.bf16.msra.mxu0 %v14298_v60  ;;  %9841 = vmatpush.bf16.msrb.mxu2 %v15566_v41  ;;  %v16773_v19 = vld [vmem:[#allocation12 + $0x184] sm:$0xf]  ;;  %v16935_v14 = vld [vmem:[#allocation12 + $0x694] sm:$0xf] }
 0x47f   : > { %9878 = vmatpush.bf16.msra.mxu1 %v14658_v21  ;;  %v18090_v9 = vpack.c.bf16 %v7430_v62, %v7430_v62  ;;  %v15207_v62 = vld [vmem:[#allocation12 + $0x738] sm:$0xf0]  ;;  %v16845_v4 = vld [vmem:[#allocation12 + $0x3c4] sm:$0xf]  ;;  %v16923_v45 = vld [vmem:[#allocation12 + $0x634] sm:$0xf] }
 0x480   : > { %9802 = vmatpush.bf16.msra.mxu3 %v14990_v46  ;;  %v7399_v53 = vpop.f32.mrf.mxu1  ;;  %v14870_v46 = vor.u32 %v16872_v28, %v14869_v17  ;;  %v7308_v3 = vpop.f32.mrf.mxu2  ;;  %v14487_v17 = vld [vmem:[#allocation12 + $0x198] sm:$0xf0] }
 0x481   : > { %v15446_v53 = vor.u32 %v17016_v16, %v15445_v61  ;;  %v14490_v21 = vor.u32 %v16773_v19, %v14487_v17  ;;  %v17100_v3 = vld [vmem:[#allocation12 + $0xbb4] sm:$0xf0]  ;;  %v15685_v16 = vld [vmem:[#allocation12 + $0xae0] sm:$0xf] }
 0x482   : > { %v7217_v6 = vpop.f32.mrf.mxu3  ;;  %9842 = vmatpush.bf16.msrb.mxu2 %v15542_v29  ;;  %v15757_v29 = vld [vmem:[#allocation12 + $0xb70] sm:$0xf]  ;;  %v17076_v19 = vld [vmem:[#allocation12 + $0xaf4] sm:$0xf0] }
 0x483   : > { %9879 = vmatpush.bf16.msra.mxu1 %v14634_v33  ;;  %v15781_v33 = vld [vmem:[#allocation12 + $0xba0] sm:$0xf]  ;;  %v15686_v17 = vor.u32 %v17076_v19, %v15685_v16  ;;  %v16899_v16 = vld [vmem:[#allocation12 + $0x574] sm:$0xf]  ;;  %v14991_v19 = vld [vmem:[#allocation12 + $0x588] sm:$0xf0] }
 0x484   : > { %9803 = vmatpush.bf16.msra.mxu3 %v14966_v34  ;;  %v14607_v34 = vld [vmem:[#allocation12 + $0x288] sm:$0xf0]  ;;  %v15782_v38 = vor.u32 %v17100_v3, %v15781_v33  ;;  %v16917_v3 = vld [vmem:[#allocation12 + $0x604] sm:$0xf] }
 0x485   : > { %v14610_v32 = vor.u32 %v16803_v39, %v14607_v34  ;;  %v14823_v39 = vld [vmem:[#allocation12 + $0x438] sm:$0xf0]  ;;  %v15210_v34 = vor.u32 %v16953_v0, %v15207_v62  ;;  %v14703_v62 = vld [vmem:[#allocation12 + $0x348] sm:$0xf0] }
 0x486   : > { %9843 = vmatpush.bf16.msrb.mxu2 %v15518_v2 }
 0x487   : > { %9880 = vmatpush.bf16.msra.mxu1 %v14610_v32  ;;  %v14826_v32 = vor.u32 %v16857_v7, %v14823_v39  ;;  %v15063_v7 = vld [vmem:[#allocation12 + $0x618] sm:$0xf0] }
 0x488   : > { %9804 = vmatpush.bf16.msra.mxu3 %v14942_v10  ;;  %v14586_v10 = vor.u32 %v16797_v52, %v14583_v30  ;;  %v15183_v52 = vld [vmem:[#allocation12 + $0x708] sm:$0xf0]  ;;  %v17094_v30 = vld [vmem:[#allocation12 + $0xb84] sm:$0xf0] }
 0x489   : > { %v15186_v2 = vor.u32 %v16947_v31, %v15183_v52 }
 0x48b   : > { %9881 = vmatpush.bf16.msra.mxu1 %v14586_v10  ;;  %v15758_v10 = vor.u32 %v17094_v30, %v15757_v29  ;;  %v15637_v29 = vld [vmem:[#allocation12 + $0xa80] sm:$0xf]  ;;  %v17064_v30 = vld [vmem:[#allocation12 + $0xa94] sm:$0xf0] }
 0x48c   : > { %9805 = vmatpush.bf16.msra.mxu3 %v14918_v37  ;;  %v15494_v37 = vor.u32 %v17028_v49, %v15493_v25  ;;  %v15733_v25 = vld [vmem:[#allocation12 + $0xb40] sm:$0xf]  ;;  %v17088_v49 = vld [vmem:[#allocation12 + $0xb54] sm:$0xf0] }
 0x48e   : > { %9844 = vmatpush.bf16.msrb.mxu2 %v15494_v37  ;;  %v15734_v37 = vor.u32 %v17088_v49, %v15733_v25  ;;  %v16911_v25 = vld [vmem:[#allocation12 + $0x5d4] sm:$0xf]  ;;  %v15039_v49 = vld [vmem:[#allocation12 + $0x5e8] sm:$0xf0] }
 0x48f   : > { %9882 = vmatpush.bf16.msra.mxu1 %v14562_v12  ;;  %v14802_v12 = vor.u32 %v16851_v44, %v14799_v48  ;;  %v15638_v44 = vor.u32 %v17064_v30, %v15637_v29  ;;  %v15066_v48 = vor.u32 %v16917_v3, %v15063_v7  ;;  %v14373_v3 = vld [vmem:[#allocation12 + $0x98] sm:$0xf]  ;;  %v16747_v7 = vld [vmem:[#allocation12 + $0xac] sm:$0xf0]  ;;  %v15303_v30 = vld [vmem:[#allocation12 + $0x7f8] sm:$0xf0] }
 0x490   : > { %9806 = vmatpush.bf16.msra.mxu3 %v14894_v18  ;;  %v15231_v18 = vld [vmem:[#allocation12 + $0x768] sm:$0xf0] }
 0x491   : > { %v15234_v24 = vor.u32 %v16959_v63, %v15231_v18  ;;  %v15138_v63 = vor.u32 %v16935_v14, %v15135_v56  ;;  %v16929_v18 = vld [vmem:[#allocation12 + $0x664] sm:$0xf]  ;;  %v15015_v56 = vld [vmem:[#allocation12 + $0x5b8] sm:$0xf0] }
 0x492   : > { %9845 = vmatpush.bf16.msrb.mxu2 %v15470_v54  ;;  %v15709_v54 = vld [vmem:[#allocation12 + $0xb10] sm:$0xf]  ;;  %v16905_v14 = vld [vmem:[#allocation12 + $0x5a4] sm:$0xf] }
 0x493   : > { %9883 = vmatpush.bf16.msra.mxu1 %v14538_v40  ;;  %v14778_v40 = vor.u32 %v16845_v4, %v14775_v5  ;;  %v14445_v5 = vld [vmem:[#allocation12 + $0x128] sm:$0xf] }
 0x494   : > { %9807 = vmatpush.bf16.msra.mxu3 %v14870_v46  ;;  %v14847_v46 = vld [vmem:[#allocation12 + $0x468] sm:$0xf0] }
 0x495   : > { %v14850_v6 = vor.u32 %v16863_v27, %v14847_v46  ;;  %v17070_v27 = vld [vmem:[#allocation12 + $0xac4] sm:$0xf0]  ;;  %v16827_v46 = vld [vmem:[#allocation12 + $0x334] sm:$0xf] }
 0x496   : > { %9846 = vmatpush.bf16.msrb.mxu2 %v15446_v53  ;;  %v16833_v53 = vld [vmem:[#allocation12 + $0x364] sm:$0xf]  ;;  %v14706_v39 = vor.u32 %v16827_v46, %v14703_v62  ;;  %v14967_v46 = vld [vmem:[#allocation12 + $0x558] sm:$0xf0] }
 0x497   : > { %9808 = vmatmul.bf16.vlgmr.msra.gmra.mxu3 %v18090_v9  ;;  %9884 = vmatpush.bf16.msra.mxu1 %v14514_v57  ;;  %v15710_v57 = vor.u32 %v17082_v1, %v15709_v54 }
 0x498   : > { %v18095_v51 = vpop.f32.mrf.mxu2  ;;  %9852 = vmatpush.bf16.msrb.mxu3 %v15806_v35  ;;  %v15661_v35 = vld [vmem:[#allocation12 + $0xab0] sm:$0xf] }
 0x499   : > { %v15662_v0 = vor.u32 %v17070_v27, %v15661_v35  ;;  %v14994_v35 = vor.u32 %v16899_v16, %v14991_v19  ;;  %v16893_v27 = vld [vmem:[#allocation12 + $0x544] sm:$0xf] }
 0x49a   : > { %v7267_v58 = vpop.f32.mrf.mxu3  ;;  %9891 = vmatpush.bf16.msra.mxu2 %v14850_v6  ;;  %v7307_v6 = vadd.f32 %v18087_v11, %v18051_v15  ;;  %v14679_v15 = vld [vmem:[#allocation12 + $0x318] sm:$0xf0] }
 0x49b   : > { %v7268_v60 = vadd.f32 %v7267_v58, %v7255_v13  ;;  %9885 = vmatpush.bf16.msra.mxu1 %v14490_v21  ;;  %v16839_v13 = vld [vmem:[#allocation12 + $0x394] sm:$0xf]  ;;  %v14751_v58 = vld [vmem:[#allocation12 + $0x3a8] sm:$0xf0] }
 0x49c   : > { %9853 = vmatpush.bf16.msrb.mxu3 %v15782_v38  ;;  %v14754_v61 = vor.u32 %v16839_v13, %v14751_v58  ;;  %v17007_v38 = vld [vmem:[#allocation12 + $0x8d4] sm:$0xf] }
 0x49d   : > { %v7431_v28 = vmax.f32 %v7268_v60, 0.0  ;;  %v15111_v60 = vld [vmem:[#allocation12 + $0x678] sm:$0xf0] }
 0x49e   : > { %9892 = vmatpush.bf16.msra.mxu2 %v14826_v32  ;;  %v15114_v22 = vor.u32 %v16929_v18, %v15111_v60  ;;  %v14469_v32 = vld [vmem:[#allocation12 + $0x158] sm:$0xf]  ;;  %v16759_v60 = vld [vmem:[#allocation12 + $0x10c] sm:$0xf0] }
 0x49f   : > { %v18097_v26 = vpack.c.bf16 %v7431_v28, %v7431_v28  ;;  %v14727_v28 = vld [vmem:[#allocation12 + $0x378] sm:$0xf0]  ;;  %v14421_v18 = vld [vmem:[#allocation12 + $0xf8] sm:$0xf] }
 0x4a0   : > { %v7360_v43 = vpop.f32.mrf.mxu2  ;;  %9854 = vmatpush.bf16.msrb.mxu3 %v15758_v10  ;;  %v14730_v21 = vor.u32 %v16833_v53, %v14727_v28  ;;  %v16821_v10 = vld [vmem:[#allocation12 + $0x304] sm:$0xf] }
 0x4a1   : > { %9821 = vmatmul.bf16.vlgmr.msrb.gmra.mxu0 %v18097_v26  ;;  %v16771_v43 = vld [vmem:[#allocation12 + $0x16c] sm:$0xf0]  ;;  %v16989_v28 = vld [vmem:[#allocation12 + $0x844] sm:$0xf] }
 0x4a2   : > { %9917 = vmatpush.bf16.msrb.mxu0 %v15234_v24  ;;  %v7269_v41 = vpop.f32.mrf.mxu3  ;;  %9893 = vmatpush.bf16.msra.mxu2 %v14802_v12  ;;  %v15087_v24 = vld [vmem:[#allocation12 + $0x648] sm:$0xf0]  ;;  %v14470_v42 = vor.u32 %v16771_v43, %v14469_v32  ;;  %v17001_v12 = vld [vmem:[#allocation12 + $0x8a4] sm:$0xf]  ;;  %v14374_v43 = vor.u32 %v16747_v7, %v14373_v3  ;;  %v14637_v3 = vld [vmem:[#allocation12 + $0x2a8] sm:$0xf] }
 0x4a3   : > { %v15090_v33 = vor.u32 %v16923_v45, %v15087_v24  ;;  %v14397_v45 = vld [vmem:[#allocation12 + $0xc8] sm:$0xf]  ;;  %v16753_v24 = vld [vmem:[#allocation12 + $0xdc] sm:$0xf0] }
 0x4a4   : > { %9855 = vmatpush.bf16.msrb.mxu3 %v15734_v37  ;;  %v15399_v37 = vld [vmem:[#allocation12 + $0x8b8] sm:$0xf0]  ;;  %v14398_v62 = vor.u32 %v16753_v24, %v14397_v45  ;;  %v16813_v7 = vld [vmem:[#allocation12 + $0x2bc] sm:$0xf0] }
 0x4a5   : > { %v15402_v1 = vor.u32 %v17001_v12, %v15399_v37  ;;  %v16971_v12 = vld [vmem:[#allocation12 + $0x7b4] sm:$0xf]  ;;  %v16735_v37 = vld [vmem:[#allocation12 + $0x4c] sm:$0xf0] }
 0x4a6   : > { %9918 = vmatpush.bf16.msrb.mxu0 %v15210_v34  ;;  %9894 = vmatpush.bf16.msra.mxu2 %v14778_v40  ;;  %v15423_v34 = vld [vmem:[#allocation12 + $0x8e8] sm:$0xf0]  ;;  %v16765_v40 = vld [vmem:[#allocation12 + $0x13c] sm:$0xf0] }
 0x4a7   : > { %v15426_v55 = vor.u32 %v17007_v38, %v15423_v34  ;;  %v14446_v13 = vor.u32 %v16765_v40, %v14445_v5  ;;  %v14970_v38 = vor.u32 %v16893_v27, %v14967_v46  ;;  %v7827_v34 = vld [vmem:[#allocation13] sm:$0x3f]  ;;  %v7359_v40 = vadd.f32 %v18095_v51, %v18071_v59  ;;  %v14661_v59 = vld [vmem:[#allocation12 + $0x2d8] sm:$0xf]  ;;  %v16819_v51 = vld [vmem:[#allocation12 + $0x2ec] sm:$0xf0] }
 0x4a8   : > { %9856 = vmatpush.bf16.msrb.mxu3 %v15710_v57  ;;  %v16995_v57 = vld [vmem:[#allocation12 + $0x874] sm:$0xf]  ;;  %v16869_v27 = vld [vmem:[#allocation12 + $0x484] sm:$0xf]  ;;  %v14871_v46 = vld [vmem:[#allocation12 + $0x498] sm:$0xf0] }
 0x4aa   : > { %9919 = vmatpush.bf16.msrb.mxu0 %v15186_v2  ;;  %9895 = vmatpush.bf16.msra.mxu2 %v14754_v61  ;;  %v14682_v2 = vor.u32 %v16821_v10, %v14679_v15  ;;  %v15018_v61 = vor.u32 %v16905_v14, %v15015_v56  ;;  %v14349_v10 = vld [vmem:[#allocation12 + $0x68] sm:$0xf]  ;;  %v14895_v14 = vld [vmem:[#allocation12 + $0x4c8] sm:$0xf0] }
 0x4ac   : > { %9857 = vmatpush.bf16.msrb.mxu3 %v15686_v17  ;;  %v14422_v17 = vor.u32 %v16759_v60, %v14421_v18  ;;  %v14301_v18 = vld [vmem:[#allocation12 + $0x8] sm:$0xf]  ;;  %v16729_v60 = vld [vmem:[#allocation12 + $0x1c] sm:$0xf0] }
 0x4ad   : > { %v14302_v24 = vor.u32 %v16729_v60, %v14301_v18  ;;  %v16939_v18 = vld [vmem:[#allocation12 + $0x6ac] sm:$0xf0] }
 0x4ae   : > { %9920 = vmatpush.bf16.msrb.mxu0 %v15162_v8  ;;  %9896 = vmatpush.bf16.msra.mxu2 %v14730_v21  ;;  %v15042_v8 = vor.u32 %v16911_v25, %v15039_v49  ;;  %v15279_v25 = vld [vmem:[#allocation12 + $0x7c8] sm:$0xf0]  ;;  %v14325_v49 = vld [vmem:[#allocation12 + $0x38] sm:$0xf] }
 0x4b0   : > { %9858 = vmatpush.bf16.msrb.mxu3 %v15662_v0 }
 0x4b1   : > { %9873 = vmatmul.bf16.vlgmr.msra.gmra.mxu0 %v18058_v20 }
 0x4b2   : > { %9921 = vmatpush.bf16.msrb.mxu0 %v15138_v63  ;;  %9897 = vmatpush.bf16.msra.mxu2 %v14706_v39  ;;  %v15375_v63 = vld [vmem:[#allocation12 + $0x888] sm:$0xf0]  ;;  %v16887_v39 = vld [vmem:[#allocation12 + $0x514] sm:$0xf] }
 0x4b3   : > { %v15378_v53 = vor.u32 %v16995_v57, %v15375_v63  ;;  %v15255_v63 = vld [vmem:[#allocation12 + $0x798] sm:$0xf0] }
 0x4b4   : > { %9859 = vmatpush.bf16.msrb.mxu3 %v15638_v44  ;;  %v16741_v44 = vld [vmem:[#allocation12 + $0x7c] sm:$0xf0] }
 0x4b6   : > { %9922 = vmatpush.bf16.msrb.mxu0 %v15114_v22  ;;  %9898 = vmatpush.bf16.msra.mxu2 %v14682_v2  ;;  %v9770_v21 = vpop.f32.mrf.mxu0  ;;  %v15351_v22 = vld [vmem:[#allocation12 + $0x858] sm:$0xf0]  ;;  %v9749_v2 = vperm.slane %v7827_v34, 0  ;;  %v14874_v34 = vor.u32 %v16869_v27, %v14871_v46  ;;  %v17019_v46 = vld [vmem:[#allocation12 + $0x934] sm:$0xf] }
 0x4b7   : > { %v15354_v0 = vor.u32 %v16989_v28, %v15351_v22  ;;  %v15237_v28 = vld [vmem:[#allocation12 + $0x758] sm:$0xf] }
 0x4b8   : > { %v18103_v52 = vpop.f32.mrf.mxu2  ;;  %9904 = vmatpush.bf16.msra.mxu3 %v15042_v8  ;;  %v16875_v8 = vld [vmem:[#allocation12 + $0x4b4] sm:$0xf]  ;;  %v9771_v56 = vadd.f32 %v9770_v21, %v9749_v2  ;;  %v16963_v21 = vld [vmem:[#allocation12 + $0x76c] sm:$0xf0] }
 0x4b9   : > { %v16951_v2 = vld [vmem:[#allocation12 + $0x70c] sm:$0xf0] }
 0x4ba   : > { %v7319_v41 = vpop.f32.mrf.mxu3  ;;  %9923 = vmatpush.bf16.msrb.mxu0 %v15090_v33  ;;  %v15327_v33 = vld [vmem:[#allocation12 + $0x828] sm:$0xf0] }
 0x4bb   : > { %v7320_v31 = vadd.f32 %v7319_v41, %v7307_v6  ;;  %v16983_v6 = vld [vmem:[#allocation12 + $0x814] sm:$0xf]  ;;  %v14943_v41 = vld [vmem:[#allocation12 + $0x528] sm:$0xf0] }
 0x4bc   : > { %9905 = vmatpush.bf16.msra.mxu3 %v15018_v61  ;;  %v15330_v32 = vor.u32 %v16983_v6, %v15327_v33  ;;  %v14946_v15 = vor.u32 %v16887_v39, %v14943_v41  ;;  %v14898_v61 = vor.u32 %v16875_v8, %v14895_v14  ;;  %v15238_v6 = vor.u32 %v16963_v21, %v15237_v28  ;;  %v17049_v33 = vld [vmem:[#allocation12 + $0xa24] sm:$0xf]  ;;  %v15213_v39 = vld [vmem:[#allocation12 + $0x728] sm:$0xf]  ;;  %v16957_v41 = vld [vmem:[#allocation12 + $0x73c] sm:$0xf0] }
 0x4bd   : > { %v7432_v11 = vmax.f32 %v7320_v31, 0.0  ;;  %v16977_v31 = vld [vmem:[#allocation12 + $0x7e4] sm:$0xf]  ;;  %v16945_v8 = vld [vmem:[#allocation12 + $0x6dc] sm:$0xf0] }
 0x4be   : > { %9924 = vmatpush.bf16.msrb.mxu0 %v15066_v48  ;;  %v9772_v29 = vpop.f32.mrf.mxu0  ;;  %v14919_v48 = vld [vmem:[#allocation12 + $0x4f8] sm:$0xf0]  ;;  %v15117_v21 = vld [vmem:[#allocation12 + $0x668] sm:$0xf] }
 0x4bf   : > { %v18105_v4 = vpack.c.bf16 %v7432_v11, %v7432_v11  ;;  %v16881_v11 = vld [vmem:[#allocation12 + $0x4e4] sm:$0xf]  ;;  %v15495_v28 = vld [vmem:[#allocation12 + $0x978] sm:$0xf0] }
 0x4c0   : > { %v7412_v58 = vpop.f32.mrf.mxu2  ;;  %9906 = vmatpush.bf16.msra.mxu3 %v14994_v35  ;;  %v14922_v5 = vor.u32 %v16881_v11, %v14919_v48  ;;  %v14662_v35 = vor.u32 %v16819_v51, %v14661_v59  ;;  %v15567_v11 = vld [vmem:[#allocation12 + $0xa08] sm:$0xf0]  ;;  %v15189_v48 = vld [vmem:[#allocation12 + $0x6f8] sm:$0xf]  ;;  %v14541_v59 = vld [vmem:[#allocation12 + $0x1e8] sm:$0xf] }
 0x4c1   : > { %9834 = vmatmul.bf16.vlgmr.msrb.gmra.mxu1 %v18105_v4  ;;  %9925 = vmatmul.bf16.vlgmr.msrb.gmra.mxu0 %v18097_v26  ;;  %v16789_v51 = vld [vmem:[#allocation12 + $0x1fc] sm:$0xf0] }
 0x4c2   : > { %9930 = vmatpush.bf16.msrb.mxu1 %v15426_v55  ;;  %9969 = vmatpush.bf16.msra.mxu0 %v14470_v42  ;;  %v7321_v54 = vpop.f32.mrf.mxu3  ;;  %v15306_v55 = vor.u32 %v16977_v31, %v15303_v30  ;;  %v14350_v42 = vor.u32 %v16741_v44, %v14349_v10  ;;  %v14638_v31 = vor.u32 %v16813_v7, %v14637_v3  ;;  %v17043_v10 = vld [vmem:[#allocation12 + $0x9f4] sm:$0xf]  ;;  %v14613_v44 = vld [vmem:[#allocation12 + $0x278] sm:$0xf]  ;;  %v16927_v7 = vld [vmem:[#allocation12 + $0x64c] sm:$0xf0] }
 0x4c3   : > { %v15282_v54 = vor.u32 %v16971_v12, %v15279_v25  ;;  %v15214_v30 = vor.u32 %v16957_v41, %v15213_v39  ;;  %v15190_v12 = vor.u32 %v16951_v2, %v15189_v48  ;;  %v17037_v25 = vld [vmem:[#allocation12 + $0x9c4] sm:$0xf]  ;;  %v15093_v3 = vld [vmem:[#allocation12 + $0x638] sm:$0xf]  ;;  %v15447_v41 = vld [vmem:[#allocation12 + $0x918] sm:$0xf0] }
 0x4c4   : > { %9907 = vmatpush.bf16.msra.mxu3 %v14970_v38  ;;  %v9783_v58 = vpop.f32.mrf.mxu1  ;;  %v15591_v38 = vld [vmem:[#allocation12 + $0xa38] sm:$0xf0]  ;;  %v17013_v39 = vld [vmem:[#allocation12 + $0x904] sm:$0xf]  ;;  %v15807_v48 = vld [vmem:[#allocation12 + $0xbe8] sm:$0xf0] }
 0x4c5   : > { %v18112_v19 = vadd.f32 %v9783_v58, %v9771_v56  ;;  %v15594_v29 = vor.u32 %v17049_v33, %v15591_v38  ;;  %v15519_v58 = vld [vmem:[#allocation12 + $0x9a8] sm:$0xf0]  ;;  %v7411_v38 = vadd.f32 %v18103_v52, %v18085_v47  ;;  %v14853_v2 = vld [vmem:[#allocation12 + $0x458] sm:$0xf]  ;;  %v17011_v52 = vld [vmem:[#allocation12 + $0x8ec] sm:$0xf0] }
 0x4c6   : > { %9931 = vmatpush.bf16.msrb.mxu1 %v15402_v1  ;;  %9970 = vmatpush.bf16.msra.mxu0 %v14446_v13  ;;  %v14326_v1 = vor.u32 %v16735_v37, %v14325_v49  ;;  %v16965_v13 = vld [vmem:[#allocation12 + $0x784] sm:$0xf]  ;;  %v14589_v49 = vld [vmem:[#allocation12 + $0x248] sm:$0xf]  ;;  %v16801_v37 = vld [vmem:[#allocation12 + $0x25c] sm:$0xf0] }
 0x4c7   : > { %v15258_v45 = vor.u32 %v16965_v13, %v15255_v63  ;;  %v14590_v14 = vor.u32 %v16801_v37, %v14589_v49  ;;  %v14565_v13 = vld [vmem:[#allocation12 + $0x218] sm:$0xf]  ;;  %v15471_v33 = vld [vmem:[#allocation12 + $0x948] sm:$0xf0]  ;;  %v14471_v49 = vld [vmem:[#allocation12 + $0x170] sm:$0xf0]  ;;  %v15450_v37 = vor.u32 %v17013_v39, %v15447_v41 }
 0x4c8   : > { %9908 = vmatpush.bf16.msra.mxu3 %v14946_v15  ;;  %v16807_v15 = vld [vmem:[#allocation12 + $0x28c] sm:$0xf0]  ;;  %v15141_v63 = vld [vmem:[#allocation12 + $0x698] sm:$0xf]  ;;  %v14781_v39 = vld [vmem:[#allocation12 + $0x3c8] sm:$0xf] }
 0x4c9   : > { %v15429_v47 = vld [vmem:[#allocation12 + $0x8d8] sm:$0xf]  ;;  %v16849_v41 = vld [vmem:[#allocation12 + $0x3dc] sm:$0xf0] }
 0x4ca   : > { %9932 = vmatpush.bf16.msrb.mxu1 %v15378_v53  ;;  %9971 = vmatpush.bf16.msra.mxu0 %v14422_v17  ;;  %v17055_v53 = vld [vmem:[#allocation12 + $0xa54] sm:$0xf]  ;;  %v15615_v17 = vld [vmem:[#allocation12 + $0xa68] sm:$0xf0] }
 0x4cc   : > { %9909 = vmatpush.bf16.msra.mxu3 %v14922_v5  ;;  %v15543_v5 = vld [vmem:[#allocation12 + $0x9d8] sm:$0xf0] }
 0x4cd   : > { %v15546_v56 = vor.u32 %v17037_v25, %v15543_v5  ;;  %v16768_v25 = vld [vmem:[#allocation12 + $0x15c] sm:$0xf] }
 0x4ce   : > { %9933 = vmatpush.bf16.msrb.mxu1 %v15354_v0  ;;  %9972 = vmatpush.bf16.msra.mxu0 %v14398_v62  ;;  %v15618_v62 = vor.u32 %v17055_v53, %v15615_v17  ;;  %v17025_v53 = vld [vmem:[#allocation12 + $0x964] sm:$0xf] }
 0x4d0   : > { %9910 = vmatpush.bf16.msra.mxu3 %v14898_v61 }
 0x4d1   : > { %9886 = vmatmul.bf16.vlgmr.msra.gmra.mxu1 %v18064_v36 }
 0x4d2   : > { %9934 = vmatpush.bf16.msrb.mxu1 %v15330_v32  ;;  %9973 = vmatpush.bf16.msra.mxu0 %v14374_v43  ;;  %v9785_v43 = vpop.f32.mrf.mxu1 }
 0x4d3   : > { %v15474_v43 = vor.u32 %v17019_v46, %v15471_v33  ;;  %v16756_v46 = vld [vmem:[#allocation12 + $0xfc] sm:$0xf] }
 0x4d4   : > { %9911 = vmatpush.bf16.msra.mxu3 %v14874_v34  ;;  %v14493_v34 = vld [vmem:[#allocation12 + $0x188] sm:$0xf] }
 0x4d6   : > { %9935 = vmatpush.bf16.msrb.mxu1 %v15306_v55  ;;  %9974 = vmatpush.bf16.msra.mxu0 %v14350_v42  ;;  %v14614_v55 = vor.u32 %v16807_v15, %v14613_v44  ;;  %v15570_v42 = vor.u32 %v17043_v10, %v15567_v11  ;;  %v16921_v10 = vld [vmem:[#allocation12 + $0x61c] sm:$0xf0]  ;;  %v17103_v11 = vld [vmem:[#allocation12 + $0xbd4] sm:$0xf] }
 0x4da   : > { %v7371_v57 = vpop.f32.mrf.mxu3  ;;  %9936 = vmatpush.bf16.msrb.mxu1 %v15282_v54  ;;  %9975 = vmatpush.bf16.msra.mxu0 %v14326_v1  ;;  %v17031_v1 = vld [vmem:[#allocation12 + $0x994] sm:$0xf] }
 0x4db   : > { %v7372_v16 = vadd.f32 %v7371_v57, %v7359_v40  ;;  %v15165_v40 = vld [vmem:[#allocation12 + $0x6c8] sm:$0xf]  ;;  %v16795_v57 = vld [vmem:[#allocation12 + $0x22c] sm:$0xf0]  ;;  %v15522_v61 = vor.u32 %v17031_v1, %v15519_v58  ;;  %v15430_v1 = vor.u32 %v17011_v52, %v15429_v47  ;;  %v16861_v58 = vld [vmem:[#allocation12 + $0x43c] sm:$0xf0] }
 0x4dc   : > { %v15166_v54 = vor.u32 %v16945_v8, %v15165_v40  ;;  %v14566_v60 = vor.u32 %v16795_v57, %v14565_v13  ;;  %v15810_v8 = vor.u32 %v17103_v11, %v15807_v48  ;;  %v14474_v13 = vor.u32 %v16768_v25, %v14471_v49  ;;  %v14829_v57 = vld [vmem:[#allocation12 + $0x428] sm:$0xf]  ;;  %v14757_v48 = vld [vmem:[#allocation12 + $0x398] sm:$0xf]  ;;  %v16987_v47 = vld [vmem:[#allocation12 + $0x82c] sm:$0xf0] }
 0x4dd   : > { %v7433_v22 = vmax.f32 %v7372_v16, 0.0  ;;  %v15142_v16 = vor.u32 %v16939_v18, %v15141_v63  ;;  %v15405_v63 = vld [vmem:[#allocation12 + $0x8a8] sm:$0xf]  ;;  %v17005_v18 = vld [vmem:[#allocation12 + $0x8bc] sm:$0xf0] }
 0x4de   : > { %9937 = vmatpush.bf16.msrb.mxu1 %v15258_v45  ;;  %9976 = vmatpush.bf16.msra.mxu0 %v14302_v24  ;;  %v14542_v24 = vor.u32 %v16789_v51, %v14541_v59  ;;  %v14830_v59 = vor.u32 %v16861_v58, %v14829_v57  ;;  %v17091_v51 = vld [vmem:[#allocation12 + $0xb74] sm:$0xf]  ;;  %v16744_v52 = vld [vmem:[#allocation12 + $0x9c] sm:$0xf]  ;;  %v17073_v49 = vld [vmem:[#allocation12 + $0xae4] sm:$0xf] }
 0x4df   : > { %v18114_v0 = vpack.c.bf16 %v7433_v22, %v7433_v22  ;;  %v16933_v22 = vld [vmem:[#allocation12 + $0x67c] sm:$0xf0]  ;;  %v14351_v57 = vld [vmem:[#allocation12 + $0x80] sm:$0xf0] }
 0x4e0   : > { %v15118_v27 = vor.u32 %v16933_v22, %v15117_v21  ;;  %v14805_v22 = vld [vmem:[#allocation12 + $0x3f8] sm:$0xf] }
 0x4e1   : > { %9847 = vmatmul.bf16.vlgmr.msrb.gmra.mxu2 %v18114_v0  ;;  %9977 = vmatmul.bf16.vlgmr.msra.gmra.mxu0 %v18058_v20 }
 0x4e2   : > { %9982 = vmatpush.bf16.msra.mxu1 %v14662_v35  ;;  %v7373_v32 = vpop.f32.mrf.mxu3  ;;  %9943 = vmatpush.bf16.msrb.mxu2 %v15618_v62  ;;  %v15498_v35 = vor.u32 %v17025_v53, %v15495_v28  ;;  %v14517_v62 = vld [vmem:[#allocation12 + $0x1b8] sm:$0xf]  ;;  %v15406_v28 = vor.u32 %v17005_v18, %v15405_v63  ;;  %v17067_v18 = vld [vmem:[#allocation12 + $0xab4] sm:$0xf] }
 0x4e3   : > { %10021 = vmatpush.bf16.msrb.mxu0 %v15238_v6  ;;  %9938 = vmatmul.bf16.vlgmr.msrb.gmra.mxu1 %v18105_v4  ;;  %v16783_v6 = vld [vmem:[#allocation12 + $0x1cc] sm:$0xf0] }
 0x4e4   : > { %v9796_v17 = vpop.f32.mrf.mxu2 }
 0x4e5   : > { %v18120_v45 = vadd.f32 %v9796_v17, %v18112_v19  ;;  %v14518_v19 = vor.u32 %v16783_v6, %v14517_v62  ;;  %v15759_v17 = vld [vmem:[#allocation12 + $0xb88] sm:$0xf0]  ;;  %v14423_v62 = vld [vmem:[#allocation12 + $0x110] sm:$0xf0] }
 0x4e6   : > { %9983 = vmatpush.bf16.msra.mxu1 %v14638_v31  ;;  %9944 = vmatpush.bf16.msrb.mxu2 %v15594_v29  ;;  %v15094_v31 = vor.u32 %v16927_v7, %v15093_v3  ;;  %v16777_v29 = vld [vmem:[#allocation12 + $0x19c] sm:$0xf0]  ;;  %v15762_v6 = vor.u32 %v17091_v51, %v15759_v17  ;;  %v17085_v3 = vld [vmem:[#allocation12 + $0xb44] sm:$0xf]  ;;  %v15735_v7 = vld [vmem:[#allocation12 + $0xb58] sm:$0xf0] }
 0x4e7   : > { %10022 = vmatpush.bf16.msrb.mxu0 %v15214_v30  ;;  %v15069_v30 = vld [vmem:[#allocation12 + $0x608] sm:$0xf]  ;;  %v15285_v51 = vld [vmem:[#allocation12 + $0x7b8] sm:$0xf]  ;;  %v16975_v17 = vld [vmem:[#allocation12 + $0x7cc] sm:$0xf0] }
 0x4e8   : > { %v15070_v5 = vor.u32 %v16921_v10, %v15069_v30  ;;  %v14782_v30 = vor.u32 %v16849_v41, %v14781_v39  ;;  %v17079_v10 = vld [vmem:[#allocation12 + $0xb14] sm:$0xf]  ;;  %v16726_v39 = vld [vmem:[#allocation12 + $0xc] sm:$0xf]  ;;  %v14303_v41 = vld [vmem:[#allocation12 + $0x20] sm:$0xf0] }
 0x4ea   : > { %9984 = vmatpush.bf16.msra.mxu1 %v14614_v55  ;;  %9945 = vmatpush.bf16.msrb.mxu2 %v15570_v42  ;;  %v16867_v55 = vld [vmem:[#allocation12 + $0x46c] sm:$0xf0] }
 0x4eb   : > { %10023 = vmatpush.bf16.msrb.mxu0 %v15190_v12  ;;  %v14494_v12 = vor.u32 %v16777_v29, %v14493_v34  ;;  %v15357_v34 = vld [vmem:[#allocation12 + $0x848] sm:$0xf]  ;;  %v15738_v29 = vor.u32 %v17085_v3, %v15735_v7  ;;  %v15286_v3 = vor.u32 %v16975_v17, %v15285_v51 }
 0x4ec   : > { %v9798_v15 = vpop.f32.mrf.mxu2 }
 0x4ee   : > { %9985 = vmatpush.bf16.msra.mxu1 %v14590_v14  ;;  %9946 = vmatpush.bf16.msrb.mxu2 %v15546_v56  ;;  %v14854_v14 = vor.u32 %v16867_v55, %v14853_v2  ;;  %v17097_v56 = vld [vmem:[#allocation12 + $0xba4] sm:$0xf]  ;;  %v16843_v2 = vld [vmem:[#allocation12 + $0x3ac] sm:$0xf0]  ;;  %v15333_v55 = vld [vmem:[#allocation12 + $0x818] sm:$0xf] }
 0x4ef   : > { %10024 = vmatpush.bf16.msrb.mxu0 %v15166_v54  ;;  %v15783_v54 = vld [vmem:[#allocation12 + $0xbb8] sm:$0xf0]  ;;  %v14758_v25 = vor.u32 %v16843_v2, %v14757_v48  ;;  %v14306_v48 = vor.u32 %v16726_v39, %v14303_v41  ;;  %v14949_v41 = vld [vmem:[#allocation12 + $0x518] sm:$0xf] }
 0x4f0   : > { %v15786_v53 = vor.u32 %v17097_v56, %v15783_v54  ;;  %v16837_v56 = vld [vmem:[#allocation12 + $0x37c] sm:$0xf0]  ;;  %v15309_v54 = vld [vmem:[#allocation12 + $0x7e8] sm:$0xf] }
 0x4f1   : > { %9899 = vmatmul.bf16.vlgmr.msra.gmra.mxu2 %v18079_v50 }
 0x4f2   : > { %9986 = vmatpush.bf16.msra.mxu1 %v14566_v60  ;;  %9947 = vmatpush.bf16.msrb.mxu2 %v15522_v61  ;;  %v16762_v60 = vld [vmem:[#allocation12 + $0x12c] sm:$0xf]  ;;  %v14447_v61 = vld [vmem:[#allocation12 + $0x140] sm:$0xf0] }
 0x4f3   : > { %10025 = vmatpush.bf16.msrb.mxu0 %v15142_v16  ;;  %v14450_v21 = vor.u32 %v16762_v60, %v14447_v61  ;;  %v15663_v60 = vld [vmem:[#allocation12 + $0xac8] sm:$0xf0] }
 0x4f6   : > { %9987 = vmatpush.bf16.msra.mxu1 %v14542_v24  ;;  %9948 = vmatpush.bf16.msrb.mxu2 %v15498_v35  ;;  %v16855_v24 = vld [vmem:[#allocation12 + $0x40c] sm:$0xf0]  ;;  %v15381_v35 = vld [vmem:[#allocation12 + $0x878] sm:$0xf] }
 0x4f7   : > { %10026 = vmatpush.bf16.msrb.mxu0 %v15118_v27  ;;  %v16999_v27 = vld [vmem:[#allocation12 + $0x88c] sm:$0xf0]  ;;  %v14806_v33 = vor.u32 %v16855_v24, %v14805_v22  ;;  %v17061_v22 = vld [vmem:[#allocation12 + $0xa84] sm:$0xf] }
 0x4fa   : > { %v7423_v32 = vpop.f32.mrf.mxu3  ;;  %9988 = vmatpush.bf16.msra.mxu1 %v14518_v19  ;;  %9949 = vmatpush.bf16.msrb.mxu2 %v15474_v43  ;;  %v14426_v19 = vor.u32 %v16756_v46, %v14423_v62  ;;  %v16750_v43 = vld [vmem:[#allocation12 + $0xcc] sm:$0xf]  ;;  %v15639_v46 = vld [vmem:[#allocation12 + $0xa98] sm:$0xf0]  ;;  %v14685_v62 = vld [vmem:[#allocation12 + $0x308] sm:$0xf] }
 0x4fb   : > { %v7424_v44 = vadd.f32 %v7423_v32, %v7411_v38  ;;  %10027 = vmatpush.bf16.msrb.mxu0 %v15094_v31  ;;  %v15382_v38 = vor.u32 %v16999_v27, %v15381_v35  ;;  %v16993_v32 = vld [vmem:[#allocation12 + $0x85c] sm:$0xf0]  ;;  %v14399_v31 = vld [vmem:[#allocation12 + $0xe0] sm:$0xf0]  ;;  %v15666_v35 = vor.u32 %v17067_v18, %v15663_v60  ;;  %v15573_v18 = vld [vmem:[#allocation12 + $0x9f8] sm:$0xf] }
 0x4fc   : > { %v15358_v15 = vor.u32 %v16993_v32, %v15357_v34  ;;  %v14402_v11 = vor.u32 %v16750_v43, %v14399_v31  ;;  %v15045_v34 = vld [vmem:[#allocation12 + $0x5d8] sm:$0xf]  ;;  %v16915_v32 = vld [vmem:[#allocation12 + $0x5ec] sm:$0xf0] }
 0x4fd   : > { %v7434_v42 = vmax.f32 %v7424_v44, 0.0  ;;  %v15711_v44 = vld [vmem:[#allocation12 + $0xb28] sm:$0xf0]  ;;  %v15621_v43 = vld [vmem:[#allocation12 + $0xa58] sm:$0xf]  ;;  %v15046_v2 = vor.u32 %v16915_v32, %v15045_v34 }
 0x4fe   : > { %9989 = vmatpush.bf16.msra.mxu1 %v14494_v12  ;;  %9950 = vmatpush.bf16.msrb.mxu2 %v15450_v37  ;;  %v15714_v12 = vor.u32 %v17079_v10, %v15711_v44  ;;  %v15687_v37 = vld [vmem:[#allocation12 + $0xaf8] sm:$0xf0]  ;;  %v17059_v31 = vld [vmem:[#allocation12 + $0xa6c] sm:$0xf0]  ;;  %v14663_v44 = vld [vmem:[#allocation12 + $0x2f0] sm:$0xf0] }
 0x4ff   : > { %v18125_v40 = vpack.c.bf16 %v7434_v42, %v7434_v42  ;;  %10028 = vmatpush.bf16.msrb.mxu0 %v15070_v5  ;;  %v14375_v42 = vld [vmem:[#allocation12 + $0xb0] sm:$0xf0]  ;;  %v15334_v5 = vor.u32 %v16987_v47, %v15333_v55  ;;  %v15690_v58 = vor.u32 %v17073_v49, %v15687_v37  ;;  %v15622_v55 = vor.u32 %v17059_v31, %v15621_v43  ;;  %v15021_v47 = vld [vmem:[#allocation12 + $0x5a8] sm:$0xf]  ;;  %v17053_v49 = vld [vmem:[#allocation12 + $0xa3c] sm:$0xf0] }
 0x500   : > { %v16810_v37 = vld [vmem:[#allocation12 + $0x2ac] sm:$0xf]  ;;  %v17047_v60 = vld [vmem:[#allocation12 + $0xa0c] sm:$0xf0]  ;;  %v15525_v31 = vld [vmem:[#allocation12 + $0x998] sm:$0xf] }
 0x501   : > { %9860 = vmatmul.bf16.vlgmr.msrb.gmra.mxu3 %v18125_v40  ;;  %9990 = vmatmul.bf16.vlgmr.msra.gmra.mxu1 %v18064_v36  ;;  %v15574_v17 = vor.u32 %v17047_v60, %v15573_v18  ;;  %v16891_v34 = vld [vmem:[#allocation12 + $0x52c] sm:$0xf0]  ;;  %v16924_v18 = vld [vmem:[#allocation12 + $0x63c] sm:$0xf]  ;;  %v15095_v60 = vld [vmem:[#allocation12 + $0x650] sm:$0xf0] }
 0x502   : > { %v7425_v16 = vpop.f32.mrf.mxu3  ;;  %9956 = vmatpush.bf16.msrb.mxu3 %v15810_v8  ;;  %9995 = vmatpush.bf16.msra.mxu2 %v14854_v14  ;;  %v14378_v8 = vor.u32 %v16744_v52, %v14375_v42  ;;  %v14733_v14 = vld [vmem:[#allocation12 + $0x368] sm:$0xf]  ;;  %v16909_v52 = vld [vmem:[#allocation12 + $0x5bc] sm:$0xf0] }
 0x503   : > { %10034 = vmatpush.bf16.msrb.mxu1 %v15430_v1  ;;  %10073 = vmatpush.bf16.msra.mxu0 %v14474_v13  ;;  %v16981_v1 = vld [vmem:[#allocation12 + $0x7fc] sm:$0xf0]  ;;  %v16738_v13 = vld [vmem:[#allocation12 + $0x6c] sm:$0xf]  ;;  %v14734_v63 = vor.u32 %v16837_v56, %v14733_v14  ;;  %v15215_v56 = vld [vmem:[#allocation12 + $0x740] sm:$0xf0] }
 0x504   : > { %10029 = vmatmul.bf16.vlgmr.msrb.gmra.mxu0 %v18097_v26  ;;  %9951 = vmatmul.bf16.vlgmr.msrb.gmra.mxu2 %v18114_v0  ;;  %v15310_v61 = vor.u32 %v16981_v1, %v15309_v54  ;;  %v14354_v16 = vor.u32 %v16738_v13, %v14351_v57  ;;  %v16954_v14 = vld [vmem:[#allocation12 + $0x72c] sm:$0xf]  ;;  %v15022_v54 = vor.u32 %v16909_v52, %v15021_v47  ;;  %v14997_v13 = vld [vmem:[#allocation12 + $0x578] sm:$0xf]  ;;  %v16903_v57 = vld [vmem:[#allocation12 + $0x58c] sm:$0xf0] }
 0x505   : > { %v14998_v51 = vor.u32 %v16903_v57, %v14997_v13  ;;  %v15501_v47 = vld [vmem:[#allocation12 + $0x968] sm:$0xf]  ;;  %v17029_v52 = vld [vmem:[#allocation12 + $0x97c] sm:$0xf0]  ;;  %v15477_v13 = vld [vmem:[#allocation12 + $0x938] sm:$0xf] }
 0x506   : > { %9957 = vmatpush.bf16.msrb.mxu3 %v15786_v53  ;;  %9996 = vmatpush.bf16.msra.mxu2 %v14830_v59  ;;  %v14709_v53 = vld [vmem:[#allocation12 + $0x338] sm:$0xf]  ;;  %v16831_v59 = vld [vmem:[#allocation12 + $0x34c] sm:$0xf0] }
 0x507   : > { %10035 = vmatpush.bf16.msrb.mxu1 %v15406_v28  ;;  %10074 = vmatpush.bf16.msra.mxu0 %v14450_v21  ;;  %v16732_v28 = vld [vmem:[#allocation12 + $0x3c] sm:$0xf]  ;;  %v14327_v21 = vld [vmem:[#allocation12 + $0x50] sm:$0xf0]  ;;  %v14710_v27 = vor.u32 %v16831_v59, %v14709_v53  ;;  %v17023_v57 = vld [vmem:[#allocation12 + $0x94c] sm:$0xf0] }
 0x508   : > { %v14330_v7 = vor.u32 %v16732_v28, %v14327_v21  ;;  %v16948_v53 = vld [vmem:[#allocation12 + $0x6fc] sm:$0xf]  ;;  %v15191_v59 = vld [vmem:[#allocation12 + $0x710] sm:$0xf0]  ;;  %v14973_v28 = vld [vmem:[#allocation12 + $0x548] sm:$0xf] }
 0x509   : > { %v16897_v21 = vld [vmem:[#allocation12 + $0x55c] sm:$0xf0] }
 0x50a   : > { %9958 = vmatpush.bf16.msrb.mxu3 %v15762_v6  ;;  %9997 = vmatpush.bf16.msra.mxu2 %v14806_v33  ;;  %v16825_v6 = vld [vmem:[#allocation12 + $0x31c] sm:$0xf0] }
 0x50b   : > { %10036 = vmatpush.bf16.msrb.mxu1 %v15382_v38  ;;  %10075 = vmatpush.bf16.msra.mxu0 %v14426_v19  ;;  %v15261_v38 = vld [vmem:[#allocation12 + $0x788] sm:$0xf]  ;;  %v16969_v19 = vld [vmem:[#allocation12 + $0x79c] sm:$0xf0]  ;;  %v14686_v10 = vor.u32 %v16825_v6, %v14685_v62  ;;  %v14591_v6 = vld [vmem:[#allocation12 + $0x260] sm:$0xf0] }
 0x50e   : > { %9959 = vmatpush.bf16.msrb.mxu3 %v15738_v29  ;;  %9998 = vmatpush.bf16.msra.mxu2 %v14782_v30  ;;  %v16816_v29 = vld [vmem:[#allocation12 + $0x2dc] sm:$0xf]  ;;  %v15642_v30 = vor.u32 %v17061_v22, %v15639_v46  ;;  %v16798_v46 = vld [vmem:[#allocation12 + $0x24c] sm:$0xf] }
 0x50f   : > { %10037 = vmatpush.bf16.msrb.mxu1 %v15358_v15  ;;  %10076 = vmatpush.bf16.msra.mxu0 %v14402_v11  ;;  %v16960_v15 = vld [vmem:[#allocation12 + $0x75c] sm:$0xf]  ;;  %v15239_v11 = vld [vmem:[#allocation12 + $0x770] sm:$0xf0]  ;;  %v14666_v42 = vor.u32 %v16816_v29, %v14663_v44  ;;  %v14594_v32 = vor.u32 %v16798_v46, %v14591_v6  ;;  %v17035_v29 = vld [vmem:[#allocation12 + $0x9ac] sm:$0xf0] }
 0x510   : > { %v16936_v44 = vld [vmem:[#allocation12 + $0x69c] sm:$0xf]  ;;  %v15071_v46 = vld [vmem:[#allocation12 + $0x620] sm:$0xf0]  ;;  %v17107_v6 = vld [vmem:[#allocation12 + $0xbec] sm:$0xf0] }
 0x511   : > { %9912 = vmatmul.bf16.vlgmr.msra.gmra.mxu3 %v18090_v9 }
 0x512   : > { %9960 = vmatpush.bf16.msrb.mxu3 %v15714_v12  ;;  %9999 = vmatpush.bf16.msra.mxu2 %v14758_v25  ;;  %v15242_v12 = vor.u32 %v16960_v15, %v15239_v11  ;;  %v15597_v25 = vld [vmem:[#allocation12 + $0xa28] sm:$0xf]  ;;  %v15143_v15 = vld [vmem:[#allocation12 + $0x6b0] sm:$0xf0]  ;;  %v15526_v11 = vor.u32 %v17035_v29, %v15525_v31 }
 0x513   : > { %10038 = vmatpush.bf16.msrb.mxu1 %v15334_v5  ;;  %10077 = vmatpush.bf16.msra.mxu0 %v14378_v8  ;;  %v14639_v8 = vld [vmem:[#allocation12 + $0x2c0] sm:$0xf0]  ;;  %v15598_v1 = vor.u32 %v17053_v49, %v15597_v25  ;;  %v16930_v49 = vld [vmem:[#allocation12 + $0x66c] sm:$0xf] }
 0x514   : > { %v14543_v25 = vld [vmem:[#allocation12 + $0x200] sm:$0xf0] }
 0x516   : > { %9961 = vmatpush.bf16.msrb.mxu3 %v15690_v58  ;;  %10000 = vmatpush.bf16.msra.mxu2 %v14734_v63  ;;  %v14642_v58 = vor.u32 %v16810_v37, %v14639_v8  ;;  %v15218_v63 = vor.u32 %v16954_v14, %v15215_v56  ;;  %v15119_v37 = vld [vmem:[#allocation12 + $0x680] sm:$0xf0]  ;;  %v15502_v8 = vor.u32 %v17029_v52, %v15501_v47  ;;  %v14901_v14 = vld [vmem:[#allocation12 + $0x4b8] sm:$0xf]  ;;  %v16879_v56 = vld [vmem:[#allocation12 + $0x4cc] sm:$0xf0] }
 0x517   : > { %10039 = vmatpush.bf16.msrb.mxu1 %v15310_v61  ;;  %10078 = vmatpush.bf16.msra.mxu0 %v14354_v16  ;;  %v16804_v61 = vld [vmem:[#allocation12 + $0x27c] sm:$0xf]  ;;  %v14615_v16 = vld [vmem:[#allocation12 + $0x290] sm:$0xf0]  ;;  %v14453_v47 = vld [vmem:[#allocation12 + $0x130] sm:$0xf] }
 0x518   : > { %v14618_v22 = vor.u32 %v16804_v61, %v14615_v16  ;;  %v14877_v61 = vld [vmem:[#allocation12 + $0x488] sm:$0xf]  ;;  %v14902_v16 = vor.u32 %v16879_v56, %v14901_v14  ;;  %v16852_v14 = vld [vmem:[#allocation12 + $0x3fc] sm:$0xf]  ;;  %v14807_v56 = vld [vmem:[#allocation12 + $0x410] sm:$0xf0] }
 0x519   : > { %v16766_v52 = vld [vmem:[#allocation12 + $0x144] sm:$0xf0] }
 0x51a   : > { %v9809_v24 = vpop.f32.mrf.mxu3  ;;  %9962 = vmatpush.bf16.msrb.mxu3 %v15666_v35  ;;  %10001 = vmatpush.bf16.msra.mxu2 %v14710_v27  ;;  %v15549_v35 = vld [vmem:[#allocation12 + $0x9c8] sm:$0xf]  ;;  %v17041_v27 = vld [vmem:[#allocation12 + $0x9dc] sm:$0xf0] }
 0x51b   : > { %v18133_v33 = vadd.f32 %v9809_v24, %v18120_v45  ;;  %10040 = vmatpush.bf16.msrb.mxu1 %v15286_v3  ;;  %10079 = vmatpush.bf16.msra.mxu0 %v14330_v7  ;;  %v15262_v45 = vor.u32 %v16969_v19, %v15261_v38  ;;  %v15194_v24 = vor.u32 %v16948_v53, %v15191_v59  ;;  %v16942_v3 = vld [vmem:[#allocation12 + $0x6cc] sm:$0xf]  ;;  %v15167_v7 = vld [vmem:[#allocation12 + $0x6e0] sm:$0xf0]  ;;  %v16873_v59 = vld [vmem:[#allocation12 + $0x49c] sm:$0xf0] }
 0x51c   : > { %v14974_v19 = vor.u32 %v16897_v21, %v14973_v28  ;;  %v15550_v39 = vor.u32 %v17041_v27, %v15549_v35  ;;  %v15170_v43 = vor.u32 %v16942_v3, %v15167_v7  ;;  %v15478_v53 = vor.u32 %v17023_v57, %v15477_v13  ;;  %v16918_v35 = vld [vmem:[#allocation12 + $0x60c] sm:$0xf]  ;;  %v16864_v3 = vld [vmem:[#allocation12 + $0x45c] sm:$0xf]  ;;  %v14855_v7 = vld [vmem:[#allocation12 + $0x470] sm:$0xf0] }
 0x51d   : > { %v15098_v21 = vor.u32 %v16924_v18, %v15095_v60  ;;  %v15074_v29 = vor.u32 %v16918_v35, %v15071_v46  ;;  %v14429_v13 = vld [vmem:[#allocation12 + $0x100] sm:$0xf]  ;;  %v16760_v57 = vld [vmem:[#allocation12 + $0x114] sm:$0xf0]  ;;  %v15741_v18 = vld [vmem:[#allocation12 + $0xb48] sm:$0xf] }
 0x51e   : > { %9963 = vmatpush.bf16.msrb.mxu3 %v15642_v30  ;;  %10002 = vmatpush.bf16.msra.mxu2 %v14686_v10  ;;  %v9822_v62 = vpop.f32.mrf.mxu0  ;;  %v16792_v30 = vld [vmem:[#allocation12 + $0x21c] sm:$0xf]  ;;  %v14567_v10 = vld [vmem:[#allocation12 + $0x230] sm:$0xf0]  ;;  %v17089_v60 = vld [vmem:[#allocation12 + $0xb5c] sm:$0xf0] }
 0x51f   : > { %10041 = vmatpush.bf16.msrb.mxu1 %v15262_v45  ;;  %10080 = vmatpush.bf16.msra.mxu0 %v14306_v48  ;;  %v18140_v38 = vadd.f32 %v9822_v62, %v18133_v33  ;;  %v14950_v33 = vor.u32 %v16891_v34, %v14949_v41  ;;  %v14925_v45 = vld [vmem:[#allocation12 + $0x4e8] sm:$0xf]  ;;  %v16885_v48 = vld [vmem:[#allocation12 + $0x4fc] sm:$0xf0]  ;;  %v15813_v62 = vld [vmem:[#allocation12 + $0xbd8] sm:$0xf]  ;;  %v15742_v46 = vor.u32 %v17089_v60, %v15741_v18 }
 0x520   : > { %v15431_v34 = vld [vmem:[#allocation12 + $0x8f0] sm:$0xf0] }
 0x521   : > { %10003 = vmatmul.bf16.vlgmr.msra.gmra.mxu2 %v18079_v50  ;;  %9964 = vmatmul.bf16.vlgmr.msrb.gmra.mxu3 %v18125_v40 }
 0x522   : > { %v9811_v5 = vpop.f32.mrf.mxu3  ;;  %10008 = vmatpush.bf16.msra.mxu3 %v15046_v2  ;;  %10047 = vmatpush.bf16.msrb.mxu2 %v15622_v55  ;;  %v14570_v2 = vor.u32 %v16792_v30, %v14567_v10  ;;  %v15146_v55 = vor.u32 %v16936_v44, %v15143_v15  ;;  %v15814_v30 = vor.u32 %v17107_v6, %v15813_v62  ;;  %v15789_v44 = vld [vmem:[#allocation12 + $0xba8] sm:$0xf]  ;;  %v17101_v15 = vld [vmem:[#allocation12 + $0xbbc] sm:$0xf0]  ;;  %v15717_v6 = vld [vmem:[#allocation12 + $0xb18] sm:$0xf] }
 0x523   : > { %10086 = vmatpush.bf16.msra.mxu1 %v14666_v42  ;;  %10125 = vmatpush.bf16.msrb.mxu0 %v15242_v12  ;;  %v16786_v42 = vld [vmem:[#allocation12 + $0x1ec] sm:$0xf]  ;;  %v14926_v5 = vor.u32 %v16885_v48, %v14925_v45  ;;  %v14858_v10 = vor.u32 %v16864_v3, %v14855_v7  ;;  %v14831_v48 = vld [vmem:[#allocation12 + $0x440] sm:$0xf0]  ;;  %v17083_v3 = vld [vmem:[#allocation12 + $0xb2c] sm:$0xf0] }
 0x524   : > { %10042 = vmatmul.bf16.vlgmr.msrb.gmra.mxu1 %v18105_v4  ;;  %10081 = vmatmul.bf16.vlgmr.msra.gmra.mxu0 %v18058_v20  ;;  %v16858_v45 = vld [vmem:[#allocation12 + $0x42c] sm:$0xf] }
 0x526   : > { %10009 = vmatpush.bf16.msra.mxu3 %v15022_v54  ;;  %10048 = vmatpush.bf16.msrb.mxu2 %v15598_v1  ;;  %v9824_v12 = vpop.f32.mrf.mxu0  ;;  %v14546_v54 = vor.u32 %v16786_v42, %v14543_v25  ;;  %v15122_v1 = vor.u32 %v16930_v49, %v15119_v37  ;;  %v14834_v25 = vor.u32 %v16858_v45, %v14831_v48  ;;  %v15765_v49 = vld [vmem:[#allocation12 + $0xb78] sm:$0xf]  ;;  %v17095_v37 = vld [vmem:[#allocation12 + $0xb8c] sm:$0xf0]  ;;  %v14735_v45 = vld [vmem:[#allocation12 + $0x380] sm:$0xf0] }
 0x527   : > { %10087 = vmatpush.bf16.msra.mxu1 %v14642_v58  ;;  %10126 = vmatpush.bf16.msrb.mxu0 %v15218_v63  ;;  %v16780_v58 = vld [vmem:[#allocation12 + $0x1bc] sm:$0xf]  ;;  %v14519_v63 = vld [vmem:[#allocation12 + $0x1d0] sm:$0xf0]  ;;  %v15790_v12 = vor.u32 %v17101_v15, %v15789_v44  ;;  %v16978_v48 = vld [vmem:[#allocation12 + $0x7ec] sm:$0xf] }
 0x528   : > { %v14522_v28 = vor.u32 %v16780_v58, %v14519_v63  ;;  %v15766_v58 = vor.u32 %v17095_v37, %v15765_v49  ;;  %v14810_v63 = vor.u32 %v16852_v14, %v14807_v56  ;;  %v15669_v37 = vld [vmem:[#allocation12 + $0xab8] sm:$0xf]  ;;  %v16828_v56 = vld [vmem:[#allocation12 + $0x33c] sm:$0xf] }
 0x52a   : > { %10010 = vmatpush.bf16.msra.mxu3 %v14998_v51  ;;  %10049 = vmatpush.bf16.msrb.mxu2 %v15574_v17  ;;  %v15453_v51 = vld [vmem:[#allocation12 + $0x908] sm:$0xf]  ;;  %v17017_v17 = vld [vmem:[#allocation12 + $0x91c] sm:$0xf0] }
 0x52b   : > { %10088 = vmatpush.bf16.msra.mxu1 %v14618_v22  ;;  %10127 = vmatpush.bf16.msrb.mxu0 %v15194_v24  ;;  %v16774_v22 = vld [vmem:[#allocation12 + $0x18c] sm:$0xf]  ;;  %v14495_v24 = vld [vmem:[#allocation12 + $0x1a0] sm:$0xf0]  ;;  %v15454_v41 = vor.u32 %v17017_v17, %v15453_v51 }
 0x52c   : > { %v14498_v31 = vor.u32 %v16774_v22, %v14495_v24  ;;  %v14783_v51 = vld [vmem:[#allocation12 + $0x3e0] sm:$0xf0]  ;;  %v16990_v17 = vld [vmem:[#allocation12 + $0x84c] sm:$0xf]  ;;  %v14405_v22 = vld [vmem:[#allocation12 + $0xd0] sm:$0xf] }
 0x52d   : > { %v16754_v24 = vld [vmem:[#allocation12 + $0xe4] sm:$0xf0] }
 0x52e   : > { %10011 = vmatpush.bf16.msra.mxu3 %v14974_v19  ;;  %10050 = vmatpush.bf16.msrb.mxu2 %v15550_v39  ;;  %v18142_v27 = vpop.f32.mrf.mxu0  ;;  %v17008_v19 = vld [vmem:[#allocation12 + $0x8dc] sm:$0xf]  ;;  %v14878_v39 = vor.u32 %v16873_v59, %v14877_v61  ;;  %v16846_v59 = vld [vmem:[#allocation12 + $0x3cc] sm:$0xf] }
 0x52f   : > { %10089 = vmatpush.bf16.msra.mxu1 %v14594_v32  ;;  %10128 = vmatpush.bf16.msrb.mxu0 %v15170_v43  ;;  %v14477_v32 = vld [vmem:[#allocation12 + $0x160] sm:$0xf]  ;;  %v16772_v43 = vld [vmem:[#allocation12 + $0x174] sm:$0xf0]  ;;  %v14786_v62 = vor.u32 %v16846_v59, %v14783_v51  ;;  %v14687_v59 = vld [vmem:[#allocation12 + $0x320] sm:$0xf0] }
 0x532   : > { %10012 = vmatpush.bf16.msra.mxu3 %v14950_v33  ;;  %10051 = vmatpush.bf16.msrb.mxu2 %v15526_v11  ;;  %v15434_v33 = vor.u32 %v17008_v19, %v15431_v34  ;;  %v14478_v11 = vor.u32 %v16772_v43, %v14477_v32  ;;  %v14406_v19 = vor.u32 %v16754_v24, %v14405_v22  ;;  %v16984_v34 = vld [vmem:[#allocation12 + $0x81c] sm:$0xf]  ;;  %v14381_v32 = vld [vmem:[#allocation12 + $0xa0] sm:$0xf]  ;;  %v16748_v43 = vld [vmem:[#allocation12 + $0xb4] sm:$0xf0] }
 0x533   : > { %10090 = vmatpush.bf16.msra.mxu1 %v14570_v2  ;;  %10129 = vmatpush.bf16.msrb.mxu0 %v15146_v55  ;;  %v17002_v2 = vld [vmem:[#allocation12 + $0x8ac] sm:$0xf]  ;;  %v15407_v55 = vld [vmem:[#allocation12 + $0x8c0] sm:$0xf0]  ;;  %v14382_v15 = vor.u32 %v16748_v43, %v14381_v32  ;;  %v15245_v32 = vld [vmem:[#allocation12 + $0x760] sm:$0xf] }
 0x534   : > { %v16966_v22 = vld [vmem:[#allocation12 + $0x78c] sm:$0xf]  ;;  %v15263_v24 = vld [vmem:[#allocation12 + $0x7a0] sm:$0xf0]  ;;  %v16964_v43 = vld [vmem:[#allocation12 + $0x774] sm:$0xf0] }
 0x536   : > { %10013 = vmatpush.bf16.msra.mxu3 %v14926_v5  ;;  %10052 = vmatpush.bf16.msrb.mxu2 %v15502_v8  ;;  %v9876_v42 = vpop.f32.mrf.mxu0  ;;  %v15410_v5 = vor.u32 %v17002_v2, %v15407_v55  ;;  %v14454_v8 = vor.u32 %v16766_v52, %v14453_v47  ;;  %v15311_v2 = vld [vmem:[#allocation12 + $0x800] sm:$0xf0]  ;;  %v14357_v55 = vld [vmem:[#allocation12 + $0x70] sm:$0xf]  ;;  %v16742_v47 = vld [vmem:[#allocation12 + $0x84] sm:$0xf0] }
 0x537   : > { %10091 = vmatpush.bf16.msra.mxu1 %v14546_v54  ;;  %10130 = vmatpush.bf16.msrb.mxu0 %v15122_v1  ;;  %v16996_v54 = vld [vmem:[#allocation12 + $0x87c] sm:$0xf]  ;;  %v15383_v1 = vld [vmem:[#allocation12 + $0x890] sm:$0xf0]  ;;  %v18153_v52 = vld [vmem:[#allocation13] sm:$0x3f]  ;;  %v14358_v14 = vor.u32 %v16742_v47, %v14357_v55 }
 0x538   : > { %v15386_v61 = vor.u32 %v16996_v54, %v15383_v1  ;;  %v9750_v42 = vperm.slane %v18153_v52, 1  ;;  %v14711_v54 = vld [vmem:[#allocation12 + $0x350] sm:$0xf0]  ;;  %v16972_v1 = vld [vmem:[#allocation12 + $0x7bc] sm:$0xf] }
 0x539   : > { %v16814_v55 = vld [vmem:[#allocation12 + $0x2c4] sm:$0xf0]  ;;  %v15221_v47 = vld [vmem:[#allocation12 + $0x730] sm:$0xf] }
 0x53a   : > { %10014 = vmatpush.bf16.msra.mxu3 %v14902_v16  ;;  %10053 = vmatpush.bf16.msrb.mxu2 %v15478_v53  ;;  %v14430_v16 = vor.u32 %v16760_v57, %v14429_v13  ;;  %v15287_v13 = vld [vmem:[#allocation12 + $0x7d0] sm:$0xf0]  ;;  %v14333_v57 = vld [vmem:[#allocation12 + $0x40] sm:$0xf]  ;;  %v9875_v18 = vadd.f32 %v18142_v27, %v9750_v42  ;;  %v16958_v42 = vld [vmem:[#allocation12 + $0x744] sm:$0xf0] }
 0x53b   : > { %10092 = vmatpush.bf16.msra.mxu1 %v14522_v28  ;;  %10131 = vmatpush.bf16.msrb.mxu0 %v15098_v21  ;;  %v15359_v21 = vld [vmem:[#allocation12 + $0x860] sm:$0xf0]  ;;  %v15290_v51 = vor.u32 %v16972_v1, %v15287_v13  ;;  %v15047_v27 = vld [vmem:[#allocation12 + $0x5f0] sm:$0xf0]  ;;  %v14621_v1 = vld [vmem:[#allocation12 + $0x280] sm:$0xf] }
 0x53c   : > { %v15362_v7 = vor.u32 %v16990_v17, %v15359_v21  ;;  %v16808_v13 = vld [vmem:[#allocation12 + $0x294] sm:$0xf0] }
 0x53e   : > { %10015 = vmatpush.bf16.msra.mxu3 %v14878_v39  ;;  %10054 = vmatpush.bf16.msrb.mxu2 %v15454_v41  ;;  %v9835_v53 = vpop.f32.mrf.mxu1  ;;  %v18151_v35 = vpop.f32.mrf.mxu0  ;;  %v16840_v39 = vld [vmem:[#allocation12 + $0x39c] sm:$0xf]  ;;  %v14759_v41 = vld [vmem:[#allocation12 + $0x3b0] sm:$0xf0] }
 0x53f   : > { %10093 = vmatpush.bf16.msra.mxu1 %v14498_v31  ;;  %10132 = vmatpush.bf16.msrb.mxu0 %v15074_v29  ;;  %v18149_v28 = vadd.f32 %v9835_v53, %v18140_v38  ;;  %v15335_v38 = vld [vmem:[#allocation12 + $0x830] sm:$0xf0]  ;;  %v15718_v31 = vor.u32 %v17083_v3, %v15717_v6  ;;  %v14762_v29 = vor.u32 %v16840_v39, %v14759_v41  ;;  %v16822_v53 = vld [vmem:[#allocation12 + $0x30c] sm:$0xf]  ;;  %v16730_v6 = vld [vmem:[#allocation12 + $0x24] sm:$0xf0] }
 0x540   : > { %v15338_v44 = vor.u32 %v16984_v34, %v15335_v38  ;;  %v16912_v3 = vld [vmem:[#allocation12 + $0x5dc] sm:$0xf]  ;;  %v14669_v39 = vld [vmem:[#allocation12 + $0x2e0] sm:$0xf]  ;;  %v14690_v34 = vor.u32 %v16822_v53, %v14687_v59  ;;  %v16820_v38 = vld [vmem:[#allocation12 + $0x2f4] sm:$0xf0] }
 0x541   : > { %10016 = vmatmul.bf16.vlgmr.msra.gmra.mxu3 %v18090_v9  ;;  %10055 = vmatmul.bf16.vlgmr.msrb.gmra.mxu2 %v18114_v0  ;;  %v17038_v59 = vld [vmem:[#allocation12 + $0x9cc] sm:$0xf] }
 0x542   : > { %10060 = vmatpush.bf16.msrb.mxu3 %v15814_v30  ;;  %10099 = vmatpush.bf16.msra.mxu2 %v14858_v10  ;;  %v15693_v30 = vld [vmem:[#allocation12 + $0xae8] sm:$0xf]  ;;  %v17077_v10 = vld [vmem:[#allocation12 + $0xafc] sm:$0xf0] }
 0x543   : > { %10138 = vmatpush.bf16.msrb.mxu1 %v15434_v33  ;;  %10177 = vmatpush.bf16.msra.mxu0 %v14478_v11  ;;  %v16834_v11 = vld [vmem:[#allocation12 + $0x36c] sm:$0xf] }
 0x544   : > { %10094 = vmatmul.bf16.vlgmr.msra.gmra.mxu1 %v18064_v36  ;;  %10133 = vmatmul.bf16.vlgmr.msrb.gmra.mxu0 %v18097_v26  ;;  %v14738_v49 = vor.u32 %v16834_v11, %v14735_v45  ;;  %v15246_v11 = vor.u32 %v16964_v43, %v15245_v32  ;;  %v17050_v45 = vld [vmem:[#allocation12 + $0xa2c] sm:$0xf]  ;;  %v14573_v32 = vld [vmem:[#allocation12 + $0x220] sm:$0xf]  ;;  %v16796_v43 = vld [vmem:[#allocation12 + $0x234] sm:$0xf0] }
 0x546   : > { %10061 = vmatpush.bf16.msrb.mxu3 %v15790_v12  ;;  %10100 = vmatpush.bf16.msra.mxu2 %v14834_v25  ;;  %v9837_v33 = vpop.f32.mrf.mxu1  ;;  %v9928_v12 = vpop.f32.mrf.mxu0  ;;  %v15694_v25 = vor.u32 %v17077_v10, %v15693_v30  ;;  %v15050_v30 = vor.u32 %v16912_v3, %v15047_v27 }
 0x547   : > { %10139 = vmatpush.bf16.msrb.mxu1 %v15410_v5  ;;  %10178 = vmatpush.bf16.msra.mxu0 %v14454_v8  ;;  %v17071_v5 = vld [vmem:[#allocation12 + $0xacc] sm:$0xf0]  ;;  %v15314_v8 = vor.u32 %v16978_v48, %v15311_v2  ;;  %v14670_v33 = vor.u32 %v16820_v38, %v14669_v39  ;;  %v15599_v48 = vld [vmem:[#allocation12 + $0xa40] sm:$0xf0]  ;;  %v15527_v38 = vld [vmem:[#allocation12 + $0x9b0] sm:$0xf0] }
 0x548   : > { %v15670_v60 = vor.u32 %v17071_v5, %v15669_v37  ;;  %v14645_v2 = vld [vmem:[#allocation12 + $0x2b0] sm:$0xf]  ;;  %v16900_v37 = vld [vmem:[#allocation12 + $0x57c] sm:$0xf]  ;;  %v14999_v5 = vld [vmem:[#allocation12 + $0x590] sm:$0xf0] }
 0x54a   : > { %10062 = vmatpush.bf16.msrb.mxu3 %v15766_v58  ;;  %10101 = vmatpush.bf16.msra.mxu2 %v14810_v63  ;;  %v16736_v58 = vld [vmem:[#allocation12 + $0x54] sm:$0xf0]  ;;  %v15645_v63 = vld [vmem:[#allocation12 + $0xa88] sm:$0xf] }
 0x54b   : > { %10140 = vmatpush.bf16.msrb.mxu1 %v15386_v61  ;;  %10179 = vmatpush.bf16.msra.mxu0 %v14430_v16  ;;  %v14714_v61 = vor.u32 %v16828_v56, %v14711_v54  ;;  %v17065_v16 = vld [vmem:[#allocation12 + $0xa9c] sm:$0xf0]  ;;  %v14334_v17 = vor.u32 %v16736_v58, %v14333_v57  ;;  %v17044_v56 = vld [vmem:[#allocation12 + $0x9fc] sm:$0xf]  ;;  %v15575_v54 = vld [vmem:[#allocation12 + $0xa10] sm:$0xf0] }
 0x54c   : > { %v15646_v41 = vor.u32 %v17065_v16, %v15645_v63  ;;  %v15197_v57 = vld [vmem:[#allocation12 + $0x700] sm:$0xf]  ;;  %v16952_v58 = vld [vmem:[#allocation12 + $0x714] sm:$0xf0]  ;;  %v15002_v63 = vor.u32 %v16900_v37, %v14999_v5  ;;  %v14622_v16 = vor.u32 %v16808_v13, %v14621_v1  ;;  %v17020_v1 = vld [vmem:[#allocation12 + $0x93c] sm:$0xf] }
 0x54d   : > { %v15198_v53 = vor.u32 %v16952_v58, %v15197_v57  ;;  %v15479_v13 = vld [vmem:[#allocation12 + $0x950] sm:$0xf0]  ;;  %v14525_v57 = vld [vmem:[#allocation12 + $0x1c0] sm:$0xf]  ;;  %v16784_v58 = vld [vmem:[#allocation12 + $0x1d4] sm:$0xf0] }
 0x54e   : > { %10063 = vmatpush.bf16.msrb.mxu3 %v15742_v46  ;;  %10102 = vmatpush.bf16.msra.mxu2 %v14786_v62  ;;  %v9887_v21 = vpop.f32.mrf.mxu1  ;;  %v14309_v46 = vld [vmem:[#allocation12 + $0x10] sm:$0xf] }
 0x54f   : > { %10141 = vmatpush.bf16.msrb.mxu1 %v15362_v7  ;;  %10180 = vmatpush.bf16.msra.mxu0 %v14406_v19  ;;  %v18157_v62 = vadd.f32 %v9887_v21, %v9875_v18  ;;  %v17056_v7 = vld [vmem:[#allocation12 + $0xa5c] sm:$0xf]  ;;  %v15623_v19 = vld [vmem:[#allocation12 + $0xa70] sm:$0xf0]  ;;  %v15578_v18 = vor.u32 %v17044_v56, %v15575_v54  ;;  %v16802_v21 = vld [vmem:[#allocation12 + $0x264] sm:$0xf0] }
 0x550   : > { %v15626_v10 = vor.u32 %v17056_v7, %v15623_v19  ;;  %v16888_v7 = vld [vmem:[#allocation12 + $0x51c] sm:$0xf]  ;;  %v14951_v19 = vld [vmem:[#allocation12 + $0x530] sm:$0xf0] }
 0x552   : > { %10064 = vmatpush.bf16.msrb.mxu3 %v15718_v31  ;;  %10103 = vmatpush.bf16.msra.mxu2 %v14762_v29  ;;  %v15266_v31 = vor.u32 %v16966_v22, %v15263_v24  ;;  %v14310_v29 = vor.u32 %v16730_v6, %v14309_v46  ;;  %v15173_v22 = vld [vmem:[#allocation12 + $0x6d0] sm:$0xf]  ;;  %v16946_v24 = vld [vmem:[#allocation12 + $0x6e4] sm:$0xf0] }
 0x553   : > { %10142 = vmatpush.bf16.msrb.mxu1 %v15338_v44  ;;  %10181 = vmatpush.bf16.msra.mxu0 %v14382_v15  ;;  %v16906_v44 = vld [vmem:[#allocation12 + $0x5ac] sm:$0xf]  ;;  %v15023_v15 = vld [vmem:[#allocation12 + $0x5c0] sm:$0xf0] }
 0x556   : > { %10065 = vmatpush.bf16.msrb.mxu3 %v15694_v25  ;;  %10104 = vmatpush.bf16.msra.mxu2 %v14738_v49  ;;  %v9889_v12 = vpop.f32.mrf.mxu1  ;;  %v15026_v25 = vor.u32 %v16906_v44, %v15023_v15  ;;  %v15602_v49 = vor.u32 %v17050_v45, %v15599_v48  ;;  %v14954_v44 = vor.u32 %v16888_v7, %v14951_v19  ;;  %v16922_v7 = vld [vmem:[#allocation12 + $0x624] sm:$0xf0]  ;;  %v17104_v19 = vld [vmem:[#allocation12 + $0xbdc] sm:$0xf] }
 0x557   : > { %10143 = vmatpush.bf16.msrb.mxu1 %v15314_v8  ;;  %10182 = vmatpush.bf16.msra.mxu0 %v14358_v14  ;;  %v14646_v8 = vor.u32 %v16814_v55, %v14645_v2  ;;  %v15222_v14 = vor.u32 %v16958_v42, %v15221_v47  ;;  %v14574_v45 = vor.u32 %v16796_v43, %v14573_v32  ;;  %v17026_v2 = vld [vmem:[#allocation12 + $0x96c] sm:$0xf]  ;;  %v15503_v55 = vld [vmem:[#allocation12 + $0x980] sm:$0xf0]  ;;  %v14549_v47 = vld [vmem:[#allocation12 + $0x1f0] sm:$0xf] }
 0x558   : > { %v16790_v42 = vld [vmem:[#allocation12 + $0x204] sm:$0xf0]  ;;  %v15125_v12 = vld [vmem:[#allocation12 + $0x670] sm:$0xf]  ;;  %v15506_v5 = vor.u32 %v17026_v2, %v15503_v55 }
 0x559   : > { %v14550_v56 = vor.u32 %v16790_v42, %v14549_v47  ;;  %v14837_v42 = vld [vmem:[#allocation12 + $0x430] sm:$0xf] }
 0x55a   : > { %10066 = vmatpush.bf16.msrb.mxu3 %v15670_v60  ;;  %10105 = vmatpush.bf16.msra.mxu2 %v14714_v61  ;;  %v16894_v60 = vld [vmem:[#allocation12 + $0x54c] sm:$0xf]  ;;  %v14975_v61 = vld [vmem:[#allocation12 + $0x560] sm:$0xf0] }
 0x55b   : > { %10144 = vmatpush.bf16.msrb.mxu1 %v15290_v51  ;;  %10183 = vmatpush.bf16.msra.mxu0 %v14334_v17  ;;  %v15551_v51 = vld [vmem:[#allocation12 + $0x9e0] sm:$0xf0]  ;;  %v14597_v17 = vld [vmem:[#allocation12 + $0x250] sm:$0xf]  ;;  %v14978_v3 = vor.u32 %v16894_v60, %v14975_v61  ;;  %v16870_v61 = vld [vmem:[#allocation12 + $0x48c] sm:$0xf] }
 0x55c   : > { %v15554_v27 = vor.u32 %v17038_v59, %v15551_v51  ;;  %v14598_v39 = vor.u32 %v16802_v21, %v14597_v17  ;;  %v14879_v59 = vld [vmem:[#allocation12 + $0x4a0] sm:$0xf0]  ;;  %v17014_v51 = vld [vmem:[#allocation12 + $0x90c] sm:$0xf]  ;;  %v14526_v21 = vor.u32 %v16784_v58, %v14525_v57  ;;  %v14813_v58 = vld [vmem:[#allocation12 + $0x400] sm:$0xf] }
 0x55d   : > { %v15455_v17 = vld [vmem:[#allocation12 + $0x920] sm:$0xf0]  ;;  %v14882_v32 = vor.u32 %v16870_v61, %v14879_v59 }
 0x55e   : > { %10067 = vmatpush.bf16.msrb.mxu3 %v15646_v41  ;;  %10106 = vmatpush.bf16.msra.mxu2 %v14690_v34  ;;  %v18163_v46 = vpop.f32.mrf.mxu0  ;;  %v15174_v41 = vor.u32 %v16946_v24, %v15173_v22  ;;  %v17032_v34 = vld [vmem:[#allocation12 + $0x99c] sm:$0xf]  ;;  %v14501_v24 = vld [vmem:[#allocation12 + $0x190] sm:$0xf]  ;;  %v15458_v43 = vor.u32 %v17014_v51, %v15455_v17  ;;  %v15743_v59 = vld [vmem:[#allocation12 + $0xb60] sm:$0xf0] }
 0x55f   : > { %10145 = vmatpush.bf16.msrb.mxu1 %v15266_v31  ;;  %10184 = vmatpush.bf16.msra.mxu0 %v14310_v29  ;;  %v15149_v31 = vld [vmem:[#allocation12 + $0x6a0] sm:$0xf]  ;;  %v16940_v29 = vld [vmem:[#allocation12 + $0x6b4] sm:$0xf0]  ;;  %v15530_v15 = vor.u32 %v17032_v34, %v15527_v38 }
 0x560   : > { %v18165_v6 = vpop.f32.mrf.mxu1  ;;  %v15150_v48 = vor.u32 %v16940_v29, %v15149_v31  ;;  %v16868_v34 = vld [vmem:[#allocation12 + $0x474] sm:$0xf0]  ;;  %v15437_v38 = vld [vmem:[#allocation12 + $0x8e0] sm:$0xf]  ;;  %v16769_v29 = vld [vmem:[#allocation12 + $0x164] sm:$0xf] }
 0x561   : > { %10068 = vmatmul.bf16.vlgmr.msrb.gmra.mxu3 %v18125_v40  ;;  %10107 = vmatmul.bf16.vlgmr.msra.gmra.mxu2 %v18079_v50  ;;  %v17012_v31 = vld [vmem:[#allocation12 + $0x8f4] sm:$0xf0] }
 0x562   : > { %10112 = vmatpush.bf16.msra.mxu3 %v15050_v30  ;;  %10151 = vmatpush.bf16.msrb.mxu2 %v15626_v10  ;;  %v15438_v2 = vor.u32 %v17012_v31, %v15437_v38  ;;  %v17080_v31 = vld [vmem:[#allocation12 + $0xb1c] sm:$0xf] }
 0x563   : > { %10190 = vmatpush.bf16.msra.mxu1 %v14670_v33  ;;  %10229 = vmatpush.bf16.msrb.mxu0 %v15246_v11  ;;  %v16882_v33 = vld [vmem:[#allocation12 + $0x4ec] sm:$0xf]  ;;  %v14927_v11 = vld [vmem:[#allocation12 + $0x500] sm:$0xf0] }
 0x564   : > { %10146 = vmatmul.bf16.vlgmr.msrb.gmra.mxu1 %v18105_v4  ;;  %10185 = vmatmul.bf16.vlgmr.msra.gmra.mxu0 %v18058_v20  ;;  %v9848_v30 = vpop.f32.mrf.mxu2 }
 0x565   : > { %v18168_v10 = vadd.f32 %v9848_v30, %v18149_v28  ;;  %v14930_v28 = vor.u32 %v16882_v33, %v14927_v11  ;;  %v14479_v30 = vld [vmem:[#allocation12 + $0x178] sm:$0xf0] }
 0x566   : > { %10113 = vmatpush.bf16.msra.mxu3 %v15026_v25  ;;  %10152 = vmatpush.bf16.msrb.mxu2 %v15602_v49  ;;  %v16934_v25 = vld [vmem:[#allocation12 + $0x684] sm:$0xf0]  ;;  %v9980_v49 = vpop.f32.mrf.mxu0  ;;  %v14482_v55 = vor.u32 %v16769_v29, %v14479_v30  ;;  %v15719_v29 = vld [vmem:[#allocation12 + $0xb30] sm:$0xf0] }
 0x567   : > { %10191 = vmatpush.bf16.msra.mxu1 %v14646_v8  ;;  %10230 = vmatpush.bf16.msrb.mxu0 %v15222_v14  ;;  %v16876_v8 = vld [vmem:[#allocation12 + $0x4bc] sm:$0xf]  ;;  %v14903_v14 = vld [vmem:[#allocation12 + $0x4d0] sm:$0xf0]  ;;  %v15126_v54 = vor.u32 %v16934_v25, %v15125_v12  ;;  %v16862_v12 = vld [vmem:[#allocation12 + $0x444] sm:$0xf0] }
 0x568   : > { %v9941_v37 = vpop.f32.mrf.mxu1  ;;  %v15413_v25 = vld [vmem:[#allocation12 + $0x8b0] sm:$0xf] }
 0x569   : > { %v17006_v37 = vld [vmem:[#allocation12 + $0x8c4] sm:$0xf0] }
 0x56a   : > { %10114 = vmatpush.bf16.msra.mxu3 %v15002_v63  ;;  %10153 = vmatpush.bf16.msrb.mxu2 %v15578_v18  ;;  %v15101_v63 = vld [vmem:[#allocation12 + $0x640] sm:$0xf]  ;;  %v16928_v18 = vld [vmem:[#allocation12 + $0x654] sm:$0xf0] }
 0x56b   : > { %10192 = vmatpush.bf16.msra.mxu1 %v14622_v16  ;;  %10231 = vmatpush.bf16.msrb.mxu0 %v15198_v53  ;;  %v14906_v16 = vor.u32 %v16876_v8, %v14903_v14  ;;  %v15482_v53 = vor.u32 %v17020_v1, %v15479_v13  ;;  %v15102_v22 = vor.u32 %v16928_v18, %v15101_v63  ;;  %v9751_v8 = vperm.slane %v18153_v52, 2  ;;  %v15767_v1 = vld [vmem:[#allocation12 + $0xb90] sm:$0xf0]  ;;  %v15389_v63 = vld [vmem:[#allocation12 + $0x880] sm:$0xf] }
 0x56c   : > { %v9850_v60 = vpop.f32.mrf.mxu2  ;;  %v15414_v13 = vor.u32 %v17006_v37, %v15413_v25  ;;  %v17000_v18 = vld [vmem:[#allocation12 + $0x894] sm:$0xf0]  ;;  %v14431_v52 = vld [vmem:[#allocation12 + $0x118] sm:$0xf0]  ;;  %v15695_v25 = vld [vmem:[#allocation12 + $0xb00] sm:$0xf0] }
 0x56d   : > { %v16757_v60 = vld [vmem:[#allocation12 + $0x104] sm:$0xf]  ;;  %v15390_v51 = vor.u32 %v17000_v18, %v15389_v63  ;;  %v17068_v63 = vld [vmem:[#allocation12 + $0xabc] sm:$0xf]  ;;  %v15671_v18 = vld [vmem:[#allocation12 + $0xad0] sm:$0xf0] }
 0x56e   : > { %10115 = vmatpush.bf16.msra.mxu3 %v14978_v3  ;;  %10154 = vmatpush.bf16.msrb.mxu2 %v15554_v27  ;;  %v16778_v3 = vld [vmem:[#allocation12 + $0x1a4] sm:$0xf0]  ;;  %v15077_v27 = vld [vmem:[#allocation12 + $0x610] sm:$0xf]  ;;  %v14434_v17 = vor.u32 %v16757_v60, %v14431_v52 }
 0x56f   : > { %10193 = vmatpush.bf16.msra.mxu1 %v14598_v39  ;;  %10232 = vmatpush.bf16.msrb.mxu0 %v15174_v41  ;;  %v15815_v39 = vld [vmem:[#allocation12 + $0xbf0] sm:$0xf0]  ;;  %v14861_v41 = vld [vmem:[#allocation12 + $0x460] sm:$0xf] }
 0x570   : > { %v15818_v33 = vor.u32 %v17104_v19, %v15815_v39  ;;  %v14862_v11 = vor.u32 %v16868_v34, %v14861_v41  ;;  %v16751_v19 = vld [vmem:[#allocation12 + $0xd4] sm:$0xf]  ;;  %v14407_v39 = vld [vmem:[#allocation12 + $0xe8] sm:$0xf0] }
 0x572   : > { %10116 = vmatpush.bf16.msra.mxu3 %v14954_v44  ;;  %10155 = vmatpush.bf16.msrb.mxu2 %v15530_v15  ;;  %v14502_v44 = vor.u32 %v16778_v3, %v14501_v24  ;;  %v15078_v15 = vor.u32 %v16922_v7, %v15077_v27  ;;  %v16850_v24 = vld [vmem:[#allocation12 + $0x3e4] sm:$0xf0]  ;;  %v15365_v3 = vld [vmem:[#allocation12 + $0x850] sm:$0xf]  ;;  %v9979_v27 = vadd.f32 %v18163_v46, %v9751_v8  ;;  %v14765_v46 = vld [vmem:[#allocation12 + $0x3a0] sm:$0xf] }
 0x573   : > { %10194 = vmatpush.bf16.msra.mxu1 %v14574_v45  ;;  %10233 = vmatpush.bf16.msrb.mxu0 %v15150_v48  ;;  %v17098_v45 = vld [vmem:[#allocation12 + $0xbac] sm:$0xf]  ;;  %v15791_v48 = vld [vmem:[#allocation12 + $0xbc0] sm:$0xf0]  ;;  %v16994_v7 = vld [vmem:[#allocation12 + $0x864] sm:$0xf0] }
 0x574   : > { %v9900_v47 = vpop.f32.mrf.mxu2  ;;  %v15794_v14 = vor.u32 %v17098_v45, %v15791_v48  ;;  %v15366_v30 = vor.u32 %v16994_v7, %v15365_v3  ;;  %v16988_v48 = vld [vmem:[#allocation12 + $0x834] sm:$0xf0]  ;;  %v16838_v8 = vld [vmem:[#allocation12 + $0x384] sm:$0xf0]  ;;  %v14693_v7 = vld [vmem:[#allocation12 + $0x310] sm:$0xf] }
 0x575   : > { %v18171_v49 = vadd.f32 %v9900_v47, %v18157_v62  ;;  %v16856_v62 = vld [vmem:[#allocation12 + $0x414] sm:$0xf0]  ;;  %v15722_v47 = vor.u32 %v17080_v31, %v15719_v29  ;;  %v16727_v31 = vld [vmem:[#allocation12 + $0x14] sm:$0xf] }
 0x576   : > { %10117 = vmatpush.bf16.msra.mxu3 %v14930_v28  ;;  %10156 = vmatpush.bf16.msrb.mxu2 %v15506_v5  ;;  %v16763_v28 = vld [vmem:[#allocation12 + $0x134] sm:$0xf]  ;;  %v14455_v5 = vld [vmem:[#allocation12 + $0x148] sm:$0xf0] }
 0x577   : > { %10195 = vmatpush.bf16.msra.mxu1 %v14550_v56  ;;  %10234 = vmatpush.bf16.msrb.mxu0 %v15126_v54  ;;  %v14838_v56 = vor.u32 %v16862_v12, %v14837_v42  ;;  %v17092_v54 = vld [vmem:[#allocation12 + $0xb7c] sm:$0xf]  ;;  %v14458_v57 = vor.u32 %v16763_v28, %v14455_v5  ;;  %v17074_v12 = vld [vmem:[#allocation12 + $0xaec] sm:$0xf]  ;;  %v14741_v5 = vld [vmem:[#allocation12 + $0x370] sm:$0xf] }
 0x578   : > { %v15770_v61 = vor.u32 %v17092_v54, %v15767_v1  ;;  %v16739_v54 = vld [vmem:[#allocation12 + $0x74] sm:$0xf]  ;;  %v14359_v1 = vld [vmem:[#allocation12 + $0x88] sm:$0xf0] }
 0x579   : > { %v14362_v52 = vor.u32 %v16739_v54, %v14359_v1 }
 0x57a   : > { %10118 = vmatpush.bf16.msra.mxu3 %v14906_v16  ;;  %10157 = vmatpush.bf16.msrb.mxu2 %v15482_v53  ;;  %v14814_v16 = vor.u32 %v16856_v62, %v14813_v58  ;;  %v17086_v53 = vld [vmem:[#allocation12 + $0xb4c] sm:$0xf]  ;;  %v15698_v58 = vor.u32 %v17074_v12, %v15695_v25  ;;  %v14742_v62 = vor.u32 %v16838_v8, %v14741_v5 }
 0x57b   : > { %10196 = vmatpush.bf16.msra.mxu1 %v14526_v21  ;;  %10235 = vmatpush.bf16.msrb.mxu0 %v15102_v22  ;;  %v14789_v22 = vld [vmem:[#allocation12 + $0x3d0] sm:$0xf] }
 0x57c   : > { %v9902_v21 = vpop.f32.mrf.mxu2 }
 0x57d   : > { %v14335_v21 = vld [vmem:[#allocation12 + $0x58] sm:$0xf0] }
 0x57e   : > { %10119 = vmatpush.bf16.msra.mxu3 %v14882_v32  ;;  %10158 = vmatpush.bf16.msrb.mxu2 %v15458_v43  ;;  %v9991_v41 = vpop.f32.mrf.mxu1  ;;  %v15746_v32 = vor.u32 %v17086_v53, %v15743_v59  ;;  %v14790_v43 = vor.u32 %v16850_v24, %v14789_v22  ;;  %v16832_v53 = vld [vmem:[#allocation12 + $0x354] sm:$0xf0]  ;;  %v15293_v59 = vld [vmem:[#allocation12 + $0x7c0] sm:$0xf]  ;;  %v17062_v22 = vld [vmem:[#allocation12 + $0xa8c] sm:$0xf]  ;;  %v15674_v24 = vor.u32 %v17068_v63, %v15671_v18 }
 0x57f   : > { %10197 = vmatpush.bf16.msra.mxu1 %v14502_v44  ;;  %10236 = vmatpush.bf16.msrb.mxu0 %v15078_v15  ;;  %v18181_v38 = vadd.f32 %v9991_v41, %v9979_v27  ;;  %v14410_v44 = vor.u32 %v16751_v19, %v14407_v39  ;;  %v15647_v27 = vld [vmem:[#allocation12 + $0xaa0] sm:$0xf0]  ;;  %v16826_v19 = vld [vmem:[#allocation12 + $0x324] sm:$0xf0]  ;;  %v14647_v63 = vld [vmem:[#allocation12 + $0x2c8] sm:$0xf0] }
 0x580   : > { %v16955_v18 = vld [vmem:[#allocation12 + $0x734] sm:$0xf] }
 0x581   : > { %10120 = vmatmul.bf16.vlgmr.msra.gmra.mxu3 %v18090_v9  ;;  %10159 = vmatmul.bf16.vlgmr.msrb.gmra.mxu2 %v18114_v0  ;;  %v18179_v34 = vpop.f32.mrf.mxu0 }
 0x582   : > { %10164 = vmatpush.bf16.msrb.mxu3 %v15818_v33  ;;  %10203 = vmatpush.bf16.msra.mxu2 %v14862_v11  ;;  %v16844_v33 = vld [vmem:[#allocation12 + $0x3b4] sm:$0xf0]  ;;  %v15341_v11 = vld [vmem:[#allocation12 + $0x820] sm:$0xf] }
 0x583   : > { %10242 = vmatpush.bf16.msrb.mxu1 %v15438_v2  ;;  %10281 = vmatpush.bf16.msra.mxu0 %v14482_v55  ;;  %v16745_v2 = vld [vmem:[#allocation12 + $0xa4] sm:$0xf]  ;;  %v14383_v55 = vld [vmem:[#allocation12 + $0xb8] sm:$0xf0]  ;;  %v14766_v42 = vor.u32 %v16844_v33, %v14765_v46  ;;  %v15342_v37 = vor.u32 %v16988_v48, %v15341_v11  ;;  %v15629_v46 = vld [vmem:[#allocation12 + $0xa60] sm:$0xf]  ;;  %v15650_v48 = vor.u32 %v17062_v22, %v15647_v27 }
 0x584   : > { %10198 = vmatmul.bf16.vlgmr.msra.gmra.mxu1 %v18064_v36  ;;  %10237 = vmatmul.bf16.vlgmr.msrb.gmra.mxu0 %v18097_v26  ;;  %v9861_v15 = vpop.f32.mrf.mxu3  ;;  %v14386_v28 = vor.u32 %v16745_v2, %v14383_v55  ;;  %v17060_v33 = vld [vmem:[#allocation12 + $0xa74] sm:$0xf0]  ;;  %v16817_v11 = vld [vmem:[#allocation12 + $0x2e4] sm:$0xf]  ;;  %v14694_v2 = vor.u32 %v16826_v19, %v14693_v7  ;;  %v14671_v55 = vld [vmem:[#allocation12 + $0x2f8] sm:$0xf0] }
 0x585   : > { %v18184_v45 = vadd.f32 %v9861_v15, %v18168_v10  ;;  %v16982_v10 = vld [vmem:[#allocation12 + $0x804] sm:$0xf0]  ;;  %v16916_v15 = vld [vmem:[#allocation12 + $0x5f4] sm:$0xf0]  ;;  %v15630_v5 = vor.u32 %v17060_v33, %v15629_v46  ;;  %v14674_v54 = vor.u32 %v16817_v11, %v14671_v55  ;;  %v16805_v22 = vld [vmem:[#allocation12 + $0x284] sm:$0xf] }
 0x586   : > { %10165 = vmatpush.bf16.msrb.mxu3 %v15794_v14  ;;  %10204 = vmatpush.bf16.msra.mxu2 %v14838_v56  ;;  %v15317_v14 = vld [vmem:[#allocation12 + $0x7f0] sm:$0xf]  ;;  %v15175_v46 = vld [vmem:[#allocation12 + $0x6e8] sm:$0xf0]  ;;  %v16892_v55 = vld [vmem:[#allocation12 + $0x534] sm:$0xf0] }
 0x587   : > { %10243 = vmatpush.bf16.msrb.mxu1 %v15414_v13  ;;  %10282 = vmatpush.bf16.msra.mxu0 %v14458_v57  ;;  %v18186_v56 = vpop.f32.mrf.mxu2  ;;  %v9993_v13 = vpop.f32.mrf.mxu1  ;;  %v15318_v60 = vor.u32 %v16982_v10, %v15317_v14  ;;  %v15029_v14 = vld [vmem:[#allocation12 + $0x5b0] sm:$0xf]  ;;  %v16910_v10 = vld [vmem:[#allocation12 + $0x5c4] sm:$0xf0] }
 0x588   : > { %v15605_v13 = vld [vmem:[#allocation12 + $0xa30] sm:$0xf] }
 0x589   : > { %v10032_v57 = vpop.f32.mrf.mxu0 }
 0x58a   : > { %10166 = vmatpush.bf16.msrb.mxu3 %v15770_v61  ;;  %10205 = vmatpush.bf16.msra.mxu2 %v14814_v16  ;;  %v14717_v16 = vld [vmem:[#allocation12 + $0x340] sm:$0xf]  ;;  %v17054_v57 = vld [vmem:[#allocation12 + $0xa44] sm:$0xf0] }
 0x58b   : > { %10244 = vmatpush.bf16.msrb.mxu1 %v15390_v51  ;;  %10283 = vmatpush.bf16.msra.mxu0 %v14434_v17  ;;  %v16976_v51 = vld [vmem:[#allocation12 + $0x7d4] sm:$0xf0]  ;;  %v16733_v17 = vld [vmem:[#allocation12 + $0x44] sm:$0xf]  ;;  %v14718_v3 = vor.u32 %v16832_v53, %v14717_v16  ;;  %v15005_v16 = vld [vmem:[#allocation12 + $0x580] sm:$0xf] }
 0x58c   : > { %v9863_v61 = vpop.f32.mrf.mxu3  ;;  %v15294_v39 = vor.u32 %v16976_v51, %v15293_v59  ;;  %v14338_v41 = vor.u32 %v16733_v17, %v14335_v21  ;;  %v16904_v53 = vld [vmem:[#allocation12 + $0x594] sm:$0xf0] }
 0x58d   : > { %v15606_v61 = vor.u32 %v17054_v57, %v15605_v13  ;;  %v17048_v21 = vld [vmem:[#allocation12 + $0xa14] sm:$0xf0]  ;;  %v15006_v19 = vor.u32 %v16904_v53, %v15005_v16  ;;  %v16931_v16 = vld [vmem:[#allocation12 + $0x674] sm:$0xf]  ;;  %v15127_v53 = vld [vmem:[#allocation12 + $0x688] sm:$0xf0] }
 0x58e   : > { %10167 = vmatpush.bf16.msrb.mxu3 %v15746_v32  ;;  %10206 = vmatpush.bf16.msra.mxu2 %v14790_v43  ;;  %v15269_v32 = vld [vmem:[#allocation12 + $0x790] sm:$0xf]  ;;  %v16970_v43 = vld [vmem:[#allocation12 + $0x7a4] sm:$0xf0] }
 0x58f   : > { %10245 = vmatpush.bf16.msrb.mxu1 %v15366_v30  ;;  %10284 = vmatpush.bf16.msra.mxu0 %v14410_v44  ;;  %v9954_v29 = vpop.f32.mrf.mxu2  ;;  %v14311_v30 = vld [vmem:[#allocation12 + $0x28] sm:$0xf0]  ;;  %v15053_v44 = vld [vmem:[#allocation12 + $0x5e0] sm:$0xf]  ;;  %v15270_v12 = vor.u32 %v16970_v43, %v15269_v32  ;;  %v16898_v32 = vld [vmem:[#allocation12 + $0x564] sm:$0xf0] }
 0x590   : > { %v14314_v25 = vor.u32 %v16727_v31, %v14311_v30  ;;  %v15557_v29 = vld [vmem:[#allocation12 + $0x9d0] sm:$0xf]  ;;  %v17042_v30 = vld [vmem:[#allocation12 + $0x9e4] sm:$0xf0] }
 0x592   : > { %10168 = vmatpush.bf16.msrb.mxu3 %v15722_v47  ;;  %10207 = vmatpush.bf16.msra.mxu2 %v14766_v42  ;;  %v16961_v47 = vld [vmem:[#allocation12 + $0x764] sm:$0xf]  ;;  %v15247_v42 = vld [vmem:[#allocation12 + $0x778] sm:$0xf0] }
 0x593   : > { %10246 = vmatpush.bf16.msrb.mxu1 %v15342_v37  ;;  %10285 = vmatpush.bf16.msra.mxu0 %v14386_v28  ;;  %v15054_v28 = vor.u32 %v16916_v15, %v15053_v44  ;;  %v15250_v1 = vor.u32 %v16961_v47, %v15247_v42  ;;  %v16799_v44 = vld [vmem:[#allocation12 + $0x254] sm:$0xf] }
 0x594   : > { %v9913_v37 = vpop.f32.mrf.mxu3  ;;  %v16943_v15 = vld [vmem:[#allocation12 + $0x6d4] sm:$0xf] }
 0x595   : > { %v9914_v8 = vadd.f32 %v9913_v37, %v18171_v49  ;;  %v15030_v49 = vor.u32 %v16910_v10, %v15029_v14  ;;  %v15178_v42 = vor.u32 %v16943_v15, %v15175_v46  ;;  %v16793_v37 = vld [vmem:[#allocation12 + $0x224] sm:$0xf] }
 0x596   : > { %10169 = vmatpush.bf16.msrb.mxu3 %v15698_v58  ;;  %10208 = vmatpush.bf16.msra.mxu2 %v14742_v62  ;;  %v16811_v58 = vld [vmem:[#allocation12 + $0x2b4] sm:$0xf] }
 0x597   : > { %10247 = vmatpush.bf16.msrb.mxu1 %v15318_v60  ;;  %10286 = vmatpush.bf16.msra.mxu0 %v14362_v52  ;;  %v9927_v62 = vadd.f32 %v18151_v35, %v9914_v8  ;;  %v15223_v60 = vld [vmem:[#allocation12 + $0x748] sm:$0xf0]  ;;  %v10385_v52 = vsub.f32 0.0, %v18184_v45  ;;  %v14650_v51 = vor.u32 %v16811_v58, %v14647_v63  ;;  %v15581_v35 = vld [vmem:[#allocation12 + $0xa00] sm:$0xf] }
 0x598   : > { %v15226_v17 = vor.u32 %v16955_v18, %v15223_v60  ;;  %v14623_v45 = vld [vmem:[#allocation12 + $0x298] sm:$0xf0]  ;;  %v15509_v63 = vld [vmem:[#allocation12 + $0x970] sm:$0xf]  ;;  %v17030_v18 = vld [vmem:[#allocation12 + $0x984] sm:$0xf0] }
 0x599   : > { %v9940_v59 = vadd.f32 %v18165_v6, %v9927_v62  ;;  %v10391_v7 = vmul.f32 1.442695, %v10385_v52  ;;  %v14626_v43 = vor.u32 %v16805_v22, %v14623_v45  ;;  %v15151_v8 = vld [vmem:[#allocation12 + $0x6b8] sm:$0xf0]  ;;  %v16787_v60 = vld [vmem:[#allocation12 + $0x1f4] sm:$0xf]  ;;  %v15510_v45 = vor.u32 %v17030_v18, %v15509_v63 }
 0x59a   : > { %10170 = vmatpush.bf16.msrb.mxu3 %v15674_v24  ;;  %10209 = vmatpush.bf16.msra.mxu2 %v14718_v3  ;;  %v16949_v24 = vld [vmem:[#allocation12 + $0x704] sm:$0xf]  ;;  %v15199_v3 = vld [vmem:[#allocation12 + $0x718] sm:$0xf0]  ;;  %v15797_v63 = vld [vmem:[#allocation12 + $0xbb0] sm:$0xf] }
 0x59b   : > { %10248 = vmatpush.bf16.msrb.mxu1 %v15294_v39  ;;  %10287 = vmatpush.bf16.msra.mxu0 %v14338_v41  ;;  %v9953_v27 = vadd.f32 %v18186_v56, %v9940_v59  ;;  %v15582_v39 = vor.u32 %v17048_v21, %v15581_v35  ;;  %v14981_v41 = vld [vmem:[#allocation12 + $0x550] sm:$0xf]  ;;  %v15202_v31 = vor.u32 %v16949_v24, %v15199_v3  ;;  %v14599_v56 = vld [vmem:[#allocation12 + $0x268] sm:$0xf0]  ;;  %17205 = vpow2.f32 %v10391_v7  ;;  %v16880_v24 = vld [vmem:[#allocation12 + $0x4d4] sm:$0xf0] }
 0x59c   : > { %v9915_v6 = vpop.f32.mrf.mxu3  ;;  %v14982_v11 = vor.u32 %v16898_v32, %v14981_v41  ;;  %v14602_v47 = vor.u32 %v16799_v44, %v14599_v56  ;;  %v15485_v3 = vld [vmem:[#allocation12 + $0x940] sm:$0xf]  ;;  %v14527_v41 = vld [vmem:[#allocation12 + $0x1d8] sm:$0xf0]  ;;  %v16874_v44 = vld [vmem:[#allocation12 + $0x4a4] sm:$0xf0] }
 0x59d   : > { %v15130_v6 = vor.u32 %v16931_v16, %v15127_v53  ;;  %v15103_v32 = vld [vmem:[#allocation12 + $0x658] sm:$0xf0]  ;;  %v15461_v56 = vld [vmem:[#allocation12 + $0x910] sm:$0xf]  ;;  %v14839_v16 = vld [vmem:[#allocation12 + $0x448] sm:$0xf0] }
 0x59e   : > { %10171 = vmatpush.bf16.msrb.mxu3 %v15650_v48  ;;  %10210 = vmatpush.bf16.msra.mxu2 %v14694_v2  ;;  %v15558_v48 = vor.u32 %v17042_v30, %v15557_v29  ;;  %v14957_v2 = vld [vmem:[#allocation12 + $0x520] sm:$0xf]  ;;  %v14885_v30 = vld [vmem:[#allocation12 + $0x490] sm:$0xf] }
 0x59f   : > { %10249 = vmatpush.bf16.msrb.mxu1 %v15270_v12  ;;  %10288 = vmatpush.bf16.msra.mxu0 %v14314_v25  ;;  %v15533_v12 = vld [vmem:[#allocation12 + $0x9a0] sm:$0xf]  ;;  %v17036_v25 = vld [vmem:[#allocation12 + $0x9b4] sm:$0xf0]  ;;  %v14958_v14 = vor.u32 %v16892_v55, %v14957_v2  ;;  %v16775_v2 = vld [vmem:[#allocation12 + $0x194] sm:$0xf] }
 0x5a0   : > { %v15534_v10 = vor.u32 %v17036_v25, %v15533_v12  ;;  %v14503_v55 = vld [vmem:[#allocation12 + $0x1a8] sm:$0xf0]  ;;  %v15821_v25 = vld [vmem:[#allocation12 + $0xbe0] sm:$0xf] }
 0x5a1   : > { %10172 = vmatmul.bf16.vlgmr.msrb.gmra.mxu3 %v18125_v40  ;;  %10211 = vmatmul.bf16.vlgmr.msra.gmra.mxu2 %v18079_v50  ;;  %v18197_v33 = vpop.f32.mrf.mxu1  ;;  %v17206_v13 = vpop.eup %17205  ;;  %v15079_v12 = vld [vmem:[#allocation12 + $0x628] sm:$0xf0] }
 0x5a2   : > { %10216 = vmatpush.bf16.msra.mxu3 %v15054_v28  ;;  %10255 = vmatpush.bf16.msrb.mxu2 %v15630_v5  ;;  %v14575_v28 = vld [vmem:[#allocation12 + $0x238] sm:$0xf0]  ;;  %v16937_v5 = vld [vmem:[#allocation12 + $0x6a4] sm:$0xf]  ;;  %v18204_v35 = vadd.f32 1.0, %v17206_v13 }
 0x5a3   : > { %10294 = vmatpush.bf16.msra.mxu1 %v14674_v54  ;;  %10333 = vmatpush.bf16.msrb.mxu0 %v15250_v1  ;;  %v14933_v54 = vld [vmem:[#allocation12 + $0x4f0] sm:$0xf]  ;;  %v16886_v1 = vld [vmem:[#allocation12 + $0x504] sm:$0xf0]  ;;  %v14578_v57 = vor.u32 %v16793_v37, %v14575_v28  ;;  %v15154_v58 = vor.u32 %v16937_v5, %v15151_v8  ;;  %v17108_v37 = vld [vmem:[#allocation12 + $0xbf4] sm:$0xf0]  ;;  %v14886_v8 = vor.u32 %v16874_v44, %v14885_v30 }
 0x5a4   : > { %10250 = vmatmul.bf16.vlgmr.msrb.gmra.mxu1 %v18105_v4  ;;  %10289 = vmatmul.bf16.vlgmr.msra.gmra.mxu0 %v18058_v20  ;;  %v18199_v20 = vpop.f32.mrf.mxu0  ;;  %v10004_v62 = vpop.f32.mrf.mxu2  ;;  %v14934_v22 = vor.u32 %v16886_v1, %v14933_v54  ;;  %17207 = vrcp.f32 %v18204_v35  ;;  %v16865_v28 = vld [vmem:[#allocation12 + $0x464] sm:$0xf]  ;;  %v14863_v5 = vld [vmem:[#allocation12 + $0x478] sm:$0xf0]  ;;  %v14506_v1 = vor.u32 %v16775_v2, %v14503_v55  ;;  %v17090_v30 = vld [vmem:[#allocation12 + $0xb64] sm:$0xf0]  ;;  %vm10414_vm6 = vweird.f32 %v18204_v35 }
 0x5a5   : > { %v18202_v52 = vadd.f32 %v10004_v62, %v18181_v38  ;;  %v15439_v54 = vld [vmem:[#allocation12 + $0x8f8] sm:$0xf0]  ;;  %v14866_v62 = vor.u32 %v16865_v28, %v14863_v5  ;;  %v16847_v44 = vld [vmem:[#allocation12 + $0x3d4] sm:$0xf] }
 0x5a6   : > { %10217 = vmatpush.bf16.msra.mxu3 %v15030_v49  ;;  %10256 = vmatpush.bf16.msrb.mxu2 %v15606_v61  ;;  %v9965_v49 = vpop.f32.mrf.mxu3  ;;  %v14551_v61 = vld [vmem:[#allocation12 + $0x208] sm:$0xf0] }
 0x5a7   : > { %10295 = vmatpush.bf16.msra.mxu1 %v14650_v51  ;;  %10334 = vmatpush.bf16.msrb.mxu0 %v15226_v17  ;;  %v9966_v59 = vadd.f32 %v9965_v49, %v9953_v27  ;;  %v14909_v17 = vld [vmem:[#allocation12 + $0x4c0] sm:$0xf]  ;;  %v14554_v7 = vor.u32 %v16787_v60, %v14551_v61  ;;  %v16925_v27 = vld [vmem:[#allocation12 + $0x644] sm:$0xf]  ;;  %v17102_v49 = vld [vmem:[#allocation12 + $0xbc4] sm:$0xf0] }
 0x5a8   : > { %v15106_v46 = vor.u32 %v16925_v27, %v15103_v32  ;;  %v16859_v61 = vld [vmem:[#allocation12 + $0x434] sm:$0xf] }
 0x5a9   : > { %v10045_v51 = vpop.f32.mrf.mxu1  ;;  %v10386_v38 = vsub.f32 0.0, %v9966_v59  ;;  %v17003_v59 = vld [vmem:[#allocation12 + $0x8b4] sm:$0xf] }
 0x5aa   : > { %10218 = vmatpush.bf16.msra.mxu3 %v15006_v19  ;;  %10257 = vmatpush.bf16.msrb.mxu2 %v15582_v39  ;;  %v17024_v19 = vld [vmem:[#allocation12 + $0x954] sm:$0xf0]  ;;  %v16781_v39 = vld [vmem:[#allocation12 + $0x1c4] sm:$0xf]  ;;  %v15415_v51 = vld [vmem:[#allocation12 + $0x8c8] sm:$0xf0] }
 0x5ab   : > { %10296 = vmatpush.bf16.msra.mxu1 %v14626_v43  ;;  %10335 = vmatpush.bf16.msrb.mxu0 %v15202_v31  ;;  %v10393_v43 = vmul.f32 1.442695, %v10386_v38  ;;  %v14910_v31 = vor.u32 %v16880_v24, %v14909_v17  ;;  %v15486_v29 = vor.u32 %v17024_v19, %v15485_v3  ;;  %v14530_v15 = vor.u32 %v16781_v39, %v14527_v41  ;;  %v17096_v3 = vld [vmem:[#allocation12 + $0xb94] sm:$0xf0]  ;;  %v16853_v38 = vld [vmem:[#allocation12 + $0x404] sm:$0xf] }
 0x5ac   : > { %v10084_v21 = vpop.f32.mrf.mxu0  ;;  %v15418_v24 = vor.u32 %v17003_v59, %v15415_v51  ;;  %v15391_v19 = vld [vmem:[#allocation12 + $0x898] sm:$0xf0]  ;;  %v18217_v41 = vld [vmem:[#allocation13] sm:$0x3f] }
 0x5ad   : > { %17209 = vpow2.f32 %v10393_v43  ;;  %v15798_v21 = vor.u32 %v17102_v49, %v15797_v63  ;;  %v9752_v27 = vperm.slane %v18217_v41, 3  ;;  %v17078_v49 = vld [vmem:[#allocation12 + $0xb04] sm:$0xf0] }
 0x5ae   : > { %10219 = vmatpush.bf16.msra.mxu3 %v14982_v11  ;;  %10258 = vmatpush.bf16.msrb.mxu2 %v15558_v48  ;;  %v10006_v11 = vpop.f32.mrf.mxu2  ;;  %v17018_v48 = vld [vmem:[#allocation12 + $0x924] sm:$0xf0] }
 0x5af   : > { %10297 = vmatpush.bf16.msra.mxu1 %v14602_v47  ;;  %10336 = vmatpush.bf16.msrb.mxu0 %v15178_v42  ;;  %v9967_v47 = vpop.f32.mrf.mxu3  ;;  %v16919_v42 = vld [vmem:[#allocation12 + $0x614] sm:$0xf] }
 0x5b0   : > { %v15082_v13 = vor.u32 %v16919_v42, %v15079_v12  ;;  %v15725_v12 = vld [vmem:[#allocation12 + $0xb20] sm:$0xf] }
 0x5b2   : > { %10220 = vmatpush.bf16.msra.mxu3 %v14958_v14  ;;  %10259 = vmatpush.bf16.msrb.mxu2 %v15534_v10  ;;  %v15462_v14 = vor.u32 %v17018_v48, %v15461_v56  ;;  %v17009_v10 = vld [vmem:[#allocation12 + $0x8e4] sm:$0xf]  ;;  %v14791_v56 = vld [vmem:[#allocation12 + $0x3e8] sm:$0xf0]  ;;  %v10083_v48 = vadd.f32 %v18199_v20, %v9752_v27 }
 0x5b3   : > { %10298 = vmatpush.bf16.msra.mxu1 %v14578_v57  ;;  %10337 = vmatpush.bf16.msrb.mxu0 %v15154_v58  ;;  %v18207_v57 = vpop.eup %17207  ;;  %v15822_v58 = vor.u32 %v17108_v37, %v15821_v25  ;;  %v15442_v60 = vor.u32 %v17009_v10, %v15439_v54  ;;  %v14794_v42 = vor.u32 %v16847_v44, %v14791_v56  ;;  %v17084_v25 = vld [vmem:[#allocation12 + $0xb34] sm:$0xf0]  ;;  %v16985_v10 = vld [vmem:[#allocation12 + $0x824] sm:$0xf]  ;;  %v15343_v54 = vld [vmem:[#allocation12 + $0x838] sm:$0xf0] }
 0x5b4   : > { %v17210_v18 = vpop.eup %17209  ;;  %v10410_v17 = vmul.f32 %v18207_v57, %v18204_v35  ;;  %vm10415_vm4 = vweird.f32 %v18207_v57  ;;  %v15726_v63 = vor.u32 %v17084_v25, %v15725_v12  ;;  %v15346_v51 = vor.u32 %v16985_v10, %v15343_v54  ;;  %v16829_v56 = vld [vmem:[#allocation12 + $0x344] sm:$0xf]  ;;  %v15055_v10 = vld [vmem:[#allocation12 + $0x5f8] sm:$0xf0] }
 0x5b5   : > { %v18209_v53 = vadd.f32 1.0, %v17210_v18  ;;  %vm18236_vm7 = vmor %vm10414_vm6, %vm10415_vm4  ;;  %v17057_v54 = vld [vmem:[#allocation12 + $0xa64] sm:$0xf] }
 0x5b6   : > { %10221 = vmatpush.bf16.msra.mxu3 %v14934_v22  ;;  %10260 = vmatpush.bf16.msrb.mxu2 %v15510_v45  ;;  %v14842_v22 = vor.u32 %v16859_v61, %v14839_v16  ;;  %v15773_v45 = vld [vmem:[#allocation12 + $0xb80] sm:$0xf]  ;;  %v10411_v39 = vsub.f32 1.0, %v10410_v17  ;;  %v10418_v16 = vand.u32 2147483647, %v18204_v35 }
 0x5b7   : > { %10299 = vmatpush.bf16.msra.mxu1 %v14554_v7  ;;  %10338 = vmatpush.bf16.msrb.mxu0 %v15130_v6  ;;  %17211 = vrcp.f32 %v18209_v53  ;;  %v14815_v7 = vld [vmem:[#allocation12 + $0x418] sm:$0xf0]  ;;  %v16997_v6 = vld [vmem:[#allocation12 + $0x884] sm:$0xf]  ;;  %v15774_v32 = vor.u32 %v17096_v3, %v15773_v45  ;;  %v10435_v20 = vand.u32 2147483648, %v18209_v53  ;;  %vm10429_vm8 = vweird.f32 %v18209_v53 }
 0x5b8   : > { %v14818_v43 = vor.u32 %v16853_v38, %v14815_v7  ;;  %v10412_v11 = vmul.f32 %v18207_v57, %v10411_v39  ;;  %v14743_v45 = vld [vmem:[#allocation12 + $0x388] sm:$0xf0]  ;;  %v16979_v38 = vld [vmem:[#allocation12 + $0x7f4] sm:$0xf]  ;;  %vm10419_vm11 = vcmp.eq.f32.partialorder %v10418_v16, 8.507059e+37 }
 0x5b9   : > { %v15319_v7 = vld [vmem:[#allocation12 + $0x808] sm:$0xf0]  ;;  %v17051_v61 = vld [vmem:[#allocation12 + $0xa34] sm:$0xf] }
 0x5ba   : > { %10222 = vmatpush.bf16.msra.mxu3 %v14910_v31  ;;  %10261 = vmatpush.bf16.msrb.mxu2 %v15486_v29  ;;  %v15749_v31 = vld [vmem:[#allocation12 + $0xb50] sm:$0xf]  ;;  %v15394_v29 = vor.u32 %v16997_v6, %v15391_v19  ;;  %v15322_v44 = vor.u32 %v16979_v38, %v15319_v7  ;;  %v15607_v16 = vld [vmem:[#allocation12 + $0xa48] sm:$0xf0]  ;;  %v16895_v38 = vld [vmem:[#allocation12 + $0x554] sm:$0xf] }
 0x5bb   : > { %10300 = vmatpush.bf16.msra.mxu1 %v14530_v15  ;;  %10339 = vmatpush.bf16.msrb.mxu0 %v15106_v46  ;;  %v16991_v15 = vld [vmem:[#allocation12 + $0x854] sm:$0xf]  ;;  %v15367_v46 = vld [vmem:[#allocation12 + $0x868] sm:$0xf0]  ;;  %v15750_v47 = vor.u32 %v17090_v30, %v15749_v31 }
 0x5bc   : > { %v15370_v5 = vor.u32 %v16991_v15, %v15367_v46  ;;  %v16973_v46 = vld [vmem:[#allocation12 + $0x7c4] sm:$0xf]  ;;  %v14983_v7 = vld [vmem:[#allocation12 + $0x568] sm:$0xf0] }
 0x5be   : > { %10223 = vmatpush.bf16.msra.mxu3 %v14886_v8  ;;  %10262 = vmatpush.bf16.msrb.mxu2 %v15462_v14  ;;  %v16841_v8 = vld [vmem:[#allocation12 + $0x3a4] sm:$0xf]  ;;  %v14767_v14 = vld [vmem:[#allocation12 + $0x3b8] sm:$0xf0] }
 0x5bf   : > { %10301 = vmatpush.bf16.msra.mxu1 %v14506_v1  ;;  %10340 = vmatpush.bf16.msrb.mxu0 %v15082_v13  ;;  %v10413_v1 = vadd.f32 %v18207_v57, %v10412_v11  ;;  %v14770_v18 = vor.u32 %v16841_v8, %v14767_v14  ;;  %v15295_v11 = vld [vmem:[#allocation12 + $0x7d8] sm:$0xf0]  ;;  %v14695_v8 = vld [vmem:[#allocation12 + $0x328] sm:$0xf0] }
 0x5c0   : > { %v15298_v12 = vor.u32 %v16973_v46, %v15295_v11  ;;  %v15271_v14 = vld [vmem:[#allocation12 + $0x7a8] sm:$0xf0] }
 0x5c1   : > { %10224 = vmatmul.bf16.vlgmr.msra.gmra.mxu3 %v18090_v9  ;;  %10263 = vmatmul.bf16.vlgmr.msrb.gmra.mxu2 %v18114_v0  ;;  %v18224_v55 = vpop.f32.mrf.mxu0 }
 0x5c2   : > { %10268 = vmatpush.bf16.msrb.mxu3 %v15822_v58  ;;  %10307 = vmatpush.bf16.msra.mxu2 %v14866_v62  ;;  %v10433_v58 = vand.u32 2147483647, %v18209_v53  ;;  %v10420_v62 = vand.u32 2147483648, %v18204_v35  ;;  %v10417_v35 = vsel %vm18236_vm7, %v18207_v57, %v10413_v1  ;;  %v14719_v57 = vld [vmem:[#allocation12 + $0x358] sm:$0xf0] }
 0x5c3   : > { %10346 = vmatpush.bf16.msrb.mxu1 %v15442_v60  ;;  %10341 = vmatmul.bf16.vlgmr.msrb.gmra.mxu0 %v18097_v26  ;;  %v10095_v26 = vpop.f32.mrf.mxu1  ;;  %v15701_v60 = vld [vmem:[#allocation12 + $0xaf0] sm:$0xf]  ;;  %v15631_v1 = vld [vmem:[#allocation12 + $0xa78] sm:$0xf0] }
 0x5c4   : > { %10302 = vmatmul.bf16.vlgmr.msra.gmra.mxu1 %v18064_v36  ;;  %v17212_v36 = vpop.eup %17211  ;;  %v18226_v28 = vadd.f32 %v10095_v26, %v10083_v48  ;;  %v10017_v17 = vpop.f32.mrf.mxu3  ;;  %vm10434_vm10 = vcmp.eq.f32.partialorder %v10433_v58, 8.507059e+37  ;;  %v10421_v19 = vor.u32 1.1754944e-38, %v10420_v62  ;;  %v14722_v26 = vor.u32 %v16829_v56, %v14719_v57  ;;  %v17027_v57 = vld [vmem:[#allocation12 + $0x974] sm:$0xf] }
 0x5c5   : > { %v10425_v2 = vmul.f32 %v17212_v36, %v18209_v53  ;;  %vm10430_vm5 = vweird.f32 %v17212_v36  ;;  %v10018_v3 = vadd.f32 %v10017_v17, %v18202_v52  ;;  %v15702_v53 = vor.u32 %v17078_v49, %v15701_v60  ;;  %v17072_v52 = vld [vmem:[#allocation12 + $0xad4] sm:$0xf0]  ;;  %v16907_v60 = vld [vmem:[#allocation12 + $0x5b4] sm:$0xf]  ;;  %v15031_v49 = vld [vmem:[#allocation12 + $0x5c8] sm:$0xf0] }
 0x5c6   : > { %10269 = vmatpush.bf16.msrb.mxu3 %v15798_v21  ;;  %10308 = vmatpush.bf16.msra.mxu2 %v14842_v22  ;;  %v10056_v21 = vpop.f32.mrf.mxu2  ;;  %v16835_v22 = vld [vmem:[#allocation12 + $0x374] sm:$0xf]  ;;  %vm10431_vm9 = vmor %vm10429_vm8, %vm10430_vm5  ;;  %v16901_v17 = vld [vmem:[#allocation12 + $0x584] sm:$0xf]  ;;  %vm10512_vm8 = vcmask 1043459  }
 0x5c7   : > { %10347 = vmatpush.bf16.msrb.mxu1 %v15418_v24  ;;  %v10426_v37 = vsub.f32 1.0, %v10425_v2  ;;  %v10436_v24 = vor.u32 1.1754944e-38, %v10435_v20  ;;  %v10031_v27 = vadd.f32 %v18179_v34, %v10018_v3  ;;  %v14746_v31 = vor.u32 %v16835_v22, %v14743_v45  ;;  %v16913_v20 = vld [vmem:[#allocation12 + $0x5e4] sm:$0xf]  ;;  %v15583_v45 = vld [vmem:[#allocation12 + $0xa18] sm:$0xf0] }
 0x5c8   : > { %v17045_v22 = vld [vmem:[#allocation12 + $0xa04] sm:$0xf] }
 0x5c9   : > { %v10427_v13 = vmul.f32 %v17212_v36, %v10426_v37  ;;  %v10044_v15 = vadd.f32 %v18197_v33, %v10031_v27  ;;  %v16967_v33 = vld [vmem:[#allocation12 + $0x794] sm:$0xf]  ;;  %v15586_v3 = vor.u32 %v17045_v22, %v15583_v45  ;;  %v16889_v27 = vld [vmem:[#allocation12 + $0x524] sm:$0xf]  ;;  %v9753_v22 = vperm.slane %v18217_v41, 4 }
 0x5ca   : > { %10270 = vmatpush.bf16.msrb.mxu3 %v15774_v32  ;;  %10309 = vmatpush.bf16.msra.mxu2 %v14818_v43  ;;  %v10136_v43 = vpop.f32.mrf.mxu0  ;;  %v15274_v62 = vor.u32 %v16967_v33, %v15271_v14  ;;  %v16871_v14 = vld [vmem:[#allocation12 + $0x494] sm:$0xf] }
 0x5cb   : > { %10348 = vmatpush.bf16.msrb.mxu1 %v15394_v29  ;;  %v10428_v59 = vadd.f32 %v17212_v36, %v10427_v13  ;;  %v10097_v32 = vpop.f32.mrf.mxu1  ;;  %v15677_v29 = vld [vmem:[#allocation12 + $0xac0] sm:$0xf]  ;;  %v18252_v34 = vadd.f32 %v10056_v21, %v10044_v15  ;;  %v15007_v21 = vld [vmem:[#allocation12 + $0x598] sm:$0xf0]  ;;  %v17033_v43 = vld [vmem:[#allocation12 + $0x9a4] sm:$0xf] }
 0x5cc   : > { %v15678_v2 = vor.u32 %v17072_v52, %v15677_v29  ;;  %v10019_v25 = vpop.f32.mrf.mxu3  ;;  %v14959_v32 = vld [vmem:[#allocation12 + $0x538] sm:$0xf0]  ;;  %v16883_v52 = vld [vmem:[#allocation12 + $0x4f4] sm:$0xf] }
 0x5cd   : > { %v10432_v6 = vsel %vm10431_vm9, %v17212_v36, %v10428_v59  ;;  %v10422_v36 = vsel %vm10419_vm11, %v10421_v19, %v10417_v35  ;;  %v15034_v59 = vor.u32 %v16907_v60, %v15031_v49  ;;  %v17039_v35 = vld [vmem:[#allocation12 + $0x9d4] sm:$0xf]  ;;  %v14911_v25 = vld [vmem:[#allocation12 + $0x4d8] sm:$0xf0]  ;;  %v15799_v49 = vld [vmem:[#allocation12 + $0xbc8] sm:$0xf0] }
 0x5ce   : > { %10271 = vmatpush.bf16.msrb.mxu3 %v15750_v47  ;;  %10310 = vmatpush.bf16.msra.mxu2 %v14794_v42  ;;  %v10437_v39 = vsel %vm10434_vm10, %v10436_v24, %v10432_v6  ;;  %v15653_v47 = vld [vmem:[#allocation12 + $0xa90] sm:$0xf]  ;;  %v17066_v42 = vld [vmem:[#allocation12 + $0xaa4] sm:$0xf0]  ;;  %v10058_v37 = vpop.f32.mrf.mxu2  ;;  %v15010_v24 = vor.u32 %v16901_v17, %v15007_v21  ;;  %v15559_v6 = vld [vmem:[#allocation12 + $0x9e8] sm:$0xf0] }
 0x5cf   : > { %10349 = vmatpush.bf16.msrb.mxu1 %v15370_v5  ;;  %v10505_v30 = vrot.slane %v10437_v39, 7  ;;  %v16823_v5 = vld [vmem:[#allocation12 + $0x314] sm:$0xf]  ;;  %v15654_v13 = vor.u32 %v17066_v42, %v15653_v47  ;;  %v17021_v37 = vld [vmem:[#allocation12 + $0x944] sm:$0xf] }
 0x5d0   : > { %v14698_v58 = vor.u32 %v16823_v5, %v14695_v8  ;;  %v15487_v5 = vld [vmem:[#allocation12 + $0x958] sm:$0xf0]  ;;  %v17099_v60 = vld [vmem:[#allocation12 + $0xbb4] sm:$0xf] }
 0x5d1   : > { %v18250_v48 = vsel %vm5441_vm0, %v10422_v36, %v10505_v30  ;;  %v14935_v30 = vld [vmem:[#allocation12 + $0x508] sm:$0xf0]  ;;  %v15775_v17 = vld [vmem:[#allocation12 + $0xb98] sm:$0xf0]  ;;  %v17087_v45 = vld [vmem:[#allocation12 + $0xb54] sm:$0xf] }
 0x5d2   : > { %10272 = vmatpush.bf16.msrb.mxu3 %v15726_v63  ;;  %10311 = vmatpush.bf16.msra.mxu2 %v14770_v18  ;;  %v15058_v63 = vor.u32 %v16913_v20, %v15055_v10  ;;  %v15634_v18 = vor.u32 %v17057_v54, %v15631_v1  ;;  %v15511_v36 = vld [vmem:[#allocation12 + $0x988] sm:$0xf0]  ;;  %v14938_v11 = vor.u32 %v16883_v52, %v14935_v30  ;;  %v17015_v20 = vld [vmem:[#allocation12 + $0x914] sm:$0xf] }
 0x5d3   : > { %10350 = vmatpush.bf16.msrb.mxu1 %v15346_v51  ;;  %v15610_v51 = vor.u32 %v17051_v61, %v15607_v16  ;;  %v15514_v42 = vor.u32 %v17027_v57, %v15511_v36  ;;  %v15463_v1 = vld [vmem:[#allocation12 + $0x928] sm:$0xf0] }
 0x5d4   : > { %v15703_v52 = vld [vmem:[#allocation12 + $0xb08] sm:$0xf0] }
 0x5d6   : > { %10273 = vmatpush.bf16.msrb.mxu3 %v15702_v53  ;;  %10312 = vmatpush.bf16.msra.mxu2 %v14746_v31  ;;  %v14986_v53 = vor.u32 %v16895_v38, %v14983_v7  ;;  %v14962_v31 = vor.u32 %v16889_v27, %v14959_v32 }
 0x5d7   : > { %10351 = vmatpush.bf16.msrb.mxu1 %v15322_v44 }
 0x5da   : > { %10274 = vmatpush.bf16.msrb.mxu3 %v15678_v2  ;;  %10313 = vmatpush.bf16.msra.mxu2 %v14722_v26 }
 0x5db   : > { %10352 = vmatpush.bf16.msrb.mxu1 %v15298_v12  ;;  %v16877_v12 = vld [vmem:[#allocation12 + $0x4c4] sm:$0xf] }
 0x5dc   : > { %v14914_v33 = vor.u32 %v16877_v12, %v14911_v25 }
 0x5de   : > { %10275 = vmatpush.bf16.msrb.mxu3 %v15654_v13  ;;  %10314 = vmatpush.bf16.msra.mxu2 %v14698_v58  ;;  %v17105_v13 = vld [vmem:[#allocation12 + $0xbe4] sm:$0xf]  ;;  %v15823_v58 = vld [vmem:[#allocation12 + $0xbf8] sm:$0xf0] }
 0x5df   : > { %10353 = vmatpush.bf16.msrb.mxu1 %v15274_v62 }
 0x5e1   : > { %10276 = vmatmul.bf16.vlgmr.msrb.gmra.mxu3 %v18125_v40  ;;  %10315 = vmatmul.bf16.vlgmr.msra.gmra.mxu2 %v18079_v50  ;;  %v18257_v19 = vpop.f32.mrf.mxu1  ;;  %v18259_v39 = vpop.f32.mrf.mxu0  ;;  %v15562_v50 = vor.u32 %v17039_v35, %v15559_v6  ;;  %v17081_v6 = vld [vmem:[#allocation12 + $0xb24] sm:$0xf] }
 0x5e2   : > { %10320 = vmatpush.bf16.msra.mxu3 %v15058_v63  ;;  %10359 = vmatpush.bf16.msrb.mxu2 %v15634_v18  ;;  %v15466_v63 = vor.u32 %v17015_v20, %v15463_v1  ;;  %v15826_v18 = vor.u32 %v17105_v13, %v15823_v58  ;;  %v10187_v35 = vadd.f32 %v18259_v39, %v9753_v22 }
 0x5e3   : > { %10354 = vmatmul.bf16.vlgmr.msrb.gmra.mxu1 %v18105_v4  ;;  %v15535_v4 = vld [vmem:[#allocation12 + $0x9b8] sm:$0xf0] }
 0x5e4   : > { %v15538_v29 = vor.u32 %v17033_v43, %v15535_v4  ;;  %v10069_v44 = vpop.f32.mrf.mxu3  ;;  %v10108_v56 = vpop.f32.mrf.mxu2 }
 0x5e5   : > { %v10070_v15 = vadd.f32 %v10069_v44, %v18252_v34  ;;  %v18263_v46 = vadd.f32 %v10108_v56, %v18226_v28  ;;  %v15490_v34 = vor.u32 %v17021_v37, %v15487_v5  ;;  %v14887_v28 = vld [vmem:[#allocation12 + $0x4a8] sm:$0xf0] }
 0x5e6   : > { %10321 = vmatpush.bf16.msra.mxu3 %v15034_v59  ;;  %10360 = vmatpush.bf16.msrb.mxu2 %v15610_v51  ;;  %v14890_v62 = vor.u32 %v16871_v14, %v14887_v28  ;;  %v15802_v59 = vor.u32 %v17099_v60, %v15799_v49  ;;  %v17093_v51 = vld [vmem:[#allocation12 + $0xb84] sm:$0xf] }
 0x5e7   : > { %v10387_v2 = vsub.f32 0.0, %v10070_v15  ;;  %v15778_v21 = vor.u32 %v17093_v51, %v15775_v17 }
 0x5e9   : > { %v10149_v26 = vpop.f32.mrf.mxu1  ;;  %v10188_v47 = vpop.f32.mrf.mxu0  ;;  %v10395_v8 = vmul.f32 1.442695, %v10387_v2  ;;  %v17069_v2 = vld [vmem:[#allocation12 + $0xac4] sm:$0xf] }
 0x5ea   : > { %10322 = vmatpush.bf16.msra.mxu3 %v15010_v24  ;;  %10361 = vmatpush.bf16.msrb.mxu2 %v15586_v3  ;;  %v15751_v24 = vld [vmem:[#allocation12 + $0xb68] sm:$0xf0]  ;;  %v15679_v26 = vld [vmem:[#allocation12 + $0xad8] sm:$0xf0] }
 0x5eb   : > { %17213 = vpow2.f32 %v10395_v8  ;;  %v15754_v7 = vor.u32 %v17087_v45, %v15751_v24  ;;  %v15682_v8 = vor.u32 %v17069_v2, %v15679_v26 }
 0x5ec   : > { %v10071_v10 = vpop.f32.mrf.mxu3  ;;  %v10110_v54 = vpop.f32.mrf.mxu2 }
 0x5ee   : > { %10323 = vmatpush.bf16.msra.mxu3 %v14986_v53  ;;  %10362 = vmatpush.bf16.msrb.mxu2 %v15562_v50  ;;  %v15727_v53 = vld [vmem:[#allocation12 + $0xb38] sm:$0xf0] }
 0x5f1   : > { %v17214_v61 = vpop.eup %17213 }
 0x5f2   : > { %10324 = vmatpush.bf16.msra.mxu3 %v14962_v31  ;;  %10363 = vmatpush.bf16.msrb.mxu2 %v15538_v29  ;;  %v10405_v16 = vadd.f32 1.0, %v17214_v61  ;;  %v15730_v31 = vor.u32 %v17081_v6, %v15727_v53  ;;  %v17075_v29 = vld [vmem:[#allocation12 + $0xaf4] sm:$0xf] }
 0x5f3   : > { %v15706_v15 = vor.u32 %v17075_v29, %v15703_v52 }
 0x5f4   : > { %17215 = vrcp.f32 %v10405_v16  ;;  %v10448_v4 = vand.u32 2147483647, %v10405_v16  ;;  %vm10444_vm13 = vweird.f32 %v10405_v16 }
 0x5f6   : > { %10325 = vmatpush.bf16.msra.mxu3 %v14938_v11  ;;  %10364 = vmatpush.bf16.msrb.mxu2 %v15514_v42  ;;  %vm10449_vm15 = vcmp.eq.f32.partialorder %v10448_v4, 8.507059e+37 }
 0x5fa   : > { %10326 = vmatpush.bf16.msra.mxu3 %v14914_v33  ;;  %10365 = vmatpush.bf16.msrb.mxu2 %v15490_v34  ;;  %v17216_v3 = vpop.eup %17215  ;;  %v17063_v33 = vld [vmem:[#allocation12 + $0xa94] sm:$0xf]  ;;  %v15655_v34 = vld [vmem:[#allocation12 + $0xaa8] sm:$0xf0] }
 0x5fb   : > { %v10440_v38 = vmul.f32 %v17216_v3, %v10405_v16  ;;  %vm10445_vm12 = vweird.f32 %v17216_v3  ;;  %v15658_v20 = vor.u32 %v17063_v33, %v15655_v34 }
 0x5fc   : > { %vm10446_vm14 = vmor %vm10444_vm13, %vm10445_vm12  ;;  %vm10514_vm13 = vcmask 1044483  }
 0x5fd   : > { %v10441_v50 = vsub.f32 1.0, %v10440_v38 }
 0x5fe   : > { %10327 = vmatpush.bf16.msra.mxu3 %v14890_v62  ;;  %10366 = vmatpush.bf16.msrb.mxu2 %v15466_v63 }
 0x601   : > { %10328 = vmatmul.bf16.vlgmr.msra.gmra.mxu3 %v18090_v9  ;;  %10367 = vmatmul.bf16.vlgmr.msrb.gmra.mxu2 %v18114_v0  ;;  %v10199_v27 = vpop.f32.mrf.mxu1  ;;  %v10238_v32 = vpop.f32.mrf.mxu0  ;;  %v10450_v9 = vand.u32 2147483648, %v10405_v16  ;;  %v10442_v0 = vmul.f32 %v17216_v3, %v10441_v50 }
 0x602   : > { %10372 = vmatpush.bf16.msrb.mxu3 %v15826_v18  ;;  %v10200_v43 = vadd.f32 %v10199_v27, %v10187_v35  ;;  %v9754_v18 = vperm.slane %v18217_v41, 5 }
 0x603   : > { %v10443_v30 = vadd.f32 %v17216_v3, %v10442_v0  ;;  %v10451_v44 = vor.u32 1.1754944e-38, %v10450_v9 }
 0x604   : > { %v10121_v56 = vpop.f32.mrf.mxu3  ;;  %v10160_v39 = vpop.f32.mrf.mxu2 }
 0x605   : > { %v10447_v57 = vsel %vm10446_vm14, %v17216_v3, %v10443_v30  ;;  %v10122_v36 = vadd.f32 %v10121_v56, %v18263_v46  ;;  %vm10516_vm14 = vcmask 1042432  }
 0x606   : > { %10373 = vmatpush.bf16.msrb.mxu3 %v15802_v59  ;;  %v10452_v11 = vsel %vm10449_vm15, %v10451_v44, %v10447_v57  ;;  %vm10519_vm15 = vcmp.lt.s32.totalorder %v5448_v23, 768 }
 0x607   : > { %v10506_v47 = vrot.slane %v10452_v11, 6  ;;  %v10135_v42 = vadd.f32 %v18224_v55, %v10122_v36 }
 0x609   : > { %v10201_v12 = vpop.f32.mrf.mxu1  ;;  %v10240_v25 = vpop.f32.mrf.mxu0  ;;  %v18273_v37 = vsel %vm5445_vm2, %v18250_v48, %v10506_v47  ;;  %v10148_v5 = vadd.f32 %v18257_v19, %v10135_v42 }
 0x60a   : > { %10374 = vmatpush.bf16.msrb.mxu3 %v15778_v21 }
 0x60b   : > { %v10161_v46 = vadd.f32 %v10160_v39, %v10148_v5 }
 0x60c   : > { %v10123_v14 = vpop.f32.mrf.mxu3  ;;  %v10162_v28 = vpop.f32.mrf.mxu2 }
 0x60e   : > { %10375 = vmatpush.bf16.msrb.mxu3 %v15754_v7 }
 0x612   : > { %10376 = vmatpush.bf16.msrb.mxu3 %v15730_v31 }
 0x616   : > { %10377 = vmatpush.bf16.msrb.mxu3 %v15706_v15 }
 0x61a   : > { %10378 = vmatpush.bf16.msrb.mxu3 %v15682_v8 }
 0x61e   : > { %10379 = vmatpush.bf16.msrb.mxu3 %v15658_v20 }
 0x621   : > { %10380 = vmatmul.bf16.vlgmr.msrb.gmra.mxu3 %v18125_v40  ;;  %v10251_v55 = vpop.f32.mrf.mxu1  ;;  %v10290_v10 = vpop.f32.mrf.mxu0 }
 0x622   : > { %v10291_v60 = vadd.f32 %v10290_v10, %v9754_v18 }
 0x624   : > { %v10173_v54 = vpop.f32.mrf.mxu3  ;;  %v10212_v1 = vpop.f32.mrf.mxu2 }
 0x625   : > { %v10174_v48 = vadd.f32 %v10173_v54, %v10161_v46  ;;  %v10213_v13 = vadd.f32 %v10212_v1, %v10200_v43 }
 0x627   : > { %v10388_v7 = vsub.f32 0.0, %v10174_v48 }
 0x629   : > { %v10253_v58 = vpop.f32.mrf.mxu1  ;;  %v10292_v19 = vpop.f32.mrf.mxu0  ;;  %v10397_v35 = vmul.f32 1.442695, %v10388_v7 }
 0x62b   : > { %17217 = vpow2.f32 %v10397_v35 }
 0x62c   : > { %v10175_v62 = vpop.f32.mrf.mxu3  ;;  %v10214_v63 = vpop.f32.mrf.mxu2 }
 0x631   : > { %v17218_v6 = vpop.eup %17217 }
 0x632   : > { %v10406_v53 = vadd.f32 1.0, %v17218_v6 }
 0x634   : > { %17219 = vrcp.f32 %v10406_v53  ;;  %v10465_v11 = vand.u32 2147483648, %v10406_v53  ;;  %vm10459_vm1 = vweird.f32 %v10406_v53  ;;  %v10463_v2 = vand.u32 2147483647, %v10406_v53 }
 0x636   : > { %v10466_v5 = vor.u32 1.1754944e-38, %v10465_v11  ;;  %vm10464_vm4 = vcmp.eq.f32.partialorder %v10463_v2, 8.507059e+37 }
 0x640   : > { %v18278_v16 = vpop.f32.mrf.mxu0 }
 0x641   : > { %v10303_v49 = vpop.f32.mrf.mxu1 }
 0x642   : > { %v10304_v61 = vadd.f32 %v10303_v49, %v10291_v60 }
 0x644   : > { %v10225_v59 = vpop.f32.mrf.mxu3  ;;  %v10264_v40 = vpop.f32.mrf.mxu2 }
 0x645   : > { %v10226_v51 = vadd.f32 %v10225_v59, %v10213_v13 }
 0x647   : > { %v10239_v17 = vadd.f32 %v10238_v32, %v10226_v51  ;;  %v17220_v32 = vpop.eup %17219 }
 0x648   : > { %v10344_v22 = vpop.f32.mrf.mxu0  ;;  %v10455_v52 = vmul.f32 %v17220_v32, %v10406_v53  ;;  %vm10460_vm0 = vweird.f32 %v17220_v32 }
 0x649   : > { %v10305_v21 = vpop.f32.mrf.mxu1  ;;  %v10252_v45 = vadd.f32 %v10251_v55, %v10239_v17  ;;  %vm10461_vm2 = vmor %vm10459_vm1, %vm10460_vm0 }
 0x64a   : > { %v10456_v56 = vsub.f32 1.0, %v10455_v52 }
 0x64b   : > { %v10265_v24 = vadd.f32 %v10264_v40, %v10252_v45 }
 0x64c   : > { %v10227_v3 = vpop.f32.mrf.mxu3  ;;  %v10266_v38 = vpop.f32.mrf.mxu2  ;;  %v10457_v39 = vmul.f32 %v17220_v32, %v10456_v56 }
 0x64e   : > { %v10458_v36 = vadd.f32 %v17220_v32, %v10457_v39 }
 0x650   : > { %v10462_v42 = vsel %vm10461_vm2, %v17220_v32, %v10458_v36 }
 0x651   : > { %v10467_v46 = vsel %vm10464_vm4, %v10466_v5, %v10462_v42 }
 0x652   : > { %v10507_v1 = vrot.slane %v10467_v46, 5 }
 0x660   : > { %v10355_v41 = vpop.f32.mrf.mxu1 }
 0x664   : > { %v10277_v50 = vpop.f32.mrf.mxu3  ;;  %v10316_v27 = vpop.f32.mrf.mxu2 }
 0x665   : > { %v10278_v9 = vadd.f32 %v10277_v50, %v10265_v24  ;;  %v10317_v8 = vadd.f32 %v10316_v27, %v10304_v61 }
 0x667   : > { %v10389_v43 = vsub.f32 0.0, %v10278_v9 }
 0x668   : > { %v10357_v0 = vpop.f32.mrf.mxu1 }
 0x669   : > { %v10399_v4 = vmul.f32 1.442695, %v10389_v43 }
 0x66b   : > { %17221 = vpow2.f32 %v10399_v4 }
 0x66c   : > { %v10279_v31 = vpop.f32.mrf.mxu3  ;;  %v10318_v29 = vpop.f32.mrf.mxu2 }
 0x671   : > { %v17222_v30 = vpop.eup %17221 }
 0x672   : > { %v10407_v44 = vadd.f32 1.0, %v17222_v30 }
 0x674   : > { %17223 = vrcp.f32 %v10407_v44  ;;  %v10480_v47 = vand.u32 2147483648, %v10407_v44  ;;  %v10478_v25 = vand.u32 2147483647, %v10407_v44  ;;  %vm10474_vm5 = vweird.f32 %v10407_v44 }
 0x676   : > { %v10481_v14 = vor.u32 1.1754944e-38, %v10480_v47  ;;  %vm10479_vm7 = vcmp.eq.f32.partialorder %v10478_v25, 8.507059e+37 }
 0x67a   : > { %v17224_v57 = vpop.eup %17223 }
 0x67b   : > { %v10470_v15 = vmul.f32 %v17224_v57, %v10407_v44  ;;  %vm10475_vm3 = vweird.f32 %v17224_v57 }
 0x67c   : > { %vm10476_vm6 = vmor %vm10474_vm5, %vm10475_vm3 }
 0x67d   : > { %v10471_v26 = vsub.f32 1.0, %v10470_v15 }
 0x67f   : > { %v10472_v12 = vmul.f32 %v17224_v57, %v10471_v26 }
 0x681   : > { %v10473_v33 = vadd.f32 %v17224_v57, %v10472_v12 }
 0x683   : > { %v10477_v55 = vsel %vm10476_vm6, %v17224_v57, %v10473_v33 }
 0x684   : > { %v10329_v34 = vpop.f32.mrf.mxu3  ;;  %v10368_v20 = vpop.f32.mrf.mxu2  ;;  %v10482_v10 = vsel %vm10479_vm7, %v10481_v14, %v10477_v55 }
 0x685   : > { %v10330_v28 = vadd.f32 %v10329_v34, %v10317_v8  ;;  %v10508_v48 = vrot.slane %v10482_v10, 4 }
 0x687   : > { %v10343_v54 = vadd.f32 %v18278_v16, %v10330_v28  ;;  %v10513_v13 = vsel %vm10512_vm8, %v10507_v1, %v10508_v48 }
 0x689   : > { %v10356_v62 = vadd.f32 %v10355_v41, %v10343_v54 }
 0x68b   : > { %v10369_v63 = vadd.f32 %v10368_v20, %v10356_v62 }
 0x68c   : > { %v10331_v58 = vpop.f32.mrf.mxu3  ;;  %v10370_v19 = vpop.f32.mrf.mxu2 }
 0x6a4   : > { %v10381_v18 = vpop.f32.mrf.mxu3 }
 0x6a5   : > { %v10382_v60 = vadd.f32 %v10381_v18, %v10369_v63 }
 0x6a7   : > { %v10390_v49 = vsub.f32 0.0, %v10382_v60 }
 0x6a9   : > { %v10401_v61 = vmul.f32 1.442695, %v10390_v49 }
 0x6ab   : > { %17225 = vpow2.f32 %v10401_v61 }
 0x6ac   : > { %v10383_v59 = vpop.f32.mrf.mxu3 }
 0x6b1   : > { %v17226_v51 = vpop.eup %17225 }
 0x6b2   : > { %v10408_v40 = vadd.f32 1.0, %v17226_v51 }
 0x6b4   : > { %17227 = vrcp.f32 %v10408_v40  ;;  %v10495_v16 = vand.u32 2147483648, %v10408_v40  ;;  %v10493_v24 = vand.u32 2147483647, %v10408_v40  ;;  %vm10489_vm10 = vweird.f32 %v10408_v40 }
 0x6b6   : > { %v10496_v38 = vor.u32 1.1754944e-38, %v10495_v16  ;;  %vm10494_vm12 = vcmp.eq.f32.partialorder %v10493_v24, 8.507059e+37 }
 0x6ba   : > { %v17228_v17 = vpop.eup %17227 }
 0x6bb   : > { %v10485_v21 = vmul.f32 %v17228_v17, %v10408_v40  ;;  %vm10490_vm9 = vweird.f32 %v17228_v17 }
 0x6bc   : > { %vm10491_vm11 = vmor %vm10489_vm10, %vm10490_vm9 }
 0x6bd   : > { %v10486_v22 = vsub.f32 1.0, %v10485_v21 }
 0x6bf   : > { %v10487_v45 = vmul.f32 %v17228_v17, %v10486_v22 }
 0x6c1   : > { %v10488_v3 = vadd.f32 %v17228_v17, %v10487_v45 }
 0x6c3   : > { %v10492_v7 = vsel %vm10491_vm11, %v17228_v17, %v10488_v3 }
 0x6c4   : > { %v10497_v35 = vsel %vm10494_vm12, %v10496_v38, %v10492_v7 }
 0x6c5   : > { %v10509_v6 = vrot.slane %v10497_v35, 3 }
 0x6c7   : > { %v10515_v41 = vsel %vm10514_vm13, %v10513_v13, %v10509_v6 }
 0x6c8   : > { %v10517_v53 = vsel %vm10516_vm14, %v18273_v37, %v10515_v41 }
 0x6c9   : > { %10521 = vst.msk [vmem:[%s490_s25] sm:$0x3f] %vm10519_vm15, %v10517_v53 }
 0x6ca PF: > { %s26_s13 = sadd.s32 1, %s17513_s13  }
 0x6cb   : > { %p23_p7 = scmp.ge.s32.totalorder %s26_s13, 4  }
 0x6cd   :  { %25 = sbr.rel (!%p23_p7) target bundleno = 5 (0x5), region = 131 }
 0x6d2   :  { %10555 = vsyncpa [#allocation3], 1 }
 0x6d3   :  { %10557 = vsyncpa [#allocation3 + $0x1], 1 }
 0x6d4   :  { %10558 = vsyncpa [#allocation5], 1 }
 0x6d5   :  { %10559 = vsyncpa [#allocation8], 1 }
 0x6d6   :  { %10560 = vsyncpa [#allocation11], 1 }
 0x6d7   :  { %10561 = vsyncpa [#allocation14], 1 }

</bundles_post_ra>
